<compile_context>
chip_gen: v5e
topology: v5e:2x2
jax: 0.10.0
libtpu: 0.0.40
codegen_flags: <defaults>
</compile_context>

<pallas_src>
import functools

import jax
import jax.numpy as jnp
import numpy as np
from jax.experimental import pallas as pl
from jax.experimental.pallas import tpu as pltpu


# ----------------------------------------------------------------------------
# Fused decoder kernel (one grid step == one batch element)
# ----------------------------------------------------------------------------
def _decoder_kernel(prm_ref, wh_ref, bh_ref, w2_ref, b2_ref, w3_ref, b3_ref,
                    wc64_ref, bc64_ref, wout_ref, bout_ref,
                    out_ref, pada_ref, padb_ref, *, H, W):
    f32 = jnp.float32
    b = pl.program_id(0)

    # (1) parameter head: param_layer -> param_layer_256 -> param_layer_512 ->
    #     upconv512 (1x1 spatial => centre tap) -> dropout(id) -> ReLU.
    #     All four affine maps were folded at init into one (P, 256) matmul.
    p = prm_ref[pl.ds(b, 1), :].astype(jnp.bfloat16)                      # (1, P)
    y = jnp.dot(p, wh_ref[...], preferred_element_type=f32) + bh_ref[...]
    y = jnp.maximum(y, 0.0).astype(jnp.bfloat16)                          # (1, 256)

    # (2) 2x2 stage: upsample(1x1->2x2) + conv256_1 + upconv256 folded to one
    #     (256, 4*128) affine (exact: spatially-constant input), then dropout(id)+ReLU.
    s2 = jnp.dot(y, w2_ref[...], preferred_element_type=f32) + b2_ref[...]
    s2 = jnp.maximum(s2, 0.0).astype(jnp.bfloat16)                        # (1, 512)

    # (3) 4x4 stage: upsample(2x2->4x4) + conv128_1 + upconv128 folded to one
    #     (512, 16*64) affine (exact: block-constant input), then dropout(id)+ReLU.
    s3 = jnp.dot(s2, w3_ref[...], preferred_element_type=f32) + b3_ref[...]
    s3 = jnp.maximum(s3, 0.0).astype(jnp.bfloat16)                        # (1, 1024)

    # (4) upsample_final (4x4 -> HxW, nearest) written straight into a zero-padded
    #     VMEM image.  s3 layout: pixel-major (q = 4*r + c), 64 channels per pixel.
    bh, bw = H // 4, W // 4
    pada_ref[...] = jnp.zeros(pada_ref.shape, pada_ref.dtype)
    for q in range(16):                                                   # static unroll
        r, c = q // 4, q % 4
        pix = s3[:, 64 * q: 64 * (q + 1)]                                 # (1, 64)
        blk = jnp.broadcast_to(pix.reshape(1, 1, 64), (bh, bw, 64))
        pada_ref[1 + bh * r: 1 + bh * (r + 1), 1 + bw * c: 1 + bw * (c + 1), :] = blk

    # (5) conv64_1: nine per-tap (H*W, 64) x (64, 64) MXU dots, f32 accumulation (no ReLU
    #     after it in the reference).
    acc = jnp.zeros((H * W, 64), f32) + bc64_ref[...]
    for dy in range(3):
        for dx in range(3):
            win = pada_ref[dy:dy + H, dx:dx + W, :]                       # (H, W, 64) bf16
            acc = acc + jnp.dot(win.reshape(H * W, 64), wc64_ref[3 * dy + dx],
                                preferred_element_type=f32)

    # (6) conv64_1 result -> second zero-padded VMEM image (f32) for the output layer halo.
    padb_ref[...] = jnp.zeros(padb_ref.shape, padb_ref.dtype)
    padb_ref[1:1 + H, 1:1 + W, :] = acc.reshape(H, W, 64)

    # (7) output_layer (64 -> 1) epilogue: per-tap VPU multiply + lane reduction.
    o = jnp.zeros((H * W, 1), f32) + bout_ref[...]
    for dy in range(3):
        for dx in range(3):
            tap = 3 * dy + dx
            win = padb_ref[dy:dy + H, dx:dx + W, :].reshape(H * W, 64)
            o = o + jnp.sum(win * wout_ref[tap:tap + 1, :], axis=1, keepdims=True)

    out_ref[0] = o                                                        # (H*W, 1) f32


# ----------------------------------------------------------------------------
# Wrapper: one pallas_call for the whole forward
# ----------------------------------------------------------------------------
def unet_forward(kparams, inputs_nchw, input_params, input_size, output_size):
    # `inputs_nchw` never influences the returned tensor in the reference forward (the
    # encoder result is overwritten by the parameter branch), so it is unused here.
    del inputs_nchw
    B, P = input_params.shape
    H, W = int(input_size), int(output_size)
    assert H % 4 == 0 and W % 8 == 0, "fused kernel assumes H % 4 == 0 and W % 8 == 0"
    HW = H * W

    kern = functools.partial(_decoder_kernel, H=H, W=W)
    out = pl.pallas_call(
        kern,
        out_shape=jax.ShapeDtypeStruct((B, HW, 1), jnp.float32),
        grid=(B,),
        in_specs=[
            pl.BlockSpec((B, P), lambda n: (0, 0)),          # params (row b read in-kernel)
            pl.BlockSpec((P, 256), lambda n: (0, 0)),        # folded head weight
            pl.BlockSpec((1, 256), lambda n: (0, 0)),
            pl.BlockSpec((256, 512), lambda n: (0, 0)),      # folded 2x2 stage
            pl.BlockSpec((1, 512), lambda n: (0, 0)),
            pl.BlockSpec((512, 1024), lambda n: (0, 0)),     # folded 4x4 stage
            pl.BlockSpec((1, 1024), lambda n: (0, 0)),
            pl.BlockSpec((9, 64, 64), lambda n: (0, 0, 0)),  # conv64_1 (tap-major)
            pl.BlockSpec((1, 64), lambda n: (0, 0)),
            pl.BlockSpec((9, 64), lambda n: (0, 0)),         # output_layer taps
            pl.BlockSpec((1, 1), lambda n: (0, 0)),
        ],
        out_specs=pl.BlockSpec((1, HW, 1), lambda n: (n, 0, 0)),
        scratch_shapes=[
            pltpu.VMEM((H + 2, W + 2, 64), jnp.bfloat16),    # upsampled image (conv64_1 in)
            pltpu.VMEM((H + 2, W + 2, 64), jnp.float32),     # conv64_1 out (output_layer in)
        ],
        # No vmem_limit override: resident set (~1.5 MiB weights + ~0.4 MiB scratch) fits
        # default scoped VMEM on v5e/v6e and v7x's 64 MiB physical VMEM.
        compiler_params=pltpu.CompilerParams(dimension_semantics=("parallel",)),
    )(input_params,
      kparams["w_head"], kparams["b_head"],
      kparams["w_s2"], kparams["b_s2"],
      kparams["w_s3"], kparams["b_s3"],
      kparams["w_c64"], kparams["b_c64"],
      kparams["w_out"], kparams["b_out"])

    return out.reshape(B, 1, H, W)                           # NCHW, like the PyTorch module


# ----------------------------------------------------------------------------
# Raw (PyTorch-layout) weights for the live subgraph
# ----------------------------------------------------------------------------
def init_raw_weights(key, parameter_count):
    ks = jax.random.split(key, 10)

    def lin(k, din, dout):                                   # stored as (in, out), like W^T
        kw, kb = jax.random.split(k)
        s = 1.0 / np.sqrt(din)
        return (jax.random.normal(kw, (din, dout), jnp.float32) * s,
                jax.random.normal(kb, (dout,), jnp.float32) * s)

    def conv(k, cin, cout):                                  # Conv2d OIHW
        kw, kb = jax.random.split(k)
        s = 1.0 / np.sqrt(cin * 9)
        return (jax.random.normal(kw, (cout, cin, 3, 3), jnp.float32) * s,
                jax.random.normal(kb, (cout,), jnp.float32) * s)

    def convT(k, cin, cout):                                 # ConvTranspose2d (in, out, kh, kw)
        kw, kb = jax.random.split(k)
        s = 1.0 / np.sqrt(cin * 9)
        return (jax.random.normal(kw, (cin, cout, 3, 3), jnp.float32) * s,
                jax.random.normal(kb, (cout,), jnp.float32) * s)

    # NOTE: encoder weights (input_layer .. conv512, conv1024*, upconv1024) are intentionally
    # not instantiated: the reference forward overwrites that subgraph's result with the
    # parameter branch, so it never affects the returned tensor.
    return {
        "param_layer": lin(ks[0], parameter_count, 128),
        "param_layer_256": lin(ks[1], 128, 256),
        "param_layer_512": lin(ks[2], 256, 512),
        "upconv512": convT(ks[3], 512, 256),
        "conv256_1": conv(ks[4], 256, 256),
        "upconv256": convT(ks[5], 256, 128),
        "conv128_1": conv(ks[6], 128, 128),
        "upconv128": convT(ks[7], 128, 64),
        "conv64_1": conv(ks[8], 64, 64),
        "output_layer": conv(ks[9], 64, 1),
    }


# ----------------------------------------------------------------------------
# Pure-JAX helpers (init-time fold construction + f32 reference for validation)
# ----------------------------------------------------------------------------
def _conv_nchw(x, wb):
    w, b = wb                                                # w: OIHW, b: (O,)
    y = jax.lax.conv_general_dilated(x, w, window_strides=(1, 1),
                                     padding=((1, 1), (1, 1)),
                                     dimension_numbers=("NCHW", "OIHW", "NCHW"))
    return y + b[None, :, None, None]


def _convT_as_conv(wb):
    # ConvTranspose2d(k=3, s=1, p=1) == Conv2d(k=3, s=1, p=1) with in/out swapped + flip.
    w, b = wb
    return jnp.flip(jnp.transpose(w, (1, 0, 2, 3)), axis=(2, 3)), b


def _linearize(fn_batched, in_dim):
    """Exact (W, b) with fn(v) == v @ W + b for an affine map, via basis evaluation."""
    probes = jnp.concatenate(
        [jnp.zeros((1, in_dim), jnp.float32), jnp.eye(in_dim, dtype=jnp.float32)], axis=0)
    out = fn_batched(probes)
    bias = out[0]
    weight = out[1:] - bias[None, :]
    return weight, bias


def _stage2_batched(raw, v):
    # v: (N, 256) channel vector of the spatially-constant 2x2 input to conv256_1.
    x = jnp.broadcast_to(v[:, :, None, None], v.shape + (2, 2))
    x = _conv_nchw(x, raw["conv256_1"])
    x = _conv_nchw(x, _convT_as_conv(raw["upconv256"]))      # (N, 128, 2, 2), pre-ReLU
    return jnp.transpose(x, (0, 2, 3, 1)).reshape(v.shape[0], -1)   # pixel-major


def _stage3_batched(raw, v):
    # v: (N, 512) post-ReLU 2x2x128 map, pixel-major / channel-minor layout.
    x = jnp.transpose(v.reshape(-1, 2, 2, 128), (0, 3, 1, 2))       # (N, 128, 2, 2)
    x = jnp.repeat(jnp.repeat(x, 2, axis=2), 2, axis=3)             # nearest x2 -> 4x4
    x = _conv_nchw(x, raw["conv128_1"])
    x = _conv_nchw(x, _convT_as_conv(raw["upconv128"]))             # (N, 64, 4, 4), pre-ReLU
    return jnp.transpose(x, (0, 2, 3, 1)).reshape(v.shape[0], -1)   # (N, 1024)


def build_kernel_params(raw):
    bf16, f32 = jnp.bfloat16, jnp.float32

    # Head fold (exact): no nonlinearity between the three Linears and upconv512, and a
    # k=3,s=1,p=1 ConvTranspose2d on a 1x1 map reduces to its centre tap.
    w1, b1 = raw["param_layer"]
    w2, b2 = raw["param_layer_256"]
    w3, b3 = raw["param_layer_512"]
    wu, bu = raw["upconv512"]
    wc = wu[:, :, 1, 1]                                      # (512, 256) centre tap
    w_head = w1 @ w2 @ w3 @ wc
    b_head = ((b1 @ w2 + b2) @ w3 + b3) @ wc + bu

    # Exact stage folds (linearization of the conv subgraphs on their block-constant inputs).
    w_s2, b_s2 = _linearize(functools.partial(_stage2_batched, raw), 256)   # (256, 512)
    w_s3, b_s3 = _linearize(functools.partial(_stage3_batched, raw), 512)   # (512, 1024)

    # conv64_1 / output_layer stay real in-kernel convs: tap-major repack.
    wc64, bc64 = raw["conv64_1"]                             # (64, 64, 3, 3) OIHW
    w_c64 = jnp.transpose(wc64, (2, 3, 1, 0)).reshape(9, 64, 64)
    wo, bo = raw["output_layer"]                             # (1, 64, 3, 3)
    w_out = jnp.transpose(wo[0], (1, 2, 0)).reshape(9, 64)

    return {
        "w_head": w_head.astype(bf16), "b_head": b_head.reshape(1, -1).astype(f32),
        "w_s2": w_s2.astype(bf16),     "b_s2": b_s2.reshape(1, -1).astype(f32),
        "w_s3": w_s3.astype(bf16),     "b_s3": b_s3.reshape(1, -1).astype(f32),
        "w_c64": w_c64.astype(bf16),   "b_c64": bc64.reshape(1, -1).astype(f32),
        "w_out": w_out.astype(f32),    "b_out": bo.reshape(1, 1).astype(f32),
    }


def reference_forward(raw, input_params, input_size, output_size):
    """f32 pure-JAX implementation of the ORIGINAL (unfolded) forward's live subgraph."""
    w, b = raw["param_layer"];      x = input_params.astype(jnp.float32) @ w + b
    w, b = raw["param_layer_256"];  x = x @ w + b
    w, b = raw["param_layer_512"];  x = x @ w + b
    x = x[:, :, None, None]                                          # (B, 512, 1, 1)
    x = _conv_nchw(x, _convT_as_conv(raw["upconv512"]))
    x = jax.nn.relu(x)
    x = jnp.repeat(jnp.repeat(x, 2, axis=2), 2, axis=3)              # (B, 256, 2, 2)
    x = _conv_nchw(x, raw["conv256_1"])
    x = _conv_nchw(x, _convT_as_conv(raw["upconv256"]))
    x = jax.nn.relu(x)
    x = jnp.repeat(jnp.repeat(x, 2, axis=2), 2, axis=3)              # (B, 128, 4, 4)
    x = _conv_nchw(x, raw["conv128_1"])
    x = _conv_nchw(x, _convT_as_conv(raw["upconv128"]))
    x = jax.nn.relu(x)
    x = jnp.repeat(jnp.repeat(x, input_size // 4, axis=2), output_size // 4, axis=3)
    x = _conv_nchw(x, raw["conv64_1"])
    x = _conv_nchw(x, raw["output_layer"])                           # (B, 1, H, W)
    return x


# ----------------------------------------------------------------------------
if __name__ == "__main__":
    input_size, output_size, parameter_count = 16, 16, 8
    batch = 2

    root = jax.random.PRNGKey(0)
    k_w, k_in, k_p = jax.random.split(root, 3)

    raw = init_raw_weights(k_w, parameter_count)
    kparams = build_kernel_params(raw)

    inputs = jax.random.normal(k_in, (batch, 1, input_size, output_size), jnp.float32)
    input_params = jax.random.normal(k_p, (batch, parameter_count), jnp.float32)

    fwd = jax.jit(functools.partial(unet_forward,
                                    input_size=input_size, output_size=output_size))
    out = jax.block_until_ready(fwd(kparams, inputs, input_params))

    assert out.shape == (batch, 1, input_size, output_size), out.shape
    assert bool(jnp.all(jnp.isfinite(out)))

    # Validate the folded / fused Pallas decoder against the unfolded f32 layer sequence
    # (tolerance test: bf16 weights + f32 accumulation vs pure f32).
    ref = jax.block_until_ready(
        reference_forward(raw, input_params, input_size, output_size))
    err = float(jnp.max(jnp.abs(out.astype(jnp.float32) - ref)))
    scale = float(jnp.max(jnp.abs(ref))) + 1e-6
    assert np.isfinite(err) and err / scale < 5e-2, (err, scale)

    print("KERNEL_OK")
</pallas_src>

<mosaic_0001>
module attributes {stable_mosaic.version = 11 : i64} {
  func.func @_decoder_kernel(%arg0: i32, %arg1: memref<2x8xf32, #tpu.memory_space<vmem>>, %arg2: memref<8x256xbf16, #tpu.memory_space<vmem>>, %arg3: memref<1x256xf32, #tpu.memory_space<vmem>>, %arg4: memref<256x512xbf16, #tpu.memory_space<vmem>>, %arg5: memref<1x512xf32, #tpu.memory_space<vmem>>, %arg6: memref<512x1024xbf16, #tpu.memory_space<vmem>>, %arg7: memref<1x1024xf32, #tpu.memory_space<vmem>>, %arg8: memref<9x64x64xbf16, #tpu.memory_space<vmem>>, %arg9: memref<1x64xf32, #tpu.memory_space<vmem>>, %arg10: memref<9x64xf32, #tpu.memory_space<vmem>>, %arg11: memref<1x1xf32, #tpu.memory_space<vmem>>, %arg12: memref<1x256x1xf32, #tpu.memory_space<vmem>>, %arg13: memref<18x18x64xbf16, #tpu.memory_space<vmem>>, %arg14: memref<18x18x64xf32, #tpu.memory_space<vmem>>) attributes {dimension_semantics = [#tpu.dimension_semantics<parallel>], iteration_bounds = array<i64: 2>, scalar_prefetch = 0 : i64, scratch_operands = 2 : i64, tpu.core_type = #tpu.core_type<tc>, window_params = [{pipeline_mode = #tpu.pipeline_mode<synchronous>, transform_indices = @transform_0, window_bounds = array<i64: 2, 8>}, {pipeline_mode = #tpu.pipeline_mode<synchronous>, transform_indices = @transform_1, window_bounds = array<i64: 8, 256>}, {pipeline_mode = #tpu.pipeline_mode<synchronous>, transform_indices = @transform_2, window_bounds = array<i64: 1, 256>}, {pipeline_mode = #tpu.pipeline_mode<synchronous>, transform_indices = @transform_3, window_bounds = array<i64: 256, 512>}, {pipeline_mode = #tpu.pipeline_mode<synchronous>, transform_indices = @transform_4, window_bounds = array<i64: 1, 512>}, {pipeline_mode = #tpu.pipeline_mode<synchronous>, transform_indices = @transform_5, window_bounds = array<i64: 512, 1024>}, {pipeline_mode = #tpu.pipeline_mode<synchronous>, transform_indices = @transform_6, window_bounds = array<i64: 1, 1024>}, {pipeline_mode = #tpu.pipeline_mode<synchronous>, transform_indices = @transform_7, window_bounds = array<i64: 9, 64, 64>}, {pipeline_mode = #tpu.pipeline_mode<synchronous>, transform_indices = @transform_8, window_bounds = array<i64: 1, 64>}, {pipeline_mode = #tpu.pipeline_mode<synchronous>, transform_indices = @transform_9, window_bounds = array<i64: 9, 64>}, {pipeline_mode = #tpu.pipeline_mode<synchronous>, transform_indices = @transform_10, window_bounds = array<i64: 1, 1>}, {transform_indices = @transform_11, window_bounds = array<i64: 1, 256, 1>}]} {
    %0 = arith.index_cast %arg0 : i32 to index
    %c0 = arith.constant 0 : index
    %1 = vector.load %arg1[%0, %c0] : memref<2x8xf32, #tpu.memory_space<vmem>>, vector<1x8xf32>
    %2 = arith.truncf %1 : vector<1x8xf32> to vector<1x8xbf16>
    %c0_0 = arith.constant 0 : index
    %c0_1 = arith.constant 0 : index
    %3 = vector.load %arg2[%c0_0, %c0_1] : memref<8x256xbf16, #tpu.memory_space<vmem>>, vector<8x256xbf16>
    %cst = arith.constant dense<0.000000e+00> : vector<1x256xf32>
    %4 = tpu.matmul %2, %3, %cst {dimension_numbers = #tpu.dot_dimension_numbers<[1], [0], [0], [1], [0, 0, 1, 1], [], []>} : vector<1x8xbf16>, vector<8x256xbf16>, vector<1x256xf32> -> vector<1x256xf32>
    %c0_2 = arith.constant 0 : index
    %c0_3 = arith.constant 0 : index
    %5 = vector.load %arg3[%c0_2, %c0_3] : memref<1x256xf32, #tpu.memory_space<vmem>>, vector<1x256xf32>
    %6 = arith.addf %4, %5 : vector<1x256xf32>
    %cst_4 = arith.constant 0.000000e+00 : f32
    %7 = vector.broadcast %cst_4 : f32 to vector<1x256xf32>
    %8 = arith.maximumf %6, %7 : vector<1x256xf32>
    %9 = arith.truncf %8 : vector<1x256xf32> to vector<1x256xbf16>
    %c0_5 = arith.constant 0 : index
    %c0_6 = arith.constant 0 : index
    %10 = vector.load %arg4[%c0_5, %c0_6] : memref<256x512xbf16, #tpu.memory_space<vmem>>, vector<256x512xbf16>
    %cst_7 = arith.constant dense<0.000000e+00> : vector<1x512xf32>
    %11 = tpu.matmul %9, %10, %cst_7 {dimension_numbers = #tpu.dot_dimension_numbers<[1], [0], [0], [1], [0, 0, 1, 1], [], []>} : vector<1x256xbf16>, vector<256x512xbf16>, vector<1x512xf32> -> vector<1x512xf32>
    %c0_8 = arith.constant 0 : index
    %c0_9 = arith.constant 0 : index
    %12 = vector.load %arg5[%c0_8, %c0_9] : memref<1x512xf32, #tpu.memory_space<vmem>>, vector<1x512xf32>
    %13 = arith.addf %11, %12 : vector<1x512xf32>
    %cst_10 = arith.constant 0.000000e+00 : f32
    %14 = vector.broadcast %cst_10 : f32 to vector<1x512xf32>
    %15 = arith.maximumf %13, %14 : vector<1x512xf32>
    %16 = arith.truncf %15 : vector<1x512xf32> to vector<1x512xbf16>
    %c0_11 = arith.constant 0 : index
    %c0_12 = arith.constant 0 : index
    %17 = vector.load %arg6[%c0_11, %c0_12] : memref<512x1024xbf16, #tpu.memory_space<vmem>>, vector<512x1024xbf16>
    %cst_13 = arith.constant dense<0.000000e+00> : vector<1x1024xf32>
    %18 = tpu.matmul %16, %17, %cst_13 {dimension_numbers = #tpu.dot_dimension_numbers<[1], [0], [0], [1], [0, 0, 1, 1], [], []>} : vector<1x512xbf16>, vector<512x1024xbf16>, vector<1x1024xf32> -> vector<1x1024xf32>
    %c0_14 = arith.constant 0 : index
    %c0_15 = arith.constant 0 : index
    %19 = vector.load %arg7[%c0_14, %c0_15] : memref<1x1024xf32, #tpu.memory_space<vmem>>, vector<1x1024xf32>
    %20 = arith.addf %18, %19 : vector<1x1024xf32>
    %cst_16 = arith.constant 0.000000e+00 : f32
    %21 = vector.broadcast %cst_16 : f32 to vector<1x1024xf32>
    %22 = arith.maximumf %20, %21 : vector<1x1024xf32>
    %23 = arith.truncf %22 : vector<1x1024xf32> to vector<1x1024xbf16>
    %cst_17 = arith.constant 0.000000e+00 : bf16
    %24 = vector.broadcast %cst_17 : bf16 to vector<18x18x64xbf16>
    %c0_18 = arith.constant 0 : index
    %c0_19 = arith.constant 0 : index
    %c0_20 = arith.constant 0 : index
    %25 = vector.load %arg13[%c0_18, %c0_19, %c0_20] : memref<18x18x64xbf16, #tpu.memory_space<vmem>>, vector<18x18x64xbf16>
    tpu.vector_store %arg13[%c0_18, %c0_19, %c0_20], %24 {strides = array<i32>} : memref<18x18x64xbf16, #tpu.memory_space<vmem>>, vector<18x18x64xbf16>,
    %26 = vector.extract_strided_slice %23 {offsets = [0, 0], sizes = [1, 64], strides = [1, 1]} : vector<1x1024xbf16> to vector<1x64xbf16>
    %27 = vector.shape_cast %26 : vector<1x64xbf16> to vector<1x1x64xbf16>
    %28 = vector.shape_cast %27 : vector<1x1x64xbf16> to vector<1x1x64xbf16>
    %29 = vector.broadcast %28 : vector<1x1x64xbf16> to vector<4x4x64xbf16>
    %c1 = arith.constant 1 : index
    %c1_21 = arith.constant 1 : index
    %c0_22 = arith.constant 0 : index
    %30 = vector.load %arg13[%c1, %c1_21, %c0_22] : memref<18x18x64xbf16, #tpu.memory_space<vmem>>, vector<4x4x64xbf16>
    tpu.vector_store %arg13[%c1, %c1_21, %c0_22], %29 {strides = array<i32>} : memref<18x18x64xbf16, #tpu.memory_space<vmem>>, vector<4x4x64xbf16>,
    %31 = vector.extract_strided_slice %23 {offsets = [0, 64], sizes = [1, 64], strides = [1, 1]} : vector<1x1024xbf16> to vector<1x64xbf16>
    %32 = vector.shape_cast %31 : vector<1x64xbf16> to vector<1x1x64xbf16>
    %33 = vector.shape_cast %32 : vector<1x1x64xbf16> to vector<1x1x64xbf16>
    %34 = vector.broadcast %33 : vector<1x1x64xbf16> to vector<4x4x64xbf16>
    %c1_23 = arith.constant 1 : index
    %c5 = arith.constant 5 : index
    %c0_24 = arith.constant 0 : index
    %35 = vector.load %arg13[%c1_23, %c5, %c0_24] : memref<18x18x64xbf16, #tpu.memory_space<vmem>>, vector<4x4x64xbf16>
    tpu.vector_store %arg13[%c1_23, %c5, %c0_24], %34 {strides = array<i32>} : memref<18x18x64xbf16, #tpu.memory_space<vmem>>, vector<4x4x64xbf16>,
    %36 = vector.extract_strided_slice %23 {offsets = [0, 128], sizes = [1, 64], strides = [1, 1]} : vector<1x1024xbf16> to vector<1x64xbf16>
    %37 = vector.shape_cast %36 : vector<1x64xbf16> to vector<1x1x64xbf16>
    %38 = vector.shape_cast %37 : vector<1x1x64xbf16> to vector<1x1x64xbf16>
    %39 = vector.broadcast %38 : vector<1x1x64xbf16> to vector<4x4x64xbf16>
    %c1_25 = arith.constant 1 : index
    %c9 = arith.constant 9 : index
    %c0_26 = arith.constant 0 : index
    %40 = vector.load %arg13[%c1_25, %c9, %c0_26] : memref<18x18x64xbf16, #tpu.memory_space<vmem>>, vector<4x4x64xbf16>
    tpu.vector_store %arg13[%c1_25, %c9, %c0_26], %39 {strides = array<i32>} : memref<18x18x64xbf16, #tpu.memory_space<vmem>>, vector<4x4x64xbf16>,
    %41 = vector.extract_strided_slice %23 {offsets = [0, 192], sizes = [1, 64], strides = [1, 1]} : vector<1x1024xbf16> to vector<1x64xbf16>
    %42 = vector.shape_cast %41 : vector<1x64xbf16> to vector<1x1x64xbf16>
    %43 = vector.shape_cast %42 : vector<1x1x64xbf16> to vector<1x1x64xbf16>
    %44 = vector.broadcast %43 : vector<1x1x64xbf16> to vector<4x4x64xbf16>
    %c1_27 = arith.constant 1 : index
    %c13 = arith.constant 13 : index
    %c0_28 = arith.constant 0 : index
    %45 = vector.load %arg13[%c1_27, %c13, %c0_28] : memref<18x18x64xbf16, #tpu.memory_space<vmem>>, vector<4x4x64xbf16>
    tpu.vector_store %arg13[%c1_27, %c13, %c0_28], %44 {strides = array<i32>} : memref<18x18x64xbf16, #tpu.memory_space<vmem>>, vector<4x4x64xbf16>,
    %46 = vector.extract_strided_slice %23 {offsets = [0, 256], sizes = [1, 64], strides = [1, 1]} : vector<1x1024xbf16> to vector<1x64xbf16>
    %47 = vector.shape_cast %46 : vector<1x64xbf16> to vector<1x1x64xbf16>
    %48 = vector.shape_cast %47 : vector<1x1x64xbf16> to vector<1x1x64xbf16>
    %49 = vector.broadcast %48 : vector<1x1x64xbf16> to vector<4x4x64xbf16>
    %c5_29 = arith.constant 5 : index
    %c1_30 = arith.constant 1 : index
    %c0_31 = arith.constant 0 : index
    %50 = vector.load %arg13[%c5_29, %c1_30, %c0_31] : memref<18x18x64xbf16, #tpu.memory_space<vmem>>, vector<4x4x64xbf16>
    tpu.vector_store %arg13[%c5_29, %c1_30, %c0_31], %49 {strides = array<i32>} : memref<18x18x64xbf16, #tpu.memory_space<vmem>>, vector<4x4x64xbf16>,
    %51 = vector.extract_strided_slice %23 {offsets = [0, 320], sizes = [1, 64], strides = [1, 1]} : vector<1x1024xbf16> to vector<1x64xbf16>
    %52 = vector.shape_cast %51 : vector<1x64xbf16> to vector<1x1x64xbf16>
    %53 = vector.shape_cast %52 : vector<1x1x64xbf16> to vector<1x1x64xbf16>
    %54 = vector.broadcast %53 : vector<1x1x64xbf16> to vector<4x4x64xbf16>
    %c5_32 = arith.constant 5 : index
    %c5_33 = arith.constant 5 : index
    %c0_34 = arith.constant 0 : index
    %55 = vector.load %arg13[%c5_32, %c5_33, %c0_34] : memref<18x18x64xbf16, #tpu.memory_space<vmem>>, vector<4x4x64xbf16>
    tpu.vector_store %arg13[%c5_32, %c5_33, %c0_34], %54 {strides = array<i32>} : memref<18x18x64xbf16, #tpu.memory_space<vmem>>, vector<4x4x64xbf16>,
    %56 = vector.extract_strided_slice %23 {offsets = [0, 384], sizes = [1, 64], strides = [1, 1]} : vector<1x1024xbf16> to vector<1x64xbf16>
    %57 = vector.shape_cast %56 : vector<1x64xbf16> to vector<1x1x64xbf16>
    %58 = vector.shape_cast %57 : vector<1x1x64xbf16> to vector<1x1x64xbf16>
    %59 = vector.broadcast %58 : vector<1x1x64xbf16> to vector<4x4x64xbf16>
    %c5_35 = arith.constant 5 : index
    %c9_36 = arith.constant 9 : index
    %c0_37 = arith.constant 0 : index
    %60 = vector.load %arg13[%c5_35, %c9_36, %c0_37] : memref<18x18x64xbf16, #tpu.memory_space<vmem>>, vector<4x4x64xbf16>
    tpu.vector_store %arg13[%c5_35, %c9_36, %c0_37], %59 {strides = array<i32>} : memref<18x18x64xbf16, #tpu.memory_space<vmem>>, vector<4x4x64xbf16>,
    %61 = vector.extract_strided_slice %23 {offsets = [0, 448], sizes = [1, 64], strides = [1, 1]} : vector<1x1024xbf16> to vector<1x64xbf16>
    %62 = vector.shape_cast %61 : vector<1x64xbf16> to vector<1x1x64xbf16>
    %63 = vector.shape_cast %62 : vector<1x1x64xbf16> to vector<1x1x64xbf16>
    %64 = vector.broadcast %63 : vector<1x1x64xbf16> to vector<4x4x64xbf16>
    %c5_38 = arith.constant 5 : index
    %c13_39 = arith.constant 13 : index
    %c0_40 = arith.constant 0 : index
    %65 = vector.load %arg13[%c5_38, %c13_39, %c0_40] : memref<18x18x64xbf16, #tpu.memory_space<vmem>>, vector<4x4x64xbf16>
    tpu.vector_store %arg13[%c5_38, %c13_39, %c0_40], %64 {strides = array<i32>} : memref<18x18x64xbf16, #tpu.memory_space<vmem>>, vector<4x4x64xbf16>,
    %66 = vector.extract_strided_slice %23 {offsets = [0, 512], sizes = [1, 64], strides = [1, 1]} : vector<1x1024xbf16> to vector<1x64xbf16>
    %67 = vector.shape_cast %66 : vector<1x64xbf16> to vector<1x1x64xbf16>
    %68 = vector.shape_cast %67 : vector<1x1x64xbf16> to vector<1x1x64xbf16>
    %69 = vector.broadcast %68 : vector<1x1x64xbf16> to vector<4x4x64xbf16>
    %c9_41 = arith.constant 9 : index
    %c1_42 = arith.constant 1 : index
    %c0_43 = arith.constant 0 : index
    %70 = vector.load %arg13[%c9_41, %c1_42, %c0_43] : memref<18x18x64xbf16, #tpu.memory_space<vmem>>, vector<4x4x64xbf16>
    tpu.vector_store %arg13[%c9_41, %c1_42, %c0_43], %69 {strides = array<i32>} : memref<18x18x64xbf16, #tpu.memory_space<vmem>>, vector<4x4x64xbf16>,
    %71 = vector.extract_strided_slice %23 {offsets = [0, 576], sizes = [1, 64], strides = [1, 1]} : vector<1x1024xbf16> to vector<1x64xbf16>
    %72 = vector.shape_cast %71 : vector<1x64xbf16> to vector<1x1x64xbf16>
    %73 = vector.shape_cast %72 : vector<1x1x64xbf16> to vector<1x1x64xbf16>
    %74 = vector.broadcast %73 : vector<1x1x64xbf16> to vector<4x4x64xbf16>
    %c9_44 = arith.constant 9 : index
    %c5_45 = arith.constant 5 : index
    %c0_46 = arith.constant 0 : index
    %75 = vector.load %arg13[%c9_44, %c5_45, %c0_46] : memref<18x18x64xbf16, #tpu.memory_space<vmem>>, vector<4x4x64xbf16>
    tpu.vector_store %arg13[%c9_44, %c5_45, %c0_46], %74 {strides = array<i32>} : memref<18x18x64xbf16, #tpu.memory_space<vmem>>, vector<4x4x64xbf16>,
    %76 = vector.extract_strided_slice %23 {offsets = [0, 640], sizes = [1, 64], strides = [1, 1]} : vector<1x1024xbf16> to vector<1x64xbf16>
    %77 = vector.shape_cast %76 : vector<1x64xbf16> to vector<1x1x64xbf16>
    %78 = vector.shape_cast %77 : vector<1x1x64xbf16> to vector<1x1x64xbf16>
    %79 = vector.broadcast %78 : vector<1x1x64xbf16> to vector<4x4x64xbf16>
    %c9_47 = arith.constant 9 : index
    %c9_48 = arith.constant 9 : index
    %c0_49 = arith.constant 0 : index
    %80 = vector.load %arg13[%c9_47, %c9_48, %c0_49] : memref<18x18x64xbf16, #tpu.memory_space<vmem>>, vector<4x4x64xbf16>
    tpu.vector_store %arg13[%c9_47, %c9_48, %c0_49], %79 {strides = array<i32>} : memref<18x18x64xbf16, #tpu.memory_space<vmem>>, vector<4x4x64xbf16>,
    %81 = vector.extract_strided_slice %23 {offsets = [0, 704], sizes = [1, 64], strides = [1, 1]} : vector<1x1024xbf16> to vector<1x64xbf16>
    %82 = vector.shape_cast %81 : vector<1x64xbf16> to vector<1x1x64xbf16>
    %83 = vector.shape_cast %82 : vector<1x1x64xbf16> to vector<1x1x64xbf16>
    %84 = vector.broadcast %83 : vector<1x1x64xbf16> to vector<4x4x64xbf16>
    %c9_50 = arith.constant 9 : index
    %c13_51 = arith.constant 13 : index
    %c0_52 = arith.constant 0 : index
    %85 = vector.load %arg13[%c9_50, %c13_51, %c0_52] : memref<18x18x64xbf16, #tpu.memory_space<vmem>>, vector<4x4x64xbf16>
    tpu.vector_store %arg13[%c9_50, %c13_51, %c0_52], %84 {strides = array<i32>} : memref<18x18x64xbf16, #tpu.memory_space<vmem>>, vector<4x4x64xbf16>,
    %86 = vector.extract_strided_slice %23 {offsets = [0, 768], sizes = [1, 64], strides = [1, 1]} : vector<1x1024xbf16> to vector<1x64xbf16>
    %87 = vector.shape_cast %86 : vector<1x64xbf16> to vector<1x1x64xbf16>
    %88 = vector.shape_cast %87 : vector<1x1x64xbf16> to vector<1x1x64xbf16>
    %89 = vector.broadcast %88 : vector<1x1x64xbf16> to vector<4x4x64xbf16>
    %c13_53 = arith.constant 13 : index
    %c1_54 = arith.constant 1 : index
    %c0_55 = arith.constant 0 : index
    %90 = vector.load %arg13[%c13_53, %c1_54, %c0_55] : memref<18x18x64xbf16, #tpu.memory_space<vmem>>, vector<4x4x64xbf16>
    tpu.vector_store %arg13[%c13_53, %c1_54, %c0_55], %89 {strides = array<i32>} : memref<18x18x64xbf16, #tpu.memory_space<vmem>>, vector<4x4x64xbf16>,
    %91 = vector.extract_strided_slice %23 {offsets = [0, 832], sizes = [1, 64], strides = [1, 1]} : vector<1x1024xbf16> to vector<1x64xbf16>
    %92 = vector.shape_cast %91 : vector<1x64xbf16> to vector<1x1x64xbf16>
    %93 = vector.shape_cast %92 : vector<1x1x64xbf16> to vector<1x1x64xbf16>
    %94 = vector.broadcast %93 : vector<1x1x64xbf16> to vector<4x4x64xbf16>
    %c13_56 = arith.constant 13 : index
    %c5_57 = arith.constant 5 : index
    %c0_58 = arith.constant 0 : index
    %95 = vector.load %arg13[%c13_56, %c5_57, %c0_58] : memref<18x18x64xbf16, #tpu.memory_space<vmem>>, vector<4x4x64xbf16>
    tpu.vector_store %arg13[%c13_56, %c5_57, %c0_58], %94 {strides = array<i32>} : memref<18x18x64xbf16, #tpu.memory_space<vmem>>, vector<4x4x64xbf16>,
    %96 = vector.extract_strided_slice %23 {offsets = [0, 896], sizes = [1, 64], strides = [1, 1]} : vector<1x1024xbf16> to vector<1x64xbf16>
    %97 = vector.shape_cast %96 : vector<1x64xbf16> to vector<1x1x64xbf16>
    %98 = vector.shape_cast %97 : vector<1x1x64xbf16> to vector<1x1x64xbf16>
    %99 = vector.broadcast %98 : vector<1x1x64xbf16> to vector<4x4x64xbf16>
    %c13_59 = arith.constant 13 : index
    %c9_60 = arith.constant 9 : index
    %c0_61 = arith.constant 0 : index
    %100 = vector.load %arg13[%c13_59, %c9_60, %c0_61] : memref<18x18x64xbf16, #tpu.memory_space<vmem>>, vector<4x4x64xbf16>
    tpu.vector_store %arg13[%c13_59, %c9_60, %c0_61], %99 {strides = array<i32>} : memref<18x18x64xbf16, #tpu.memory_space<vmem>>, vector<4x4x64xbf16>,
    %101 = vector.extract_strided_slice %23 {offsets = [0, 960], sizes = [1, 64], strides = [1, 1]} : vector<1x1024xbf16> to vector<1x64xbf16>
    %102 = vector.shape_cast %101 : vector<1x64xbf16> to vector<1x1x64xbf16>
    %103 = vector.shape_cast %102 : vector<1x1x64xbf16> to vector<1x1x64xbf16>
    %104 = vector.broadcast %103 : vector<1x1x64xbf16> to vector<4x4x64xbf16>
    %c13_62 = arith.constant 13 : index
    %c13_63 = arith.constant 13 : index
    %c0_64 = arith.constant 0 : index
    %105 = vector.load %arg13[%c13_62, %c13_63, %c0_64] : memref<18x18x64xbf16, #tpu.memory_space<vmem>>, vector<4x4x64xbf16>
    tpu.vector_store %arg13[%c13_62, %c13_63, %c0_64], %104 {strides = array<i32>} : memref<18x18x64xbf16, #tpu.memory_space<vmem>>, vector<4x4x64xbf16>,
    %cst_65 = arith.constant 0.000000e+00 : f32
    %106 = vector.broadcast %cst_65 : f32 to vector<256x64xf32>
    %c0_66 = arith.constant 0 : index
    %c0_67 = arith.constant 0 : index
    %107 = vector.load %arg9[%c0_66, %c0_67] : memref<1x64xf32, #tpu.memory_space<vmem>>, vector<1x64xf32>
    %108 = vector.broadcast %107 : vector<1x64xf32> to vector<256x64xf32>
    %109 = arith.addf %106, %108 : vector<256x64xf32>
    %c0_68 = arith.constant 0 : index
    %c0_69 = arith.constant 0 : index
    %c0_70 = arith.constant 0 : index
    %110 = vector.load %arg13[%c0_68, %c0_69, %c0_70] : memref<18x18x64xbf16, #tpu.memory_space<vmem>>, vector<16x16x64xbf16>
    %111 = vector.shape_cast %110 : vector<16x16x64xbf16> to vector<256x64xbf16>
    %c0_71 = arith.constant 0 : index
    %c0_72 = arith.constant 0 : index
    %c0_73 = arith.constant 0 : index
    %112 = vector.load %arg8[%c0_71, %c0_72, %c0_73] : memref<9x64x64xbf16, #tpu.memory_space<vmem>>, vector<1x64x64xbf16>
    %113 = vector.shape_cast %112 : vector<1x64x64xbf16> to vector<64x64xbf16>
    %cst_74 = arith.constant dense<0.000000e+00> : vector<256x64xf32>
    %114 = tpu.matmul %111, %113, %cst_74 {dimension_numbers = #tpu.dot_dimension_numbers<[1], [0], [0], [1], [0, 0, 1, 1], [], []>} : vector<256x64xbf16>, vector<64x64xbf16>, vector<256x64xf32> -> vector<256x64xf32>
    %115 = arith.addf %109, %114 : vector<256x64xf32>
    %c0_75 = arith.constant 0 : index
    %c1_76 = arith.constant 1 : index
    %c0_77 = arith.constant 0 : index
    %116 = vector.load %arg13[%c0_75, %c1_76, %c0_77] : memref<18x18x64xbf16, #tpu.memory_space<vmem>>, vector<16x16x64xbf16>
    %117 = vector.shape_cast %116 : vector<16x16x64xbf16> to vector<256x64xbf16>
    %c1_78 = arith.constant 1 : index
    %c0_79 = arith.constant 0 : index
    %c0_80 = arith.constant 0 : index
    %118 = vector.load %arg8[%c1_78, %c0_79, %c0_80] : memref<9x64x64xbf16, #tpu.memory_space<vmem>>, vector<1x64x64xbf16>
    %119 = vector.shape_cast %118 : vector<1x64x64xbf16> to vector<64x64xbf16>
    %cst_81 = arith.constant dense<0.000000e+00> : vector<256x64xf32>
    %120 = tpu.matmul %117, %119, %cst_81 {dimension_numbers = #tpu.dot_dimension_numbers<[1], [0], [0], [1], [0, 0, 1, 1], [], []>} : vector<256x64xbf16>, vector<64x64xbf16>, vector<256x64xf32> -> vector<256x64xf32>
    %121 = arith.addf %115, %120 : vector<256x64xf32>
    %c0_82 = arith.constant 0 : index
    %c2 = arith.constant 2 : index
    %c0_83 = arith.constant 0 : index
    %122 = vector.load %arg13[%c0_82, %c2, %c0_83] : memref<18x18x64xbf16, #tpu.memory_space<vmem>>, vector<16x16x64xbf16>
    %123 = vector.shape_cast %122 : vector<16x16x64xbf16> to vector<256x64xbf16>
    %c2_84 = arith.constant 2 : index
    %c0_85 = arith.constant 0 : index
    %c0_86 = arith.constant 0 : index
    %124 = vector.load %arg8[%c2_84, %c0_85, %c0_86] : memref<9x64x64xbf16, #tpu.memory_space<vmem>>, vector<1x64x64xbf16>
    %125 = vector.shape_cast %124 : vector<1x64x64xbf16> to vector<64x64xbf16>
    %cst_87 = arith.constant dense<0.000000e+00> : vector<256x64xf32>
    %126 = tpu.matmul %123, %125, %cst_87 {dimension_numbers = #tpu.dot_dimension_numbers<[1], [0], [0], [1], [0, 0, 1, 1], [], []>} : vector<256x64xbf16>, vector<64x64xbf16>, vector<256x64xf32> -> vector<256x64xf32>
    %127 = arith.addf %121, %126 : vector<256x64xf32>
    %c1_88 = arith.constant 1 : index
    %c0_89 = arith.constant 0 : index
    %c0_90 = arith.constant 0 : index
    %128 = vector.load %arg13[%c1_88, %c0_89, %c0_90] : memref<18x18x64xbf16, #tpu.memory_space<vmem>>, vector<16x16x64xbf16>
    %129 = vector.shape_cast %128 : vector<16x16x64xbf16> to vector<256x64xbf16>
    %c3 = arith.constant 3 : index
    %c0_91 = arith.constant 0 : index
    %c0_92 = arith.constant 0 : index
    %130 = vector.load %arg8[%c3, %c0_91, %c0_92] : memref<9x64x64xbf16, #tpu.memory_space<vmem>>, vector<1x64x64xbf16>
    %131 = vector.shape_cast %130 : vector<1x64x64xbf16> to vector<64x64xbf16>
    %cst_93 = arith.constant dense<0.000000e+00> : vector<256x64xf32>
    %132 = tpu.matmul %129, %131, %cst_93 {dimension_numbers = #tpu.dot_dimension_numbers<[1], [0], [0], [1], [0, 0, 1, 1], [], []>} : vector<256x64xbf16>, vector<64x64xbf16>, vector<256x64xf32> -> vector<256x64xf32>
    %133 = arith.addf %127, %132 : vector<256x64xf32>
    %c1_94 = arith.constant 1 : index
    %c1_95 = arith.constant 1 : index
    %c0_96 = arith.constant 0 : index
    %134 = vector.load %arg13[%c1_94, %c1_95, %c0_96] : memref<18x18x64xbf16, #tpu.memory_space<vmem>>, vector<16x16x64xbf16>
    %135 = vector.shape_cast %134 : vector<16x16x64xbf16> to vector<256x64xbf16>
    %c4 = arith.constant 4 : index
    %c0_97 = arith.constant 0 : index
    %c0_98 = arith.constant 0 : index
    %136 = vector.load %arg8[%c4, %c0_97, %c0_98] : memref<9x64x64xbf16, #tpu.memory_space<vmem>>, vector<1x64x64xbf16>
    %137 = vector.shape_cast %136 : vector<1x64x64xbf16> to vector<64x64xbf16>
    %cst_99 = arith.constant dense<0.000000e+00> : vector<256x64xf32>
    %138 = tpu.matmul %135, %137, %cst_99 {dimension_numbers = #tpu.dot_dimension_numbers<[1], [0], [0], [1], [0, 0, 1, 1], [], []>} : vector<256x64xbf16>, vector<64x64xbf16>, vector<256x64xf32> -> vector<256x64xf32>
    %139 = arith.addf %133, %138 : vector<256x64xf32>
    %c1_100 = arith.constant 1 : index
    %c2_101 = arith.constant 2 : index
    %c0_102 = arith.constant 0 : index
    %140 = vector.load %arg13[%c1_100, %c2_101, %c0_102] : memref<18x18x64xbf16, #tpu.memory_space<vmem>>, vector<16x16x64xbf16>
    %141 = vector.shape_cast %140 : vector<16x16x64xbf16> to vector<256x64xbf16>
    %c5_103 = arith.constant 5 : index
    %c0_104 = arith.constant 0 : index
    %c0_105 = arith.constant 0 : index
    %142 = vector.load %arg8[%c5_103, %c0_104, %c0_105] : memref<9x64x64xbf16, #tpu.memory_space<vmem>>, vector<1x64x64xbf16>
    %143 = vector.shape_cast %142 : vector<1x64x64xbf16> to vector<64x64xbf16>
    %cst_106 = arith.constant dense<0.000000e+00> : vector<256x64xf32>
    %144 = tpu.matmul %141, %143, %cst_106 {dimension_numbers = #tpu.dot_dimension_numbers<[1], [0], [0], [1], [0, 0, 1, 1], [], []>} : vector<256x64xbf16>, vector<64x64xbf16>, vector<256x64xf32> -> vector<256x64xf32>
    %145 = arith.addf %139, %144 : vector<256x64xf32>
    %c2_107 = arith.constant 2 : index
    %c0_108 = arith.constant 0 : index
    %c0_109 = arith.constant 0 : index
    %146 = vector.load %arg13[%c2_107, %c0_108, %c0_109] : memref<18x18x64xbf16, #tpu.memory_space<vmem>>, vector<16x16x64xbf16>
    %147 = vector.shape_cast %146 : vector<16x16x64xbf16> to vector<256x64xbf16>
    %c6 = arith.constant 6 : index
    %c0_110 = arith.constant 0 : index
    %c0_111 = arith.constant 0 : index
    %148 = vector.load %arg8[%c6, %c0_110, %c0_111] : memref<9x64x64xbf16, #tpu.memory_space<vmem>>, vector<1x64x64xbf16>
    %149 = vector.shape_cast %148 : vector<1x64x64xbf16> to vector<64x64xbf16>
    %cst_112 = arith.constant dense<0.000000e+00> : vector<256x64xf32>
    %150 = tpu.matmul %147, %149, %cst_112 {dimension_numbers = #tpu.dot_dimension_numbers<[1], [0], [0], [1], [0, 0, 1, 1], [], []>} : vector<256x64xbf16>, vector<64x64xbf16>, vector<256x64xf32> -> vector<256x64xf32>
    %151 = arith.addf %145, %150 : vector<256x64xf32>
    %c2_113 = arith.constant 2 : index
    %c1_114 = arith.constant 1 : index
    %c0_115 = arith.constant 0 : index
    %152 = vector.load %arg13[%c2_113, %c1_114, %c0_115] : memref<18x18x64xbf16, #tpu.memory_space<vmem>>, vector<16x16x64xbf16>
    %153 = vector.shape_cast %152 : vector<16x16x64xbf16> to vector<256x64xbf16>
    %c7 = arith.constant 7 : index
    %c0_116 = arith.constant 0 : index
    %c0_117 = arith.constant 0 : index
    %154 = vector.load %arg8[%c7, %c0_116, %c0_117] : memref<9x64x64xbf16, #tpu.memory_space<vmem>>, vector<1x64x64xbf16>
    %155 = vector.shape_cast %154 : vector<1x64x64xbf16> to vector<64x64xbf16>
    %cst_118 = arith.constant dense<0.000000e+00> : vector<256x64xf32>
    %156 = tpu.matmul %153, %155, %cst_118 {dimension_numbers = #tpu.dot_dimension_numbers<[1], [0], [0], [1], [0, 0, 1, 1], [], []>} : vector<256x64xbf16>, vector<64x64xbf16>, vector<256x64xf32> -> vector<256x64xf32>
    %157 = arith.addf %151, %156 : vector<256x64xf32>
    %c2_119 = arith.constant 2 : index
    %c2_120 = arith.constant 2 : index
    %c0_121 = arith.constant 0 : index
    %158 = vector.load %arg13[%c2_119, %c2_120, %c0_121] : memref<18x18x64xbf16, #tpu.memory_space<vmem>>, vector<16x16x64xbf16>
    %159 = vector.shape_cast %158 : vector<16x16x64xbf16> to vector<256x64xbf16>
    %c8 = arith.constant 8 : index
    %c0_122 = arith.constant 0 : index
    %c0_123 = arith.constant 0 : index
    %160 = vector.load %arg8[%c8, %c0_122, %c0_123] : memref<9x64x64xbf16, #tpu.memory_space<vmem>>, vector<1x64x64xbf16>
    %161 = vector.shape_cast %160 : vector<1x64x64xbf16> to vector<64x64xbf16>
    %cst_124 = arith.constant dense<0.000000e+00> : vector<256x64xf32>
    %162 = tpu.matmul %159, %161, %cst_124 {dimension_numbers = #tpu.dot_dimension_numbers<[1], [0], [0], [1], [0, 0, 1, 1], [], []>} : vector<256x64xbf16>, vector<64x64xbf16>, vector<256x64xf32> -> vector<256x64xf32>
    %163 = arith.addf %157, %162 : vector<256x64xf32>
    %cst_125 = arith.constant 0.000000e+00 : f32
    %164 = vector.broadcast %cst_125 : f32 to vector<18x18x64xf32>
    %c0_126 = arith.constant 0 : index
    %c0_127 = arith.constant 0 : index
    %c0_128 = arith.constant 0 : index
    %165 = vector.load %arg14[%c0_126, %c0_127, %c0_128] : memref<18x18x64xf32, #tpu.memory_space<vmem>>, vector<18x18x64xf32>
    tpu.vector_store %arg14[%c0_126, %c0_127, %c0_128], %164 {strides = array<i32>} : memref<18x18x64xf32, #tpu.memory_space<vmem>>, vector<18x18x64xf32>,
    %166 = vector.shape_cast %163 : vector<256x64xf32> to vector<16x16x64xf32>
    %c1_129 = arith.constant 1 : index
    %c1_130 = arith.constant 1 : index
    %c0_131 = arith.constant 0 : index
    %167 = vector.load %arg14[%c1_129, %c1_130, %c0_131] : memref<18x18x64xf32, #tpu.memory_space<vmem>>, vector<16x16x64xf32>
    tpu.vector_store %arg14[%c1_129, %c1_130, %c0_131], %166 {strides = array<i32>} : memref<18x18x64xf32, #tpu.memory_space<vmem>>, vector<16x16x64xf32>,
    %cst_132 = arith.constant 0.000000e+00 : f32
    %168 = vector.broadcast %cst_132 : f32 to vector<256x1xf32>
    %c0_133 = arith.constant 0 : index
    %c0_134 = arith.constant 0 : index
    %169 = vector.load %arg11[%c0_133, %c0_134] : memref<1x1xf32, #tpu.memory_space<vmem>>, vector<1x1xf32>
    %170 = vector.broadcast %169 : vector<1x1xf32> to vector<256x1xf32>
    %171 = arith.addf %168, %170 : vector<256x1xf32>
    %c0_135 = arith.constant 0 : index
    %c0_136 = arith.constant 0 : index
    %c0_137 = arith.constant 0 : index
    %172 = vector.load %arg14[%c0_135, %c0_136, %c0_137] : memref<18x18x64xf32, #tpu.memory_space<vmem>>, vector<16x16x64xf32>
    %173 = vector.shape_cast %172 : vector<16x16x64xf32> to vector<256x64xf32>
    %c0_138 = arith.constant 0 : index
    %c0_139 = arith.constant 0 : index
    %174 = vector.load %arg10[%c0_138, %c0_139] : memref<9x64xf32, #tpu.memory_space<vmem>>, vector<1x64xf32>
    %175 = vector.broadcast %174 : vector<1x64xf32> to vector<256x64xf32>
    %176 = arith.mulf %173, %175 : vector<256x64xf32>
    %cst_140 = arith.constant dense<0.000000e+00> : vector<256xf32>
    %177 = vector.multi_reduction <add>, %176, %cst_140 [1] : vector<256x64xf32> to vector<256xf32>
    %178 = vector.shape_cast %177 : vector<256xf32> to vector<256x1xf32>
    %179 = arith.addf %171, %178 : vector<256x1xf32>
    %c0_141 = arith.constant 0 : index
    %c1_142 = arith.constant 1 : index
    %c0_143 = arith.constant 0 : index
    %180 = vector.load %arg14[%c0_141, %c1_142, %c0_143] : memref<18x18x64xf32, #tpu.memory_space<vmem>>, vector<16x16x64xf32>
    %181 = vector.shape_cast %180 : vector<16x16x64xf32> to vector<256x64xf32>
    %c1_144 = arith.constant 1 : index
    %c0_145 = arith.constant 0 : index
    %182 = vector.load %arg10[%c1_144, %c0_145] : memref<9x64xf32, #tpu.memory_space<vmem>>, vector<1x64xf32>
    %183 = vector.broadcast %182 : vector<1x64xf32> to vector<256x64xf32>
    %184 = arith.mulf %181, %183 : vector<256x64xf32>
    %cst_146 = arith.constant dense<0.000000e+00> : vector<256xf32>
    %185 = vector.multi_reduction <add>, %184, %cst_146 [1] : vector<256x64xf32> to vector<256xf32>
    %186 = vector.shape_cast %185 : vector<256xf32> to vector<256x1xf32>
    %187 = arith.addf %179, %186 : vector<256x1xf32>
    %c0_147 = arith.constant 0 : index
    %c2_148 = arith.constant 2 : index
    %c0_149 = arith.constant 0 : index
    %188 = vector.load %arg14[%c0_147, %c2_148, %c0_149] : memref<18x18x64xf32, #tpu.memory_space<vmem>>, vector<16x16x64xf32>
    %189 = vector.shape_cast %188 : vector<16x16x64xf32> to vector<256x64xf32>
    %c2_150 = arith.constant 2 : index
    %c0_151 = arith.constant 0 : index
    %190 = vector.load %arg10[%c2_150, %c0_151] : memref<9x64xf32, #tpu.memory_space<vmem>>, vector<1x64xf32>
    %191 = vector.broadcast %190 : vector<1x64xf32> to vector<256x64xf32>
    %192 = arith.mulf %189, %191 : vector<256x64xf32>
    %cst_152 = arith.constant dense<0.000000e+00> : vector<256xf32>
    %193 = vector.multi_reduction <add>, %192, %cst_152 [1] : vector<256x64xf32> to vector<256xf32>
    %194 = vector.shape_cast %193 : vector<256xf32> to vector<256x1xf32>
    %195 = arith.addf %187, %194 : vector<256x1xf32>
    %c1_153 = arith.constant 1 : index
    %c0_154 = arith.constant 0 : index
    %c0_155 = arith.constant 0 : index
    %196 = vector.load %arg14[%c1_153, %c0_154, %c0_155] : memref<18x18x64xf32, #tpu.memory_space<vmem>>, vector<16x16x64xf32>
    %197 = vector.shape_cast %196 : vector<16x16x64xf32> to vector<256x64xf32>
    %c3_156 = arith.constant 3 : index
    %c0_157 = arith.constant 0 : index
    %198 = vector.load %arg10[%c3_156, %c0_157] : memref<9x64xf32, #tpu.memory_space<vmem>>, vector<1x64xf32>
    %199 = vector.broadcast %198 : vector<1x64xf32> to vector<256x64xf32>
    %200 = arith.mulf %197, %199 : vector<256x64xf32>
    %cst_158 = arith.constant dense<0.000000e+00> : vector<256xf32>
    %201 = vector.multi_reduction <add>, %200, %cst_158 [1] : vector<256x64xf32> to vector<256xf32>
    %202 = vector.shape_cast %201 : vector<256xf32> to vector<256x1xf32>
    %203 = arith.addf %195, %202 : vector<256x1xf32>
    %c1_159 = arith.constant 1 : index
    %c1_160 = arith.constant 1 : index
    %c0_161 = arith.constant 0 : index
    %204 = vector.load %arg14[%c1_159, %c1_160, %c0_161] : memref<18x18x64xf32, #tpu.memory_space<vmem>>, vector<16x16x64xf32>
    %205 = vector.shape_cast %204 : vector<16x16x64xf32> to vector<256x64xf32>
    %c4_162 = arith.constant 4 : index
    %c0_163 = arith.constant 0 : index
    %206 = vector.load %arg10[%c4_162, %c0_163] : memref<9x64xf32, #tpu.memory_space<vmem>>, vector<1x64xf32>
    %207 = vector.broadcast %206 : vector<1x64xf32> to vector<256x64xf32>
    %208 = arith.mulf %205, %207 : vector<256x64xf32>
    %cst_164 = arith.constant dense<0.000000e+00> : vector<256xf32>
    %209 = vector.multi_reduction <add>, %208, %cst_164 [1] : vector<256x64xf32> to vector<256xf32>
    %210 = vector.shape_cast %209 : vector<256xf32> to vector<256x1xf32>
    %211 = arith.addf %203, %210 : vector<256x1xf32>
    %c1_165 = arith.constant 1 : index
    %c2_166 = arith.constant 2 : index
    %c0_167 = arith.constant 0 : index
    %212 = vector.load %arg14[%c1_165, %c2_166, %c0_167] : memref<18x18x64xf32, #tpu.memory_space<vmem>>, vector<16x16x64xf32>
    %213 = vector.shape_cast %212 : vector<16x16x64xf32> to vector<256x64xf32>
    %c5_168 = arith.constant 5 : index
    %c0_169 = arith.constant 0 : index
    %214 = vector.load %arg10[%c5_168, %c0_169] : memref<9x64xf32, #tpu.memory_space<vmem>>, vector<1x64xf32>
    %215 = vector.broadcast %214 : vector<1x64xf32> to vector<256x64xf32>
    %216 = arith.mulf %213, %215 : vector<256x64xf32>
    %cst_170 = arith.constant dense<0.000000e+00> : vector<256xf32>
    %217 = vector.multi_reduction <add>, %216, %cst_170 [1] : vector<256x64xf32> to vector<256xf32>
    %218 = vector.shape_cast %217 : vector<256xf32> to vector<256x1xf32>
    %219 = arith.addf %211, %218 : vector<256x1xf32>
    %c2_171 = arith.constant 2 : index
    %c0_172 = arith.constant 0 : index
    %c0_173 = arith.constant 0 : index
    %220 = vector.load %arg14[%c2_171, %c0_172, %c0_173] : memref<18x18x64xf32, #tpu.memory_space<vmem>>, vector<16x16x64xf32>
    %221 = vector.shape_cast %220 : vector<16x16x64xf32> to vector<256x64xf32>
    %c6_174 = arith.constant 6 : index
    %c0_175 = arith.constant 0 : index
    %222 = vector.load %arg10[%c6_174, %c0_175] : memref<9x64xf32, #tpu.memory_space<vmem>>, vector<1x64xf32>
    %223 = vector.broadcast %222 : vector<1x64xf32> to vector<256x64xf32>
    %224 = arith.mulf %221, %223 : vector<256x64xf32>
    %cst_176 = arith.constant dense<0.000000e+00> : vector<256xf32>
    %225 = vector.multi_reduction <add>, %224, %cst_176 [1] : vector<256x64xf32> to vector<256xf32>
    %226 = vector.shape_cast %225 : vector<256xf32> to vector<256x1xf32>
    %227 = arith.addf %219, %226 : vector<256x1xf32>
    %c2_177 = arith.constant 2 : index
    %c1_178 = arith.constant 1 : index
    %c0_179 = arith.constant 0 : index
    %228 = vector.load %arg14[%c2_177, %c1_178, %c0_179] : memref<18x18x64xf32, #tpu.memory_space<vmem>>, vector<16x16x64xf32>
    %229 = vector.shape_cast %228 : vector<16x16x64xf32> to vector<256x64xf32>
    %c7_180 = arith.constant 7 : index
    %c0_181 = arith.constant 0 : index
    %230 = vector.load %arg10[%c7_180, %c0_181] : memref<9x64xf32, #tpu.memory_space<vmem>>, vector<1x64xf32>
    %231 = vector.broadcast %230 : vector<1x64xf32> to vector<256x64xf32>
    %232 = arith.mulf %229, %231 : vector<256x64xf32>
    %cst_182 = arith.constant dense<0.000000e+00> : vector<256xf32>
    %233 = vector.multi_reduction <add>, %232, %cst_182 [1] : vector<256x64xf32> to vector<256xf32>
    %234 = vector.shape_cast %233 : vector<256xf32> to vector<256x1xf32>
    %235 = arith.addf %227, %234 : vector<256x1xf32>
    %c2_183 = arith.constant 2 : index
    %c2_184 = arith.constant 2 : index
    %c0_185 = arith.constant 0 : index
    %236 = vector.load %arg14[%c2_183, %c2_184, %c0_185] : memref<18x18x64xf32, #tpu.memory_space<vmem>>, vector<16x16x64xf32>
    %237 = vector.shape_cast %236 : vector<16x16x64xf32> to vector<256x64xf32>
    %c8_186 = arith.constant 8 : index
    %c0_187 = arith.constant 0 : index
    %238 = vector.load %arg10[%c8_186, %c0_187] : memref<9x64xf32, #tpu.memory_space<vmem>>, vector<1x64xf32>
    %239 = vector.broadcast %238 : vector<1x64xf32> to vector<256x64xf32>
    %240 = arith.mulf %237, %239 : vector<256x64xf32>
    %cst_188 = arith.constant dense<0.000000e+00> : vector<256xf32>
    %241 = vector.multi_reduction <add>, %240, %cst_188 [1] : vector<256x64xf32> to vector<256xf32>
    %242 = vector.shape_cast %241 : vector<256xf32> to vector<256x1xf32>
    %243 = arith.addf %235, %242 : vector<256x1xf32>
    %c0_189 = arith.constant 0 : index
    %c0_190 = arith.constant 0 : index
    %c0_191 = arith.constant 0 : index
    %244 = vector.load %arg12[%c0_189, %c0_190, %c0_191] : memref<1x256x1xf32, #tpu.memory_space<vmem>>, vector<1x256x1xf32>
    %245 = vector.shape_cast %244 : vector<1x256x1xf32> to vector<256x1xf32>
    %246 = vector.shape_cast %243 : vector<256x1xf32> to vector<1x256x1xf32>
    tpu.vector_store %arg12[%c0_189, %c0_190, %c0_191], %246 {strides = array<i32>} : memref<1x256x1xf32, #tpu.memory_space<vmem>>, vector<1x256x1xf32>,
    return
  }
  func.func @transform_0(%arg0: i32) -> (i32, i32) {
    %c0_i32 = arith.constant 0 : i32
    %c0_i32_0 = arith.constant 0 : i32
    %c0_i32_1 = arith.constant 0 : i32
    return %c0_i32, %c0_i32_0 : i32, i32
  }
  func.func @transform_1(%arg0: i32) -> (i32, i32) {
    %c0_i32 = arith.constant 0 : i32
    %c0_i32_0 = arith.constant 0 : i32
    %c0_i32_1 = arith.constant 0 : i32
    return %c0_i32, %c0_i32_0 : i32, i32
  }
  func.func @transform_2(%arg0: i32) -> (i32, i32) {
    %c0_i32 = arith.constant 0 : i32
    %c0_i32_0 = arith.constant 0 : i32
    %c0_i32_1 = arith.constant 0 : i32
    return %c0_i32, %c0_i32_0 : i32, i32
  }
  func.func @transform_3(%arg0: i32) -> (i32, i32) {
    %c0_i32 = arith.constant 0 : i32
    %c0_i32_0 = arith.constant 0 : i32
    %c0_i32_1 = arith.constant 0 : i32
    return %c0_i32, %c0_i32_0 : i32, i32
  }
  func.func @transform_4(%arg0: i32) -> (i32, i32) {
    %c0_i32 = arith.constant 0 : i32
    %c0_i32_0 = arith.constant 0 : i32
    %c0_i32_1 = arith.constant 0 : i32
    return %c0_i32, %c0_i32_0 : i32, i32
  }
  func.func @transform_5(%arg0: i32) -> (i32, i32) {
    %c0_i32 = arith.constant 0 : i32
    %c0_i32_0 = arith.constant 0 : i32
    %c0_i32_1 = arith.constant 0 : i32
    return %c0_i32, %c0_i32_0 : i32, i32
  }
  func.func @transform_6(%arg0: i32) -> (i32, i32) {
    %c0_i32 = arith.constant 0 : i32
    %c0_i32_0 = arith.constant 0 : i32
    %c0_i32_1 = arith.constant 0 : i32
    return %c0_i32, %c0_i32_0 : i32, i32
  }
  func.func @transform_7(%arg0: i32) -> (i32, i32, i32) {
    %c0_i32 = arith.constant 0 : i32
    %c0_i32_0 = arith.constant 0 : i32
    %c0_i32_1 = arith.constant 0 : i32
    %c0_i32_2 = arith.constant 0 : i32
    return %c0_i32, %c0_i32_0, %c0_i32_1 : i32, i32, i32
  }
  func.func @transform_8(%arg0: i32) -> (i32, i32) {
    %c0_i32 = arith.constant 0 : i32
    %c0_i32_0 = arith.constant 0 : i32
    %c0_i32_1 = arith.constant 0 : i32
    return %c0_i32, %c0_i32_0 : i32, i32
  }
  func.func @transform_9(%arg0: i32) -> (i32, i32) {
    %c0_i32 = arith.constant 0 : i32
    %c0_i32_0 = arith.constant 0 : i32
    %c0_i32_1 = arith.constant 0 : i32
    return %c0_i32, %c0_i32_0 : i32, i32
  }
  func.func @transform_10(%arg0: i32) -> (i32, i32) {
    %c0_i32 = arith.constant 0 : i32
    %c0_i32_0 = arith.constant 0 : i32
    %c0_i32_1 = arith.constant 0 : i32
    return %c0_i32, %c0_i32_0 : i32, i32
  }
  func.func @transform_11(%arg0: i32) -> (i32, i32, i32) {
    %c0_i32 = arith.constant 0 : i32
    %c0_i32_0 = arith.constant 0 : i32
    %c0_i32_1 = arith.constant 0 : i32
    return %arg0, %c0_i32, %c0_i32_0 : i32, i32, i32
  }
}

</mosaic_0001>

<bundles_post_ra>
// kernel: unet_forward.1
= control target key start
LH: loop header
LB: loop body
LE: loop exit
PB: predicated region body
PF: predicated region fallthrough
CT: control target
= control target key end

     0   :  { %s16478_s0 = inlined_call_operand.vmem [shape: f32[2,8], index: 0, kind: input, shape index: {}]   ;;  %s16479_s1 = inlined_call_operand.hbm [shape: bf16[8,256], index: 1, kind: input, shape index: {}]   ;;  %s16480_s2 = inlined_call_operand.hbm [shape: f32[1,256], index: 2, kind: input, shape index: {}]   ;;  %s16481_s3 = inlined_call_operand.hbm [shape: bf16[256,512], index: 3, kind: input, shape index: {}]   ;;  %s16482_s4 = inlined_call_operand.hbm [shape: f32[1,512], index: 4, kind: input, shape index: {}]   ;;  %s16483_s5 = inlined_call_operand.hbm [shape: bf16[512,1024], index: 5, kind: input, shape index: {}]   ;;  %s16484_s6 = inlined_call_operand.hbm [shape: f32[1,1024], index: 6, kind: input, shape index: {}]   ;;  %s16485_s7 = inlined_call_operand.hbm [shape: bf16[9,64,64], index: 7, kind: input, shape index: {}]   ;;  %s16486_s8 = inlined_call_operand.vmem [shape: f32[1,64], index: 8, kind: input, shape index: {}]   ;;  %s16487_s9 = inlined_call_operand.hbm [shape: f32[9,64], index: 9, kind: input, shape index: {}]   ;;  %s16488_s10 = inlined_call_operand.<no memory space> [shape: f32[1,1], index: 10, kind: input, shape index: {}]   ;;  %s16489_s11 = inlined_call_operand.vmem [shape: f32[2,256,1], index: 11, kind: output, shape index: {}]  }
   0x1   :  { %v16_v0 = vstv %s16488_s10 }
   0x2   :  { %17 = vst [vmem:[#allocation4] sm:$0x1] %v16_v0 }
   0x3   :  { %18 = vsyncpa [#allocation6], 0 }
   0x4   :  { %19 = vsyncpa [#allocation8], 0 }
   0x5   :  { %20 = vsyncpa [#allocation11], 0 }
   0x6   :  { %21 = vsyncpa [#allocation14], 0 }
   0x7   :  { %22 = vsyncpa [#allocation17], 0  ;;  %s12585_s19 = smov 0  }
   0x8 LB: > { %s317_s10 = sshll.u32 %s16480_s2, 4  ;;  %s12594_s22 = sadd.s32 4294967295, %s12501_s19   ;;  %s12501_s19 = sphi %s12585_s19, %s28_s19   ;;  %s318_s10 = int_to_ptr.hbm [resolvable:$true] %s317_s10 }
   0x9   : > { %p9780_p0 = scmp.ge.s32.totalorder %s12501_s19, 1  ;;  %p290_p1 = scmp.lt.s32.totalorder %s12501_s19, 3 }
   0xa   : > { %p12082_p2 = scmp.eq.s32.totalorder %s12594_s22, 0  ;;  %s12503_s24 = smov [#allocation7]  }
   0xb   : > { %p12599_p3 = pnand %p9780_p0, %p290_p1  ;;  %s319_s25 = sshll.u32 %s12503_s24, 4  ;;  %s320_s25 = int_to_ptr.vmem [resolvable:$true] %s319_s25 }
   0xc   : > { %s343_s28 = sshll.u32 %s16482_s4, 4  ;;  %s369_s12 = sshll.u32 %s16484_s6, 4  ;;  %s344_s28 = int_to_ptr.hbm [resolvable:$true] %s343_s28  ;;  %s370_s12 = int_to_ptr.hbm [resolvable:$true] %s369_s12 }
   0xd   : > { %p12057_p4 = pneg %p12599_p3  ;;  %s12504_s14 = smov [#allocation10]  }
   0xe   : > { %s345_s15 = sshll.u32 %s12504_s14, 4  ;;  %s12505_s16 = smov [#allocation13]   ;;  %s346_s15 = int_to_ptr.vmem [resolvable:$true] %s345_s15 }
   0xf   : > { %p12613_p5 = pnand %p12082_p2, %p12057_p4  ;;  %s371_s17 = sshll.u32 %s12505_s16, 4  ;;  %s372_s17 = int_to_ptr.vmem [resolvable:$true] %s371_s17 }
  0x10   : > { %s305_s21 = sshll.u32 %s16479_s1, 4  ;;  %s328_s27 = sshll.u32 %s16481_s3, 4  ;;  %s306_s21 = int_to_ptr.hbm [resolvable:$true] %s305_s21  ;;  %s329_s27 = int_to_ptr.hbm [resolvable:$true] %s328_s27 }
  0x11   : > { %12063 = dma.hbm_to_vmem [thread:$0]  (!%p12613_p5), %s318_s10, 32, %s320_s25, [#allocation8]  }
  0x12   : > { %12069 = dma.hbm_to_vmem [thread:$0]  (!%p12613_p5), %s344_s28, 64, %s346_s15, [#allocation11]  }
  0x13   : > { %12075 = dma.hbm_to_vmem [thread:$0]  (!%p12613_p5), %s370_s12, 128, %s372_s17, [#allocation14]  }
  0x14   : > { %s12506_s29 = smov [#allocation5]   ;;  %s12507_s10 = smov [#allocation9]  }
  0x15   : > { %s307_s30 = sshll.u32 %s12506_s29, 4  ;;  %s330_s25 = sshll.u32 %s12507_s10, 4  ;;  %s308_s30 = int_to_ptr.vmem [resolvable:$true] %s307_s30  ;;  %s331_s25 = int_to_ptr.vmem [resolvable:$true] %s330_s25 }
  0x16   : > { %12060 = dma.hbm_to_vmem [thread:$0]  (!%p12613_p5), %s306_s21, 128, %s308_s30, [#allocation6]  }
  0x17   : > { %s12508_s28 = smov 256   ;;  %s12509_s14 = smov 16  }
  0x18   : > { %12066 = dma.hbm_to_vmem [thread:$0]  (!%p12613_p5), %s329_s27, 8192, %s331_s25, [#allocation8], %s12508_s28, %s12508_s28, %s12509_s14  }
  0x19   : > { %s354_s16 = sshll.u32 %s16483_s5, 4  ;;  %s12510_s17 = smov [#allocation12]   ;;  %s355_s16 = int_to_ptr.hbm [resolvable:$true] %s354_s16 }
  0x1a   : > { %s356_s18 = sshll.u32 %s12510_s17, 4  ;;  %s380_s21 = sshll.u32 %s16485_s7, 4  ;;  %s357_s18 = int_to_ptr.vmem [resolvable:$true] %s356_s18  ;;  %s381_s21 = int_to_ptr.hbm [resolvable:$true] %s380_s21 }
  0x1b   : > { %s12511_s26 = smov 512   ;;  %s12512_s29 = smov 32  }
  0x1c   : > { %12072 = dma.hbm_to_vmem [thread:$0]  (!%p12613_p5), %s355_s16, 32768, %s357_s18, [#allocation11], %s12511_s26, %s12511_s26, %s12512_s29  }
  0x1d   : > { %s12513_s27 = smov [#allocation15]   ;;  %s12514_s10 = smov 64  }
  0x1e   : > { %s382_s30 = sshll.u32 %s12513_s27, 4  ;;  %s12515_s25 = smov 4   ;;  %s383_s30 = int_to_ptr.vmem [resolvable:$true] %s382_s30 }
  0x1f   : > { %12078 = dma.hbm_to_vmem [thread:$0]  (!%p12613_p5), %s381_s21, 4608, %s383_s30, [#allocation14], %s12514_s10, %s12514_s10, %s12515_s25  }
  0x20   : > { %s397_s15 = sshll.u32 %s16487_s9, 4  ;;  %s12516_s12 = smov [#allocation16]   ;;  %s398_s15 = int_to_ptr.hbm [resolvable:$true] %s397_s15 }
  0x21   : > { %s399_s17 = sshll.u32 %s12516_s12, 4  ;;  %s12517_s20 = smov 128   ;;  %s400_s17 = int_to_ptr.vmem [resolvable:$true] %s399_s17 }
  0x22   : > { %s12518_s24 = smov 8   ;;  %418 = sbr.rel (%p12599_p3) target bundleno = 2184 (0x888), region = 64 }
  0x23   : > { %12081 = dma.hbm_to_vmem [thread:$0]  (!%p12613_p5), %s398_s15, 256, %s400_s17, [#allocation17], %s12517_s20, %s12517_s20, %s12518_s24  }
  0x27   : > { %12480 = dma.done.wait (%p12082_p2), [#allocation6], 128  }
  0x28   : > { %12482 = vsyncadd (%p12082_p2), [#allocation6], 4294967168 }
  0x29   : > { %12484 = dma.done.wait (%p12082_p2), [#allocation8], 8224  }
  0x2a   : > { %12486 = vsyncadd (%p12082_p2), [#allocation8], 4294959072 }
  0x2b   : > { %12488 = dma.done.wait (%p12082_p2), [#allocation11], 32832  }
  0x2c   : > { %12490 = vsyncadd (%p12082_p2), [#allocation11], 4294934464 }
  0x2d   : > { %12492 = dma.done.wait (%p12082_p2), [#allocation14], 4736  }
  0x2e   : > { %12494 = vsyncadd (%p12082_p2), [#allocation14], 4294962560 }
  0x2f   : > { %12496 = dma.done.wait (%p12082_p2), [#allocation17], 256  }
  0x30   : > { %12498 = vsyncadd (%p12082_p2), [#allocation17], 4294967040  ;;  %s495_s16 = scalar_lea.vmem %s16478_s0, %s12594_s22  ;;  %v498_v1 = vld [vmem:[#allocation5] sm:$0xff]  ;;  %v9916_v2 = vld [vmem:[#allocation9 + $0xe0] sm:$0xf]  ;;  %vm514_vm0 = vcmask 1043456  }
  0x31   : > { %v501_v3 = vunpack.c.l.b16 %v498_v1  ;;  %v502_v4 = vunpack.c.h.b16 %v498_v1  ;;  %v11643_v5 = vld [vmem:[#allocation9 + $0xec] sm:$0xf0]  ;;  %v496_v6 = vld [vmem:[%s495_s16] sm:$0x1]  ;;  %v10044_v10 = vld [vmem:[#allocation9 + $0x1e0] sm:$0xf] }
  0x32   : > { %v9917_v9 = vor.u32 %v11643_v5, %v9916_v2  ;;  %v11675_v11 = vld [vmem:[#allocation9 + $0x1ec] sm:$0xf0]  ;;  %v9900_v12 = vld [vmem:[#allocation9 + $0xc0] sm:$0xf]  ;;  %v497_v18 = vpack.c.bf16 %v496_v6, %v496_v6  ;;  %vm510_vm1 = vcmask 64512   ;;  %vm3039_vm2 = vcmask 519168  }
  0x33   : > { %v503_v7 = vpack.c.b16 %v501_v3, %v501_v3  ;;  %v504_v8 = vpack.c.b16 %v502_v4, %v502_v4  ;;  %v11639_v13 = vld [vmem:[#allocation9 + $0xcc] sm:$0xf0]  ;;  %v10045_v14 = vor.u32 %v11675_v11, %v10044_v10  ;;  %v10028_v15 = vld [vmem:[#allocation9 + $0x1c0] sm:$0xf]  ;;  %v9924_v26 = vld [vmem:[#allocation9 + $0xe8] sm:$0xf] }
  0x34   : > { %v11671_v19 = vld [vmem:[#allocation9 + $0x1cc] sm:$0xf0]  ;;  %v9901_v20 = vor.u32 %v11639_v13, %v9900_v12  ;;  %v9884_v21 = vld [vmem:[#allocation9 + $0xa0] sm:$0xf]  ;;  %v11644_v27 = vld [vmem:[#allocation9 + $0xf4] sm:$0xf0] }
  0x35   : > { %v516_v16 = vsel %vm514_vm0, %v503_v7, 0  ;;  %v519_v17 = vsel %vm514_vm0, %v504_v8, 0  ;;  %v11635_v22 = vld [vmem:[#allocation9 + $0xac] sm:$0xf0]  ;;  %958 = vmatpush.bf16.msra.mxu3 %v10045_v14  ;;  %v10029_v23 = vor.u32 %v11671_v19, %v10028_v15  ;;  %v10012_v24 = vld [vmem:[#allocation9 + $0x1a0] sm:$0xf]  ;;  %v9925_v28 = vor.u32 %v11644_v27, %v9924_v26 }
  0x36   : > { %528 = vmatpush.bf16.msra.mxu0 %v516_v16  ;;  %541 = vmatpush.bf16.msra.mxu1 %v519_v17  ;;  %v11667_v25 = vld [vmem:[#allocation9 + $0x1ac] sm:$0xf0]  ;;  %v11642_v29 = vld [vmem:[#allocation9 + $0xec] sm:$0xf]  ;;  %v9926_v30 = vld [vmem:[#allocation9 + $0xf8] sm:$0xf0]  ;;  %v9885_v34 = vor.u32 %v11635_v22, %v9884_v21 }
  0x37   : > { %v9868_v31 = vld [vmem:[#allocation9 + $0x80] sm:$0xf]  ;;  %v11631_v32 = vld [vmem:[#allocation9 + $0x8c] sm:$0xf0]  ;;  %v9929_v33 = vor.u32 %v11642_v29, %v9926_v30  ;;  %v10013_v35 = vor.u32 %v11667_v25, %v10012_v24  ;;  %v9908_v38 = vld [vmem:[#allocation9 + $0xc8] sm:$0xf]  ;;  %997 = vmatpush.bf16.msra.mxu2 %v9925_v28 }
  0x38   : > { %v9996_v36 = vld [vmem:[#allocation9 + $0x180] sm:$0xf]  ;;  %v11663_v37 = vld [vmem:[#allocation9 + $0x18c] sm:$0xf0]  ;;  %v11640_v39 = vld [vmem:[#allocation9 + $0xd4] sm:$0xf0]  ;;  %v9869_v46 = vor.u32 %v11631_v32, %v9868_v31 }
  0x39   : > { %9800 = vmatmul.msk.bf16.vlgmr.msra.gmra.mxu0 %vm510_vm1, %v497_v18  ;;  %9801 = vmatmul.msk.bf16.vlgmr.msra.gmra.mxu1 %vm510_vm1, %v497_v18  ;;  %v11638_v40 = vld [vmem:[#allocation9 + $0xcc] sm:$0xf]  ;;  %v9910_v41 = vld [vmem:[#allocation9 + $0xd8] sm:$0xf0]  ;;  %v9909_v42 = vor.u32 %v11640_v39, %v9908_v38  ;;  %v9892_v44 = vld [vmem:[#allocation9 + $0xa8] sm:$0xf]  ;;  %v9997_v48 = vor.u32 %v11663_v37, %v9996_v36 }
  0x3a   : > { %945 = vmatpush.bf16.msrb.mxu1 %v9917_v9  ;;  %959 = vmatpush.bf16.msra.mxu3 %v10029_v23  ;;  %v9913_v43 = vor.u32 %v11638_v40, %v9910_v41  ;;  %v11636_v45 = vld [vmem:[#allocation9 + $0xb4] sm:$0xf0]  ;;  %v9852_v47 = vld [vmem:[#allocation9 + $0x60] sm:$0xf]  ;;  %v11634_v49 = vld [vmem:[#allocation9 + $0xac] sm:$0xf] }
  0x3b   : > { %1023 = vmatpush.bf16.msrb.mxu0 %v9929_v33  ;;  %v9894_v50 = vld [vmem:[#allocation9 + $0xb8] sm:$0xf0]  ;;  %v11627_v51 = vld [vmem:[#allocation9 + $0x6c] sm:$0xf0]  ;;  %v9980_v52 = vld [vmem:[#allocation9 + $0x160] sm:$0xf]  ;;  %998 = vmatpush.bf16.msra.mxu2 %v9909_v42  ;;  %v9893_v54 = vor.u32 %v11636_v45, %v9892_v44 }
  0x3c   : > { %v11659_v53 = vld [vmem:[#allocation9 + $0x16c] sm:$0xf0]  ;;  %v9897_v55 = vor.u32 %v11634_v49, %v9894_v50  ;;  %v9876_v56 = vld [vmem:[#allocation9 + $0x88] sm:$0xf]  ;;  %v11632_v57 = vld [vmem:[#allocation9 + $0x94] sm:$0xf0]  ;;  %v9853_v60 = vor.u32 %v11627_v51, %v9852_v47 }
  0x3d   : > { %v11630_v58 = vld [vmem:[#allocation9 + $0x8c] sm:$0xf]  ;;  %v9878_v59 = vld [vmem:[#allocation9 + $0x98] sm:$0xf0]  ;;  %v9836_v61 = vld [vmem:[#allocation9 + $0x40] sm:$0xf]  ;;  %v9981_v63 = vor.u32 %v11659_v53, %v9980_v52  ;;  %v9877_v2 = vor.u32 %v11632_v57, %v9876_v56 }
  0x3e   : > { %946 = vmatpush.bf16.msrb.mxu1 %v9901_v20  ;;  %960 = vmatpush.bf16.msra.mxu3 %v10013_v35  ;;  %v11623_v62 = vld [vmem:[#allocation9 + $0x4c] sm:$0xf0]  ;;  %v9964_v0 = vld [vmem:[#allocation9 + $0x140] sm:$0xf]  ;;  %v9881_v3 = vor.u32 %v11630_v58, %v9878_v59  ;;  %v9860_v4 = vld [vmem:[#allocation9 + $0x68] sm:$0xf] }
  0x3f   : > { %1024 = vmatpush.bf16.msrb.mxu0 %v9913_v43  ;;  %v11655_v1 = vld [vmem:[#allocation9 + $0x14c] sm:$0xf0]  ;;  %999 = vmatpush.bf16.msra.mxu2 %v9893_v54  ;;  %v11628_v5 = vld [vmem:[#allocation9 + $0x74] sm:$0xf0]  ;;  %v11626_v6 = vld [vmem:[#allocation9 + $0x6c] sm:$0xf]  ;;  %v9837_v9 = vor.u32 %v11623_v62, %v9836_v61 }
  0x40   : > { %v9862_v7 = vld [vmem:[#allocation9 + $0x78] sm:$0xf0]  ;;  %v9820_v8 = vld [vmem:[#allocation9 + $0x20] sm:$0xf]  ;;  %v11619_v10 = vld [vmem:[#allocation9 + $0x2c] sm:$0xf0]  ;;  %v9965_v11 = vor.u32 %v11655_v1, %v9964_v0  ;;  %v9861_v14 = vor.u32 %v11628_v5, %v9860_v4 }
  0x41   : > { %v9948_v12 = vld [vmem:[#allocation9 + $0x120] sm:$0xf]  ;;  %v11651_v13 = vld [vmem:[#allocation9 + $0x12c] sm:$0xf0]  ;;  %v9865_v15 = vor.u32 %v11626_v6, %v9862_v7  ;;  %v9844_v16 = vld [vmem:[#allocation9 + $0x48] sm:$0xf]  ;;  %v9821_v24 = vor.u32 %v11619_v10, %v9820_v8 }
  0x42   : > { %947 = vmatpush.bf16.msrb.mxu1 %v9885_v34  ;;  %961 = vmatpush.bf16.msra.mxu3 %v9997_v48  ;;  %v11624_v17 = vld [vmem:[#allocation9 + $0x54] sm:$0xf0]  ;;  %v11622_v18 = vld [vmem:[#allocation9 + $0x4c] sm:$0xf]  ;;  %v9846_v19 = vld [vmem:[#allocation9 + $0x58] sm:$0xf0]  ;;  %v9949_v27 = vor.u32 %v11651_v13, %v9948_v12 }
  0x43   : > { %1025 = vmatpush.bf16.msrb.mxu0 %v9897_v55  ;;  %1000 = vmatpush.bf16.msra.mxu2 %v9877_v2  ;;  %v9804_v20 = vld [vmem:[#allocation9] sm:$0xf]  ;;  %v11615_v21 = vld [vmem:[#allocation9 + $0xc] sm:$0xf0]  ;;  %v11641_v25 = vld [vmem:[#allocation9 + $0xe4] sm:$0xf]  ;;  %v9845_v28 = vor.u32 %v11624_v17, %v9844_v16  ;;  %v9849_v29 = vor.u32 %v11622_v18, %v9846_v19 }
  0x44   : > { %v9932_v22 = vld [vmem:[#allocation9 + $0x100] sm:$0xf]  ;;  %v11647_v23 = vld [vmem:[#allocation9 + $0x10c] sm:$0xf0]  ;;  %v9918_v26 = vld [vmem:[#allocation9 + $0xf0] sm:$0xf0]  ;;  %v9805_v32 = vor.u32 %v11615_v21, %v9804_v20 }
  0x45   : > { %v10052_v30 = vld [vmem:[#allocation9 + $0x1e8] sm:$0xf]  ;;  %v11676_v31 = vld [vmem:[#allocation9 + $0x1f4] sm:$0xf0]  ;;  %v9933_v33 = vor.u32 %v11647_v23, %v9932_v22  ;;  %v9921_v34 = vor.u32 %v11641_v25, %v9918_v26  ;;  %v11637_v35 = vld [vmem:[#allocation9 + $0xc4] sm:$0xf] }
  0x46   : > { %948 = vmatpush.bf16.msrb.mxu1 %v9869_v46  ;;  %962 = vmatpush.bf16.msra.mxu3 %v9981_v63  ;;  %v10053_v36 = vor.u32 %v11676_v31, %v10052_v30  ;;  %v9902_v37 = vld [vmem:[#allocation9 + $0xd0] sm:$0xf0]  ;;  %v10036_v38 = vld [vmem:[#allocation9 + $0x1c8] sm:$0xf]  ;;  %v11672_v39 = vld [vmem:[#allocation9 + $0x1d4] sm:$0xf0] }
  0x47   : > { %1026 = vmatpush.bf16.msrb.mxu0 %v9881_v3  ;;  %1001 = vmatpush.bf16.msra.mxu2 %v9861_v14  ;;  %v9905_v40 = vor.u32 %v11637_v35, %v9902_v37  ;;  %v10037_v41 = vor.u32 %v11672_v39, %v10036_v38  ;;  %v11633_v42 = vld [vmem:[#allocation9 + $0xa4] sm:$0xf]  ;;  %v9886_v43 = vld [vmem:[#allocation9 + $0xb0] sm:$0xf0]  ;;  %v9828_v54 = vld [vmem:[#allocation9 + $0x28] sm:$0xf] }
  0x48   : > { %v9889_v44 = vor.u32 %v11633_v42, %v9886_v43  ;;  %v11629_v45 = vld [vmem:[#allocation9 + $0x84] sm:$0xf]  ;;  %v9870_v46 = vld [vmem:[#allocation9 + $0x90] sm:$0xf0]  ;;  %v11620_v55 = vld [vmem:[#allocation9 + $0x34] sm:$0xf0] }
  0x49   : > { %v9873_v47 = vor.u32 %v11629_v45, %v9870_v46  ;;  %v11625_v48 = vld [vmem:[#allocation9 + $0x64] sm:$0xf]  ;;  %v9854_v49 = vld [vmem:[#allocation9 + $0x70] sm:$0xf0]  ;;  %v10020_v56 = vld [vmem:[#allocation9 + $0x1a8] sm:$0xf]  ;;  %v9829_v57 = vor.u32 %v11620_v55, %v9828_v54 }
  0x4a   : > { %949 = vmatpush.bf16.msrb.mxu1 %v9853_v60  ;;  %963 = vmatpush.bf16.msra.mxu3 %v9965_v11  ;;  %v9857_v50 = vor.u32 %v11625_v48, %v9854_v49  ;;  %v11621_v51 = vld [vmem:[#allocation9 + $0x44] sm:$0xf]  ;;  %v9838_v52 = vld [vmem:[#allocation9 + $0x50] sm:$0xf0]  ;;  %v11668_v58 = vld [vmem:[#allocation9 + $0x1b4] sm:$0xf0] }
  0x4b   : > { %1027 = vmatpush.bf16.msrb.mxu0 %v9865_v15  ;;  %1002 = vmatpush.bf16.msra.mxu2 %v9845_v28  ;;  %v9841_v53 = vor.u32 %v11621_v51, %v9838_v52  ;;  %v11618_v59 = vld [vmem:[#allocation9 + $0x2c] sm:$0xf]  ;;  %v9830_v60 = vld [vmem:[#allocation9 + $0x38] sm:$0xf0]  ;;  %v10021_v61 = vor.u32 %v11668_v58, %v10020_v56  ;;  %v11617_v63 = vld [vmem:[#allocation9 + $0x24] sm:$0xf] }
  0x4c   : > { %v9833_v62 = vor.u32 %v11618_v59, %v9830_v60  ;;  %v9822_v0 = vld [vmem:[#allocation9 + $0x30] sm:$0xf0]  ;;  %v9812_v2 = vld [vmem:[#allocation9 + $0x8] sm:$0xf]  ;;  %v11616_v3 = vld [vmem:[#allocation9 + $0x14] sm:$0xf0] }
  0x4d   : > { %v9825_v1 = vor.u32 %v11617_v63, %v9822_v0  ;;  %v10004_v4 = vld [vmem:[#allocation9 + $0x188] sm:$0xf]  ;;  %v9813_v5 = vor.u32 %v11616_v3, %v9812_v2  ;;  %v11664_v6 = vld [vmem:[#allocation9 + $0x194] sm:$0xf0]  ;;  %v11614_v7 = vld [vmem:[#allocation9 + $0xc] sm:$0xf] }
  0x4e   : > { %950 = vmatpush.bf16.msrb.mxu1 %v9837_v9  ;;  %964 = vmatpush.bf16.msra.mxu3 %v9949_v27  ;;  %v9814_v8 = vld [vmem:[#allocation9 + $0x18] sm:$0xf0]  ;;  %v10005_v9 = vor.u32 %v11664_v6, %v10004_v4  ;;  %v11613_v11 = vld [vmem:[#allocation9 + $0x4] sm:$0xf]  ;;  %v9806_v12 = vld [vmem:[#allocation9 + $0x10] sm:$0xf0] }
  0x4f   : > { %1028 = vmatpush.bf16.msrb.mxu0 %v9849_v29  ;;  %1003 = vmatpush.bf16.msra.mxu2 %v9829_v57  ;;  %v9817_v10 = vor.u32 %v11614_v7, %v9814_v8  ;;  %v9809_v13 = vor.u32 %v11613_v11, %v9806_v12  ;;  %v9988_v14 = vld [vmem:[#allocation9 + $0x168] sm:$0xf]  ;;  %v11660_v15 = vld [vmem:[#allocation9 + $0x174] sm:$0xf0]  ;;  %v499_v26 = vld [vmem:[#allocation7] sm:$0x3] }
  0x50   : > { %v9989_v16 = vor.u32 %v11660_v15, %v9988_v14  ;;  %v9972_v17 = vld [vmem:[#allocation9 + $0x148] sm:$0xf]  ;;  %v11656_v18 = vld [vmem:[#allocation9 + $0x154] sm:$0xf0]  ;;  %v506_v27 = vperm.slane %v499_v26, 0  ;;  %v507_v28 = vperm.slane %v499_v26, 1 }
  0x51   : > { %v9973_v19 = vor.u32 %v11656_v18, %v9972_v17  ;;  %v9956_v20 = vld [vmem:[#allocation9 + $0x128] sm:$0xf]  ;;  %v11652_v21 = vld [vmem:[#allocation9 + $0x134] sm:$0xf0]  ;;  %v11665_v45 = vld [vmem:[#allocation9 + $0x1a4] sm:$0xf] }
  0x52   : > { %951 = vmatpush.bf16.msrb.mxu1 %v9821_v24  ;;  %965 = vmatpush.bf16.msra.mxu3 %v9933_v33  ;;  %v9957_v22 = vor.u32 %v11652_v21, %v9956_v20  ;;  %v9940_v23 = vld [vmem:[#allocation9 + $0x108] sm:$0xf]  ;;  %v11648_v24 = vld [vmem:[#allocation9 + $0x114] sm:$0xf0]  ;;  %v11673_v33 = vld [vmem:[#allocation9 + $0x1e4] sm:$0xf] }
  0x53   : > { %1029 = vmatpush.bf16.msrb.mxu0 %v9833_v62  ;;  %1004 = vmatpush.bf16.msra.mxu2 %v9813_v5  ;;  %v9941_v25 = vor.u32 %v11648_v24, %v9940_v23  ;;  %v10014_v46 = vld [vmem:[#allocation9 + $0x1b0] sm:$0xf0]  ;;  %v11661_v48 = vld [vmem:[#allocation9 + $0x184] sm:$0xf]  ;;  %v11674_v62 = vld [vmem:[#allocation9 + $0x1ec] sm:$0xf] }
  0x54   : > { %v9998_v49 = vld [vmem:[#allocation9 + $0x190] sm:$0xf0]  ;;  %v11657_v51 = vld [vmem:[#allocation9 + $0x164] sm:$0xf]  ;;  %v10054_v63 = vld [vmem:[#allocation9 + $0x1f8] sm:$0xf0] }
  0x55   : > { %v9982_v52 = vld [vmem:[#allocation9 + $0x170] sm:$0xf0]  ;;  %v11653_v54 = vld [vmem:[#allocation9 + $0x144] sm:$0xf]  ;;  %v11670_v2 = vld [vmem:[#allocation9 + $0x1cc] sm:$0xf] }
  0x56   : > { %952 = vmatpush.bf16.msrb.mxu1 %v9805_v32  ;;  %1010 = vmatpush.bf16.msrb.mxu3 %v10053_v36  ;;  %v9966_v55 = vld [vmem:[#allocation9 + $0x150] sm:$0xf0]  ;;  %v11649_v57 = vld [vmem:[#allocation9 + $0x124] sm:$0xf]  ;;  %v10038_v3 = vld [vmem:[#allocation9 + $0x1d8] sm:$0xf0] }
  0x57   : > { %1030 = vmatpush.bf16.msrb.mxu0 %v9817_v10  ;;  %v9969_v56 = vor.u32 %v11653_v54, %v9966_v55  ;;  %v9950_v58 = vld [vmem:[#allocation9 + $0x130] sm:$0xf0]  ;;  %v11645_v60 = vld [vmem:[#allocation9 + $0x104] sm:$0xf]  ;;  %v10041_v7 = vor.u32 %v11670_v2, %v10038_v3  ;;  %v11666_v10 = vld [vmem:[#allocation9 + $0x1ac] sm:$0xf] }
  0x58   : > { %v9953_v59 = vor.u32 %v11649_v57, %v9950_v58  ;;  %v10284_v4 = vld [vmem:[#allocation12 + $0x1c0] sm:$0xf]  ;;  %v10022_v11 = vld [vmem:[#allocation9 + $0x1b8] sm:$0xf0]  ;;  %v11662_v21 = vld [vmem:[#allocation9 + $0x18c] sm:$0xf] }
  0x59   : > { %v11737_v5 = vld [vmem:[#allocation12 + $0x1dc] sm:$0xf0]  ;;  %vm3100_vm3 = vcmask 518144   ;;  %vm3101_vm4 = vsmask.f32 2306  ;;  %s12520_s18 = smov 64  }
  0x5a   : > { %971 = vmatpush.bf16.msra.mxu1 %v9921_v34  ;;  %1011 = vmatpush.bf16.msrb.mxu3 %v10037_v41  ;;  %v10046_v34 = vld [vmem:[#allocation9 + $0x1f0] sm:$0xf0]  ;;  %v10252_v6 = vld [vmem:[#allocation12 + $0x180] sm:$0xf]  ;;  %v10285_v8 = vor.u32 %v11737_v5, %v10284_v4  ;;  %vm12836_vm5 = vmand %vm3100_vm3, %vm3101_vm4  ;;  %vm3042_vm6 = vcmask 516096   ;;  %vm3653_vm7 = vcmask 523264  }
  0x5b   : > { %v10049_v37 = vor.u32 %v11673_v33, %v10046_v34  ;;  %v10030_v41 = vld [vmem:[#allocation9 + $0x1d0] sm:$0xf0]  ;;  %v11865_v14 = vld [vmem:[#allocation12 + $0x5dc] sm:$0xf0]  ;;  %vm3121_vm8 = vcmask 519170   ;;  %vm4572_vm0 = vcmask 1042432  }
  0x5c   : > { %2611 = vmatpush.bf16.msrb.mxu2 %v10285_v8  ;;  %v10220_v15 = vld [vmem:[#allocation12 + $0x140] sm:$0xf]  ;;  %v11646_v8 = vld [vmem:[#allocation9 + $0x10c] sm:$0xf]  ;;  %vm3122_vm9 = vsmask.f32 7946 }
  0x5d   : > { %v10764_v18 = vld [vmem:[#allocation12 + $0x580] sm:$0xf]  ;;  %vm3128_vm10 = vsmask.f32 256  ;;  %vm12936_vm11 = vmand %vm3121_vm8, %vm3122_vm9  ;;  %vm3871_vm13 = vsmask.f32 3328 }
  0x5e   : > { %972 = vmatpush.bf16.msra.mxu1 %v9905_v40  ;;  %1012 = vmatpush.bf16.msrb.mxu3 %v10021_v61  ;;  %v11669_v40 = vld [vmem:[#allocation9 + $0x1c4] sm:$0xf]  ;;  %v9934_v61 = vld [vmem:[#allocation9 + $0x110] sm:$0xf0]  ;;  %vm12943_vm12 = vmand %vm3042_vm6, %vm3128_vm10  ;;  %vm3872_vm14 = vsmask.f32 7440 }
  0x5f   : > { %v10033_v43 = vor.u32 %v11669_v40, %v10030_v41  ;;  %v9937_v0 = vor.u32 %v11645_v60, %v9934_v61  ;;  %v11857_v20 = vld [vmem:[#allocation12 + $0x59c] sm:$0xf0]  ;;  %v11650_v60 = vld [vmem:[#allocation9 + $0x12c] sm:$0xf]  ;;  %v9958_v61 = vld [vmem:[#allocation9 + $0x138] sm:$0xf0] }
  0x60   : > { %v10765_v23 = vor.u32 %v11857_v20, %v10764_v18  ;;  %v10540_v24 = vld [vmem:[#allocation12 + $0x3c0] sm:$0xf]  ;;  %v11733_v18 = vld [vmem:[#allocation12 + $0x1c4] sm:$0xf]  ;;  %vm13092_vm15 = vmor %vm3871_vm13, %vm3872_vm14  ;;  %vm4573_vm1 = vcmask 1046532   ;;  %vm7784_vm3 = vcmask 517120  }
  0x61   : > { %v10732_v26 = vld [vmem:[#allocation12 + $0x540] sm:$0xf]  ;;  %p489_p6 = scmp.lt.s32.totalorder %s12594_s22, 1  ;;  %vm9622_vm4 = vcmask 7168  }
  0x62   : > { %973 = vmatpush.bf16.msra.mxu1 %v9889_v44  ;;  %1013 = vmatpush.bf16.msrb.mxu3 %v10005_v9  ;;  %v11729_v9 = vld [vmem:[#allocation12 + $0x19c] sm:$0xf0] }
  0x63   : > { %v10253_v12 = vor.u32 %v11729_v9, %v10252_v6  ;;  %v10508_v33 = vld [vmem:[#allocation12 + $0x380] sm:$0xf]  ;;  %v9942_v9 = vld [vmem:[#allocation9 + $0x118] sm:$0xf0]  ;;  %s16780_s22 = smov (!%p489_p6, %s12594_s22), 1 }
  0x64   : > { %v11793_v34 = vld [vmem:[#allocation12 + $0x39c] sm:$0xf0]  ;;  %s11612_s25 = sshll.u32 %s16780_s22, 8 }
  0x65   : > { %2612 = vmatpush.bf16.msrb.mxu2 %v10253_v12  ;;  %v10509_v40 = vor.u32 %v11793_v34, %v10508_v33  ;;  %v11833_v54 = vld [vmem:[#allocation12 + $0x4dc] sm:$0xf0]  ;;  %v10190_v33 = vld [vmem:[#allocation12 + $0x120] sm:$0xf0]  ;;  %s15462_s14 = scalar_lea.vmem %s16489_s11, %s11612_s25 }
  0x66   : > { %974 = vmatpush.bf16.msra.mxu1 %v9873_v47  ;;  %1014 = vmatpush.bf16.msrb.mxu3 %v9989_v16  ;;  %v10017_v47 = vor.u32 %v11665_v45, %v10014_v46  ;;  %v11721_v16 = vld [vmem:[#allocation12 + $0x15c] sm:$0xf0] }
  0x67   : > { %v10156_v45 = vld [vmem:[#allocation12 + $0xc0] sm:$0xf] }
  0x68   : > { %v11705_v46 = vld [vmem:[#allocation12 + $0xdc] sm:$0xf0] }
  0x69   : > { %v10444_v55 = vld [vmem:[#allocation12 + $0x300] sm:$0xf] }
  0x6a   : > { %975 = vmatpush.bf16.msra.mxu1 %v9857_v50  ;;  %1015 = vmatpush.bf16.msrb.mxu3 %v9973_v19  ;;  %v10001_v50 = vor.u32 %v11661_v48, %v9998_v49  ;;  %v10025_v19 = vor.u32 %v11666_v10, %v10022_v11  ;;  %v11654_v48 = vld [vmem:[#allocation9 + $0x14c] sm:$0xf]  ;;  %v9974_v49 = vld [vmem:[#allocation9 + $0x158] sm:$0xf0]  ;;  %v10124_v57 = vld [vmem:[#allocation12 + $0x80] sm:$0xf] }
  0x6b   : > { %v11697_v58 = vld [vmem:[#allocation12 + $0x9c] sm:$0xf0] }
  0x6c   : > { %v11825_v2 = vld [vmem:[#allocation12 + $0x49c] sm:$0xf0] }
  0x6d   : > { %v10412_v3 = vld [vmem:[#allocation12 + $0x2c0] sm:$0xf] }
  0x6e   : > { %976 = vmatpush.bf16.msra.mxu1 %v9841_v53  ;;  %1016 = vmatpush.bf16.msrb.mxu3 %v9957_v22  ;;  %v9985_v53 = vor.u32 %v11657_v51, %v9982_v52  ;;  %v10006_v22 = vld [vmem:[#allocation9 + $0x198] sm:$0xf0]  ;;  %v10668_v51 = vld [vmem:[#allocation12 + $0x4c0] sm:$0xf] }
  0x6f   : > { %v11769_v4 = vld [vmem:[#allocation12 + $0x2dc] sm:$0xf0] }
  0x70   : > { %v10092_v5 = vld [vmem:[#allocation12 + $0x40] sm:$0xf]  ;;  %v10413_v11 = vor.u32 %v11769_v4, %v10412_v3  ;;  %v11677_v4 = vld [vmem:[#allocation12 + $0x4] sm:$0xf] }
  0x71   : > { %v11689_v6 = vld [vmem:[#allocation12 + $0x5c] sm:$0xf0] }
  0x72   : > { %977 = vmatpush.bf16.msra.mxu1 %v9825_v1  ;;  %1017 = vmatpush.bf16.msrb.mxu3 %v9941_v25  ;;  %v10057_v1 = vor.u32 %v11674_v62, %v10054_v63  ;;  %v10221_v25 = vor.u32 %v11721_v16, %v10220_v15  ;;  %v10669_v62 = vor.u32 %v11833_v54, %v10668_v51  ;;  %v10636_v63 = vld [vmem:[#allocation12 + $0x480] sm:$0xf]  ;;  %v10094_v54 = vld [vmem:[#allocation12 + $0x60] sm:$0xf0] }
  0x73   : > { %v10637_v10 = vor.u32 %v11825_v2, %v10636_v63  ;;  %v10093_v12 = vor.u32 %v11689_v6, %v10092_v5  ;;  %v10060_v15 = vld [vmem:[#allocation12] sm:$0xf]  ;;  %v10542_v2 = vld [vmem:[#allocation12 + $0x3e0] sm:$0xf0] }
  0x74   : > { %2613 = vmatpush.bf16.msrb.mxu2 %v10221_v25  ;;  %v11681_v16 = vld [vmem:[#allocation12 + $0x1c] sm:$0xf0]  ;;  %v11725_v25 = vld [vmem:[#allocation12 + $0x184] sm:$0xf] }
  0x75   : > { %v10062_v5 = vld [vmem:[#allocation12 + $0x20] sm:$0xf0] }
  0x76   : > { %978 = vmatpush.bf16.msra.mxu1 %v9809_v13  ;;  %v10796_v13 = vld [vmem:[#allocation12 + $0x5c0] sm:$0xf]  ;;  %v11837_v6 = vld [vmem:[#allocation12 + $0x504] sm:$0xf] }
  0x77   : > { %v10797_v17 = vor.u32 %v11865_v14, %v10796_v13  ;;  %v10604_v13 = vld [vmem:[#allocation12 + $0x440] sm:$0xf] }
  0x78   : > { %v11817_v14 = vld [vmem:[#allocation12 + $0x45c] sm:$0xf0] }
  0x79   : > { %2637 = vmatpush.bf16.msra.mxu0 %v10797_v17  ;;  %v9945_v17 = vor.u32 %v11646_v8, %v9942_v9  ;;  %v10605_v20 = vor.u32 %v11817_v14, %v10604_v13  ;;  %v10702_v8 = vld [vmem:[#allocation12 + $0x520] sm:$0xf0]  ;;  %v11020_v9 = vld [vmem:[#allocation12 + $0x780] sm:$0xf] }
  0x7a   : > { %v11789_v13 = vld [vmem:[#allocation12 + $0x384] sm:$0xf] }
  0x7b   : > { %v10510_v14 = vld [vmem:[#allocation12 + $0x3a0] sm:$0xf0] }
  0x7d   : > { %2638 = vmatpush.bf16.msra.mxu0 %v10765_v23  ;;  %v11809_v23 = vld [vmem:[#allocation12 + $0x41c] sm:$0xf0] }
  0xb6   : > { %v530_v29 = vpop.f32.mrf.mxu0  ;;  %v543_v30 = vpop.f32.mrf.mxu1 }
  0xb7   : > { %v531_v31 = vadd.f32 %v530_v29, %v506_v27  ;;  %v544_v32 = vadd.f32 %v543_v30, %v507_v28  ;;  %v11849_v27 = vld [vmem:[#allocation12 + $0x55c] sm:$0xf0] }
  0xb8   : > { %v11801_v28 = vld [vmem:[#allocation12 + $0x3dc] sm:$0xf0] }
  0xb9   : > { %v547_v35 = vmax.f32 %v531_v31, 0.0  ;;  %v548_v36 = vmax.f32 %v544_v32, 0.0  ;;  %v10188_v29 = vld [vmem:[#allocation12 + $0x100] sm:$0xf]  ;;  %v10541_v31 = vor.u32 %v11801_v28, %v10540_v24  ;;  %v10009_v32 = vor.u32 %v11662_v21, %v10006_v22 }
  0xba   : > { %v11713_v30 = vld [vmem:[#allocation12 + $0x11c] sm:$0xf0]  ;;  %v10061_v21 = vor.u32 %v11681_v16, %v10060_v15  ;;  %v10513_v15 = vor.u32 %v11789_v13, %v10510_v14  ;;  %v11829_v16 = vld [vmem:[#allocation12 + $0x4c4] sm:$0xf] }
  0xbb   : > { %v549_v38 = vpack.c.bf16 %v547_v35, %v547_v35  ;;  %v12674_v39 = vpack.c.bf16 %v548_v36, %v548_v36  ;;  %v11658_v35 = vld [vmem:[#allocation9 + $0x16c] sm:$0xf]  ;;  %v9990_v36 = vld [vmem:[#allocation9 + $0x178] sm:$0xf0]  ;;  %v10189_v41 = vor.u32 %v11713_v30, %v10188_v29  ;;  %v10572_v22 = vld [vmem:[#allocation12 + $0x400] sm:$0xf] }
  0xbc   : > { %v11717_v29 = vld [vmem:[#allocation12 + $0x144] sm:$0xf] }
  0xbd   : > { %953 = vmatmul.bf16.vlgmr.msrb.gmra.mxu1 %v549_v38  ;;  %966 = vmatmul.bf16.vlgmr.msra.gmra.mxu3 %v12674_v39  ;;  %v10222_v30 = vld [vmem:[#allocation12 + $0x160] sm:$0xf0] }
  0xbe   : > { %984 = vmatpush.bf16.msrb.mxu1 %v10049_v37  ;;  %1005 = vmatmul.bf16.vlgmr.msra.gmra.mxu2 %v549_v38  ;;  %v532_v42 = vpop.f32.mrf.mxu0  ;;  %v545_v44 = vpop.f32.mrf.mxu1  ;;  %v10733_v37 = vor.u32 %v11849_v27, %v10732_v26  ;;  %v10254_v26 = vld [vmem:[#allocation12 + $0x1a0] sm:$0xf0]  ;;  %v10573_v27 = vor.u32 %v11809_v23, %v10572_v22 }
  0xbf   : > { %1031 = vmatmul.bf16.vlgmr.msrb.gmra.mxu0 %v549_v38  ;;  %2624 = vmatpush.bf16.msra.mxu3 %v10541_v31  ;;  %v11841_v42 = vld [vmem:[#allocation12 + $0x51c] sm:$0xf0]  ;;  %v10257_v28 = vor.u32 %v11725_v25, %v10254_v26  ;;  %v10225_v31 = vor.u32 %v11717_v29, %v10222_v30  ;;  %v11781_v22 = vld [vmem:[#allocation12 + $0x344] sm:$0xf] }
  0xc0   : > { %v11785_v44 = vld [vmem:[#allocation12 + $0x35c] sm:$0xf0]  ;;  %2639 = vmatpush.bf16.msra.mxu0 %v10733_v37  ;;  %2614 = vmatpush.bf16.msrb.mxu2 %v10189_v41  ;;  %v11861_v37 = vld [vmem:[#allocation12 + $0x5c4] sm:$0xf] }
  0xc1   : > { %v10380_v41 = vld [vmem:[#allocation12 + $0x280] sm:$0xf]  ;;  %v10478_v23 = vld [vmem:[#allocation12 + $0x360] sm:$0xf0] }
  0xc2   : > { %985 = vmatpush.bf16.msrb.mxu1 %v10033_v43  ;;  %v10476_v43 = vld [vmem:[#allocation12 + $0x340] sm:$0xf]  ;;  %v11821_v25 = vld [vmem:[#allocation12 + $0x484] sm:$0xf] }
  0xc3   : > { %2625 = vmatpush.bf16.msra.mxu3 %v10509_v40  ;;  %v10477_v52 = vor.u32 %v11785_v44, %v10476_v43  ;;  %v10798_v40 = vld [vmem:[#allocation12 + $0x5e0] sm:$0xf0]  ;;  %v11905_v29 = vld [vmem:[#allocation12 + $0x71c] sm:$0xf0] }
  0xc4   : > { %v11693_v44 = vld [vmem:[#allocation12 + $0x84] sm:$0xf] }
  0xc5   : > { %v10638_v26 = vld [vmem:[#allocation12 + $0x4a0] sm:$0xf0] }
  0xc6   : > { %986 = vmatpush.bf16.msrb.mxu1 %v10017_v47  ;;  %v9993_v47 = vor.u32 %v11658_v35, %v9990_v36  ;;  %v11701_v35 = vld [vmem:[#allocation12 + $0xc4] sm:$0xf] }
  0xc7   : > { %2626 = vmatpush.bf16.msra.mxu3 %v10477_v52  ;;  %v10158_v36 = vld [vmem:[#allocation12 + $0xe0] sm:$0xf0] }
  0xca   : > { %987 = vmatpush.bf16.msrb.mxu1 %v10001_v50 }
  0xcd   : > { %979 = vmatmul.bf16.vlgmr.msra.gmra.mxu1 %v549_v38  ;;  %1018 = vmatmul.bf16.vlgmr.msrb.gmra.mxu3 %v12674_v39  ;;  %v10700_v38 = vld [vmem:[#allocation12 + $0x500] sm:$0xf] }
  0xce   : > { %988 = vmatpush.bf16.msrb.mxu1 %v9985_v53  ;;  %v10701_v50 = vor.u32 %v11841_v42, %v10700_v38  ;;  %v10157_v53 = vor.u32 %v11705_v46, %v10156_v45  ;;  %v10161_v38 = vor.u32 %v11701_v35, %v10158_v36  ;;  %v11761_v42 = vld [vmem:[#allocation12 + $0x29c] sm:$0xf0]  ;;  %v10126_v45 = vld [vmem:[#allocation12 + $0xa0] sm:$0xf0] }
  0xcf   : > { %v10381_v43 = vor.u32 %v11761_v42, %v10380_v41  ;;  %v11853_v46 = vld [vmem:[#allocation12 + $0x584] sm:$0xf] }
  0xd0   : > { %2640 = vmatpush.bf16.msra.mxu0 %v10701_v50  ;;  %2615 = vmatpush.bf16.msrb.mxu2 %v10157_v53  ;;  %v11753_v50 = vld [vmem:[#allocation12 + $0x25c] sm:$0xf0]  ;;  %v11685_v53 = vld [vmem:[#allocation12 + $0x44] sm:$0xf] }
  0xd1   : > { %v10606_v35 = vld [vmem:[#allocation12 + $0x460] sm:$0xf0] }
  0xd2   : > { %989 = vmatpush.bf16.msrb.mxu1 %v9969_v56  ;;  %v11777_v56 = vld [vmem:[#allocation12 + $0x31c] sm:$0xf0]  ;;  %v11765_v41 = vld [vmem:[#allocation12 + $0x2c4] sm:$0xf] }
  0xd3   : > { %v10414_v42 = vld [vmem:[#allocation12 + $0x2e0] sm:$0xf0] }
  0xd4   : > { %2641 = vmatpush.bf16.msra.mxu0 %v10669_v62  ;;  %v11929_v62 = vld [vmem:[#allocation12 + $0x7dc] sm:$0xf0] }
  0xd6   : > { %990 = vmatpush.bf16.msrb.mxu1 %v9953_v59  ;;  %v9977_v59 = vor.u32 %v11654_v48, %v9974_v49  ;;  %v10766_v48 = vld [vmem:[#allocation12 + $0x5a0] sm:$0xf0]  ;;  %v10348_v49 = vld [vmem:[#allocation12 + $0x240] sm:$0xf] }
  0xd7   : > { %v10769_v51 = vor.u32 %v11853_v46, %v10766_v48  ;;  %v10349_v52 = vor.u32 %v11753_v50, %v10348_v49  ;;  %v10892_v46 = vld [vmem:[#allocation12 + $0x680] sm:$0xf]  ;;  %v12680_v49 = vld [vmem:[#allocation10] sm:$0xf]  ;;  %v11757_v50 = vld [vmem:[#allocation12 + $0x284] sm:$0xf] }
  0xd8   : > { %2642 = vmatpush.bf16.msra.mxu0 %v10637_v10  ;;  %v11921_v10 = vld [vmem:[#allocation12 + $0x79c] sm:$0xf0] }
  0xda   : > { %991 = vmatpush.bf16.msrb.mxu1 %v9937_v0  ;;  %v10445_v0 = vor.u32 %v11777_v56, %v10444_v55  ;;  %v10097_v55 = vor.u32 %v11685_v53, %v10094_v54  ;;  %v11845_v56 = vld [vmem:[#allocation12 + $0x544] sm:$0xf]  ;;  %v10860_v54 = vld [vmem:[#allocation12 + $0x640] sm:$0xf] }
  0xdc   : > { %2627 = vmatpush.bf16.msra.mxu3 %v10445_v0  ;;  %2643 = vmatpush.bf16.msra.mxu0 %v10605_v20  ;;  %v11913_v20 = vld [vmem:[#allocation12 + $0x75c] sm:$0xf0] }
  0xdd   : > { %992 = vmatmul.bf16.vlgmr.msrb.gmra.mxu1 %v12674_v39 }
  0xde   : > { %1036 = vmatpush.bf16.msra.mxu1 %v10057_v1  ;;  %v10125_v1 = vor.u32 %v11697_v58, %v10124_v57  ;;  %v10734_v57 = vld [vmem:[#allocation12 + $0x560] sm:$0xf0]  ;;  %v10316_v58 = vld [vmem:[#allocation12 + $0x200] sm:$0xf] }
  0xe0   : > { %2616 = vmatpush.bf16.msrb.mxu2 %v10125_v1  ;;  %2628 = vmatpush.bf16.msra.mxu3 %v10413_v11  ;;  %v11797_v1 = vld [vmem:[#allocation12 + $0x3c4] sm:$0xf]  ;;  %v10705_v11 = vor.u32 %v11837_v6, %v10702_v8  ;;  %v10292_v8 = vld [vmem:[#allocation12 + $0x1c8] sm:$0xf] }
  0xe1   : > { %2644 = vmatpush.bf16.msra.mxu0 %v10573_v27  ;;  %v10545_v3 = vor.u32 %v11797_v1, %v10542_v2  ;;  %v10956_v27 = vld [vmem:[#allocation12 + $0x700] sm:$0xf] }
  0xe2   : > { %1037 = vmatpush.bf16.msra.mxu1 %v10041_v7  ;;  %v9961_v7 = vor.u32 %v11650_v60, %v9958_v61  ;;  %v11745_v60 = vld [vmem:[#allocation12 + $0x21c] sm:$0xf0]  ;;  %v10957_v30 = vor.u32 %v11905_v29, %v10956_v27  ;;  %v10228_v29 = vld [vmem:[#allocation12 + $0x148] sm:$0xf] }
  0xe3   : > { %v11052_v61 = vld [vmem:[#allocation12 + $0x7c0] sm:$0xf]  ;;  %v10317_v63 = vor.u32 %v11745_v60, %v10316_v58  ;;  %v10350_v60 = vld [vmem:[#allocation12 + $0x260] sm:$0xf0] }
  0xe4   : > { %2617 = vmatpush.bf16.msrb.mxu2 %v10093_v12  ;;  %2629 = vmatpush.bf16.msra.mxu3 %v10381_v43  ;;  %v11053_v0 = vor.u32 %v11929_v62, %v11052_v61  ;;  %v11021_v12 = vor.u32 %v11921_v10, %v11020_v9  ;;  %v11805_v43 = vld [vmem:[#allocation12 + $0x404] sm:$0xf]  ;;  %v10828_v62 = vld [vmem:[#allocation12 + $0x600] sm:$0xf]  ;;  %v11738_v9 = vld [vmem:[#allocation12 + $0x1e4] sm:$0xf0] }
  0xe6   : > { %1038 = vmatpush.bf16.msra.mxu1 %v10025_v19  ;;  %v10286_v19 = vld [vmem:[#allocation12 + $0x1e0] sm:$0xf0] }
  0xe7   : > { %v10289_v24 = vor.u32 %v11733_v18, %v10286_v19  ;;  %v10988_v19 = vld [vmem:[#allocation12 + $0x740] sm:$0xf] }
  0xe8   : > { %2618 = vmatpush.bf16.msrb.mxu2 %v10061_v21  ;;  %2630 = vmatpush.bf16.msra.mxu3 %v10349_v52  ;;  %v10989_v21 = vor.u32 %v11913_v20, %v10988_v19  ;;  %v10260_v20 = vld [vmem:[#allocation12 + $0x188] sm:$0xf] }
  0xea   : > { %1039 = vmatpush.bf16.msra.mxu1 %v10009_v32  ;;  %v11709_v32 = vld [vmem:[#allocation12 + $0x104] sm:$0xf] }
  0xeb   : > { %v10193_v34 = vor.u32 %v11709_v32, %v10190_v33  ;;  %v10446_v32 = vld [vmem:[#allocation12 + $0x320] sm:$0xf0] }
  0xec   : > { %2663 = vmatpush.bf16.msra.mxu2 %v10289_v24  ;;  %2631 = vmatpush.bf16.msra.mxu3 %v10317_v63  ;;  %v10481_v24 = vor.u32 %v11781_v22, %v10478_v23  ;;  %v11873_v63 = vld [vmem:[#allocation12 + $0x61c] sm:$0xf0]  ;;  %v11909_v23 = vld [vmem:[#allocation12 + $0x744] sm:$0xf] }
  0xed   : > { %v10829_v1 = vor.u32 %v11873_v63, %v10828_v62  ;;  %v10772_v62 = vld [vmem:[#allocation12 + $0x588] sm:$0xf] }
  0xee   : > { %1040 = vmatpush.bf16.msra.mxu1 %v9993_v47  ;;  %v10129_v47 = vor.u32 %v11693_v44, %v10126_v45  ;;  %v10574_v44 = vld [vmem:[#allocation12 + $0x420] sm:$0xf0]  ;;  %v11858_v63 = vld [vmem:[#allocation12 + $0x5a4] sm:$0xf0] }
  0xef   : > { %v10577_v45 = vor.u32 %v11805_v43, %v10574_v44  ;;  %v10164_v44 = vld [vmem:[#allocation12 + $0xc8] sm:$0xf] }
  0xf0   : > { %2664 = vmatpush.bf16.msra.mxu2 %v10257_v28  ;;  %2676 = vmatpush.bf16.msrb.mxu3 %v10545_v3  ;;  %v10641_v28 = vor.u32 %v11821_v25, %v10638_v26  ;;  %v11741_v3 = vld [vmem:[#allocation12 + $0x204] sm:$0xf] }
  0xf2   : > { %1041 = vmatpush.bf16.msra.mxu1 %v9977_v59  ;;  %v10737_v59 = vor.u32 %v11845_v56, %v10734_v57  ;;  %v937_v56 = vperm.slane %v12680_v49, 0 }
  0xf4   : > { %2665 = vmatpush.bf16.msra.mxu2 %v10225_v31  ;;  %2677 = vmatpush.bf16.msrb.mxu3 %v10513_v15  ;;  %v11773_v31 = vld [vmem:[#allocation12 + $0x304] sm:$0xf] }
  0xf5   : > { %v10449_v33 = vor.u32 %v11773_v31, %v10446_v32  ;;  %v11917_v15 = vld [vmem:[#allocation12 + $0x784] sm:$0xf]  ;;  %v939_v32 = vperm.slane %v12680_v49, 2 }
  0xf6   : > { %1042 = vmatpush.bf16.msra.mxu1 %v9961_v7  ;;  %v10065_v7 = vor.u32 %v11677_v4, %v10062_v5  ;;  %v10318_v4 = vld [vmem:[#allocation12 + $0x220] sm:$0xf0] }
  0xf7   : > { %v11925_v5 = vld [vmem:[#allocation12 + $0x7c4] sm:$0xf]  ;;  %v10321_v10 = vor.u32 %v11741_v3, %v10318_v4  ;;  %v10773_v4 = vor.u32 %v11858_v63, %v10772_v62  ;;  %v10198_v62 = vld [vmem:[#allocation12 + $0x128] sm:$0xf0]  ;;  %v10420_v63 = vld [vmem:[#allocation12 + $0x2c8] sm:$0xf] }
  0xf8   : > { %2666 = vmatpush.bf16.msra.mxu2 %v10193_v34  ;;  %2678 = vmatpush.bf16.msrb.mxu3 %v10481_v24  ;;  %v11813_v34 = vld [vmem:[#allocation12 + $0x444] sm:$0xf] }
  0xf9   : > { %v10609_v36 = vor.u32 %v11813_v34, %v10606_v35  ;;  %v10990_v24 = vld [vmem:[#allocation12 + $0x760] sm:$0xf0] }
  0xfa   : > { %1043 = vmatpush.bf16.msra.mxu1 %v9945_v17  ;;  %v10670_v17 = vld [vmem:[#allocation12 + $0x4e0] sm:$0xf0]  ;;  %v10993_v27 = vor.u32 %v11909_v23, %v10990_v24  ;;  %v10708_v24 = vld [vmem:[#allocation12 + $0x508] sm:$0xf] }
  0xfb   : > { %v10673_v18 = vor.u32 %v11829_v16, %v10670_v17  ;;  %v10293_v17 = vor.u32 %v11738_v9, %v10292_v8  ;;  %v10958_v34 = vld [vmem:[#allocation12 + $0x720] sm:$0xf0]  ;;  %v11690_v8 = vld [vmem:[#allocation12 + $0x64] sm:$0xf0] }
  0xfc   : > { %2667 = vmatpush.bf16.msra.mxu2 %v10161_v38  ;;  %v11897_v38 = vld [vmem:[#allocation12 + $0x6dc] sm:$0xf0]  ;;  %2679 = vmatpush.bf16.msrb.mxu3 %v10449_v33  ;;  %v11901_v33 = vld [vmem:[#allocation12 + $0x704] sm:$0xf]  ;;  %v10740_v9 = vld [vmem:[#allocation12 + $0x548] sm:$0xf] }
  0xfd   : > { %1044 = vmatmul.bf16.vlgmr.msra.gmra.mxu1 %v12674_v39  ;;  %v10801_v39 = vor.u32 %v11861_v37, %v10798_v40  ;;  %v10924_v37 = vld [vmem:[#allocation12 + $0x6c0] sm:$0xf] }
  0xfe   : > { %2650 = vmatpush.bf16.msrb.mxu1 %v11053_v0  ;;  %v10925_v40 = vor.u32 %v11897_v38, %v10924_v37  ;;  %v10196_v37 = vld [vmem:[#allocation12 + $0x108] sm:$0xf] }
  0xff   : > { %2689 = vmatpush.bf16.msrb.mxu0 %v10801_v39  ;;  %v10417_v39 = vor.u32 %v11765_v41, %v10414_v42  ;;  %v11714_v38 = vld [vmem:[#allocation12 + $0x124] sm:$0xf0]  ;;  %v11893_v41 = vld [vmem:[#allocation12 + $0x6c4] sm:$0xf] }
 0x100   : > { %2668 = vmatpush.bf16.msra.mxu2 %v10129_v47  ;;  %v11889_v47 = vld [vmem:[#allocation12 + $0x69c] sm:$0xf0]  ;;  %v10926_v42 = vld [vmem:[#allocation12 + $0x6e0] sm:$0xf0]  ;;  %v10197_v43 = vor.u32 %v11714_v38, %v10196_v37  ;;  %v11834_v37 = vld [vmem:[#allocation12 + $0x4e4] sm:$0xf0] }
 0x101   : > { %2680 = vmatpush.bf16.msrb.mxu3 %v10417_v39  ;;  %v10893_v48 = vor.u32 %v11889_v47, %v10892_v46  ;;  %v11706_v47 = vld [vmem:[#allocation12 + $0xe4] sm:$0xf0] }
 0x102   : > { %2651 = vmatpush.bf16.msrb.mxu1 %v11021_v12 }
 0x103   : > { %2690 = vmatpush.bf16.msrb.mxu0 %v10769_v51  ;;  %v10382_v51 = vld [vmem:[#allocation12 + $0x2a0] sm:$0xf0] }
 0x104   : > { %2669 = vmatpush.bf16.msra.mxu2 %v10097_v55  ;;  %v10385_v52 = vor.u32 %v11757_v50, %v10382_v51  ;;  %v11881_v55 = vld [vmem:[#allocation12 + $0x65c] sm:$0xf0]  ;;  %v11866_v50 = vld [vmem:[#allocation12 + $0x5e4] sm:$0xf0] }
 0x105   : > { %v10861_v57 = vor.u32 %v11881_v55, %v10860_v54  ;;  %v10894_v54 = vld [vmem:[#allocation12 + $0x6a0] sm:$0xf0]  ;;  %v938_v55 = vperm.slane %v12680_v49, 1 }
 0x106   : > { %2652 = vmatpush.bf16.msrb.mxu1 %v10989_v21  ;;  %2681 = vmatpush.bf16.msrb.mxu3 %v10385_v52  ;;  %v11730_v21 = vld [vmem:[#allocation12 + $0x1a4] sm:$0xf0] }
 0x107   : > { %2691 = vmatpush.bf16.msrb.mxu0 %v10737_v59  ;;  %v11749_v59 = vld [vmem:[#allocation12 + $0x244] sm:$0xf]  ;;  %v10261_v26 = vor.u32 %v11730_v21, %v10260_v20  ;;  %v10068_v21 = vld [vmem:[#allocation12 + $0x8] sm:$0xf] }
 0x108   : > { %2670 = vmatpush.bf16.msra.mxu2 %v10065_v7  ;;  %v10353_v61 = vor.u32 %v11749_v59, %v10350_v60  ;;  %v10132_v59 = vld [vmem:[#allocation12 + $0x88] sm:$0xf] }
 0x10a   : > { %2653 = vmatpush.bf16.msrb.mxu1 %v10957_v30  ;;  %2682 = vmatpush.bf16.msrb.mxu3 %v10353_v61  ;;  %v11722_v30 = vld [vmem:[#allocation12 + $0x164] sm:$0xf0] }
 0x10b   : > { %2692 = vmatpush.bf16.msrb.mxu0 %v10705_v11  ;;  %v11054_v11 = vld [vmem:[#allocation12 + $0x7e0] sm:$0xf0]  ;;  %v10229_v35 = vor.u32 %v11722_v30, %v10228_v29  ;;  %v11698_v61 = vld [vmem:[#allocation12 + $0xa4] sm:$0xf0]  ;;  %v10294_v29 = vld [vmem:[#allocation12 + $0x1e8] sm:$0xf0] }
 0x10c   : > { %v11057_v13 = vor.u32 %v11925_v5, %v11054_v11  ;;  %v10133_v3 = vor.u32 %v11698_v61, %v10132_v59  ;;  %v10100_v5 = vld [vmem:[#allocation12 + $0x48] sm:$0xf]  ;;  %v11710_v61 = vld [vmem:[#allocation12 + $0x10c] sm:$0xf] }
 0x10e   : > { %2654 = vmatpush.bf16.msrb.mxu1 %v10925_v40  ;;  %2683 = vmatpush.bf16.msrb.mxu3 %v10321_v10  ;;  %v11850_v10 = vld [vmem:[#allocation12 + $0x564] sm:$0xf0] }
 0x10f   : > { %2693 = vmatpush.bf16.msrb.mxu0 %v10673_v18  ;;  %v11022_v18 = vld [vmem:[#allocation12 + $0x7a0] sm:$0xf0]  ;;  %v10741_v20 = vor.u32 %v11850_v10, %v10740_v9  ;;  %v10806_v9 = vld [vmem:[#allocation12 + $0x5e8] sm:$0xf0]  ;;  %v10388_v10 = vld [vmem:[#allocation12 + $0x288] sm:$0xf] }
 0x110   : > { %v11025_v22 = vor.u32 %v11917_v15, %v11022_v18  ;;  %v11802_v15 = vld [vmem:[#allocation12 + $0x3e4] sm:$0xf0]  ;;  %v10101_v18 = vor.u32 %v11690_v8, %v10100_v5  ;;  %v11702_v5 = vld [vmem:[#allocation12 + $0xcc] sm:$0xf] }
 0x111   : > { %v11862_v8 = vld [vmem:[#allocation12 + $0x5cc] sm:$0xf] }
 0x112   : > { %2655 = vmatpush.bf16.msrb.mxu1 %v10893_v48  ;;  %v10804_v48 = vld [vmem:[#allocation12 + $0x5c8] sm:$0xf] }
 0x113   : > { %2694 = vmatpush.bf16.msrb.mxu0 %v10641_v28 }
 0x116   : > { %2656 = vmatpush.bf16.msrb.mxu1 %v10861_v57  ;;  %v10805_v57 = vor.u32 %v11866_v50, %v10804_v48  ;;  %v11718_v50 = vld [vmem:[#allocation12 + $0x14c] sm:$0xf] }
 0x117   : > { %2695 = vmatpush.bf16.msrb.mxu0 %v10609_v36  ;;  %v10961_v36 = vor.u32 %v11901_v33, %v10958_v34 }
 0x11a   : > { %2657 = vmatpush.bf16.msrb.mxu1 %v10829_v1  ;;  %v11877_v1 = vld [vmem:[#allocation12 + $0x644] sm:$0xf] }
 0x11b   : > { %2696 = vmatpush.bf16.msrb.mxu0 %v10577_v45  ;;  %v10929_v45 = vor.u32 %v11893_v41, %v10926_v42  ;;  %v11726_v41 = vld [vmem:[#allocation12 + $0x18c] sm:$0xf] }
 0x11c   : > { %v10262_v42 = vld [vmem:[#allocation12 + $0x1a8] sm:$0xf0] }
 0x11e   : > { %2702 = vmatpush.bf16.msra.mxu1 %v11057_v13  ;;  %v10548_v13 = vld [vmem:[#allocation12 + $0x3c8] sm:$0xf] }
 0x122   : > { %2703 = vmatpush.bf16.msra.mxu1 %v11025_v22  ;;  %v11682_v22 = vld [vmem:[#allocation12 + $0x24] sm:$0xf0] }
 0x123   : > { %v10069_v33 = vor.u32 %v11682_v22, %v10068_v21  ;;  %v10774_v21 = vld [vmem:[#allocation12 + $0x5a8] sm:$0xf0]  ;;  %v10356_v22 = vld [vmem:[#allocation12 + $0x248] sm:$0xf] }
 0x126   : > { %2704 = vmatpush.bf16.msra.mxu1 %v10993_v27  ;;  %v10549_v27 = vor.u32 %v11802_v15, %v10548_v13  ;;  %v940_v13 = vperm.slane %v12680_v49, 3  ;;  %v10809_v15 = vor.u32 %v11862_v8, %v10806_v9  ;;  %v10486_v8 = vld [vmem:[#allocation12 + $0x368] sm:$0xf0] }
 0x12a   : > { %2705 = vmatpush.bf16.msra.mxu1 %v10961_v36  ;;  %v10676_v36 = vld [vmem:[#allocation12 + $0x4c8] sm:$0xf] }
 0x12e   : > { %2706 = vmatpush.bf16.msra.mxu1 %v10929_v45  ;;  %v10265_v45 = vor.u32 %v11726_v41, %v10262_v42 }
 0x13a   : > { %v954_v53 = vpop.f32.mrf.mxu1 }
 0x13b   : > { %v955_v0 = vadd.f32 %v954_v53, %v937_v56  ;;  %v11885_v53 = vld [vmem:[#allocation12 + $0x684] sm:$0xf]  ;;  %v10165_v56 = vor.u32 %v11706_v47, %v10164_v44  ;;  %v10677_v44 = vor.u32 %v11834_v37, %v10676_v36  ;;  %v11826_v47 = vld [vmem:[#allocation12 + $0x4a4] sm:$0xf0] }
 0x13c   : > { %v12683_v58 = vpop.f32.mrf.mxu0  ;;  %v11930_v37 = vld [vmem:[#allocation12 + $0x7e4] sm:$0xf0] }
 0x13d   : > { %v1033_v49 = vadd.f32 %v12683_v58, %v940_v13  ;;  %v11678_v58 = vld [vmem:[#allocation12 + $0xc] sm:$0xf] }
 0x140   : > { %v967_v2 = vpop.f32.mrf.mxu3 }
 0x141   : > { %v968_v6 = vadd.f32 %v967_v2, %v955_v0  ;;  %v1006_v7 = vpop.f32.mrf.mxu2  ;;  %v10897_v0 = vor.u32 %v11885_v53, %v10894_v54  ;;  %v10862_v2 = vld [vmem:[#allocation12 + $0x660] sm:$0xf0]  ;;  %v11778_v53 = vld [vmem:[#allocation12 + $0x324] sm:$0xf0] }
 0x142   : > { %v956_v12 = vpop.f32.mrf.mxu1  ;;  %v1007_v40 = vadd.f32 %v1006_v7, %v939_v32  ;;  %v10865_v11 = vor.u32 %v11877_v1, %v10862_v2  ;;  %v11794_v32 = vld [vmem:[#allocation12 + $0x3a4] sm:$0xf0]  ;;  %v10201_v2 = vor.u32 %v11710_v61, %v10198_v62  ;;  %v11830_v62 = vld [vmem:[#allocation12 + $0x4cc] sm:$0xf] }
 0x143   : > { %v1049_v14 = vmax.f32 %v968_v6, 0.0  ;;  %2707 = vmatpush.bf16.msra.mxu1 %v10897_v0  ;;  %v11770_v0 = vld [vmem:[#allocation12 + $0x2e4] sm:$0xf0] }
 0x144   : > { %v1034_v16 = vpop.f32.mrf.mxu0 }
 0x145   : > { %v12685_v19 = vpack.c.bf16 %v1049_v14, %v1049_v14  ;;  %v11869_v16 = vld [vmem:[#allocation12 + $0x604] sm:$0xf] }
 0x147   : > { %2619 = vmatmul.bf16.vlgmr.msrb.gmra.mxu2 %v12685_v19  ;;  %2708 = vmatpush.bf16.msra.mxu1 %v10865_v11  ;;  %v11762_v11 = vld [vmem:[#allocation12 + $0x2a4] sm:$0xf0] }
 0x148   : > { %2715 = vmatpush.bf16.msrb.mxu2 %v10293_v17  ;;  %v969_v25 = vpop.f32.mrf.mxu3  ;;  %v10830_v17 = vld [vmem:[#allocation12 + $0x620] sm:$0xf0] }
 0x149   : > { %v1008_v28 = vpop.f32.mrf.mxu2  ;;  %v11842_v25 = vld [vmem:[#allocation12 + $0x524] sm:$0xf0] }
 0x14a   : > { %v980_v31 = vpop.f32.mrf.mxu1  ;;  %v11734_v28 = vld [vmem:[#allocation12 + $0x1cc] sm:$0xf]  ;;  %v10709_v34 = vor.u32 %v11842_v25, %v10708_v24 }
 0x14b   : > { %v981_v7 = vadd.f32 %v980_v31, %v938_v55  ;;  %v10516_v31 = vld [vmem:[#allocation12 + $0x388] sm:$0xf] }
 0x14c   : > { %2716 = vmatpush.bf16.msrb.mxu2 %v10261_v26  ;;  %v10833_v26 = vor.u32 %v11869_v16, %v10830_v17  ;;  %v11694_v16 = vld [vmem:[#allocation12 + $0x8c] sm:$0xf]  ;;  %v10389_v17 = vor.u32 %v11762_v11, %v10388_v10 }
 0x14d   : > { %v11822_v11 = vld [vmem:[#allocation12 + $0x48c] sm:$0xf] }
 0x14e   : > { %2709 = vmatpush.bf16.msra.mxu1 %v10833_v26  ;;  %v11686_v26 = vld [vmem:[#allocation12 + $0x4c] sm:$0xf] }
 0x150   : > { %2717 = vmatpush.bf16.msrb.mxu2 %v10229_v35  ;;  %v1019_v39 = vpop.f32.mrf.mxu3  ;;  %v10297_v35 = vor.u32 %v11734_v28, %v10294_v29  ;;  %v10102_v28 = vld [vmem:[#allocation12 + $0x68] sm:$0xf0] }
 0x151   : > { %v1020_v46 = vadd.f32 %v1019_v39, %v1007_v40  ;;  %v10517_v40 = vor.u32 %v11794_v32, %v10516_v31  ;;  %v10484_v39 = vld [vmem:[#allocation12 + $0x348] sm:$0xf]  ;;  %v11846_v29 = vld [vmem:[#allocation12 + $0x54c] sm:$0xf]  ;;  %v10105_v41 = vor.u32 %v11686_v26, %v10102_v28  ;;  %v10204_v28 = vld [vmem:[#allocation12 + $0x110] sm:$0xf] }
 0x152   : > { %v982_v51 = vpop.f32.mrf.mxu1  ;;  %v10742_v31 = vld [vmem:[#allocation12 + $0x568] sm:$0xf0] }
 0x153   : > { %v1051_v52 = vmax.f32 %v1020_v46, 0.0  ;;  %v10644_v46 = vld [vmem:[#allocation12 + $0x488] sm:$0xf]  ;;  %v10230_v51 = vld [vmem:[#allocation12 + $0x168] sm:$0xf0]  ;;  %v10745_v42 = vor.u32 %v11846_v29, %v10742_v31 }
 0x154   : > { %2718 = vmatpush.bf16.msrb.mxu2 %v10197_v43  ;;  %v11786_v43 = vld [vmem:[#allocation12 + $0x364] sm:$0xf0]  ;;  %v10645_v54 = vor.u32 %v11826_v47, %v10644_v46  ;;  %v10233_v55 = vor.u32 %v11718_v50, %v10230_v51  ;;  %v10710_v46 = vld [vmem:[#allocation12 + $0x528] sm:$0xf0]  ;;  %v10300_v51 = vld [vmem:[#allocation12 + $0x1d0] sm:$0xf] }
 0x155   : > { %v12690_v60 = vpack.c.bf16 %v1051_v52, %v1051_v52  ;;  %v10485_v48 = vor.u32 %v11786_v43, %v10484_v39  ;;  %v10452_v52 = vld [vmem:[#allocation12 + $0x308] sm:$0xf]  ;;  %v10070_v39 = vld [vmem:[#allocation12 + $0x28] sm:$0xf0]  ;;  %v11715_v29 = vld [vmem:[#allocation12 + $0x12c] sm:$0xf0] }
 0x156   : > { %v10453_v59 = vor.u32 %v11778_v53, %v10452_v52  ;;  %v11028_v50 = vld [vmem:[#allocation12 + $0x788] sm:$0xf]  ;;  %v11739_v52 = vld [vmem:[#allocation12 + $0x1ec] sm:$0xf0] }
 0x157   : > { %2645 = vmatmul.bf16.vlgmr.msra.gmra.mxu0 %v12690_v60  ;;  %2671 = vmatmul.bf16.vlgmr.msra.gmra.mxu2 %v12685_v19  ;;  %v10301_v61 = vor.u32 %v11739_v52, %v10300_v51  ;;  %v11898_v31 = vld [vmem:[#allocation12 + $0x6e4] sm:$0xf0]  ;;  %v10140_v52 = vld [vmem:[#allocation12 + $0x90] sm:$0xf] }
 0x158   : > { %2719 = vmatpush.bf16.msrb.mxu2 %v10165_v56  ;;  %2741 = vmatpush.bf16.msra.mxu0 %v10805_v57  ;;  %v1021_v6 = vpop.f32.mrf.mxu3  ;;  %v10612_v56 = vld [vmem:[#allocation12 + $0x448] sm:$0xf] }
 0x159   : > { %v11818_v57 = vld [vmem:[#allocation12 + $0x464] sm:$0xf0]  ;;  %v10421_v6 = vor.u32 %v11770_v0, %v10420_v63  ;;  %v10678_v63 = vld [vmem:[#allocation12 + $0x4e8] sm:$0xf0] }
 0x15a   : > { %v993_v12 = vpop.f32.mrf.mxu1  ;;  %v10613_v1 = vor.u32 %v11818_v57, %v10612_v56  ;;  %v10518_v56 = vld [vmem:[#allocation12 + $0x3a8] sm:$0xf0]  ;;  %v10073_v57 = vor.u32 %v11678_v58, %v10070_v39  ;;  %v10681_v9 = vor.u32 %v11830_v62, %v10678_v63  ;;  %v11707_v58 = vld [vmem:[#allocation12 + $0xec] sm:$0xf0]  ;;  %v10868_v51 = vld [vmem:[#allocation12 + $0x648] sm:$0xf] }
 0x15b   : > { %v994_v14 = vadd.f32 %v993_v12, %v981_v7  ;;  %v10166_v7 = vld [vmem:[#allocation12 + $0xe8] sm:$0xf0]  ;;  %v10812_v39 = vld [vmem:[#allocation12 + $0x5d0] sm:$0xf] }
 0x15c   : > { %2720 = vmatpush.bf16.msrb.mxu2 %v10133_v3  ;;  %2742 = vmatpush.bf16.msra.mxu0 %v10773_v4  ;;  %v10580_v3 = vld [vmem:[#allocation12 + $0x408] sm:$0xf]  ;;  %v11750_v62 = vld [vmem:[#allocation12 + $0x24c] sm:$0xf] }
 0x15d   : > { %v1050_v23 = vmax.f32 %v994_v14, 0.0  ;;  %v11810_v4 = vld [vmem:[#allocation12 + $0x424] sm:$0xf0]  ;;  %v10169_v14 = vor.u32 %v11702_v5, %v10166_v7  ;;  %v11731_v5 = vld [vmem:[#allocation12 + $0x1ac] sm:$0xf0] }
 0x15e   : > { %v10581_v12 = vor.u32 %v11810_v4, %v10580_v3  ;;  %v10996_v3 = vld [vmem:[#allocation12 + $0x748] sm:$0xf]  ;;  %v10268_v4 = vld [vmem:[#allocation12 + $0x190] sm:$0xf]  ;;  %v11782_v7 = vld [vmem:[#allocation12 + $0x34c] sm:$0xf] }
 0x15f   : > { %v12694_v30 = vpack.c.bf16 %v1050_v23, %v1050_v23  ;;  %v11754_v23 = vld [vmem:[#allocation12 + $0x264] sm:$0xf0]  ;;  %v10269_v10 = vor.u32 %v11731_v5, %v10268_v4  ;;  %v10358_v63 = vld [vmem:[#allocation12 + $0x268] sm:$0xf0]  ;;  %v10108_v4 = vld [vmem:[#allocation12 + $0x50] sm:$0xf] }
 0x160   : > { %2721 = vmatpush.bf16.msrb.mxu2 %v10101_v18  ;;  %2743 = vmatpush.bf16.msra.mxu0 %v10741_v20  ;;  %v10134_v18 = vld [vmem:[#allocation12 + $0xa8] sm:$0xf0] }
 0x161   : > { %2632 = vmatmul.bf16.vlgmr.msra.gmra.mxu3 %v12694_v30  ;;  %v11854_v20 = vld [vmem:[#allocation12 + $0x58c] sm:$0xf]  ;;  %v10137_v24 = vor.u32 %v11694_v16, %v10134_v18  ;;  %v10236_v16 = vld [vmem:[#allocation12 + $0x150] sm:$0xf]  ;;  %v11906_v18 = vld [vmem:[#allocation12 + $0x724] sm:$0xf0] }
 0x162   : > { %2728 = vmatpush.bf16.msra.mxu3 %v10549_v27  ;;  %v995_v38 = vpop.f32.mrf.mxu1  ;;  %v10777_v25 = vor.u32 %v11854_v20, %v10774_v21  ;;  %v10357_v27 = vor.u32 %v11754_v23, %v10356_v22  ;;  %v11774_v20 = vld [vmem:[#allocation12 + $0x30c] sm:$0xf] }
 0x163   : > { %v11798_v38 = vld [vmem:[#allocation12 + $0x3cc] sm:$0xf] }
 0x164   : > { %2722 = vmatpush.bf16.msrb.mxu2 %v10069_v33  ;;  %2744 = vmatpush.bf16.msra.mxu0 %v10709_v34  ;;  %v10324_v33 = vld [vmem:[#allocation12 + $0x208] sm:$0xf]  ;;  %v10454_v21 = vld [vmem:[#allocation12 + $0x328] sm:$0xf0] }
 0x165   : > { %v11746_v34 = vld [vmem:[#allocation12 + $0x224] sm:$0xf0] }
 0x166   : > { %2729 = vmatpush.bf16.msra.mxu3 %v10517_v40  ;;  %v10550_v40 = vld [vmem:[#allocation12 + $0x3e8] sm:$0xf0] }
 0x167   : > { %2697 = vmatmul.bf16.vlgmr.msrb.gmra.mxu0 %v12690_v60  ;;  %2723 = vmatmul.bf16.vlgmr.msrb.gmra.mxu2 %v12685_v19 }
 0x168   : > { %2767 = vmatpush.bf16.msra.mxu2 %v10297_v35  ;;  %2745 = vmatpush.bf16.msra.mxu0 %v10677_v44  ;;  %v11060_v35 = vld [vmem:[#allocation12 + $0x7c8] sm:$0xf]  ;;  %v10325_v44 = vor.u32 %v11746_v34, %v10324_v33  ;;  %v10422_v33 = vld [vmem:[#allocation12 + $0x2e8] sm:$0xf0] }
 0x169   : > { %v11061_v47 = vor.u32 %v11930_v37, %v11060_v35  ;;  %v11806_v35 = vld [vmem:[#allocation12 + $0x40c] sm:$0xf] }
 0x16a   : > { %2730 = vmatpush.bf16.msra.mxu3 %v10485_v48  ;;  %v10553_v48 = vor.u32 %v11798_v38, %v10550_v40  ;;  %v10582_v37 = vld [vmem:[#allocation12 + $0x428] sm:$0xf0]  ;;  %v10900_v38 = vld [vmem:[#allocation12 + $0x688] sm:$0xf]  ;;  %v10172_v40 = vld [vmem:[#allocation12 + $0xd0] sm:$0xf] }
 0x16c   : > { %2768 = vmatpush.bf16.msra.mxu2 %v10265_v45  ;;  %2746 = vmatpush.bf16.msra.mxu0 %v10645_v54  ;;  %v11838_v45 = vld [vmem:[#allocation12 + $0x50c] sm:$0xf]  ;;  %v11922_v54 = vld [vmem:[#allocation12 + $0x7a4] sm:$0xf0] }
 0x16e   : > { %2731 = vmatpush.bf16.msra.mxu3 %v10453_v59  ;;  %v10713_v59 = vor.u32 %v11838_v45, %v10710_v46  ;;  %v11758_v45 = vld [vmem:[#allocation12 + $0x28c] sm:$0xf] }
 0x16f   : > { %v10390_v46 = vld [vmem:[#allocation12 + $0x2a8] sm:$0xf0] }
 0x170   : > { %2769 = vmatpush.bf16.msra.mxu2 %v10233_v55  ;;  %2747 = vmatpush.bf16.msra.mxu0 %v10613_v1  ;;  %v11790_v55 = vld [vmem:[#allocation12 + $0x38c] sm:$0xf]  ;;  %v11029_v1 = vor.u32 %v11922_v54, %v11028_v50 }
 0x171   : > { %2684 = vmatmul.bf16.vlgmr.msrb.gmra.mxu3 %v12694_v30 }
 0x172   : > { %2732 = vmatpush.bf16.msra.mxu3 %v10421_v6  ;;  %v11914_v6 = vld [vmem:[#allocation12 + $0x764] sm:$0xf0] }
 0x173   : > { %v10997_v13 = vor.u32 %v11914_v6, %v10996_v3  ;;  %v11874_v3 = vld [vmem:[#allocation12 + $0x624] sm:$0xf0]  ;;  %v10361_v6 = vor.u32 %v11750_v62, %v10358_v63 }
 0x174   : > { %2770 = vmatpush.bf16.msra.mxu2 %v10201_v2  ;;  %2748 = vmatpush.bf16.msra.mxu0 %v10581_v12  ;;  %v10521_v2 = vor.u32 %v11790_v55, %v10518_v56  ;;  %v10646_v12 = vld [vmem:[#allocation12 + $0x4a8] sm:$0xf0]  ;;  %v10393_v55 = vor.u32 %v11758_v45, %v10390_v46  ;;  %v11699_v56 = vld [vmem:[#allocation12 + $0xac] sm:$0xf0] }
 0x175   : > { %v10649_v22 = vor.u32 %v11822_v11, %v10646_v12  ;;  %v10326_v11 = vld [vmem:[#allocation12 + $0x228] sm:$0xf0] }
 0x176   : > { %2733 = vmatpush.bf16.msra.mxu3 %v10389_v17  ;;  %v11723_v17 = vld [vmem:[#allocation12 + $0x16c] sm:$0xf0]  ;;  %v11926_v12 = vld [vmem:[#allocation12 + $0x7cc] sm:$0xf] }
 0x177   : > { %2749 = vmatmul.bf16.vlgmr.msra.gmra.mxu0 %v12690_v60  ;;  %v10237_v23 = vor.u32 %v11723_v17, %v10236_v16 }
 0x178   : > { %2771 = vmatpush.bf16.msra.mxu2 %v10169_v14  ;;  %2793 = vmatpush.bf16.msrb.mxu0 %v10809_v15  ;;  %v10489_v14 = vor.u32 %v11782_v7, %v10486_v8  ;;  %v10964_v15 = vld [vmem:[#allocation12 + $0x708] sm:$0xf]  ;;  %v11691_v7 = vld [vmem:[#allocation12 + $0x6c] sm:$0xf0] }
 0x179   : > { %v10965_v26 = vor.u32 %v11906_v18, %v10964_v15  ;;  %v10748_v8 = vld [vmem:[#allocation12 + $0x550] sm:$0xf]  ;;  %v10109_v16 = vor.u32 %v11691_v7, %v10108_v4  ;;  %v10934_v4 = vld [vmem:[#allocation12 + $0x6e8] sm:$0xf0] }
 0x17a   : > { %v1045_v32 = vpop.f32.mrf.mxu1  ;;  %2734 = vmatpush.bf16.msra.mxu3 %v10357_v27  ;;  %v10932_v27 = vld [vmem:[#allocation12 + $0x6c8] sm:$0xf]  ;;  %v11803_v15 = vld [vmem:[#allocation12 + $0x3ec] sm:$0xf0] }
 0x17b   : > { %v1046_v36 = vadd.f32 %v1045_v32, %v1033_v49  ;;  %v10457_v49 = vor.u32 %v11774_v20, %v10454_v21  ;;  %v11766_v32 = vld [vmem:[#allocation12 + $0x2cc] sm:$0xf]  ;;  %v10076_v21 = vld [vmem:[#allocation12 + $0x10] sm:$0xf] }
 0x17c   : > { %2772 = vmatpush.bf16.msra.mxu2 %v10137_v24  ;;  %2794 = vmatpush.bf16.msrb.mxu0 %v10777_v25  ;;  %v11814_v24 = vld [vmem:[#allocation12 + $0x44c] sm:$0xf]  ;;  %v10428_v7 = vld [vmem:[#allocation12 + $0x2d0] sm:$0xf] }
 0x17d   : > { %v1052_v43 = vmax.f32 %v1046_v36, 0.0  ;;  %v10614_v25 = vld [vmem:[#allocation12 + $0x468] sm:$0xf0]  ;;  %v10205_v36 = vor.u32 %v11715_v29, %v10204_v28  ;;  %v11735_v28 = vld [vmem:[#allocation12 + $0x1d4] sm:$0xf] }
 0x17e   : > { %2735 = vmatpush.bf16.msra.mxu3 %v10325_v44  ;;  %v10617_v34 = vor.u32 %v11814_v24, %v10614_v25  ;;  %v11890_v44 = vld [vmem:[#allocation12 + $0x6a4] sm:$0xf0]  ;;  %v10716_v25 = vld [vmem:[#allocation12 + $0x510] sm:$0xf]  ;;  %v10302_v29 = vld [vmem:[#allocation12 + $0x1f0] sm:$0xf0] }
 0x17f   : > { %v12703_v53 = vpack.c.bf16 %v1052_v43, %v1052_v43  ;;  %v11867_v43 = vld [vmem:[#allocation12 + $0x5ec] sm:$0xf0]  ;;  %v10901_v54 = vor.u32 %v11890_v44, %v10900_v38 }
 0x180   : > { %2773 = vmatpush.bf16.msra.mxu2 %v10105_v41  ;;  %2795 = vmatpush.bf16.msrb.mxu0 %v10745_v42  ;;  %v10933_v41 = vor.u32 %v11898_v31, %v10932_v27  ;;  %v10425_v42 = vor.u32 %v11766_v32, %v10422_v33  ;;  %v10813_v50 = vor.u32 %v11867_v43, %v10812_v39  ;;  %v11030_v27 = vld [vmem:[#allocation12 + $0x7a8] sm:$0xf0]  ;;  %v10524_v31 = vld [vmem:[#allocation12 + $0x390] sm:$0xf]  ;;  %v10270_v39 = vld [vmem:[#allocation12 + $0x1b0] sm:$0xf0] }
 0x181   : > { %2658 = vmatmul.bf16.vlgmr.msrb.gmra.mxu1 %v12703_v53  ;;  %2736 = vmatmul.bf16.vlgmr.msra.gmra.mxu3 %v12694_v30  ;;  %v11795_v32 = vld [vmem:[#allocation12 + $0x3ac] sm:$0xf0] }
 0x182   : > { %2754 = vmatpush.bf16.msrb.mxu1 %v11061_v47  ;;  %v1047_v0 = vpop.f32.mrf.mxu1  ;;  %2780 = vmatpush.bf16.msrb.mxu3 %v10553_v48  ;;  %v10585_v47 = vor.u32 %v11806_v35, %v10582_v37  ;;  %v10173_v48 = vor.u32 %v11707_v58, %v10172_v40  ;;  %v10684_v37 = vld [vmem:[#allocation12 + $0x4d0] sm:$0xf]  ;;  %v11910_v40 = vld [vmem:[#allocation12 + $0x74c] sm:$0xf]  ;;  %v11727_v58 = vld [vmem:[#allocation12 + $0x194] sm:$0xf] }
 0x183   : > { %v10141_v0 = vor.u32 %v11699_v56, %v10140_v52  ;;  %v11835_v38 = vld [vmem:[#allocation12 + $0x4ec] sm:$0xf0]  ;;  %v10238_v56 = vld [vmem:[#allocation12 + $0x170] sm:$0xf0] }
 0x184   : > { %2774 = vmatpush.bf16.msra.mxu2 %v10073_v57  ;;  %2796 = vmatpush.bf16.msrb.mxu0 %v10713_v59  ;;  %v10780_v57 = vld [vmem:[#allocation12 + $0x590] sm:$0xf]  ;;  %v10685_v45 = vor.u32 %v11835_v38, %v10684_v37 }
 0x185   : > { %v11859_v59 = vld [vmem:[#allocation12 + $0x5ac] sm:$0xf0] }
 0x186   : > { %2755 = vmatpush.bf16.msrb.mxu1 %v11029_v1  ;;  %2781 = vmatpush.bf16.msrb.mxu3 %v10521_v2  ;;  %v10781_v1 = vor.u32 %v11859_v59, %v10780_v57  ;;  %v10836_v2 = vld [vmem:[#allocation12 + $0x608] sm:$0xf]  ;;  %v10492_v43 = vld [vmem:[#allocation12 + $0x350] sm:$0xf] }
 0x187   : > { %2775 = vmatmul.bf16.vlgmr.msra.gmra.mxu2 %v12685_v19  ;;  %v10837_v18 = vor.u32 %v11874_v3, %v10836_v2  ;;  %v11787_v44 = vld [vmem:[#allocation12 + $0x36c] sm:$0xf0]  ;;  %v11894_v2 = vld [vmem:[#allocation12 + $0x6cc] sm:$0xf] }
 0x188   : > { %2819 = vmatpush.bf16.msrb.mxu2 %v10301_v61  ;;  %2797 = vmatpush.bf16.msrb.mxu0 %v10681_v9  ;;  %v11882_v61 = vld [vmem:[#allocation12 + $0x664] sm:$0xf0]  ;;  %v11851_v9 = vld [vmem:[#allocation12 + $0x56c] sm:$0xf0]  ;;  %v10493_v52 = vor.u32 %v11787_v44, %v10492_v43  ;;  %v10110_v43 = vld [vmem:[#allocation12 + $0x70] sm:$0xf0] }
 0x189   : > { %v10869_v5 = vor.u32 %v11882_v61, %v10868_v51  ;;  %v10749_v17 = vor.u32 %v11851_v9, %v10748_v8  ;;  %v11902_v51 = vld [vmem:[#allocation12 + $0x70c] sm:$0xf]  ;;  %v10460_v57 = vld [vmem:[#allocation12 + $0x310] sm:$0xf]  ;;  %v11847_v44 = vld [vmem:[#allocation12 + $0x554] sm:$0xf] }
 0x18a   : > { %2756 = vmatpush.bf16.msrb.mxu1 %v10997_v13  ;;  %2782 = vmatpush.bf16.msrb.mxu3 %v10489_v14  ;;  %v11062_v13 = vld [vmem:[#allocation12 + $0x7e8] sm:$0xf0]  ;;  %v10556_v14 = vld [vmem:[#allocation12 + $0x3d0] sm:$0xf] }
 0x18b   : > { %v10557_v24 = vor.u32 %v11803_v15, %v10556_v14  ;;  %v11779_v59 = vld [vmem:[#allocation12 + $0x32c] sm:$0xf0]  ;;  %v11886_v14 = vld [vmem:[#allocation12 + $0x68c] sm:$0xf] }
 0x18c   : > { %2820 = vmatpush.bf16.msrb.mxu2 %v10269_v10  ;;  %2798 = vmatpush.bf16.msrb.mxu0 %v10649_v22  ;;  %v11742_v10 = vld [vmem:[#allocation12 + $0x20c] sm:$0xf]  ;;  %v11683_v22 = vld [vmem:[#allocation12 + $0x2c] sm:$0xf0]  ;;  %v10461_v3 = vor.u32 %v11779_v59, %v10460_v57 }
 0x18d   : > { %v10329_v20 = vor.u32 %v11742_v10, %v10326_v11  ;;  %v10077_v33 = vor.u32 %v11683_v22, %v10076_v21  ;;  %v11771_v8 = vld [vmem:[#allocation12 + $0x2ec] sm:$0xf0]  ;;  %v10937_v11 = vor.u32 %v11894_v2, %v10934_v4  ;;  %v10902_v15 = vld [vmem:[#allocation12 + $0x6a8] sm:$0xf0]  ;;  %v10814_v21 = vld [vmem:[#allocation12 + $0x5f0] sm:$0xf0] }
 0x18e   : > { %2757 = vmatpush.bf16.msrb.mxu1 %v10965_v26  ;;  %2783 = vmatpush.bf16.msrb.mxu3 %v10457_v49  ;;  %v11843_v26 = vld [vmem:[#allocation12 + $0x52c] sm:$0xf0]  ;;  %v11918_v49 = vld [vmem:[#allocation12 + $0x78c] sm:$0xf]  ;;  %v11740_v4 = vld [vmem:[#allocation12 + $0x1f4] sm:$0xf0] }
 0x18f   : > { %v11033_v35 = vor.u32 %v11918_v49, %v11030_v27  ;;  %v10588_v10 = vld [vmem:[#allocation12 + $0x410] sm:$0xf]  ;;  %v11878_v49 = vld [vmem:[#allocation12 + $0x64c] sm:$0xf] }
 0x190   : > { %2821 = vmatpush.bf16.msrb.mxu2 %v10237_v23  ;;  %2799 = vmatpush.bf16.msrb.mxu0 %v10617_v34  ;;  %v11065_v23 = vor.u32 %v11926_v12, %v11062_v13  ;;  %v10717_v34 = vor.u32 %v11843_v26, %v10716_v25  ;;  %v11811_v13 = vld [vmem:[#allocation12 + $0x42c] sm:$0xf0]  ;;  %v10905_v25 = vor.u32 %v11886_v14, %v10902_v15  ;;  %v10870_v27 = vld [vmem:[#allocation12 + $0x668] sm:$0xf0] }
 0x191   : > { %2710 = vmatmul.bf16.vlgmr.msra.gmra.mxu1 %v12703_v53  ;;  %v10396_v22 = vld [vmem:[#allocation12 + $0x290] sm:$0xf]  ;;  %v10873_v37 = vor.u32 %v11878_v49, %v10870_v27 }
 0x192   : > { %2758 = vmatpush.bf16.msrb.mxu1 %v10933_v41  ;;  %2784 = vmatpush.bf16.msrb.mxu3 %v10425_v42  ;;  %v10525_v41 = vor.u32 %v11795_v32, %v10524_v31  ;;  %v10998_v42 = vld [vmem:[#allocation12 + $0x768] sm:$0xf0]  ;;  %v11695_v31 = vld [vmem:[#allocation12 + $0x94] sm:$0xf]  ;;  %v11036_v2 = vld [vmem:[#allocation12 + $0x790] sm:$0xf] }
 0x193   : > { %v11001_v46 = vor.u32 %v11910_v40, %v10998_v42  ;;  %v10142_v32 = vld [vmem:[#allocation12 + $0xb0] sm:$0xf0]  ;;  %v11870_v40 = vld [vmem:[#allocation12 + $0x60c] sm:$0xf]  ;;  %v11004_v15 = vld [vmem:[#allocation12 + $0x750] sm:$0xf] }
 0x194   : > { %2822 = vmatpush.bf16.msrb.mxu2 %v10205_v36  ;;  %2800 = vmatpush.bf16.msrb.mxu0 %v10585_v47  ;;  %v10305_v36 = vor.u32 %v11735_v28, %v10302_v29  ;;  %v10273_v47 = vor.u32 %v11727_v58, %v10270_v39  ;;  %v10145_v38 = vor.u32 %v11695_v31, %v10142_v32  ;;  %v11687_v42 = vld [vmem:[#allocation12 + $0x54] sm:$0xf]  ;;  %v10972_v27 = vld [vmem:[#allocation12 + $0x710] sm:$0xf] }
 0x195   : > { %v11907_v31 = vld [vmem:[#allocation12 + $0x72c] sm:$0xf0]  ;;  %v11775_v32 = vld [vmem:[#allocation12 + $0x314] sm:$0xf] }
 0x196   : > { %2759 = vmatpush.bf16.msrb.mxu1 %v10901_v54  ;;  %2785 = vmatpush.bf16.msrb.mxu3 %v10393_v55  ;;  %v10966_v54 = vld [vmem:[#allocation12 + $0x728] sm:$0xf0]  ;;  %v11719_v55 = vld [vmem:[#allocation12 + $0x154] sm:$0xf] }
 0x197   : > { %2801 = vmatmul.bf16.vlgmr.msrb.gmra.mxu0 %v12690_v60  ;;  %v10969_v62 = vor.u32 %v11902_v51, %v10966_v54  ;;  %v10241_v63 = vor.u32 %v11719_v55, %v10238_v56  ;;  %v11799_v51 = vld [vmem:[#allocation12 + $0x3d4] sm:$0xf]  ;;  %v10113_v55 = vor.u32 %v11687_v42, %v10110_v43  ;;  %v10212_v42 = vld [vmem:[#allocation12 + $0x118] sm:$0xf] }
 0x198   : > { %2823 = vmatpush.bf16.msrb.mxu2 %v10173_v48  ;;  %2845 = vmatpush.bf16.msra.mxu0 %v10813_v50  ;;  %v10652_v48 = vld [vmem:[#allocation12 + $0x490] sm:$0xf]  ;;  %v11679_v56 = vld [vmem:[#allocation12 + $0x14] sm:$0xf] }
 0x199   : > { %v11827_v50 = vld [vmem:[#allocation12 + $0x4ac] sm:$0xf0]  ;;  %v11767_v43 = vld [vmem:[#allocation12 + $0x2d4] sm:$0xf] }
 0x19a   : > { %2760 = vmatpush.bf16.msrb.mxu1 %v10869_v5  ;;  %2786 = vmatpush.bf16.msrb.mxu3 %v10361_v6  ;;  %v10653_v61 = vor.u32 %v11827_v50, %v10652_v48  ;;  %v11711_v5 = vld [vmem:[#allocation12 + $0x114] sm:$0xf]  ;;  %v11068_v48 = vld [vmem:[#allocation12 + $0x7d0] sm:$0xf] }
 0x19b   : > { %v10206_v6 = vld [vmem:[#allocation12 + $0x130] sm:$0xf0]  ;;  %v11931_v50 = vld [vmem:[#allocation12 + $0x7ec] sm:$0xf0] }
 0x19c   : > { %2824 = vmatpush.bf16.msrb.mxu2 %v10141_v0  ;;  %2846 = vmatpush.bf16.msra.mxu0 %v10781_v1  ;;  %v10620_v0 = vld [vmem:[#allocation12 + $0x450] sm:$0xf]  ;;  %v10209_v12 = vor.u32 %v11711_v5, %v10206_v6  ;;  %v11791_v6 = vld [vmem:[#allocation12 + $0x394] sm:$0xf] }
 0x19d   : > { %v11819_v1 = vld [vmem:[#allocation12 + $0x46c] sm:$0xf0] }
 0x19e   : > { %2761 = vmatpush.bf16.msrb.mxu1 %v10837_v18  ;;  %2787 = vmatpush.bf16.msrb.mxu3 %v10329_v20  ;;  %v10621_v9 = vor.u32 %v11819_v1, %v10620_v0  ;;  %v10174_v18 = vld [vmem:[#allocation12 + $0xf0] sm:$0xf0]  ;;  %v11069_v0 = vor.u32 %v11931_v50, %v11068_v48  ;;  %v11923_v5 = vld [vmem:[#allocation12 + $0x7ac] sm:$0xf0] }
 0x19f   : > { %v11863_v20 = vld [vmem:[#allocation12 + $0x5d4] sm:$0xf] }
 0x1a0   : > { %2825 = vmatpush.bf16.msrb.mxu2 %v10109_v16  ;;  %2847 = vmatpush.bf16.msra.mxu0 %v10749_v17  ;;  %v10429_v16 = vor.u32 %v11771_v8, %v10428_v7  ;;  %v11703_v17 = vld [vmem:[#allocation12 + $0xd4] sm:$0xf]  ;;  %v10817_v28 = vor.u32 %v11863_v20, %v10814_v21 }
 0x1a1   : > { %2762 = vmatmul.bf16.vlgmr.msrb.gmra.mxu1 %v12703_v53  ;;  %2788 = vmatmul.bf16.vlgmr.msrb.gmra.mxu3 %v12694_v30  ;;  %v10177_v26 = vor.u32 %v11703_v17, %v10174_v18  ;;  %v10526_v7 = vld [vmem:[#allocation12 + $0x3b0] sm:$0xf0]  ;;  %v11732_v17 = vld [vmem:[#allocation12 + $0x1b4] sm:$0xf0]  ;;  %v11915_v18 = vld [vmem:[#allocation12 + $0x76c] sm:$0xf0] }
 0x1a2   : > { %2806 = vmatpush.bf16.msra.mxu1 %v11065_v23  ;;  %2832 = vmatpush.bf16.msra.mxu3 %v10557_v24  ;;  %v11763_v23 = vld [vmem:[#allocation12 + $0x2ac] sm:$0xf0]  ;;  %v10589_v24 = vor.u32 %v11811_v13, %v10588_v10  ;;  %v11037_v13 = vor.u32 %v11923_v5, %v11036_v2  ;;  %v10529_v14 = vor.u32 %v11791_v6, %v10526_v7  ;;  %v11783_v20 = vld [vmem:[#allocation12 + $0x354] sm:$0xf]  ;;  %v10148_v5 = vld [vmem:[#allocation12 + $0x98] sm:$0xf] }
 0x1a3   : > { %v10397_v29 = vor.u32 %v11763_v23, %v10396_v22  ;;  %v10494_v21 = vld [vmem:[#allocation12 + $0x370] sm:$0xf0]  ;;  %v11700_v6 = vld [vmem:[#allocation12 + $0xb4] sm:$0xf0] }
 0x1a4   : > { %2826 = vmatpush.bf16.msrb.mxu2 %v10077_v33  ;;  %2848 = vmatpush.bf16.msra.mxu0 %v10717_v34  ;;  %v11855_v33 = vld [vmem:[#allocation12 + $0x594] sm:$0xf]  ;;  %v10497_v49 = vor.u32 %v11783_v20, %v10494_v21  ;;  %v11692_v20 = vld [vmem:[#allocation12 + $0x74] sm:$0xf0] }
 0x1a5   : > { %v10782_v34 = vld [vmem:[#allocation12 + $0x5b0] sm:$0xf0] }
 0x1a6   : > { %2807 = vmatpush.bf16.msra.mxu1 %v11033_v35  ;;  %2833 = vmatpush.bf16.msra.mxu3 %v10525_v41  ;;  %v10364_v35 = vld [vmem:[#allocation12 + $0x250] sm:$0xf]  ;;  %v10838_v41 = vld [vmem:[#allocation12 + $0x628] sm:$0xf0]  ;;  %v10785_v58 = vor.u32 %v11855_v33, %v10782_v34  ;;  %v10462_v33 = vld [vmem:[#allocation12 + $0x330] sm:$0xf0] }
 0x1a7   : > { %2827 = vmatmul.bf16.vlgmr.msrb.gmra.mxu2 %v12685_v19  ;;  %v10841_v54 = vor.u32 %v11870_v40, %v10838_v41  ;;  %v10465_v40 = vor.u32 %v11775_v32, %v10462_v33  ;;  %v10940_v41 = vld [vmem:[#allocation12 + $0x6d0] sm:$0xf]  ;;  %v10590_v48 = vld [vmem:[#allocation12 + $0x430] sm:$0xf0] }
 0x1a8   : > { %2871 = vmatpush.bf16.msra.mxu2 %v10305_v36  ;;  %2849 = vmatpush.bf16.msra.mxu0 %v10685_v45  ;;  %v11755_v36 = vld [vmem:[#allocation12 + $0x26c] sm:$0xf0]  ;;  %v10750_v45 = vld [vmem:[#allocation12 + $0x570] sm:$0xf0] }
 0x1a9   : > { %v10365_v39 = vor.u32 %v11755_v36, %v10364_v35  ;;  %v10753_v57 = vor.u32 %v11847_v44, %v10750_v45  ;;  %v11815_v36 = vld [vmem:[#allocation12 + $0x454] sm:$0xf] }
 0x1aa   : > { %2808 = vmatpush.bf16.msra.mxu1 %v11001_v46  ;;  %2834 = vmatpush.bf16.msra.mxu3 %v10493_v52  ;;  %v10332_v46 = vld [vmem:[#allocation12 + $0x210] sm:$0xf]  ;;  %v10558_v52 = vld [vmem:[#allocation12 + $0x3f0] sm:$0xf0] }
 0x1ab   : > { %v10561_v1 = vor.u32 %v11799_v51, %v10558_v52  ;;  %v10430_v44 = vld [vmem:[#allocation12 + $0x2f0] sm:$0xf0]  ;;  %v10908_v52 = vld [vmem:[#allocation12 + $0x690] sm:$0xf] }
 0x1ac   : > { %2872 = vmatpush.bf16.msra.mxu2 %v10273_v47  ;;  %2850 = vmatpush.bf16.msra.mxu0 %v10653_v61  ;;  %v11747_v47 = vld [vmem:[#allocation12 + $0x22c] sm:$0xf0]  ;;  %v10078_v61 = vld [vmem:[#allocation12 + $0x30] sm:$0xf0]  ;;  %v10433_v51 = vor.u32 %v11767_v43, %v10430_v44  ;;  %v11736_v43 = vld [vmem:[#allocation12 + $0x1dc] sm:$0xf] }
 0x1ad   : > { %v10333_v59 = vor.u32 %v11747_v47, %v10332_v46  ;;  %v10081_v8 = vor.u32 %v11679_v56, %v10078_v61  ;;  %v11807_v47 = vld [vmem:[#allocation12 + $0x414] sm:$0xf]  ;;  %v11891_v56 = vld [vmem:[#allocation12 + $0x6ac] sm:$0xf0]  ;;  %v10310_v44 = vld [vmem:[#allocation12 + $0x1f8] sm:$0xf0] }
 0x1ae   : > { %2809 = vmatpush.bf16.msra.mxu1 %v10969_v62  ;;  %2835 = vmatpush.bf16.msra.mxu3 %v10461_v3  ;;  %v11839_v62 = vld [vmem:[#allocation12 + $0x514] sm:$0xf]  ;;  %v10308_v3 = vld [vmem:[#allocation12 + $0x1d8] sm:$0xf]  ;;  %v10909_v2 = vor.u32 %v11891_v56, %v10908_v52 }
 0x1af   : > { %v10309_v10 = vor.u32 %v11740_v4, %v10308_v3  ;;  %v11759_v61 = vld [vmem:[#allocation12 + $0x294] sm:$0xf]  ;;  %v10876_v4 = vld [vmem:[#allocation12 + $0x650] sm:$0xf]  ;;  %v10692_v52 = vld [vmem:[#allocation12 + $0x4d8] sm:$0xf] }
 0x1b0   : > { %2873 = vmatpush.bf16.msra.mxu2 %v10241_v63  ;;  %2851 = vmatpush.bf16.msra.mxu0 %v10621_v9  ;;  %v10718_v63 = vld [vmem:[#allocation12 + $0x530] sm:$0xf0] }
 0x1b1   : > { %v10721_v9 = vor.u32 %v11839_v62, %v10718_v63  ;;  %v10398_v62 = vld [vmem:[#allocation12 + $0x2b0] sm:$0xf0]  ;;  %v10593_v63 = vor.u32 %v11807_v47, %v10590_v48  ;;  %v11796_v47 = vld [vmem:[#allocation12 + $0x3b4] sm:$0xf0] }
 0x1b2   : > { %2810 = vmatpush.bf16.msra.mxu1 %v10937_v11  ;;  %2836 = vmatpush.bf16.msra.mxu3 %v10429_v16  ;;  %v11831_v11 = vld [vmem:[#allocation12 + $0x4d4] sm:$0xf]  ;;  %v10276_v16 = vld [vmem:[#allocation12 + $0x198] sm:$0xf]  ;;  %v10401_v7 = vor.u32 %v11759_v61, %v10398_v62  ;;  %v10278_v61 = vld [vmem:[#allocation12 + $0x1b8] sm:$0xf0] }
 0x1b3   : > { %v10277_v23 = vor.u32 %v11732_v17, %v10276_v16  ;;  %v11875_v17 = vld [vmem:[#allocation12 + $0x62c] sm:$0xf0]  ;;  %v10500_v62 = vld [vmem:[#allocation12 + $0x358] sm:$0xf] }
 0x1b4   : > { %2874 = vmatpush.bf16.msra.mxu2 %v10209_v12  ;;  %2852 = vmatpush.bf16.msra.mxu0 %v10589_v24  ;;  %v10686_v12 = vld [vmem:[#allocation12 + $0x4f0] sm:$0xf0] }
 0x1b5   : > { %v10689_v22 = vor.u32 %v11831_v11, %v10686_v12  ;;  %v11823_v24 = vld [vmem:[#allocation12 + $0x494] sm:$0xf] }
 0x1b6   : > { %2811 = vmatpush.bf16.msra.mxu1 %v10905_v25  ;;  %2837 = vmatpush.bf16.msra.mxu3 %v10397_v29  ;;  %v10654_v25 = vld [vmem:[#allocation12 + $0x4b0] sm:$0xf0]  ;;  %v11724_v29 = vld [vmem:[#allocation12 + $0x174] sm:$0xf0] }
 0x1b7   : > { %2853 = vmatmul.bf16.vlgmr.msra.gmra.mxu0 %v12690_v60  ;;  %v10657_v34 = vor.u32 %v11823_v24, %v10654_v25  ;;  %v11751_v11 = vld [vmem:[#allocation12 + $0x254] sm:$0xf] }
 0x1b8   : > { %2875 = vmatpush.bf16.msra.mxu2 %v10177_v26  ;;  %2897 = vmatpush.bf16.msrb.mxu0 %v10817_v28  ;;  %v11005_v26 = vor.u32 %v11915_v18, %v11004_v15  ;;  %v10244_v28 = vld [vmem:[#allocation12 + $0x158] sm:$0xf]  ;;  %v10366_v12 = vld [vmem:[#allocation12 + $0x270] sm:$0xf0] }
 0x1b9   : > { %v10245_v35 = vor.u32 %v11724_v29, %v10244_v28  ;;  %v10116_v18 = vld [vmem:[#allocation12 + $0x58] sm:$0xf]  ;;  %v10369_v21 = vor.u32 %v11751_v11, %v10366_v12  ;;  %v11743_v24 = vld [vmem:[#allocation12 + $0x214] sm:$0xf]  ;;  %v11720_v11 = vld [vmem:[#allocation12 + $0x15c] sm:$0xf] }
 0x1ba   : > { %2812 = vmatpush.bf16.msra.mxu1 %v10873_v37  ;;  %2838 = vmatpush.bf16.msra.mxu3 %v10365_v39  ;;  %v10622_v37 = vld [vmem:[#allocation12 + $0x470] sm:$0xf0]  ;;  %v11899_v39 = vld [vmem:[#allocation12 + $0x6ec] sm:$0xf0]  ;;  %v10564_v28 = vld [vmem:[#allocation12 + $0x3d8] sm:$0xf] }
 0x1bb   : > { %v10625_v45 = vor.u32 %v11815_v36, %v10622_v37  ;;  %v10941_v50 = vor.u32 %v11899_v39, %v10940_v41  ;;  %v10334_v25 = vld [vmem:[#allocation12 + $0x230] sm:$0xf0]  ;;  %v11804_v29 = vld [vmem:[#allocation12 + $0x3f4] sm:$0xf0]  ;;  %v10246_v12 = vld [vmem:[#allocation12 + $0x178] sm:$0xf0] }
 0x1bc   : > { %2876 = vmatpush.bf16.msra.mxu2 %v10145_v38  ;;  %2898 = vmatpush.bf16.msrb.mxu0 %v10785_v58  ;;  %v10973_v38 = vor.u32 %v11907_v31, %v10972_v27  ;;  %v11716_v58 = vld [vmem:[#allocation12 + $0x134] sm:$0xf0]  ;;  %v10117_v27 = vor.u32 %v11692_v20, %v10116_v18  ;;  %v10337_v36 = vor.u32 %v11743_v24, %v10334_v25  ;;  %v11919_v41 = vld [vmem:[#allocation12 + $0x794] sm:$0xf]  ;;  %v11712_v24 = vld [vmem:[#allocation12 + $0x11c] sm:$0xf] }
 0x1bd   : > { %v10213_v46 = vor.u32 %v11716_v58, %v10212_v42  ;;  %v10565_v58 = vor.u32 %v11804_v29, %v10564_v28  ;;  %v11038_v39 = vld [vmem:[#allocation12 + $0x7b0] sm:$0xf0]  ;;  %v10628_v18 = vld [vmem:[#allocation12 + $0x458] sm:$0xf]  ;;  %v10214_v25 = vld [vmem:[#allocation12 + $0x138] sm:$0xf0] }
 0x1be   : > { %2813 = vmatpush.bf16.msra.mxu1 %v10841_v54  ;;  %2839 = vmatpush.bf16.msra.mxu3 %v10333_v59  ;;  %v10180_v54 = vld [vmem:[#allocation12 + $0xd8] sm:$0xf] }
 0x1bf   : > { %v11868_v59 = vld [vmem:[#allocation12 + $0x5f4] sm:$0xf0] }
 0x1c0   : > { %2877 = vmatpush.bf16.msra.mxu2 %v10113_v55  ;;  %2899 = vmatpush.bf16.msrb.mxu0 %v10753_v57  ;;  %v11708_v55 = vld [vmem:[#allocation12 + $0xf4] sm:$0xf0] }
 0x1c1   : > { %2814 = vmatmul.bf16.vlgmr.msra.gmra.mxu1 %v12703_v53  ;;  %2840 = vmatmul.bf16.vlgmr.msra.gmra.mxu3 %v12694_v30  ;;  %v10820_v57 = vld [vmem:[#allocation12 + $0x5d8] sm:$0xf] }
 0x1c2   : > { %2858 = vmatpush.bf16.msrb.mxu1 %v11069_v0  ;;  %2884 = vmatpush.bf16.msrb.mxu3 %v10561_v1  ;;  %v10181_v0 = vor.u32 %v11708_v55, %v10180_v54  ;;  %v10821_v3 = vor.u32 %v11868_v59, %v10820_v57  ;;  %v11836_v54 = vld [vmem:[#allocation12 + $0x4f4] sm:$0xf0]  ;;  %v11911_v55 = vld [vmem:[#allocation12 + $0x754] sm:$0xf]  ;;  %v11728_v59 = vld [vmem:[#allocation12 + $0x19c] sm:$0xf] }
 0x1c3   : > { %v11006_v57 = vld [vmem:[#allocation12 + $0x770] sm:$0xf0]  ;;  %v11820_v20 = vld [vmem:[#allocation12 + $0x474] sm:$0xf0] }
 0x1c4   : > { %2878 = vmatpush.bf16.msra.mxu2 %v10081_v8  ;;  %2900 = vmatpush.bf16.msrb.mxu0 %v10721_v9  ;;  %v11883_v8 = vld [vmem:[#allocation12 + $0x66c] sm:$0xf0]  ;;  %v10788_v9 = vld [vmem:[#allocation12 + $0x598] sm:$0xf]  ;;  %v10629_v28 = vor.u32 %v11820_v20, %v10628_v18  ;;  %v10566_v18 = vld [vmem:[#allocation12 + $0x3f8] sm:$0xf0] }
 0x1c5   : > { %v10877_v15 = vor.u32 %v11883_v8, %v10876_v4  ;;  %v10281_v4 = vor.u32 %v11728_v59, %v10278_v61  ;;  %v10596_v29 = vld [vmem:[#allocation12 + $0x418] sm:$0xf] }
 0x1c6   : > { %2859 = vmatpush.bf16.msrb.mxu1 %v11037_v13  ;;  %2885 = vmatpush.bf16.msrb.mxu3 %v10529_v14  ;;  %v10149_v13 = vor.u32 %v11700_v6, %v10148_v5  ;;  %v10844_v14 = vld [vmem:[#allocation12 + $0x610] sm:$0xf]  ;;  %v10660_v5 = vld [vmem:[#allocation12 + $0x498] sm:$0xf] }
 0x1c7   : > { %2879 = vmatmul.bf16.vlgmr.msra.gmra.mxu2 %v12685_v19  ;;  %v10845_v32 = vor.u32 %v11875_v17, %v10844_v14  ;;  %v11828_v6 = vld [vmem:[#allocation12 + $0x4b4] sm:$0xf0]  ;;  %v10249_v17 = vor.u32 %v11720_v11, %v10246_v12  ;;  %v11848_v11 = vld [vmem:[#allocation12 + $0x55c] sm:$0xf] }
 0x1c8   : > { %2923 = vmatpush.bf16.msrb.mxu2 %v10309_v10  ;;  %2901 = vmatpush.bf16.msrb.mxu0 %v10689_v22  ;;  %v11860_v10 = vld [vmem:[#allocation12 + $0x5b4] sm:$0xf0]  ;;  %v10758_v12 = vld [vmem:[#allocation12 + $0x578] sm:$0xf0] }
 0x1c9   : > { %v10789_v16 = vor.u32 %v11860_v10, %v10788_v9  ;;  %v10756_v22 = vld [vmem:[#allocation12 + $0x558] sm:$0xf]  ;;  %v10974_v10 = vld [vmem:[#allocation12 + $0x730] sm:$0xf0] }
 0x1ca   : > { %2860 = vmatpush.bf16.msrb.mxu1 %v11005_v26  ;;  %2886 = vmatpush.bf16.msrb.mxu3 %v10497_v49  ;;  %v12717_v1 = vpop.f32.mrf.mxu2  ;;  %v11927_v26 = vld [vmem:[#allocation12 + $0x7d4] sm:$0xf]  ;;  %v11780_v14 = vld [vmem:[#allocation12 + $0x334] sm:$0xf0] }
 0x1cb   : > { %v11070_v49 = vld [vmem:[#allocation12 + $0x7f0] sm:$0xf0]  ;;  %v10372_v59 = vld [vmem:[#allocation12 + $0x258] sm:$0xf] }
 0x1cc   : > { %2924 = vmatpush.bf16.msrb.mxu2 %v10277_v23  ;;  %2902 = vmatpush.bf16.msrb.mxu0 %v10657_v34  ;;  %v11852_v23 = vld [vmem:[#allocation12 + $0x574] sm:$0xf0]  ;;  %v11073_v37 = vor.u32 %v11927_v26, %v11070_v49 }
 0x1cd   : > { %v10757_v33 = vor.u32 %v11852_v23, %v10756_v22  ;;  %v10084_v34 = vld [vmem:[#allocation12 + $0x18] sm:$0xf]  ;;  %v10942_v23 = vld [vmem:[#allocation12 + $0x6f0] sm:$0xf0] }
 0x1ce   : > { %2861 = vmatpush.bf16.msrb.mxu1 %v10973_v38  ;;  %2887 = vmatpush.bf16.msrb.mxu3 %v10465_v40  ;;  %v10724_v38 = vld [vmem:[#allocation12 + $0x518] sm:$0xf] }
 0x1cf   : > { %v11844_v40 = vld [vmem:[#allocation12 + $0x534] sm:$0xf0] }
 0x1d0   : > { %2925 = vmatpush.bf16.msrb.mxu2 %v10245_v35  ;;  %2903 = vmatpush.bf16.msrb.mxu0 %v10625_v45  ;;  %v11684_v35 = vld [vmem:[#allocation12 + $0x34] sm:$0xf0]  ;;  %v10725_v48 = vor.u32 %v11844_v40, %v10724_v38  ;;  %v11704_v40 = vld [vmem:[#allocation12 + $0xdc] sm:$0xf] }
 0x1d1   : > { %v10085_v45 = vor.u32 %v11684_v35, %v10084_v34  ;;  %v10436_v26 = vld [vmem:[#allocation12 + $0x2d8] sm:$0xf]  ;;  %v11887_v34 = vld [vmem:[#allocation12 + $0x694] sm:$0xf] }
 0x1d2   : > { %2862 = vmatpush.bf16.msrb.mxu1 %v10941_v50  ;;  %2888 = vmatpush.bf16.msrb.mxu3 %v10433_v51  ;;  %v2622_v31 = vpop.f32.mrf.mxu2  ;;  %v11041_v50 = vor.u32 %v11919_v41, %v11038_v39  ;;  %v10313_v51 = vor.u32 %v11736_v43, %v10310_v44  ;;  %v11772_v49 = vld [vmem:[#allocation12 + $0x2f4] sm:$0xf0]  ;;  %v10910_v35 = vld [vmem:[#allocation12 + $0x6b0] sm:$0xf0]  ;;  %v10182_v41 = vld [vmem:[#allocation12 + $0xf8] sm:$0xf0] }
 0x1d3   : > { %v10437_v38 = vor.u32 %v11772_v49, %v10436_v26  ;;  %v10822_v39 = vld [vmem:[#allocation12 + $0x5f8] sm:$0xf0]  ;;  %v10404_v43 = vld [vmem:[#allocation12 + $0x298] sm:$0xf] }
 0x1d4   : > { %2926 = vmatpush.bf16.msrb.mxu2 %v10213_v46  ;;  %2904 = vmatpush.bf16.msrb.mxu0 %v10593_v63  ;;  %v12720_v42 = vpop.f32.mrf.mxu0  ;;  %v10532_v46 = vld [vmem:[#allocation12 + $0x398] sm:$0xf]  ;;  %v11840_v26 = vld [vmem:[#allocation12 + $0x51c] sm:$0xf] }
 0x1d5   : > { %v10533_v56 = vor.u32 %v11796_v47, %v10532_v46  ;;  %v11788_v63 = vld [vmem:[#allocation12 + $0x374] sm:$0xf0]  ;;  %v10913_v46 = vor.u32 %v11887_v34, %v10910_v35  ;;  %v10185_v47 = vor.u32 %v11704_v40, %v10182_v41  ;;  %v10726_v49 = vld [vmem:[#allocation12 + $0x538] sm:$0xf0] }
 0x1d6   : > { %2863 = vmatpush.bf16.msrb.mxu1 %v10909_v2  ;;  %2889 = vmatpush.bf16.msrb.mxu3 %v10401_v7  ;;  %v10693_v2 = vor.u32 %v11836_v54, %v10692_v52  ;;  %v11903_v7 = vld [vmem:[#allocation12 + $0x714] sm:$0xf]  ;;  %v10501_v9 = vor.u32 %v11788_v63, %v10500_v62  ;;  %v11764_v44 = vld [vmem:[#allocation12 + $0x2b4] sm:$0xf0]  ;;  %v11696_v54 = vld [vmem:[#allocation12 + $0x9c] sm:$0xf] }
 0x1d7   : > { %2905 = vmatmul.bf16.vlgmr.msrb.gmra.mxu0 %v12690_v60  ;;  %v10405_v52 = vor.u32 %v11764_v44, %v10404_v43  ;;  %v11756_v61 = vld [vmem:[#allocation12 + $0x274] sm:$0xf0]  ;;  %v11792_v34 = vld [vmem:[#allocation12 + $0x39c] sm:$0xf] }
 0x1d8   : > { %2927 = vmatpush.bf16.msrb.mxu2 %v10181_v0  ;;  %2949 = vmatpush.bf16.msra.mxu0 %v10821_v3  ;;  %v11009_v3 = vor.u32 %v11911_v55, %v11006_v57  ;;  %v10150_v55 = vld [vmem:[#allocation12 + $0xb8] sm:$0xf0] }
 0x1d9   : > { %v10790_v57 = vld [vmem:[#allocation12 + $0x5b8] sm:$0xf0] }
 0x1da   : > { %2864 = vmatpush.bf16.msrb.mxu1 %v10877_v15  ;;  %2890 = vmatpush.bf16.msrb.mxu3 %v10369_v21  ;;  %v12724_v0 = vpop.f32.mrf.mxu2  ;;  %v10661_v15 = vor.u32 %v11828_v6, %v10660_v5  ;;  %v11895_v21 = vld [vmem:[#allocation12 + $0x6d4] sm:$0xf]  ;;  %v11688_v5 = vld [vmem:[#allocation12 + $0x5c] sm:$0xf] }
 0x1db   : > { %v10945_v31 = vor.u32 %v11895_v21, %v10942_v23  ;;  %v10086_v23 = vld [vmem:[#allocation12 + $0x38] sm:$0xf0] }
 0x1dc   : > { %2928 = vmatpush.bf16.msrb.mxu2 %v10149_v13  ;;  %2950 = vmatpush.bf16.msra.mxu0 %v10789_v16  ;;  %v2648_v8 = vpop.f32.mrf.mxu0  ;;  %v10468_v13 = vld [vmem:[#allocation12 + $0x318] sm:$0xf]  ;;  %v10977_v16 = vor.u32 %v11903_v7, %v10974_v10  ;;  %v10118_v10 = vld [vmem:[#allocation12 + $0x78] sm:$0xf0] }
 0x1dd   : > { %v10469_v22 = vor.u32 %v11780_v14, %v10468_v13  ;;  %v10340_v13 = vld [vmem:[#allocation12 + $0x218] sm:$0xf]  ;;  %v10121_v21 = vor.u32 %v11688_v5, %v10118_v10  ;;  %v10534_v35 = vld [vmem:[#allocation12 + $0x3b8] sm:$0xf0] }
 0x1de   : > { %2865 = vmatpush.bf16.msrb.mxu1 %v10845_v32  ;;  %2891 = vmatpush.bf16.msrb.mxu3 %v10337_v36  ;;  %v10217_v32 = vor.u32 %v11712_v24, %v10214_v25  ;;  %v11748_v14 = vld [vmem:[#allocation12 + $0x234] sm:$0xf0]  ;;  %v10761_v24 = vor.u32 %v11848_v11, %v10758_v12  ;;  %v10694_v43 = vld [vmem:[#allocation12 + $0x4f8] sm:$0xf0] }
 0x1df   : > { %v10341_v25 = vor.u32 %v11748_v14, %v10340_v13  ;;  %v10948_v11 = vld [vmem:[#allocation12 + $0x6d8] sm:$0xf]  ;;  %v11768_v13 = vld [vmem:[#allocation12 + $0x2dc] sm:$0xf] }
 0x1e0   : > { %2929 = vmatpush.bf16.msrb.mxu2 %v10117_v27  ;;  %2951 = vmatpush.bf16.msra.mxu0 %v10757_v33  ;;  %v11812_v33 = vld [vmem:[#allocation12 + $0x434] sm:$0xf0]  ;;  %v10438_v14 = vld [vmem:[#allocation12 + $0x2f8] sm:$0xf0] }
 0x1e1   : > { %2866 = vmatmul.bf16.vlgmr.msrb.gmra.mxu1 %v12703_v53  ;;  %2892 = vmatmul.bf16.vlgmr.msrb.gmra.mxu3 %v12694_v30  ;;  %v11900_v12 = vld [vmem:[#allocation12 + $0x6f4] sm:$0xf0] }
 0x1e2   : > { %2910 = vmatpush.bf16.msra.mxu1 %v11073_v37  ;;  %2936 = vmatpush.bf16.msra.mxu3 %v10565_v58  ;;  %v2674_v27 = vpop.f32.mrf.mxu2  ;;  %v11864_v58 = vld [vmem:[#allocation12 + $0x5dc] sm:$0xf] }
 0x1e4   : > { %2930 = vmatpush.bf16.msrb.mxu2 %v10085_v45  ;;  %2952 = vmatpush.bf16.msra.mxu0 %v10725_v48  ;;  %v12727_v36 = vpop.f32.mrf.mxu3  ;;  %v12729_v37 = vpop.f32.mrf.mxu0  ;;  %v10597_v45 = vor.u32 %v11812_v33, %v10596_v29  ;;  %v11879_v48 = vld [vmem:[#allocation12 + $0x654] sm:$0xf]  ;;  %v11044_v29 = vld [vmem:[#allocation12 + $0x798] sm:$0xf] }
 0x1e6   : > { %2911 = vmatpush.bf16.msra.mxu1 %v11041_v50  ;;  %2937 = vmatpush.bf16.msra.mxu3 %v10533_v56  ;;  %v10878_v50 = vld [vmem:[#allocation12 + $0x670] sm:$0xf0]  ;;  %v11856_v56 = vld [vmem:[#allocation12 + $0x59c] sm:$0xf] }
 0x1e7   : > { %2931 = vmatmul.bf16.vlgmr.msrb.gmra.mxu2 %v12685_v19  ;;  %v10881_v63 = vor.u32 %v11879_v48, %v10878_v50  ;;  %v10793_v8 = vor.u32 %v11856_v56, %v10790_v57  ;;  %v11784_v48 = vld [vmem:[#allocation12 + $0x35c] sm:$0xf] }
 0x1e8   : > { %2975 = vmatpush.bf16.msra.mxu2 %v10313_v51  ;;  %2953 = vmatpush.bf16.msra.mxu0 %v10693_v2  ;;  %v10825_v51 = vor.u32 %v11864_v58, %v10822_v39  ;;  %v10153_v2 = vor.u32 %v11696_v54, %v10150_v55  ;;  %v10729_v58 = vor.u32 %v11840_v26, %v10726_v49  ;;  %v11832_v39 = vld [vmem:[#allocation12 + $0x4dc] sm:$0xf] }
 0x1e9   : > { %v10502_v50 = vld [vmem:[#allocation12 + $0x378] sm:$0xf0] }
 0x1ea   : > { %2912 = vmatpush.bf16.msra.mxu1 %v11009_v3  ;;  %2938 = vmatpush.bf16.msra.mxu3 %v10501_v9  ;;  %v12731_v62 = vpop.f32.mrf.mxu2  ;;  %v11871_v3 = vld [vmem:[#allocation12 + $0x614] sm:$0xf]  ;;  %v10373_v9 = vor.u32 %v11756_v61, %v10372_v59  ;;  %v11824_v54 = vld [vmem:[#allocation12 + $0x49c] sm:$0xf]  ;;  %v10505_v57 = vor.u32 %v11784_v48, %v10502_v50  ;;  %v10980_v59 = vld [vmem:[#allocation12 + $0x718] sm:$0xf] }
 0x1eb   : > { %v10662_v55 = vld [vmem:[#allocation12 + $0x4b8] sm:$0xf0]  ;;  %v11908_v61 = vld [vmem:[#allocation12 + $0x734] sm:$0xf0] }
 0x1ec   : > { %2976 = vmatpush.bf16.msra.mxu2 %v10281_v4  ;;  %2954 = vmatpush.bf16.msra.mxu0 %v10661_v15  ;;  %v10846_v4 = vld [vmem:[#allocation12 + $0x630] sm:$0xf0]  ;;  %v2635_v6 = vpop.f32.mrf.mxu3  ;;  %v2700_v7 = vpop.f32.mrf.mxu0  ;;  %v11076_v15 = vld [vmem:[#allocation12 + $0x7d8] sm:$0xf]  ;;  %v11760_v26 = vld [vmem:[#allocation12 + $0x29c] sm:$0xf] }
 0x1ed   : > { %v10849_v20 = vor.u32 %v11871_v3, %v10846_v4  ;;  %v10665_v7 = vor.u32 %v11824_v54, %v10662_v55  ;;  %v10406_v49 = vld [vmem:[#allocation12 + $0x2b8] sm:$0xf0]  ;;  %v11876_v48 = vld [vmem:[#allocation12 + $0x634] sm:$0xf0] }
 0x1ee   : > { %2913 = vmatpush.bf16.msra.mxu1 %v10977_v16  ;;  %2939 = vmatpush.bf16.msra.mxu3 %v10469_v22  ;;  %v11932_v16 = vld [vmem:[#allocation12 + $0x7f4] sm:$0xf0]  ;;  %v11680_v22 = vld [vmem:[#allocation12 + $0x1c] sm:$0xf] }
 0x1ef   : > { %v11077_v27 = vor.u32 %v11932_v16, %v11076_v15  ;;  %v10342_v54 = vld [vmem:[#allocation12 + $0x238] sm:$0xf0] }
 0x1f0   : > { %2977 = vmatpush.bf16.msra.mxu2 %v10249_v17  ;;  %2955 = vmatpush.bf16.msra.mxu0 %v10629_v28  ;;  %v11800_v17 = vld [vmem:[#allocation12 + $0x3dc] sm:$0xf] }
 0x1f1   : > { %v10569_v28 = vor.u32 %v11800_v17, %v10566_v18  ;;  %v11808_v18 = vld [vmem:[#allocation12 + $0x41c] sm:$0xf] }
 0x1f2   : > { %2914 = vmatpush.bf16.msra.mxu1 %v10945_v31  ;;  %2940 = vmatpush.bf16.msra.mxu3 %v10437_v38  ;;  %v11924_v31 = vld [vmem:[#allocation12 + $0x7b4] sm:$0xf0]  ;;  %v2726_v33 = vpop.f32.mrf.mxu2  ;;  %v10089_v38 = vor.u32 %v11680_v22, %v10086_v23  ;;  %v10441_v22 = vor.u32 %v11768_v13, %v10438_v14  ;;  %v11928_v55 = vld [vmem:[#allocation12 + $0x7dc] sm:$0xf] }
 0x1f3   : > { %v11045_v44 = vor.u32 %v11924_v31, %v11044_v29  ;;  %v10916_v23 = vld [vmem:[#allocation12 + $0x698] sm:$0xf] }
 0x1f4   : > { %2978 = vmatpush.bf16.msra.mxu2 %v10217_v32  ;;  %2956 = vmatpush.bf16.msra.mxu0 %v10597_v45  ;;  %v12519_v32 = vmov 0   ;;  %v12740_v40 = vpop.f32.mrf.mxu3  ;;  %v12742_v41 = vpop.f32.mrf.mxu0  ;;  %v10537_v45 = vor.u32 %v11792_v34, %v10534_v35  ;;  %v10409_v35 = vor.u32 %v11760_v26, %v10406_v49  ;;  %v10982_v26 = vld [vmem:[#allocation12 + $0x738] sm:$0xf0] }
 0x1f5   : > { %3044 = vst.msk [vmem:[#allocation2 + $0xc] sm:$0xf] %vm3039_vm2, %v12519_v32 }
 0x1f6   : > { %2915 = vmatpush.bf16.msra.mxu1 %v10913_v46  ;;  %2941 = vmatpush.bf16.msra.mxu3 %v10405_v52  ;;  %3047 = vst.msk [vmem:[#allocation2 + $0x18] sm:$0xf] %vm3039_vm2, %v12519_v32  ;;  %v11012_v46 = vld [vmem:[#allocation12 + $0x758] sm:$0xf]  ;;  %v10697_v52 = vor.u32 %v11832_v39, %v10694_v43  ;;  %v10374_v39 = vld [vmem:[#allocation12 + $0x278] sm:$0xf0] }
 0x1f7   : > { %2957 = vmatmul.bf16.vlgmr.msra.gmra.mxu0 %v12690_v60  ;;  %3050 = vst.msk [vmem:[#allocation2 + $0x24] sm:$0xf] %vm3039_vm2, %v12519_v32 }
 0x1f8   : > { %2979 = vmatpush.bf16.msra.mxu2 %v10185_v47  ;;  %3001 = vmatpush.bf16.msrb.mxu0 %v10825_v51  ;;  %3053 = vst.msk [vmem:[#allocation2 + $0x30] sm:$0xf] %vm3039_vm2, %v12519_v32  ;;  %v11916_v47 = vld [vmem:[#allocation12 + $0x774] sm:$0xf0]  ;;  %v12751_v51 = vld [vmem:[#allocation13] sm:$0xff] }
 0x1f9   : > { %3040 = vst.msk [vmem:[#allocation2] sm:$0xf] %vm3039_vm2, %v12519_v32  ;;  %v11013_v56 = vor.u32 %v11916_v47, %v11012_v46  ;;  %v2595_v3 = vperm.slane %v12751_v51, 0  ;;  %v2596_v15 = vperm.slane %v12751_v51, 1  ;;  %v2597_v16 = vperm.slane %v12751_v51, 2 }
 0x1fa   : > { %2916 = vmatpush.bf16.msra.mxu1 %v10881_v63  ;;  %2942 = vmatpush.bf16.msra.mxu3 %v10373_v9  ;;  %3041 = vst.msk [vmem:[#allocation2 + $0x4] sm:$0xf] %vm3039_vm2, %v12519_v32  ;;  %v11776_v63 = vld [vmem:[#allocation12 + $0x31c] sm:$0xf]  ;;  %v10852_v47 = vld [vmem:[#allocation12 + $0x618] sm:$0xf] }
 0x1fb   : > { %3045 = vst.msk [vmem:[#allocation2 + $0x10] sm:$0xf] %vm3039_vm2, %v12519_v32  ;;  %v10630_v9 = vld [vmem:[#allocation12 + $0x478] sm:$0xf0]  ;;  %v2725_v31 = vadd.f32 %v12731_v62, %v2597_v16 }
 0x1fc   : > { %2980 = vmatpush.bf16.msra.mxu2 %v10153_v2  ;;  %3002 = vmatpush.bf16.msrb.mxu0 %v10793_v8  ;;  %3048 = vst.msk [vmem:[#allocation2 + $0x1c] sm:$0xf] %vm3039_vm2, %v12519_v32  ;;  %v10470_v2 = vld [vmem:[#allocation12 + $0x338] sm:$0xf0]  ;;  %v2687_v5 = vpop.f32.mrf.mxu3  ;;  %v2752_v6 = vpop.f32.mrf.mxu0 }
 0x1fd   : > { %3051 = vst.msk [vmem:[#allocation2 + $0x28] sm:$0xf] %vm3039_vm2, %v12519_v32  ;;  %v11816_v8 = vld [vmem:[#allocation12 + $0x45c] sm:$0xf]  ;;  %v10473_v10 = vor.u32 %v11776_v63, %v10470_v2  ;;  %v3106_v13 = vld [vmem:[#allocation2 + $0x18] sm:$0x7] }
 0x1fe   : > { %2917 = vmatpush.bf16.msra.mxu1 %v10849_v20  ;;  %2943 = vmatpush.bf16.msra.mxu3 %v10341_v25  ;;  %3054 = vst.msk [vmem:[#allocation2 + $0x34] sm:$0xf] %vm3039_vm2, %v12519_v32  ;;  %v12764_v4 = vpop.f32.mrf.mxu1  ;;  %v10633_v17 = vor.u32 %v11816_v8, %v10630_v9  ;;  %v10598_v20 = vld [vmem:[#allocation12 + $0x438] sm:$0xf0]  ;;  %v2621_v25 = vadd.f32 %v12717_v1, %v2595_v3  ;;  %v3109_v14 = vld [vmem:[#allocation2 + $0x24] sm:$0x7] }
 0x1ff   : > { %3056 = vst.msk [vmem:[#allocation2 + $0x3c] sm:$0xf] %vm3039_vm2, %v12519_v32  ;;  %v10601_v33 = vor.u32 %v11808_v18, %v10598_v20  ;;  %v11752_v62 = vld [vmem:[#allocation12 + $0x25c] sm:$0xf] }
 0x200   : > { %2981 = vmatpush.bf16.msra.mxu2 %v10121_v21  ;;  %3003 = vmatpush.bf16.msrb.mxu0 %v10761_v24  ;;  %3057 = vst.msk [vmem:[#allocation2 + $0x40] sm:$0xf] %vm3039_vm2, %v12519_v32  ;;  %v10949_v21 = vor.u32 %v11900_v12, %v10948_v11  ;;  %v11892_v24 = vld [vmem:[#allocation12 + $0x6b4] sm:$0xf0]  ;;  %v2634_v29 = vadd.f32 %v12727_v36, %v2621_v25  ;;  %v11046_v5 = vld [vmem:[#allocation12 + $0x7b8] sm:$0xf0] }
 0x201   : > { %2918 = vmatmul.bf16.vlgmr.msra.gmra.mxu1 %v12703_v53  ;;  %2944 = vmatmul.bf16.vlgmr.msra.gmra.mxu3 %v12694_v30  ;;  %3059 = vst.msk [vmem:[#allocation2 + $0x48] sm:$0xf] %vm3039_vm2, %v12519_v32  ;;  %v10917_v34 = vor.u32 %v11892_v24, %v10916_v23  ;;  %v10377_v46 = vor.u32 %v11752_v62, %v10374_v39  ;;  %v11912_v8 = vld [vmem:[#allocation12 + $0x75c] sm:$0xf] }
 0x202   : > { %2962 = vmatpush.bf16.msrb.mxu1 %v11077_v27  ;;  %2988 = vmatpush.bf16.msrb.mxu3 %v10569_v28  ;;  %3060 = vst.msk [vmem:[#allocation2 + $0x4c] sm:$0xf] %vm3039_vm2, %v12519_v32  ;;  %v2673_v27 = vadd.f32 %v12724_v0, %v2596_v15  ;;  %v11884_v0 = vld [vmem:[#allocation12 + $0x674] sm:$0xf0]  ;;  %v11014_v11 = vld [vmem:[#allocation12 + $0x778] sm:$0xf0] }
 0x203   : > { %3062 = vst.msk [vmem:[#allocation2 + $0x54] sm:$0xf] %vm3039_vm2, %v12519_v32  ;;  %v11904_v25 = vld [vmem:[#allocation12 + $0x71c] sm:$0xf] }
 0x204   : > { %2982 = vmatpush.bf16.msra.mxu2 %v10089_v38  ;;  %3004 = vmatpush.bf16.msrb.mxu0 %v10729_v58  ;;  %3063 = vst.msk [vmem:[#allocation2 + $0x58] sm:$0xf] %vm3039_vm2, %v12519_v32  ;;  %v2737_v1 = vpop.f32.mrf.mxu3  ;;  %v10884_v38 = vld [vmem:[#allocation12 + $0x658] sm:$0xf]  ;;  %v2686_v58 = vadd.f32 %v12740_v40, %v2673_v27  ;;  %v10985_v27 = vor.u32 %v11904_v25, %v10982_v26 }
 0x205   : > { %3065 = vst.msk [vmem:[#allocation2 + $0x60] sm:$0xf] %vm3039_vm2, %v12519_v32  ;;  %v2738_v36 = vadd.f32 %v2737_v1, %v2725_v31  ;;  %v10885_v40 = vor.u32 %v11884_v0, %v10884_v38  ;;  %v10950_v31 = vld [vmem:[#allocation12 + $0x6f8] sm:$0xf0] }
 0x206   : > { %2963 = vmatpush.bf16.msrb.mxu1 %v11045_v44  ;;  %2989 = vmatpush.bf16.msrb.mxu3 %v10537_v45  ;;  %3066 = vst.msk [vmem:[#allocation2 + $0x64] sm:$0xf] %vm3039_vm2, %v12519_v32  ;;  %v2661_v28 = vpop.f32.mrf.mxu1  ;;  %v2647_v44 = vadd.f32 %v12720_v42, %v2634_v29  ;;  %v2699_v42 = vadd.f32 %v12729_v37, %v2686_v58  ;;  %v11896_v29 = vld [vmem:[#allocation12 + $0x6dc] sm:$0xf] }
 0x207   : > { %2983 = vmatmul.bf16.vlgmr.msra.gmra.mxu2 %v12685_v19  ;;  %v10981_v19 = vor.u32 %v11908_v61, %v10980_v59  ;;  %3068 = vst.msk [vmem:[#allocation2 + $0x6c] sm:$0xf] %vm3039_vm2, %v12519_v32  ;;  %v12805_v45 = vadd.f32 %v12742_v41, %v2738_v36  ;;  %v10853_v59 = vor.u32 %v11876_v48, %v10852_v47  ;;  %v11888_v1 = vld [vmem:[#allocation12 + $0x69c] sm:$0xf]  ;;  %v2598_v48 = vperm.slane %v12751_v51, 3 }
 0x208   : > { %3005 = vmatpush.bf16.msrb.mxu0 %v10697_v52  ;;  %3069 = vst.msk [vmem:[#allocation2 + $0x70] sm:$0xf] %vm3039_vm2, %v12519_v32  ;;  %v2660_v50 = vadd.f32 %v12764_v4, %v2647_v44  ;;  %v11744_v52 = vld [vmem:[#allocation12 + $0x21c] sm:$0xf] }
 0x209   : > { %3071 = vst.msk [vmem:[#allocation2 + $0x78] sm:$0xf] %vm3039_vm2, %v12519_v32  ;;  %v10345_v61 = vor.u32 %v11744_v52, %v10342_v54  ;;  %v11920_v4 = vld [vmem:[#allocation12 + $0x79c] sm:$0xf] }
 0x20a   : > { %2964 = vmatpush.bf16.msrb.mxu1 %v11013_v56  ;;  %2990 = vmatpush.bf16.msrb.mxu3 %v10505_v57  ;;  %3072 = vst.msk [vmem:[#allocation2 + $0x7c] sm:$0xf] %vm3039_vm2, %v12519_v32  ;;  %v12797_v43 = vpop.f32.mrf.mxu2  ;;  %v11078_v56 = vld [vmem:[#allocation12 + $0x7f8] sm:$0xf0]  ;;  %v3027_v63 = vmax.f32 %v2660_v50, 0.0 }
 0x20b   : > { %3074 = vst.msk [vmem:[#allocation2 + $0x84] sm:$0xf] %vm3039_vm2, %v12519_v32  ;;  %v11081_v2 = vor.u32 %v11928_v55, %v11078_v56  ;;  %v11880_v58 = vld [vmem:[#allocation12 + $0x65c] sm:$0xf]  ;;  %v2777_v52 = vadd.f32 %v12797_v43, %v2598_v48 }
 0x20c   : > { %3006 = vmatpush.bf16.msrb.mxu0 %v10665_v7  ;;  %3075 = vst.msk [vmem:[#allocation2 + $0x88] sm:$0xf] %vm3039_vm2, %v12519_v32  ;;  %v2739_v37 = vpop.f32.mrf.mxu3  ;;  %v10886_v36 = vld [vmem:[#allocation12 + $0x678] sm:$0xf0] }
 0x20d   : > { %3077 = vst.msk [vmem:[#allocation2 + $0x90] sm:$0xf] %vm3039_vm2, %v12519_v32  ;;  %v10889_v39 = vor.u32 %v11880_v58, %v10886_v36  ;;  %v11872_v44 = vld [vmem:[#allocation12 + $0x61c] sm:$0xf]  ;;  %v2601_v36 = vperm.slane %v12751_v51, 6 }
 0x20e   : > { %2965 = vmatpush.bf16.msrb.mxu1 %v10981_v19  ;;  %2991 = vmatpush.bf16.msrb.mxu3 %v10473_v10  ;;  %3078 = vst.msk [vmem:[#allocation2 + $0x94] sm:$0xf] %vm3039_vm2, %v12519_v32  ;;  %v2711_v41 = vpop.f32.mrf.mxu1  ;;  %v3103_v19 = vld [vmem:[#allocation2 + $0xc] sm:$0x7]  ;;  %v11049_v10 = vor.u32 %v11920_v4, %v11046_v5  ;;  %v3212_v4 = vld [vmem:[#allocation2 + $0x48] sm:$0x7] }
 0x20f   : > { %3080 = vst.msk [vmem:[#allocation2 + $0x9c] sm:$0xf] %vm3039_vm2, %v12519_v32  ;;  %v2712_v57 = vadd.f32 %v2711_v41, %v2699_v42  ;;  %v3215_v5 = vld [vmem:[#allocation2 + $0x54] sm:$0x7]  ;;  %v3309_v48 = vld [vmem:[#allocation2 + $0x6c] sm:$0x7] }
 0x210   : > { %3007 = vmatpush.bf16.msrb.mxu0 %v10633_v17  ;;  %3081 = vst.msk [vmem:[#allocation2 + $0xa0] sm:$0xf] %vm3039_vm2, %v12519_v32  ;;  %v3112_v17 = vld [vmem:[#allocation2 + $0x30] sm:$0x7] }
 0x211   : > { %3083 = vst.msk [vmem:[#allocation2 + $0xa8] sm:$0xf] %vm3039_vm2, %v12519_v32  ;;  %v11951_v58 = vld [vmem:[#allocation15 + $0x10] sm:$0xff] }
 0x212   : > { %2966 = vmatpush.bf16.msrb.mxu1 %v10949_v21  ;;  %2992 = vmatpush.bf16.msrb.mxu3 %v10441_v22  ;;  %3084 = vst.msk [vmem:[#allocation2 + $0xac] sm:$0xf] %vm3039_vm2, %v12519_v32  ;;  %v2778_v3 = vpop.f32.mrf.mxu2  ;;  %v11017_v22 = vor.u32 %v11912_v8, %v11014_v11 }
 0x213   : > { %3086 = vst.msk [vmem:[#allocation2 + $0xb4] sm:$0xf] %vm3039_vm2, %v12519_v32 }
 0x214   : > { %3008 = vmatpush.bf16.msrb.mxu0 %v10601_v33  ;;  %3087 = vst.msk [vmem:[#allocation2 + $0xb8] sm:$0xf] %vm3039_vm2, %v12519_v32  ;;  %v12830_v7 = vpop.f32.mrf.mxu0  ;;  %v10953_v33 = vor.u32 %v11896_v29, %v10950_v31  ;;  %v11952_v29 = vld [vmem:[#allocation15 + $0x18] sm:$0xff] }
 0x215   : > { %3089 = vst.msk [vmem:[#allocation2 + $0xc0] sm:$0xf] %vm3039_vm2, %v12519_v32  ;;  %12017 = vmatpush.bf16.msrb.mxu2 %v11952_v29 }
 0x216   : > { %2967 = vmatpush.bf16.msrb.mxu1 %v10917_v34  ;;  %2993 = vmatpush.bf16.msrb.mxu3 %v10409_v35  ;;  %3090 = vst.msk [vmem:[#allocation2 + $0xc4] sm:$0xf] %vm3039_vm2, %v12519_v32  ;;  %v2713_v15 = vpop.f32.mrf.mxu1  ;;  %v10918_v34 = vld [vmem:[#allocation12 + $0x6b8] sm:$0xf0] }
 0x217   : > { %3009 = vmatmul.bf16.vlgmr.msrb.gmra.mxu0 %v12690_v60  ;;  %v3028_v60 = vmax.f32 %v2712_v57, 0.0  ;;  %3092 = vst.msk [vmem:[#allocation2 + $0xcc] sm:$0xf] %vm3039_vm2, %v12519_v32  ;;  %v10921_v38 = vor.u32 %v11888_v1, %v10918_v34 }
 0x218   : > { %3093 = vst.msk [vmem:[#allocation2 + $0xd0] sm:$0xf] %vm3039_vm2, %v12519_v32  ;;  %3706 = vmatpush.bf16.msra.mxu0 %v11952_v29  ;;  %vm13122_vm2 = vmor %vm4572_vm0, %vm4573_vm1 }
 0x219   : > { %v12824_v6 = vpack.c.bf16 %v3028_v60, %v3027_v63  ;;  %3043 = vst.msk [vmem:[#allocation2 + $0x8] sm:$0x1] %vm3042_vm6, %v12519_v32  ;;  %12019 = vmatpush.bf16.msrb.mxu2 %v11951_v58 }
 0x21a   : > { %2968 = vmatpush.bf16.msrb.mxu1 %v10885_v40  ;;  %2994 = vmatpush.bf16.msrb.mxu3 %v10377_v46  ;;  %v10854_v40 = vld [vmem:[#allocation12 + $0x638] sm:$0xf0]  ;;  %3046 = vst.msk [vmem:[#allocation2 + $0x14] sm:$0x1] %vm3042_vm6, %v12519_v32 }
 0x21b   : > { %v3096_v9 = vpack.i.b16 %v12824_v6, %v12824_v6  ;;  %v10857_v47 = vor.u32 %v11872_v44, %v10854_v40  ;;  %3049 = vst.msk [vmem:[#allocation2 + $0x20] sm:$0x1] %vm3042_vm6, %v12519_v32  ;;  %v11950_v40 = vld [vmem:[#allocation15 + $0x8] sm:$0xff] }
 0x21c   : > { %3052 = vst.msk [vmem:[#allocation2 + $0x2c] sm:$0x1] %vm3042_vm6, %v12519_v32  ;;  %3707 = vmatpush.bf16.msra.mxu0 %v11951_v58 }
 0x21d   : > { %v3098_v16 = vperm.slane %v3096_v9, 0  ;;  %3055 = vst.msk [vmem:[#allocation2 + $0x38] sm:$0x1] %vm3042_vm6, %v12519_v32  ;;  %12021 = vmatpush.bf16.msrb.mxu2 %v11950_v40 }
 0x21e   : > { %2969 = vmatpush.bf16.msrb.mxu1 %v10853_v59  ;;  %2995 = vmatpush.bf16.msrb.mxu3 %v10345_v61  ;;  %v2763_v28 = vpop.f32.mrf.mxu1  ;;  %v2599_v59 = vperm.slane %v12751_v51, 4  ;;  %3058 = vst.msk [vmem:[#allocation2 + $0x44] sm:$0x1] %vm3042_vm6, %v12519_v32 }
 0x21f   : > { %v3104_v18 = vsel %vm12836_vm5, %v3098_v16, %v3103_v19  ;;  %v3107_v20 = vsel %vm12836_vm5, %v3098_v16, %v3106_v13  ;;  %v3110_v21 = vsel %vm12836_vm5, %v3098_v16, %v3109_v14  ;;  %v3113_v23 = vsel %vm12836_vm5, %v3098_v16, %v3112_v17  ;;  %3061 = vst.msk [vmem:[#allocation2 + $0x50] sm:$0x1] %vm3042_vm6, %v12519_v32 }
 0x220   : > { %3105 = vst [vmem:[#allocation2 + $0xc] sm:$0x7] %v3104_v18  ;;  %v3116_v24 = vunpack.c.l.b16 %v3098_v16  ;;  %v2764_v41 = vadd.f32 %v2763_v28, %v12805_v45  ;;  %3708 = vmatpush.bf16.msra.mxu0 %v11950_v40 }
 0x221   : > { %2970 = vmatmul.bf16.vlgmr.msrb.gmra.mxu1 %v12703_v53  ;;  %2996 = vmatmul.bf16.vlgmr.msrb.gmra.mxu3 %v12694_v30  ;;  %3108 = vst [vmem:[#allocation2 + $0x18] sm:$0x7] %v3107_v20  ;;  %v2804_v30 = vpop.f32.mrf.mxu0 }
 0x222   : > { %3014 = vmatpush.bf16.msra.mxu1 %v11081_v2  ;;  %3111 = vst [vmem:[#allocation2 + $0x24] sm:$0x7] %v3110_v21  ;;  %v3117_v49 = vpack.c.b16 %v3116_v24, %v3116_v24  ;;  %v3029_v61 = vmax.f32 %v2764_v41, 0.0  ;;  %12018 = vmatpush.bf16.msra.mxu3 %v11952_v29 }
 0x223   : > { %3114 = vst [vmem:[#allocation2 + $0x30] sm:$0x7] %v3113_v23 }
 0x224   : > { %3118 = vrot.lane.b32.xlu0 %v3117_v49, %s12520_s18  ;;  %v2789_v35 = vpop.f32.mrf.mxu3  ;;  %3064 = vst.msk [vmem:[#allocation2 + $0x5c] sm:$0x1] %vm3042_vm6, %v12519_v32 }
 0x225   : > { %v2790_v54 = vadd.f32 %v2789_v35, %v2777_v52  ;;  %3067 = vst.msk [vmem:[#allocation2 + $0x68] sm:$0x1] %vm3042_vm6, %v12519_v32  ;;  %v3315_v52 = vld [vmem:[#allocation2 + $0x84] sm:$0x7] }
 0x226   : > { %3015 = vmatpush.bf16.msra.mxu1 %v11049_v10  ;;  %v2765_v0 = vpop.f32.mrf.mxu1  ;;  %3070 = vst.msk [vmem:[#allocation2 + $0x74] sm:$0x1] %vm3042_vm6, %v12519_v32  ;;  %12020 = vmatpush.bf16.msra.mxu3 %v11951_v58 }
 0x227   : > { %v2803_v56 = vadd.f32 %v12830_v7, %v2790_v54  ;;  %v3218_v7 = vld [vmem:[#allocation2 + $0x60] sm:$0x7]  ;;  %3073 = vst.msk [vmem:[#allocation2 + $0x80] sm:$0x1] %vm3042_vm6, %v12519_v32 }
 0x228   : > { %3076 = vst.msk [vmem:[#allocation2 + $0x8c] sm:$0x1] %vm3042_vm6, %v12519_v32 }
 0x229   : > { %3079 = vst.msk [vmem:[#allocation2 + $0x98] sm:$0x1] %vm3042_vm6, %v12519_v32 }
 0x22a   : > { %3016 = vmatpush.bf16.msra.mxu1 %v11017_v22  ;;  %v2828_v62 = vpop.f32.mrf.mxu2  ;;  %3082 = vst.msk [vmem:[#allocation2 + $0xa4] sm:$0x1] %vm3042_vm6, %v12519_v32  ;;  %12022 = vmatpush.bf16.msra.mxu3 %v11950_v40 }
 0x22b   : > { %v2829_v2 = vadd.f32 %v2828_v62, %v2599_v59  ;;  %3085 = vst.msk [vmem:[#allocation2 + $0xb0] sm:$0x1] %vm3042_vm6, %v12519_v32 }
 0x22c   : > { %3169 = vrot.lane.b32.xlu0 %v12824_v6, %s12520_s18  ;;  %v2791_v46 = vpop.f32.mrf.mxu3  ;;  %3088 = vst.msk [vmem:[#allocation2 + $0xbc] sm:$0x1] %vm3042_vm6, %v12519_v32 }
 0x22d   : > { %3091 = vst.msk [vmem:[#allocation2 + $0xc8] sm:$0x1] %vm3042_vm6, %v12519_v32 }
 0x22e   : > { %3017 = vmatpush.bf16.msra.mxu1 %v10985_v27  ;;  %v2600_v27 = vperm.slane %v12751_v51, 5  ;;  %3094 = vst.msk [vmem:[#allocation2 + $0xd4] sm:$0x1] %vm3042_vm6, %v12519_v32  ;;  %v11979_v32 = vld [vmem:[#allocation15 + $0x70] sm:$0xff] }
 0x232   : > { %3018 = vmatpush.bf16.msra.mxu1 %v10953_v33  ;;  %v2830_v50 = vpop.f32.mrf.mxu2 }
 0x234   : > { %v2854_v42 = vpop.f32.mrf.mxu0 }
 0x236   : > { %3019 = vmatpush.bf16.msra.mxu1 %v10921_v38 }
 0x23a   : > { %3020 = vmatpush.bf16.msra.mxu1 %v10889_v39 }
 0x23c   : > { %v2856_v55 = vpop.f32.mrf.mxu0 }
 0x23e   : > { %3021 = vmatpush.bf16.msra.mxu1 %v10857_v47  ;;  %v2815_v57 = vpop.f32.mrf.mxu1 }
 0x23f   : > { %v2816_v37 = vadd.f32 %v2815_v57, %v2803_v56  ;;  %v3318_v56 = vld [vmem:[#allocation2 + $0x90] sm:$0x7]  ;;  %v11949_v57 = vld [vmem:[#allocation15] sm:$0xff] }
 0x240   : > { %3709 = vmatpush.bf16.msra.mxu0 %v11949_v57  ;;  %12023 = vmatpush.bf16.msrb.mxu2 %v11949_v57 }
 0x241   : > { %3022 = vmatmul.bf16.vlgmr.msra.gmra.mxu1 %v12703_v53  ;;  %v3030_v63 = vmax.f32 %v2816_v37, 0.0  ;;  %v3209_v53 = vld [vmem:[#allocation2 + $0x3c] sm:$0x7]  ;;  %12024 = vmatpush.bf16.msra.mxu3 %v11949_v57 }
 0x243   : > { %v12863_v60 = vpack.c.bf16 %v3030_v63, %v3029_v61 }
 0x244   : > { %v2841_v3 = vpop.f32.mrf.mxu3 }
 0x245   : > { %v3205_v43 = vpack.i.b16 %v12863_v60, %v12863_v60  ;;  %v2842_v45 = vadd.f32 %v2841_v3, %v2829_v2 }
 0x246   : > { %v2817_v8 = vpop.f32.mrf.mxu1 }
 0x247   : > { %v3207_v9 = vperm.slane %v3205_v43, 0  ;;  %v2855_v10 = vadd.f32 %v2854_v42, %v2842_v45  ;;  %v3312_v42 = vld [vmem:[#allocation2 + $0x78] sm:$0x7] }
 0x249   : > { %v3210_v11 = vsel %vm12836_vm5, %v3207_v9, %v3209_v53  ;;  %v3213_v13 = vsel %vm12836_vm5, %v3207_v9, %v3212_v4  ;;  %v3216_v14 = vsel %vm12836_vm5, %v3207_v9, %v3215_v5  ;;  %v3219_v15 = vsel %vm12836_vm5, %v3207_v9, %v3218_v7  ;;  %v11933_v53 = vld [vmem:[#allocation2] sm:$0xff]  ;;  %v11980_v4 = vld [vmem:[#allocation15 + $0x78] sm:$0xff] }
 0x24a   : > { %v2880_v19 = vpop.f32.mrf.mxu2  ;;  %3211 = vst [vmem:[#allocation2 + $0x3c] sm:$0x7] %v3210_v11  ;;  %v3222_v16 = vunpack.c.l.b16 %v3207_v9  ;;  %11162 = vmatmul.msk.bf16.vlgmr.msra.gmra.mxu0 %vm3653_vm7, %v11933_v53  ;;  %5134 = vmatpush.bf16.msrb.mxu1 %v11980_v4  ;;  %v11978_v7 = vld [vmem:[#allocation15 + $0x68] sm:$0xff] }
 0x24b   : > { %3214 = vst [vmem:[#allocation2 + $0x48] sm:$0x7] %v3213_v13  ;;  %v2881_v31 = vadd.f32 %v2880_v19, %v2600_v27  ;;  %v3130_v13 = vld [vmem:[#allocation2 + $0x10] sm:$0x1]  ;;  %v3145_v27 = vld [vmem:[#allocation2 + $0x30] sm:$0xc] }
 0x24c   : > { %3217 = vst [vmem:[#allocation2 + $0x54] sm:$0x7] %v3216_v14  ;;  %v3223_v17 = vpack.c.b16 %v3222_v16, %v3222_v16  ;;  %v2843_v18 = vpop.f32.mrf.mxu3  ;;  %v3136_v14 = vld [vmem:[#allocation2 + $0x1c] sm:$0x1]  ;;  %v3124_v16 = vld [vmem:[#allocation2 + $0xc] sm:$0xc] }
 0x24d   : > { %3220 = vst [vmem:[#allocation2 + $0x60] sm:$0x7] %v3219_v15  ;;  %v3152_v18 = vrot.slane %v12824_v6, 4 }
 0x24e   : > { %3224 = vrot.lane.b32.xlu1 %v3223_v17, %s12520_s18  ;;  %5135 = vmatpush.bf16.msrb.mxu1 %v11979_v32  ;;  %v3133_v17 = vld [vmem:[#allocation2 + $0x18] sm:$0xc] }
 0x24f   : > { %v3154_v29 = vpack.i.b16 %v3152_v18, %v3152_v18 }
 0x252   : > { %v2882_v20 = vpop.f32.mrf.mxu2  ;;  %5136 = vmatpush.bf16.msrb.mxu1 %v11978_v7 }
 0x253   : > { %v3142_v20 = vld [vmem:[#allocation2 + $0x28] sm:$0x1] }
 0x254   : > { %v2906_v21 = vpop.f32.mrf.mxu0 }
 0x256   : > { %3269 = vrot.lane.b32.xlu1 %v12863_v60, %s12520_s18 }
 0x25c   : > { %v2908_v22 = vpop.f32.mrf.mxu0 }
 0x25e   : > { %v2867_v23 = vpop.f32.mrf.mxu1 }
 0x25f   : > { %v2868_v1 = vadd.f32 %v2867_v23, %v2855_v10  ;;  %v11977_v10 = vld [vmem:[#allocation15 + $0x60] sm:$0xff] }
 0x260   : > { %5137 = vmatpush.bf16.msrb.mxu1 %v11977_v10 }
 0x261   : > { %v3031_v62 = vmax.f32 %v2868_v1, 0.0 }
 0x264   : > { %v2893_v24 = vpop.f32.mrf.mxu3 }
 0x265   : > { %v2894_v33 = vadd.f32 %v2893_v24, %v2881_v31 }
 0x266   : > { %v2869_v25 = vpop.f32.mrf.mxu1 }
 0x267   : > { %v2907_v35 = vadd.f32 %v2906_v21, %v2894_v33  ;;  %v3139_v25 = vld [vmem:[#allocation2 + $0x24] sm:$0xc] }
 0x26a   : > { %v2932_v26 = vpop.f32.mrf.mxu2 }
 0x26b   : > { %v2933_v46 = vadd.f32 %v2932_v26, %v2601_v36  ;;  %v3148_v26 = vld [vmem:[#allocation2 + $0x34] sm:$0x1] }
 0x26c   : > { %v2895_v30 = vpop.f32.mrf.mxu3 }
 0x272   : > { %v2934_v49 = vpop.f32.mrf.mxu2 }
 0x274   : > { %v2958_v28 = vpop.f32.mrf.mxu0 }
 0x27c   : > { %v2960_v34 = vpop.f32.mrf.mxu0 }
 0x27d   : > { %v3156_v34 = vperm.slane %v3154_v29, 0  ;;  %v3230_v29 = vld [vmem:[#allocation2 + $0x40] sm:$0x1] }
 0x27e   : > { %v2919_v38 = vpop.f32.mrf.mxu1 }
 0x27f   : > { %v2920_v0 = vadd.f32 %v2919_v38, %v2907_v35 }
 0x281   : > { %v3032_v39 = vmax.f32 %v2920_v0, 0.0 }
 0x283   : > { %v12902_v44 = vpack.c.bf16 %v3032_v39, %v3031_v62 }
 0x284   : > { %v2945_v50 = vpop.f32.mrf.mxu3 }
 0x285   : > { %v3305_v47 = vpack.i.b16 %v12902_v44, %v12902_v44  ;;  %v2946_v54 = vadd.f32 %v2945_v50, %v2933_v46  ;;  %v3183_v50 = vld [vmem:[#allocation2 + $0x14] sm:$0x1] }
 0x286   : > { %v2921_v41 = vpop.f32.mrf.mxu1 }
 0x287   : > { %v3307_v55 = vperm.slane %v3305_v47, 0  ;;  %v12920_v59 = vadd.f32 %v2958_v28, %v2946_v54  ;;  %v3195_v41 = vld [vmem:[#allocation2 + $0x2c] sm:$0x1] }
 0x289   : > { %v3310_v61 = vsel %vm12836_vm5, %v3307_v55, %v3309_v48  ;;  %v3313_v63 = vsel %vm12836_vm5, %v3307_v55, %v3312_v42  ;;  %v3316_v2 = vsel %vm12836_vm5, %v3307_v55, %v3315_v52  ;;  %v3319_v43 = vsel %vm12836_vm5, %v3307_v55, %v3318_v56  ;;  %v3189_v42 = vld [vmem:[#allocation2 + $0x20] sm:$0x1]  ;;  %v3201_v56 = vld [vmem:[#allocation2 + $0x38] sm:$0x1] }
 0x28a   : > { %v12916_v37 = vpop.f32.mrf.mxu2  ;;  %3311 = vst [vmem:[#allocation2 + $0x6c] sm:$0x7] %v3310_v61  ;;  %v3322_v3 = vunpack.c.l.b16 %v3307_v55 }
 0x28b   : > { %3314 = vst [vmem:[#allocation2 + $0x78] sm:$0x7] %v3313_v63 }
 0x28c   : > { %3317 = vst [vmem:[#allocation2 + $0x84] sm:$0x7] %v3316_v2  ;;  %v3323_v5 = vpack.c.b16 %v3322_v3, %v3322_v3  ;;  %v2947_v45 = vpop.f32.mrf.mxu3 }
 0x28d   : > { %3320 = vst [vmem:[#allocation2 + $0x90] sm:$0x7] %v3319_v43  ;;  %v2602_v45 = vperm.slane %v12751_v51, 7 }
 0x28e   : > { %3324 = vrot.lane.b32.xlu2 %v3323_v5, %s12520_s18 }
 0x292   : > { %v2986_v8 = vpop.f32.mrf.mxu2 }
 0x294   : > { %v12934_v9 = vpop.f32.mrf.mxu0 }
 0x296   : > { %3369 = vrot.lane.b32.xlu2 %v12902_v44, %s12520_s18  ;;  %v3119_v15 = vpop.permute.xlu0 %3118 }
 0x297   : > { %v3125_v21 = vsel %vm12936_vm11, %v3119_v15, %v3124_v16  ;;  %v3131_v22 = vsel %vm12943_vm12, %v3119_v15, %v3130_v13  ;;  %v3134_v23 = vsel %vm12936_vm11, %v3119_v15, %v3133_v17  ;;  %v3137_v24 = vsel %vm12943_vm12, %v3119_v15, %v3136_v14 }
 0x298   : > { %3126 = vst [vmem:[#allocation2 + $0xc] sm:$0xc] %v3125_v21  ;;  %v3140_v6 = vsel %vm12936_vm11, %v3119_v15, %v3139_v25  ;;  %v3143_v49 = vsel %vm12943_vm12, %v3119_v15, %v3142_v20  ;;  %v3146_v31 = vsel %vm12936_vm11, %v3119_v15, %v3145_v27  ;;  %v3149_v33 = vsel %vm12943_vm12, %v3119_v15, %v3148_v26  ;;  %v3409_v25 = vld [vmem:[#allocation2 + $0x9c] sm:$0x7]  ;;  %v3415_v26 = vld [vmem:[#allocation2 + $0xb4] sm:$0x7] }
 0x299   : > { %3132 = vst [vmem:[#allocation2 + $0x10] sm:$0x1] %v3131_v22  ;;  %v2985_v13 = vadd.f32 %v12916_v37, %v2602_v45  ;;  %v3283_v45 = vld [vmem:[#allocation2 + $0x44] sm:$0x1] }
 0x29a   : > { %3135 = vst [vmem:[#allocation2 + $0x18] sm:$0xc] %v3134_v23 }
 0x29b   : > { %3138 = vst [vmem:[#allocation2 + $0x1c] sm:$0x1] %v3137_v24 }
 0x29c   : > { %v3012_v30 = vpop.f32.mrf.mxu0  ;;  %3141 = vst [vmem:[#allocation2 + $0x24] sm:$0xc] %v3140_v6 }
 0x29d   : > { %3144 = vst [vmem:[#allocation2 + $0x28] sm:$0x1] %v3143_v49  ;;  %v3418_v30 = vld [vmem:[#allocation2 + $0xc0] sm:$0x7] }
 0x29e   : > { %v2971_v28 = vpop.f32.mrf.mxu1  ;;  %3147 = vst [vmem:[#allocation2 + $0x30] sm:$0xc] %v3146_v31  ;;  %v3170_v1 = vpop.permute.xlu0 %3169 }
 0x29f   : > { %3150 = vst [vmem:[#allocation2 + $0x34] sm:$0x1] %v3149_v33  ;;  %v3171_v35 = vrot.slane %v3170_v1, 4  ;;  %v2972_v17 = vadd.f32 %v2971_v28, %v12920_v59  ;;  %v3412_v59 = vld [vmem:[#allocation2 + $0xa8] sm:$0x7] }
 0x2a0   : > { %v3157_v38 = vld [vmem:[#allocation2 + $0x10] sm:$0x7]  ;;  %v3227_v1 = vld [vmem:[#allocation2 + $0x3c] sm:$0xc] }
 0x2a1   : > { %v3158_v58 = vsel %vm12836_vm5, %v3156_v34, %v3157_v38  ;;  %v3173_v36 = vpack.i.b16 %v3171_v35, %v3171_v35  ;;  %v3033_v22 = vmax.f32 %v2972_v17, 0.0  ;;  %v3236_v35 = vld [vmem:[#allocation2 + $0x4c] sm:$0x1]  ;;  %v3301_v17 = vld [vmem:[#allocation2 + $0x68] sm:$0x1] }
 0x2a2   : > { %3159 = vst [vmem:[#allocation2 + $0x10] sm:$0x7] %v3158_v58  ;;  %v3160_v62 = vld [vmem:[#allocation2 + $0x1c] sm:$0x7]  ;;  %v3233_v58 = vld [vmem:[#allocation2 + $0x48] sm:$0xc] }
 0x2a3   : > { %v3161_v40 = vsel %vm12836_vm5, %v3156_v34, %v3160_v62  ;;  %v3175_v46 = vperm.slane %v3173_v36, 0 }
 0x2a4   : > { %v2997_v0 = vpop.f32.mrf.mxu3  ;;  %3162 = vst [vmem:[#allocation2 + $0x1c] sm:$0x7] %v3161_v40  ;;  %v3163_v47 = vld [vmem:[#allocation2 + $0x28] sm:$0x7]  ;;  %v3242_v40 = vld [vmem:[#allocation2 + $0x58] sm:$0x1] }
 0x2a5   : > { %v3164_v48 = vsel %vm12836_vm5, %v3156_v34, %v3163_v47  ;;  %v3177_v52 = vunpack.c.l.b16 %v3175_v46  ;;  %v2998_v51 = vadd.f32 %v2997_v0, %v2985_v13  ;;  %v3295_v13 = vld [vmem:[#allocation2 + $0x5c] sm:$0x1] }
 0x2a6   : > { %v2973_v39 = vpop.f32.mrf.mxu1  ;;  %3165 = vst [vmem:[#allocation2 + $0x28] sm:$0x7] %v3164_v48  ;;  %v3166_v54 = vld [vmem:[#allocation2 + $0x34] sm:$0x7] }
 0x2a7   : > { %v3167_v55 = vsel %vm12836_vm5, %v3156_v34, %v3166_v54  ;;  %v3178_v57 = vpack.c.b16 %v3177_v52, %v3177_v52  ;;  %v3011_v18 = vadd.f32 %v12934_v9, %v2998_v51  ;;  %v3252_v39 = vrot.slane %v12863_v60, 4  ;;  %v3245_v54 = vld [vmem:[#allocation2 + $0x60] sm:$0xc] }
 0x2a8   : > { %3168 = vst [vmem:[#allocation2 + $0x34] sm:$0x7] %v3167_v55 }
 0x2a9   : > { %v3180_v63 = vld [vmem:[#allocation2 + $0x10] sm:$0xc]  ;;  %v3184_v2 = vsel %vm12943_vm12, %v3178_v57, %v3183_v50  ;;  %v3190_v43 = vsel %vm12943_vm12, %v3178_v57, %v3189_v42  ;;  %v3196_v3 = vsel %vm12943_vm12, %v3178_v57, %v3195_v41  ;;  %v3202_v53 = vsel %vm12943_vm12, %v3178_v57, %v3201_v56  ;;  %v3239_v50 = vld [vmem:[#allocation2 + $0x54] sm:$0xc]  ;;  %v3248_v42 = vld [vmem:[#allocation2 + $0x64] sm:$0x1] }
 0x2aa   : > { %3185 = vst [vmem:[#allocation2 + $0x14] sm:$0x1] %v3184_v2  ;;  %v3181_v5 = vsel %vm12936_vm11, %v3178_v57, %v3180_v63  ;;  %v3254_v41 = vpack.i.b16 %v3252_v39, %v3252_v39 }
 0x2ab   : > { %v3186_v4 = vld [vmem:[#allocation2 + $0x1c] sm:$0xc]  ;;  %3191 = vst [vmem:[#allocation2 + $0x20] sm:$0x1] %v3190_v43 }
 0x2ac   : > { %v2999_v61 = vpop.f32.mrf.mxu3  ;;  %v3187_v32 = vsel %vm12936_vm11, %v3178_v57, %v3186_v4  ;;  %3197 = vst [vmem:[#allocation2 + $0x2c] sm:$0x1] %v3196_v3  ;;  %v3256_v63 = vperm.slane %v3254_v41, 0  ;;  %v3345_v41 = vld [vmem:[#allocation2 + $0x90] sm:$0xc] }
 0x2ad   : > { %v3192_v8 = vld [vmem:[#allocation2 + $0x28] sm:$0xc]  ;;  %3203 = vst [vmem:[#allocation2 + $0x38] sm:$0x1] %v3202_v53 }
 0x2ae   : > { %v3193_v7 = vsel %vm12936_vm11, %v3178_v57, %v3192_v8  ;;  %3182 = vst [vmem:[#allocation2 + $0x10] sm:$0xc] %v3181_v5 }
 0x2af   : > { %v3198_v10 = vld [vmem:[#allocation2 + $0x34] sm:$0xc]  ;;  %3188 = vst [vmem:[#allocation2 + $0x1c] sm:$0xc] %v3187_v32 }
 0x2b0   : > { %v3199_v14 = vsel %vm12936_vm11, %v3178_v57, %v3198_v10  ;;  %3194 = vst [vmem:[#allocation2 + $0x28] sm:$0xc] %v3193_v7  ;;  %v3289_v7 = vld [vmem:[#allocation2 + $0x50] sm:$0x1] }
 0x2b1   : > { %3200 = vst [vmem:[#allocation2 + $0x34] sm:$0xc] %v3199_v14 }
 0x2b5   : > { %v11934_v15 = vld [vmem:[#allocation2 + $0xc] sm:$0xff] }
 0x2b6   : > { %v11961_v16 = vld [vmem:[#allocation2 + $0xc] sm:$0xff]  ;;  %11163 = vmatmul.msk.bf16.gmra.mxu0 %vm3653_vm7, %v11934_v15  ;;  %v11935_v36 = vld [vmem:[#allocation2 + $0x18] sm:$0xff] }
 0x2b7   : > { %11338 = vmatmul.msk.bf16.vlgmr.msrb.gmra.mxu1 %vm3653_vm7, %v11961_v16  ;;  %v11962_v62 = vld [vmem:[#allocation2 + $0x18] sm:$0xff]  ;;  %v11936_v51 = vld [vmem:[#allocation2 + $0x24] sm:$0xff] }
 0x2b8   : > { %v11963_v15 = vld [vmem:[#allocation2 + $0x24] sm:$0xff] }
 0x2be   : > { %v3023_v20 = vpop.f32.mrf.mxu1 }
 0x2bf   : > { %v3024_v21 = vadd.f32 %v3023_v20, %v3011_v18 }
 0x2c0   : > { %v3225_v33 = vpop.permute.xlu1 %3224 }
 0x2c1   : > { %v3034_v37 = vmax.f32 %v3024_v21, 0.0  ;;  %v3228_v38 = vsel %vm12936_vm11, %v3225_v33, %v3227_v1  ;;  %v3231_v0 = vsel %vm12943_vm12, %v3225_v33, %v3230_v29  ;;  %v3234_v46 = vsel %vm12936_vm11, %v3225_v33, %v3233_v58  ;;  %v11958_v29 = vld [vmem:[#allocation15 + $0x48] sm:$0xff]  ;;  %v3336_v1 = vld [vmem:[#allocation2 + $0x7c] sm:$0x1]  ;;  %v11957_v58 = vld [vmem:[#allocation15 + $0x40] sm:$0xff] }
 0x2c2   : > { %3229 = vst [vmem:[#allocation2 + $0x3c] sm:$0xc] %v3228_v38  ;;  %v3237_v48 = vsel %vm12943_vm12, %v3225_v33, %v3236_v35  ;;  %v3240_v60 = vsel %vm12936_vm11, %v3225_v33, %v3239_v50  ;;  %v3243_v52 = vsel %vm12943_vm12, %v3225_v33, %v3242_v40  ;;  %v3246_v55 = vsel %vm12936_vm11, %v3225_v33, %v3245_v54  ;;  %v3327_v38 = vld [vmem:[#allocation2 + $0x6c] sm:$0xc] }
 0x2c3   : > { %v12994_v23 = vpack.c.bf16 %v3034_v37, %v3033_v22  ;;  %3232 = vst [vmem:[#allocation2 + $0x40] sm:$0x1] %v3231_v0  ;;  %v3249_v56 = vsel %vm12943_vm12, %v3225_v33, %v3248_v42  ;;  %v3330_v33 = vld [vmem:[#allocation2 + $0x70] sm:$0x1]  ;;  %v3333_v0 = vld [vmem:[#allocation2 + $0x78] sm:$0xc] }
 0x2c4   : > { %3235 = vst [vmem:[#allocation2 + $0x48] sm:$0xc] %v3234_v46  ;;  %v3339_v42 = vld [vmem:[#allocation2 + $0x84] sm:$0xc] }
 0x2c5   : > { %v3405_v24 = vpack.i.b16 %v12994_v23, %v12994_v23  ;;  %3469 = vrot.lane.b32.xlu1 %v12994_v23, %s12520_s18  ;;  %3238 = vst [vmem:[#allocation2 + $0x4c] sm:$0x1] %v3237_v48  ;;  %v3826_v48 = vld [vmem:[#allocation2 + $0xc] sm:$0xf] }
 0x2c6   : > { %v3025_v9 = vpop.f32.mrf.mxu1  ;;  %11164 = vmatmul.msk.bf16.gmra.mxu0 %vm3653_vm7, %v11935_v36  ;;  %3241 = vst [vmem:[#allocation2 + $0x54] sm:$0xc] %v3240_v60  ;;  %v3352_v36 = vrot.slane %v12902_v44, 4  ;;  %v13065_v44 = vld [vmem:[#allocation2 + $0x10] sm:$0xf] }
 0x2c7   : > { %v3407_v6 = vperm.slane %v3405_v24, 0  ;;  %11339 = vmatmul.msk.bf16.gmra.mxu1 %vm3653_vm7, %v11962_v62  ;;  %3244 = vst [vmem:[#allocation2 + $0x58] sm:$0x1] %v3243_v52  ;;  %v3342_v62 = vld [vmem:[#allocation2 + $0x88] sm:$0x1] }
 0x2c8   : > { %v3270_v57 = vpop.permute.xlu1 %3269  ;;  %3247 = vst [vmem:[#allocation2 + $0x60] sm:$0xc] %v3246_v55  ;;  %v3348_v60 = vld [vmem:[#allocation2 + $0x94] sm:$0x1]  ;;  %v3899_v55 = vshrl.u32 %v3826_v48, 16 }
 0x2c9   : > { %v3410_v49 = vsel %vm12836_vm5, %v3407_v6, %v3409_v25  ;;  %v3413_v27 = vsel %vm12836_vm5, %v3407_v6, %v3412_v59  ;;  %v3416_v28 = vsel %vm12836_vm5, %v3407_v6, %v3415_v26  ;;  %v3419_v31 = vsel %vm12836_vm5, %v3407_v6, %v3418_v30  ;;  %3250 = vst [vmem:[#allocation2 + $0x64] sm:$0x1] %v3249_v56 }
 0x2ca   : > { %3411 = vst [vmem:[#allocation2 + $0x9c] sm:$0x7] %v3410_v49  ;;  %v3422_v34 = vunpack.c.l.b16 %v3407_v6  ;;  %v3271_v61 = vrot.slane %v3270_v57, 4  ;;  %v3257_v43 = vld [vmem:[#allocation2 + $0x40] sm:$0x7]  ;;  %v11960_v6 = vld [vmem:[#allocation15 + $0x58] sm:$0xff]  ;;  %v3354_v57 = vpack.i.b16 %v3352_v36, %v3352_v36 }
 0x2cb   : > { %3414 = vst [vmem:[#allocation2 + $0xa8] sm:$0x7] %v3413_v27  ;;  %v3258_v3 = vsel %vm12836_vm5, %v3256_v63, %v3257_v43  ;;  %4820 = vmatpush.bf16.msrb.mxu0 %v11960_v6  ;;  %v3902_v56 = vshll.u32 %v3826_v48, 16 }
 0x2cc   : > { %3417 = vst [vmem:[#allocation2 + $0xb4] sm:$0x7] %v3416_v28  ;;  %v3423_v47 = vpack.c.b16 %v3422_v34, %v3422_v34  ;;  %v3273_v2 = vpack.i.b16 %v3271_v61, %v3271_v61  ;;  %v3260_v4 = vld [vmem:[#allocation2 + $0x4c] sm:$0x7]  ;;  %v11959_v28 = vld [vmem:[#allocation15 + $0x50] sm:$0xff] }
 0x2cd   : > { %3420 = vst [vmem:[#allocation2 + $0xc0] sm:$0x7] %v3419_v31  ;;  %v3261_v5 = vsel %vm12836_vm5, %v3256_v63, %v3260_v4  ;;  %v11937_v34 = vld [vmem:[#allocation2 + $0x30] sm:$0xff]  ;;  %v3904_v4 = vrot.slane %v3902_v56, 5 }
 0x2ce   : > { %3424 = vrot.lane.b32.xlu0 %v3423_v47, %s12520_s18  ;;  %v3275_v53 = vperm.slane %v3273_v2, 0  ;;  %3259 = vst [vmem:[#allocation2 + $0x40] sm:$0x7] %v3258_v3  ;;  %v3263_v8 = vld [vmem:[#allocation2 + $0x58] sm:$0x7]  ;;  %v11964_v47 = vld [vmem:[#allocation2 + $0x30] sm:$0xff] }
 0x2cf   : > { %3262 = vst [vmem:[#allocation2 + $0x4c] sm:$0x7] %v3261_v5  ;;  %v3264_v10 = vsel %vm12836_vm5, %v3256_v63, %v3263_v8  ;;  %4821 = vmatpush.bf16.msrb.mxu0 %v11959_v28  ;;  %v3912_v2 = vshrl.u32 %v13065_v44, 16  ;;  %v3356_v5 = vperm.slane %v3354_v57, 0 }
 0x2d0   : > { %v3277_v32 = vunpack.c.l.b16 %v3275_v53  ;;  %3265 = vst [vmem:[#allocation2 + $0x58] sm:$0x7] %v3264_v10  ;;  %v3266_v16 = vld [vmem:[#allocation2 + $0x64] sm:$0x7]  ;;  %v3901_v53 = vrot.slane %v3899_v55, 4 }
 0x2d1   : > { %v3267_v18 = vsel %vm12836_vm5, %v3256_v63, %v3266_v16  ;;  %v3908_v63 = vshll.u32 %v13065_v44, 16  ;;  %v3914_v8 = vrot.slane %v3912_v2, 4 }
 0x2d2   : > { %v3278_v14 = vpack.c.b16 %v3277_v32, %v3277_v32  ;;  %3268 = vst [vmem:[#allocation2 + $0x64] sm:$0x7] %v3267_v18  ;;  %v3905_v16 = vor.u32 %v3904_v4, %v3901_v53 }
 0x2d3   : > { %4822 = vmatpush.bf16.msrb.mxu0 %v11958_v29  ;;  %v13078_v32 = vrot.slane %v3908_v63, 5 }
 0x2d4   : > { %v3284_v20 = vsel %vm12943_vm12, %v3278_v14, %v3283_v45  ;;  %v3290_v21 = vsel %vm12943_vm12, %v3278_v14, %v3289_v7  ;;  %v3296_v22 = vsel %vm12943_vm12, %v3278_v14, %v3295_v13  ;;  %v3302_v24 = vsel %vm12943_vm12, %v3278_v14, %v3301_v17 }
 0x2d5   : > { %v3280_v37 = vld [vmem:[#allocation2 + $0x40] sm:$0xc]  ;;  %3285 = vst [vmem:[#allocation2 + $0x44] sm:$0x1] %v3284_v20 }
 0x2d6   : > { %11165 = vmatmul.msk.bf16.gmra.mxu0 %vm3653_vm7, %v11936_v51  ;;  %3291 = vst [vmem:[#allocation2 + $0x50] sm:$0x1] %v3290_v21  ;;  %v3286_v25 = vld [vmem:[#allocation2 + $0x4c] sm:$0xc]  ;;  %v3281_v59 = vsel %vm12936_vm11, %v3278_v14, %v3280_v37  ;;  %v3915_v21 = vor.u32 %v3914_v8, %v13078_v32  ;;  %v3383_v37 = vld [vmem:[#allocation2 + $0x74] sm:$0x1] }
 0x2d7   : > { %11340 = vmatmul.msk.bf16.gmra.mxu1 %vm3653_vm7, %v11963_v15  ;;  %3297 = vst [vmem:[#allocation2 + $0x5c] sm:$0x1] %v3296_v22  ;;  %v3287_v26 = vsel %vm12936_vm11, %v3278_v14, %v3286_v25  ;;  %v3292_v9 = vld [vmem:[#allocation2 + $0x58] sm:$0xc]  ;;  %4823 = vmatpush.bf16.msrb.mxu0 %v11957_v58  ;;  %v13084_v15 = vld [vmem:[#allocation2 + $0x14] sm:$0x1] }
 0x2d8   : > { %3303 = vst [vmem:[#allocation2 + $0x68] sm:$0x1] %v3302_v24  ;;  %v3293_v30 = vsel %vm12936_vm11, %v3278_v14, %v3292_v9  ;;  %v3389_v24 = vld [vmem:[#allocation2 + $0x80] sm:$0x1]  ;;  %v3395_v25 = vld [vmem:[#allocation2 + $0x8c] sm:$0x1] }
 0x2d9   : > { %3288 = vst [vmem:[#allocation2 + $0x4c] sm:$0xc] %v3287_v26  ;;  %v3298_v49 = vld [vmem:[#allocation2 + $0x64] sm:$0xc]  ;;  %v3918_v28 = vshll.u32 %v13084_v15, 16  ;;  %v11984_v8 = vld [vmem:[#allocation15 + $0x98] sm:$0xff] }
 0x2da   : > { %3282 = vst [vmem:[#allocation2 + $0x40] sm:$0xc] %v3281_v59  ;;  %v3299_v27 = vsel %vm12936_vm11, %v3278_v14, %v3298_v49  ;;  %v13082_v14 = vld [vmem:[#allocation2 + $0x4] sm:$0xf]  ;;  %v13099_v49 = vld [vmem:[#allocation2 + $0x8] sm:$0x1]  ;;  %5816 = vmatpush.bf16.msra.mxu2 %v11984_v8 }
 0x2db   : > { %3294 = vst [vmem:[#allocation2 + $0x58] sm:$0xc] %v3293_v30  ;;  %v4577_v59 = vrot.slane %v13082_v14, 5  ;;  %v4580_v36 = vrot.slane %v13099_v49, 5  ;;  %v3920_v48 = vrot.slane %v3918_v28, 5 }
 0x2dc   : > { %3300 = vst [vmem:[#allocation2 + $0x64] sm:$0xc] %v3299_v27  ;;  %v4508_v27 = vld [vmem:[#allocation2] sm:$0xe]  ;;  %v13161_v28 = vld [vmem:[#allocation2 + $0x20] sm:$0x1] }
 0x2dd   : > { %v4579_v58 = vrot.slane %v4577_v59, 4  ;;  %v13176_v8 = vld [vmem:[#allocation2 + $0x2c] sm:$0x1] }
 0x2df   : > { %v4581_v55 = vsel %vm13122_vm2, %v4579_v58, %v4580_v36 }
 0x2e0   : > { %v11939_v31 = vld [vmem:[#allocation2 + $0x48] sm:$0xff]  ;;  %v4697_v4 = vunpack.c.l.b16 %v4581_v55 }
 0x2e1   : > { %11168 = vmatmul.msk.bf16.vlgmr.msrb.gmra.mxu2 %vm3653_vm7, %v11939_v31  ;;  %v11938_v30 = vld [vmem:[#allocation2 + $0x3c] sm:$0xff]  ;;  %v3906_v31 = vrot.slane %v3905_v16, 4 }
 0x2e2   : > { %v11940_v20 = vld [vmem:[#allocation2 + $0x54] sm:$0xff] }
 0x2e6   : > { %11166 = vmatmul.msk.bf16.gmra.mxu0 %vm3653_vm7, %v11937_v34 }
 0x2e7   : > { %11341 = vmatmul.msk.bf16.gmra.mxu1 %vm3653_vm7, %v11964_v47 }
 0x2e8   : > { %v3325_v35 = vpop.permute.xlu2 %3324 }
 0x2e9   : > { %v3328_v39 = vsel %vm12936_vm11, %v3325_v35, %v3327_v38  ;;  %v3331_v40 = vsel %vm12943_vm12, %v3325_v35, %v3330_v33  ;;  %v3334_v46 = vsel %vm12936_vm11, %v3325_v35, %v3333_v0  ;;  %v3337_v50 = vsel %vm12943_vm12, %v3325_v35, %v3336_v1  ;;  %v3401_v1 = vld [vmem:[#allocation2 + $0x98] sm:$0x1] }
 0x2ea   : > { %3329 = vst [vmem:[#allocation2 + $0x6c] sm:$0xc] %v3328_v39  ;;  %v3340_v52 = vsel %vm12936_vm11, %v3325_v35, %v3339_v42  ;;  %v3343_v54 = vsel %vm12943_vm12, %v3325_v35, %v3342_v62  ;;  %v3346_v61 = vsel %vm12936_vm11, %v3325_v35, %v3345_v41  ;;  %v3349_v43 = vsel %vm12943_vm12, %v3325_v35, %v3348_v60  ;;  %v11965_v35 = vld [vmem:[#allocation2 + $0x3c] sm:$0xff] }
 0x2eb   : > { %3332 = vst [vmem:[#allocation2 + $0x70] sm:$0x1] %v3331_v40  ;;  %v3916_v38 = vrot.slane %v3915_v21, 4  ;;  %v11210_v0 = vrot.slane %v4508_v27, 9  ;;  %v3911_v62 = vsel %vm13092_vm15, %v3906_v31, %v13078_v32  ;;  %v11967_v27 = vld [vmem:[#allocation2 + $0x54] sm:$0xff] }
 0x2ec   : > { %3335 = vst [vmem:[#allocation2 + $0x78] sm:$0xc] %v3334_v46  ;;  %v13132_v56 = vunpack.c.l.b16 %v3911_v62  ;;  %v11956_v62 = vld [vmem:[#allocation15 + $0x38] sm:$0xff] }
 0x2ed   : > { %3338 = vst [vmem:[#allocation2 + $0x7c] sm:$0x1] %v3337_v50  ;;  %v4578_v41 = vsel %vm13122_vm2, %v11210_v0, %v4577_v59  ;;  %4391 = vmatpush.bf16.msrb.mxu3 %v11956_v62  ;;  %v5256_v62 = vld [vmem:[#allocation2 + $0x20] sm:$0x1] }
 0x2ee   : > { %3341 = vst [vmem:[#allocation2 + $0x84] sm:$0xc] %v3340_v52  ;;  %v4696_v53 = vunpack.c.l.b16 %v4578_v41  ;;  %v13170_v41 = vld [vmem:[#allocation2 + $0x28] sm:$0xf] }
 0x2ef   : > { %3344 = vst [vmem:[#allocation2 + $0x88] sm:$0x1] %v3343_v54  ;;  %v3921_v54 = vsel %vm13092_vm15, %v3916_v38, %v3920_v48 }
 0x2f0   : > { %3347 = vst [vmem:[#allocation2 + $0x90] sm:$0xc] %v3346_v61  ;;  %v3370_v3 = vpop.permute.xlu2 %3369  ;;  %v13134_v57 = vunpack.c.l.b16 %v3921_v54  ;;  %v4728_v32 = vpack.c.b16 %v4697_v4, %v4696_v53  ;;  %v5253_v54 = vld [vmem:[#allocation2 + $0x14] sm:$0x1]  ;;  %v4598_v53 = vrot.slane %v13170_v41, 5  ;;  %v11968_v4 = vld [vmem:[#allocation2 + $0x60] sm:$0xff] }
 0x2f1   : > { %3350 = vst [vmem:[#allocation2 + $0x94] sm:$0x1] %v3349_v43  ;;  %v3371_v45 = vrot.slane %v3370_v3, 4  ;;  %11169 = vmatmul.msk.bf16.gmra.mxu2 %vm3653_vm7, %v11940_v20  ;;  %v4587_v20 = vrot.slane %v13084_v15, 5 }
 0x2f2   : > { %v3357_v7 = vld [vmem:[#allocation2 + $0x70] sm:$0x7] }
 0x2f3   : > { %v3358_v10 = vsel %vm12836_vm5, %v3356_v5, %v3357_v7  ;;  %v3373_v13 = vpack.i.b16 %v3371_v45, %v3371_v45  ;;  %v11941_v45 = vld [vmem:[#allocation2 + $0x60] sm:$0xff] }
 0x2f4   : > { %3359 = vst [vmem:[#allocation2 + $0x70] sm:$0x7] %v3358_v10  ;;  %v3360_v51 = vld [vmem:[#allocation2 + $0x7c] sm:$0x7]  ;;  %v4584_v10 = vrot.slane %v13065_v44, 5  ;;  %v11981_v44 = vld [vmem:[#allocation15 + $0x80] sm:$0xff] }
 0x2f5   : > { %v3361_v17 = vsel %vm12836_vm5, %v3356_v5, %v3360_v51  ;;  %v3375_v18 = vperm.slane %v3373_v13, 0  ;;  %v11966_v13 = vld [vmem:[#allocation2 + $0x48] sm:$0xff] }
 0x2f6   : > { %3362 = vst [vmem:[#allocation2 + $0x7c] sm:$0x7] %v3361_v17  ;;  %v3363_v22 = vld [vmem:[#allocation2 + $0x88] sm:$0x7]  ;;  %11167 = vmatmul.msk.bf16.gmra.mxu0 %vm3653_vm7, %v11938_v30  ;;  %v11983_v51 = vld [vmem:[#allocation15 + $0x90] sm:$0xff]  ;;  %v4586_v16 = vrot.slane %v4584_v10, 4 }
 0x2f7   : > { %v3364_v9 = vsel %vm12836_vm5, %v3356_v5, %v3363_v22  ;;  %v3377_v6 = vunpack.c.l.b16 %v3375_v18  ;;  %11342 = vmatmul.msk.bf16.gmra.mxu1 %vm3653_vm7, %v11965_v35  ;;  %v4509_v17 = vld [vmem:[#allocation2 + $0xc] sm:$0xe]  ;;  %5817 = vmatpush.bf16.msra.mxu2 %v11983_v51  ;;  %v4600_v51 = vrot.slane %v4598_v53, 4 }
 0x2f8   : > { %3365 = vst [vmem:[#allocation2 + $0x88] sm:$0x7] %v3364_v9  ;;  %v3366_v29 = vld [vmem:[#allocation2 + $0x94] sm:$0x7]  ;;  %v11982_v18 = vld [vmem:[#allocation15 + $0x88] sm:$0xff]  ;;  %v11211_v21 = vrot.slane %v4509_v17, 9  ;;  %v4588_v22 = vsel %vm13122_vm2, %v4586_v16, %v4587_v20 }
 0x2f9   : > { %v3367_v33 = vsel %vm12836_vm5, %v3356_v5, %v3366_v29  ;;  %v3378_v34 = vpack.c.b16 %v3377_v6, %v3377_v6  ;;  %v13154_v9 = vld [vmem:[#allocation2 + $0x1c] sm:$0xf]  ;;  %v5252_v29 = vld [vmem:[#allocation2 + $0x10] sm:$0xf]  ;;  %v5254_v16 = vld [vmem:[#allocation2 + $0x18] sm:$0xf] }
 0x2fa   : > { %3368 = vst [vmem:[#allocation2 + $0x94] sm:$0x7] %v3367_v33  ;;  %v4591_v15 = vrot.slane %v13154_v9, 5  ;;  %v4510_v33 = vld [vmem:[#allocation2 + $0x18] sm:$0xe]  ;;  %v5309_v35 = vshll.u32 %v5252_v29, 16 }
 0x2fb   : > { %v3380_v39 = vld [vmem:[#allocation2 + $0x70] sm:$0xc]  ;;  %v3384_v40 = vsel %vm12943_vm12, %v3378_v34, %v3383_v37  ;;  %v3390_v46 = vsel %vm12943_vm12, %v3378_v34, %v3389_v24  ;;  %v3396_v47 = vsel %vm12943_vm12, %v3378_v34, %v3395_v25  ;;  %v3402_v50 = vsel %vm12943_vm12, %v3378_v34, %v3401_v1  ;;  %5818 = vmatpush.bf16.msra.mxu2 %v11982_v18 }
 0x2fc   : > { %3385 = vst [vmem:[#allocation2 + $0x74] sm:$0x1] %v3384_v40  ;;  %v3381_v60 = vsel %vm12936_vm11, %v3378_v34, %v3380_v39  ;;  %v4585_v37 = vsel %vm13122_vm2, %v11211_v21, %v4584_v10  ;;  %v4699_v24 = vunpack.c.l.b16 %v4588_v22  ;;  %v4593_v31 = vrot.slane %v4591_v15, 4  ;;  %v13166_v39 = vpop.f32.mrf.mxu0 }
 0x2fd   : > { %v3386_v42 = vld [vmem:[#allocation2 + $0x7c] sm:$0xc]  ;;  %3391 = vst [vmem:[#allocation2 + $0x80] sm:$0x1] %v3390_v46  ;;  %v4698_v59 = vunpack.c.l.b16 %v4585_v37  ;;  %v4594_v1 = vrot.slane %v13161_v28, 5  ;;  %v5313_v38 = vshrl.u32 %v5252_v29, 16 }
 0x2fe   : > { %3397 = vst [vmem:[#allocation2 + $0x8c] sm:$0x1] %v3396_v47  ;;  %v3387_v63 = vsel %vm12936_vm11, %v3378_v34, %v3386_v42  ;;  %v11212_v0 = vrot.slane %v4510_v33, 9  ;;  %v5311_v47 = vrot.slane %v5309_v35, 5  ;;  %v4601_v22 = vrot.slane %v13176_v8, 5 }
 0x2ff   : > { %v3392_v61 = vld [vmem:[#allocation2 + $0x88] sm:$0xc]  ;;  %3403 = vst [vmem:[#allocation2 + $0x98] sm:$0x1] %v3402_v50  ;;  %5819 = vmatpush.bf16.msra.mxu2 %v11981_v44  ;;  %v4729_v6 = vpack.c.b16 %v4699_v24, %v4698_v59  ;;  %v4595_v58 = vsel %vm13122_vm2, %v4593_v31, %v4594_v1  ;;  %v5315_v48 = vrot.slane %v5313_v38, 4  ;;  %v5327_v59 = vshll.u32 %v5254_v16, 16 }
 0x300   : > { %v3393_v2 = vsel %vm12936_vm11, %v3378_v34, %v3392_v61  ;;  %3382 = vst [vmem:[#allocation2 + $0x70] sm:$0xc] %v3381_v60  ;;  %v4592_v40 = vsel %vm13122_vm2, %v11212_v0, %v4591_v15  ;;  %v4701_v50 = vunpack.c.l.b16 %v4595_v58  ;;  %v4602_v24 = vsel %vm13122_vm2, %v4600_v51, %v4601_v22  ;;  %v11955_v31 = vld [vmem:[#allocation15 + $0x30] sm:$0xff] }
 0x301   : > { %v3398_v3 = vld [vmem:[#allocation2 + $0x94] sm:$0xc]  ;;  %3394 = vst [vmem:[#allocation2 + $0x88] sm:$0xc] %v3393_v2  ;;  %11170 = vmatmul.msk.bf16.gmra.mxu2 %vm3653_vm7, %v11941_v45  ;;  %v4700_v60 = vunpack.c.l.b16 %v4592_v40  ;;  %v5329_v38 = vrot.slane %v5327_v59, 5  ;;  %4392 = vmatpush.bf16.msrb.mxu3 %v11955_v31 }
 0x302   : > { %v3399_v5 = vsel %vm12936_vm11, %v3378_v34, %v3398_v3  ;;  %3388 = vst [vmem:[#allocation2 + $0x7c] sm:$0xc] %v3387_v63  ;;  %v5251_v34 = vld [vmem:[#allocation2 + $0xc] sm:$0xf]  ;;  %v5316_v63 = vor.u32 %v5315_v48, %v5311_v47  ;;  %v5319_v3 = vshll.u32 %v5253_v54, 16  ;;  %v5343_v54 = vshll.u32 %v5256_v62, 16 }
 0x303   : > { %3400 = vst [vmem:[#allocation2 + $0x94] sm:$0xc] %v3399_v5  ;;  %v5300_v36 = vshrl.u32 %v5251_v34, 16  ;;  %v5303_v46 = vshll.u32 %v5251_v34, 16  ;;  %v4730_v2 = vpack.c.b16 %v4701_v50, %v4700_v60  ;;  %v4703_v34 = vunpack.c.l.b16 %v4602_v24  ;;  %v3430_v24 = vld [vmem:[#allocation2 + $0xa0] sm:$0x1] }
 0x304   : > { %v5317_v45 = vrot.slane %v5316_v63, 4  ;;  %v5321_v10 = vrot.slane %v5319_v3, 5  ;;  %v13201_v3 = vld [vmem:[#allocation2 + $0x38] sm:$0x1] }
 0x305   : > { %v5302_v55 = vrot.slane %v5300_v36, 4  ;;  %v5305_v61 = vrot.slane %v5303_v46, 5  ;;  %v13192_v46 = vld [vmem:[#allocation2 + $0x34] sm:$0xf] }
 0x306   : > { %11242 = vmatmul.msk.bf16.vlgmr.msrb.gmra.mxu0 %vm3653_vm7, %v4728_v32  ;;  %v5255_v32 = vld [vmem:[#allocation2 + $0x1c] sm:$0xf]  ;;  %v5322_v21 = vsel %vm13092_vm15, %v5317_v45, %v5321_v10 }
 0x307   : > { %11343 = vmatmul.msk.bf16.gmra.mxu1 %vm3653_vm7, %v11966_v13  ;;  %v11942_v25 = vld [vmem:[#allocation2 + $0x6c] sm:$0xff]  ;;  %v5306_v5 = vor.u32 %v5305_v61, %v5302_v55  ;;  %v4511_v13 = vld [vmem:[#allocation2 + $0x24] sm:$0xe]  ;;  %v5333_v17 = vshll.u32 %v5255_v32, 16  ;;  %v5337_v18 = vshrl.u32 %v5255_v32, 16  ;;  %v4605_v55 = vrot.slane %v13192_v46, 5 }
 0x308   : > { %v11944_v7 = vld [vmem:[#allocation2 + $0x84] sm:$0xff]  ;;  %v11213_v44 = vrot.slane %v4511_v13, 9  ;;  %v11969_v63 = vld [vmem:[#allocation2 + $0x6c] sm:$0xff]  ;;  %v3495_v45 = vld [vmem:[#allocation2 + $0xbc] sm:$0x1] }
 0x309   : > { %11173 = vmatmul.msk.bf16.vlgmr.msra.gmra.mxu3 %vm3653_vm7, %v11944_v7  ;;  %v11943_v42 = vld [vmem:[#allocation2 + $0x78] sm:$0xff]  ;;  %v13178_v7 = vpop.f32.mrf.mxu0  ;;  %v5307_v20 = vrot.slane %v5306_v5, 4  ;;  %v5339_v15 = vrot.slane %v5337_v18, 4  ;;  %v3489_v5 = vld [vmem:[#allocation2 + $0xb0] sm:$0x1] }
 0x30a   : > { %v11945_v30 = vld [vmem:[#allocation2 + $0x90] sm:$0xff]  ;;  %16502 = vst [vmem:[#allocation23_spill] sm:$0xff] %v13178_v7  ;;  %v4599_v29 = vsel %vm13122_vm2, %v11213_v44, %v4598_v53  ;;  %v3501_v32 = vld [vmem:[#allocation2 + $0xc8] sm:$0x1] }
 0x30b   : > { %v5312_v37 = vsel %vm13092_vm15, %v5307_v20, %v5311_v47  ;;  %v4702_v36 = vunpack.c.l.b16 %v4599_v29  ;;  %v4512_v53 = vld [vmem:[#allocation2 + $0x30] sm:$0xe]  ;;  %v5258_v13 = vld [vmem:[#allocation2 + $0x28] sm:$0xf]  ;;  %v4607_v20 = vrot.slane %v4605_v55, 4 }
 0x30c   : > { %v5692_v1 = vunpack.c.l.b16 %v5312_v37  ;;  %v11214_v18 = vrot.slane %v4512_v53, 9  ;;  %v5357_v31 = vshll.u32 %v5258_v13, 16  ;;  %v3448_v53 = vld [vmem:[#allocation2 + $0xc4] sm:$0x1] }
 0x311   : > { %11171 = vmatmul.msk.bf16.gmra.mxu2 %vm3653_vm7, %v11942_v25  ;;  %v5324_v25 = vshrl.u32 %v5254_v16, 16 }
 0x313   : > { %v5326_v35 = vrot.slane %v5324_v25, 4  ;;  %v4608_v25 = vrot.slane %v13201_v3, 5 }
 0x315   : > { %v5330_v60 = vor.u32 %v5329_v38, %v5326_v35  ;;  %v11954_v38 = vld [vmem:[#allocation15 + $0x28] sm:$0xff]  ;;  %v4609_v62 = vsel %vm13122_vm2, %v4607_v20, %v4608_v25 }
 0x316   : > { %11243 = vmatmul.msk.bf16.gmra.mxu0 %vm3653_vm7, %v4729_v6  ;;  %v5693_v6 = vunpack.c.l.b16 %v5322_v21  ;;  %v5257_v21 = vld [vmem:[#allocation2 + $0x24] sm:$0xf]  ;;  %4393 = vmatpush.bf16.msrb.mxu3 %v11954_v38 }
 0x317   : > { %11344 = vmatmul.msk.bf16.gmra.mxu1 %vm3653_vm7, %v11967_v27  ;;  %v5331_v16 = vrot.slane %v5330_v60, 4  ;;  %v5348_v35 = vshrl.u32 %v5257_v21, 16 }
 0x318   : > { %v5724_v58 = vpack.c.b16 %v5693_v6, %v5692_v1  ;;  %v3427_v6 = vld [vmem:[#allocation2 + $0x9c] sm:$0xc]  ;;  %v3436_v1 = vld [vmem:[#allocation2 + $0xac] sm:$0x1] }
 0x319   : > { %11174 = vmatmul.msk.bf16.gmra.mxu3 %vm3653_vm7, %v11945_v30  ;;  %v13187_v30 = vrot.slane %v5333_v17, 5  ;;  %v5345_v17 = vrot.slane %v5343_v54, 5 }
 0x31b   : > { %v5340_v40 = vor.u32 %v5339_v15, %v13187_v30 }
 0x321   : > { %11172 = vmatmul.msk.bf16.gmra.mxu2 %vm3653_vm7, %v11943_v42  ;;  %v4731_v42 = vpack.c.b16 %v4703_v34, %v4702_v36  ;;  %v5336_v36 = vsel %vm13092_vm15, %v5331_v16, %v13187_v30  ;;  %v5350_v16 = vrot.slane %v5348_v35, 4  ;;  %v5261_v35 = vld [vmem:[#allocation2 + $0x34] sm:$0xf] }
 0x326   : > { %11244 = vmatmul.msk.bf16.gmra.mxu0 %vm3653_vm7, %v4730_v2  ;;  %v5341_v2 = vrot.slane %v5340_v40, 4  ;;  %v5351_v40 = vshll.u32 %v5257_v21, 16 }
 0x327   : > { %11345 = vmatmul.msk.bf16.gmra.mxu1 %vm3653_vm7, %v11968_v4  ;;  %v3483_v4 = vld [vmem:[#allocation2 + $0xa4] sm:$0x1] }
 0x328   : > { %v5346_v29 = vsel %vm13092_vm15, %v5341_v2, %v5345_v17  ;;  %v13247_v2 = vrot.slane %v5357_v31, 5  ;;  %v5353_v17 = vrot.slane %v5351_v40, 5 }
 0x329   : > { %v5695_v54 = vunpack.c.l.b16 %v5346_v29 }
 0x32a   : > { %v5354_v11 = vor.u32 %v5353_v17, %v5350_v16 }
 0x331   : > { %11370 = vmatmul.msk.bf16.vlgmr.msra.gmra.mxu2 %vm3653_vm7, %v5724_v58 }
 0x333   : > { %v13194_v47 = vpop.f32.mrf.mxu0 }
 0x334   : > { %v13196_v48 = vpop.f32.mrf.mxu1 }
 0x335   : > { %16503 = vst [vmem:[#allocation24_spill] sm:$0xff] %v13196_v48 }
 0x336   : > { %11245 = vmatmul.msk.bf16.gmra.mxu0 %vm3653_vm7, %v4731_v42  ;;  %v3442_v42 = vld [vmem:[#allocation2 + $0xb8] sm:$0x1] }
 0x337   : > { %v3470_v27 = vpop.permute.xlu1 %3469  ;;  %11346 = vmatmul.msk.bf16.gmra.mxu1 %vm3653_vm7, %v11969_v63  ;;  %v4606_v63 = vsel %vm13122_vm2, %v11214_v18, %v4605_v55 }
 0x338   : > { %v3471_v33 = vrot.slane %v3470_v27, 4  ;;  %v4704_v21 = vunpack.c.l.b16 %v4606_v63 }
 0x33a   : > { %v3473_v0 = vpack.i.b16 %v3471_v33, %v3471_v33  ;;  %v5361_v33 = vshrl.u32 %v5258_v13, 16 }
 0x33b   : > { %v13221_v15 = vpop.f32.mrf.mxu0 }
 0x33c   : > { %v3475_v50 = vperm.slane %v3473_v0, 0  ;;  %v13223_v27 = vpop.f32.mrf.mxu1  ;;  %v3433_v0 = vld [vmem:[#allocation2 + $0xa8] sm:$0xc] }
 0x33d   : > { %16504 = vst [vmem:[#allocation25_spill] sm:$0xff] %v13223_v27  ;;  %v4519_v27 = vld [vmem:[#allocation2 + $0x84] sm:$0xe] }
 0x33e   : > { %v3477_v61 = vunpack.c.l.b16 %v3475_v50  ;;  %v3452_v50 = vrot.slane %v12994_v23, 4  ;;  %v5363_v23 = vrot.slane %v5361_v33, 4 }
 0x340   : > { %v13203_v10 = vpack.c.b16 %v3477_v61, %v3477_v61  ;;  %v13206_v51 = vpop.permute.xlu0 %3424  ;;  %v3439_v61 = vld [vmem:[#allocation2 + $0xb4] sm:$0xc]  ;;  %v3454_v55 = vpack.i.b16 %v3452_v50, %v3452_v50 }
 0x341   : > { %v3428_v34 = vsel %vm12936_vm11, %v13206_v51, %v3427_v6  ;;  %v3431_v58 = vsel %vm12943_vm12, %v13206_v51, %v3430_v24  ;;  %v3434_v60 = vsel %vm12936_vm11, %v13206_v51, %v3433_v0  ;;  %v3437_v30 = vsel %vm12943_vm12, %v13206_v51, %v3436_v1  ;;  %v11970_v1 = vld [vmem:[#allocation2 + $0x78] sm:$0xff]  ;;  %v3840_v0 = vld [vmem:[#allocation2 + $0x44] sm:$0x1] }
 0x342   : > { %v3484_v22 = vsel %vm12943_vm12, %v13203_v10, %v3483_v4  ;;  %v3490_v44 = vsel %vm12943_vm12, %v13203_v10, %v3489_v5  ;;  %v3496_v37 = vsel %vm12943_vm12, %v13203_v10, %v3495_v45  ;;  %v3502_v59 = vsel %vm12943_vm12, %v13203_v10, %v3501_v32  ;;  %3429 = vst [vmem:[#allocation2 + $0x9c] sm:$0xc] %v3428_v34  ;;  %v3445_v32 = vld [vmem:[#allocation2 + $0xc0] sm:$0xc] }
 0x343   : > { %3485 = vst [vmem:[#allocation2 + $0xa4] sm:$0x1] %v3484_v22  ;;  %v3440_v4 = vsel %vm12936_vm11, %v13206_v51, %v3439_v61  ;;  %v5694_v5 = vunpack.c.l.b16 %v5336_v36  ;;  %v4705_v45 = vunpack.c.l.b16 %v4609_v62  ;;  %v3443_v13 = vsel %vm12943_vm12, %v13206_v51, %v3442_v42  ;;  %v5259_v22 = vld [vmem:[#allocation2 + $0x2c] sm:$0x1]  ;;  %v13261_v24 = vpop.f32.mrf.mxu0 }
 0x344   : > { %3491 = vst [vmem:[#allocation2 + $0xb0] sm:$0x1] %v3490_v44  ;;  %v3446_v18 = vsel %vm12936_vm11, %v13206_v51, %v3445_v32  ;;  %v3839_v44 = vld [vmem:[#allocation2 + $0x40] sm:$0xf]  ;;  %v13263_v25 = vpop.f32.mrf.mxu1  ;;  %v5367_v29 = vshll.u32 %v5259_v22, 16  ;;  %v3456_v33 = vperm.slane %v3454_v55, 0 }
 0x345   : > { %3497 = vst [vmem:[#allocation2 + $0xbc] sm:$0x1] %v3496_v37  ;;  %v5725_v20 = vpack.c.b16 %v5695_v54, %v5694_v5  ;;  %v3449_v37 = vsel %vm12943_vm12, %v13206_v51, %v3448_v53  ;;  %v4732_v6 = vpack.c.b16 %v4705_v45, %v4704_v21  ;;  %v4612_v31 = vrot.slane %v3839_v44, 5 }
 0x346   : > { %3503 = vst [vmem:[#allocation2 + $0xc8] sm:$0x1] %v3502_v59  ;;  %v5364_v59 = vor.u32 %v5363_v23, %v13247_v2  ;;  %v5369_v62 = vrot.slane %v5367_v29, 5  ;;  %v5355_v42 = vrot.slane %v5354_v11, 4  ;;  %v5381_v54 = vshll.u32 %v5261_v35, 16  ;;  %v11953_v29 = vld [vmem:[#allocation15 + $0x20] sm:$0xff] }
 0x347   : > { %3432 = vst [vmem:[#allocation2 + $0xa0] sm:$0x1] %v3431_v58  ;;  %11371 = vmatmul.msk.bf16.gmra.mxu2 %vm3653_vm7, %v5725_v20  ;;  %11246 = vmatmul.msk.bf16.gmra.mxu0 %vm3653_vm7, %v4732_v6  ;;  %v5260_v58 = vld [vmem:[#allocation2 + $0x30] sm:$0xf]  ;;  %v4614_v40 = vrot.slane %v4612_v31, 4  ;;  %v4615_v53 = vrot.slane %v3840_v0, 5 }
 0x348   : > { %3435 = vst [vmem:[#allocation2 + $0xa8] sm:$0xc] %v3434_v60  ;;  %v5365_v34 = vrot.slane %v5364_v59, 4  ;;  %11347 = vmatmul.msk.bf16.gmra.mxu1 %vm3653_vm7, %v11970_v1  ;;  %v4513_v60 = vld [vmem:[#allocation2 + $0x3c] sm:$0xe]  ;;  %v5372_v45 = vshrl.u32 %v5260_v58, 16  ;;  %4394 = vmatpush.bf16.msrb.mxu3 %v11953_v29 }
 0x349   : > { %3438 = vst [vmem:[#allocation2 + $0xac] sm:$0x1] %v3437_v30  ;;  %v11215_v16 = vrot.slane %v4513_v60, 9  ;;  %v4616_v17 = vsel %vm13122_vm2, %v4614_v40, %v4615_v53  ;;  %v5375_v55 = vshll.u32 %v5260_v58, 16  ;;  %v5383_v22 = vrot.slane %v5381_v54, 5  ;;  %v11971_v60 = vld [vmem:[#allocation2 + $0x84] sm:$0xff] }
 0x34a   : > { %3441 = vst [vmem:[#allocation2 + $0xb4] sm:$0xc] %v3440_v4  ;;  %v5370_v23 = vsel %vm13092_vm15, %v5365_v34, %v5369_v62  ;;  %v5385_v4 = vshrl.u32 %v5261_v35, 16  ;;  %v4707_v6 = vunpack.c.l.b16 %v4616_v17  ;;  %v5262_v1 = vld [vmem:[#allocation2 + $0x38] sm:$0x1]  ;;  %v5374_v11 = vrot.slane %v5372_v45, 4 }
 0x34b   : > { %16505 = vst [vmem:[#allocation26_spill] sm:$0xff] %v13263_v25  ;;  %v13273_v30 = vpop.f32.mrf.mxu0  ;;  %v5697_v20 = vunpack.c.l.b16 %v5370_v23  ;;  %v4613_v21 = vsel %vm13122_vm2, %v11215_v16, %v4612_v31  ;;  %v3842_v35 = vld [vmem:[#allocation2 + $0x4c] sm:$0xf]  ;;  %v5391_v40 = vshll.u32 %v5262_v1, 16  ;;  %v3843_v23 = vld [vmem:[#allocation2 + $0x50] sm:$0x1] }
 0x34c   : > { %3444 = vst [vmem:[#allocation2 + $0xb8] sm:$0x1] %v3443_v13  ;;  %v13275_v63 = vpop.f32.mrf.mxu1  ;;  %v5360_v13 = vsel %vm13092_vm15, %v5355_v42, %v13247_v2  ;;  %v5387_v44 = vrot.slane %v5385_v4, 4  ;;  %v5264_v53 = vld [vmem:[#allocation2 + $0x40] sm:$0xf] }
 0x34d   : > { %3447 = vst [vmem:[#allocation2 + $0xc0] sm:$0xc] %v3446_v18 }
 0x34e   : > { %3450 = vst [vmem:[#allocation2 + $0xc4] sm:$0x1] %v3449_v37  ;;  %v3457_v51 = vld [vmem:[#allocation2 + $0xa0] sm:$0x7]  ;;  %v5696_v37 = vunpack.c.l.b16 %v5360_v13  ;;  %v5388_v0 = vor.u32 %v5387_v44, %v5383_v22  ;;  %v4514_v13 = vld [vmem:[#allocation2 + $0x48] sm:$0xe] }
 0x34f   : > { %v3458_v38 = vsel %vm12836_vm5, %v3456_v33, %v3457_v51  ;;  %16506 = vst [vmem:[#allocation27_spill] sm:$0xff] %v13275_v63  ;;  %v5377_v51 = vrot.slane %v5375_v55, 5  ;;  %v5409_v44 = vshrl.u32 %v5264_v53, 16 }
 0x350   : > { %3459 = vst [vmem:[#allocation2 + $0xa0] sm:$0x7] %v3458_v38  ;;  %v3460_v36 = vld [vmem:[#allocation2 + $0xac] sm:$0x7]  ;;  %v5726_v12 = vpack.c.b16 %v5697_v20, %v5696_v37  ;;  %v5263_v20 = vld [vmem:[#allocation2 + $0x3c] sm:$0xf] }
 0x351   : > { %v3461_v50 = vsel %vm12836_vm5, %v3456_v33, %v3460_v36  ;;  %v5378_v54 = vor.u32 %v5377_v51, %v5374_v11  ;;  %v5399_v1 = vshll.u32 %v5263_v20, 16 }
 0x352   : > { %3462 = vst [vmem:[#allocation2 + $0xac] sm:$0x7] %v3461_v50  ;;  %v4619_v50 = vrot.slane %v3842_v35, 5  ;;  %v3845_v35 = vld [vmem:[#allocation2 + $0x58] sm:$0xf] }
 0x353   : > { %v3463_v61 = vld [vmem:[#allocation2 + $0xb8] sm:$0x7]  ;;  %v13293_v31 = vpop.f32.mrf.mxu0 }
 0x354   : > { %v3464_v5 = vsel %vm12836_vm5, %v3456_v33, %v3463_v61  ;;  %v13295_v38 = vpop.f32.mrf.mxu1  ;;  %v5389_v61 = vrot.slane %v5388_v0, 4  ;;  %v4621_v45 = vrot.slane %v4619_v50, 4 }
 0x355   : > { %3465 = vst [vmem:[#allocation2 + $0xb8] sm:$0x7] %v3464_v5  ;;  %v3466_v32 = vld [vmem:[#allocation2 + $0xc4] sm:$0x7]  ;;  %v5393_v5 = vrot.slane %v5391_v40, 5 }
 0x356   : > { %v3467_v18 = vsel %vm12836_vm5, %v3456_v33, %v3466_v32  ;;  %v4706_v33 = vunpack.c.l.b16 %v4613_v21  ;;  %16507 = vst [vmem:[#allocation28_spill] sm:$0xff] %v13295_v38  ;;  %v5379_v32 = vrot.slane %v5378_v54, 4  ;;  %v5405_v21 = vshll.u32 %v5264_v53, 16 }
 0x357   : > { %3468 = vst [vmem:[#allocation2 + $0xc4] sm:$0x7] %v3467_v18  ;;  %v3480_v59 = vld [vmem:[#allocation2 + $0xa0] sm:$0xc]  ;;  %11372 = vmatmul.msk.bf16.gmra.mxu2 %vm3653_vm7, %v5726_v12  ;;  %v5394_v55 = vsel %vm13092_vm15, %v5389_v61, %v5393_v5  ;;  %v4622_v18 = vrot.slane %v3843_v23, 5  ;;  %v5411_v12 = vrot.slane %v5409_v44, 4 }
 0x358   : > { %v3481_v2 = vsel %vm12936_vm11, %v13203_v10, %v3480_v59  ;;  %v4733_v36 = vpack.c.b16 %v4707_v6, %v4706_v33  ;;  %11348 = vmatmul.msk.bf16.gmra.mxu1 %vm3653_vm7, %v11971_v60  ;;  %v5384_v37 = vsel %vm13092_vm15, %v5379_v32, %v5383_v22  ;;  %v11216_v59 = vrot.slane %v4514_v13, 9  ;;  %v11972_v23 = vld [vmem:[#allocation2 + $0x90] sm:$0xff]  ;;  %v5267_v32 = vld [vmem:[#allocation2 + $0x4c] sm:$0xf] }
 0x359   : > { %3482 = vst [vmem:[#allocation2 + $0xa0] sm:$0xc] %v3481_v2  ;;  %v3486_v34 = vld [vmem:[#allocation2 + $0xac] sm:$0xc]  ;;  %v4623_v6 = vsel %vm13122_vm2, %v4621_v45, %v4622_v18  ;;  %v5699_v29 = vunpack.c.l.b16 %v5394_v55  ;;  %v5396_v2 = vshrl.u32 %v5263_v20, 16  ;;  %v5407_v51 = vrot.slane %v5405_v21, 5 }
 0x35a   : > { %v3487_v58 = vsel %vm12936_vm11, %v13203_v10, %v3486_v34  ;;  %11247 = vmatmul.msk.bf16.gmra.mxu0 %vm3653_vm7, %v4733_v36  ;;  %v4620_v11 = vsel %vm13122_vm2, %v11216_v59, %v4619_v50  ;;  %v5698_v33 = vunpack.c.l.b16 %v5384_v37  ;;  %v4709_v34 = vunpack.c.l.b16 %v4623_v6  ;;  %v5265_v36 = vld [vmem:[#allocation2 + $0x44] sm:$0x1]  ;;  %v3846_v45 = vld [vmem:[#allocation2 + $0x5c] sm:$0x1]  ;;  %v4515_v20 = vld [vmem:[#allocation2 + $0x54] sm:$0xe] }
 0x35b   : > { %3488 = vst [vmem:[#allocation2 + $0xac] sm:$0xc] %v3487_v58  ;;  %v13307_v16 = vpop.f32.mrf.mxu0  ;;  %v4708_v58 = vunpack.c.l.b16 %v4620_v11  ;;  %v5401_v22 = vrot.slane %v5399_v1, 5  ;;  %v4626_v54 = vrot.slane %v3845_v35, 5  ;;  %v5415_v50 = vshll.u32 %v5265_v36, 16  ;;  %v11988_v1 = vld [vmem:[#allocation15 + $0xb8] sm:$0xff] }
 0x35c   : > { %v3492_v62 = vld [vmem:[#allocation2 + $0xb8] sm:$0xc]  ;;  %v13309_v17 = vpop.f32.mrf.mxu1  ;;  %v5727_v0 = vpack.c.b16 %v5699_v29, %v5698_v33  ;;  %v4629_v44 = vrot.slane %v3846_v45, 5  ;;  %v5266_v37 = vld [vmem:[#allocation2 + $0x48] sm:$0xf]  ;;  %v5429_v59 = vshll.u32 %v5267_v32, 16  ;;  %6242 = vmatpush.bf16.msra.mxu3 %v11988_v1 }
 0x35d   : > { %v3493_v42 = vsel %vm12936_vm11, %v13203_v10, %v3492_v62  ;;  %16508 = vst [vmem:[#allocation29_spill] sm:$0xff] %v13309_v17  ;;  %v5398_v62 = vrot.slane %v5396_v2, 4  ;;  %v4734_v60 = vpack.c.b16 %v4709_v34, %v4708_v58  ;;  %v4628_v13 = vrot.slane %v4626_v54, 4  ;;  %v3823_v58 = vld [vmem:[#allocation2] sm:$0xf]  ;;  %v12016_v36 = vld [vmem:[#allocation15 + $0x118] sm:$0xff] }
 0x35e   : > { %3494 = vst [vmem:[#allocation2 + $0xb8] sm:$0xc] %v3493_v42  ;;  %v5412_v42 = vor.u32 %v5411_v12, %v5407_v51  ;;  %v5417_v18 = vrot.slane %v5415_v50, 5  ;;  %v5433_v6 = vshrl.u32 %v5267_v32, 16  ;;  %v11217_v12 = vrot.slane %v4515_v20, 9  ;;  %7665 = vmatpush.bf16.msrb.mxu2 %v12016_v36 }
 0x35f   : > { %v5402_v53 = vor.u32 %v5401_v22, %v5398_v62  ;;  %v4630_v33 = vsel %vm13122_vm2, %v4628_v13, %v4629_v44  ;;  %v5420_v35 = vshrl.u32 %v5266_v37, 16  ;;  %v3875_v45 = vshrl.u32 %v3823_v58, 16 }
 0x360   : > { %v11946_v4 = vld [vmem:[#allocation2 + $0x9c] sm:$0xff]  ;;  %v5413_v5 = vrot.slane %v5412_v42, 4  ;;  %v4627_v22 = vsel %vm13122_vm2, %v11217_v12, %v4626_v54  ;;  %v13341_v42 = vrot.slane %v5429_v59, 5  ;;  %v3878_v32 = vshll.u32 %v3823_v58, 16 }
 0x361   : > { %11175 = vmatmul.msk.bf16.gmra.mxu3 %vm3653_vm7, %v11946_v4  ;;  %v5403_v21 = vrot.slane %v5402_v53, 4  ;;  %v5268_v53 = vld [vmem:[#allocation2 + $0x50] sm:$0x1]  ;;  %v3884_v13 = vshll.u32 %v13082_v14, 16  ;;  %v4710_v20 = vunpack.c.l.b16 %v4627_v22  ;;  %v5422_v54 = vrot.slane %v5420_v35, 4 }
 0x362   : > { %v11947_v55 = vld [vmem:[#allocation2 + $0xa8] sm:$0xff]  ;;  %v5418_v2 = vsel %vm13092_vm15, %v5413_v5, %v5417_v18  ;;  %v13345_v5 = vld [vmem:[#allocation2 + $0x64] sm:$0xf]  ;;  %v12008_v18 = vld [vmem:[#allocation15 + $0xd8] sm:$0xff]  ;;  %v3877_v12 = vrot.slane %v3875_v45, 4 }
 0x363   : > { %v13319_v40 = vpop.f32.mrf.mxu0  ;;  %v5408_v11 = vsel %vm13092_vm15, %v5403_v21, %v5407_v51  ;;  %v5701_v62 = vunpack.c.l.b16 %v5418_v2  ;;  %6557 = vmatpush.bf16.msra.mxu0 %v12008_v18  ;;  %v5439_v2 = vshll.u32 %v5268_v53, 16  ;;  %v4633_v1 = vrot.slane %v13345_v5, 5  ;;  %v5269_v35 = vld [vmem:[#allocation2 + $0x54] sm:$0xf]  ;;  %v3849_v53 = vld [vmem:[#allocation2 + $0x68] sm:$0x1] }
 0x364   : > { %v13322_v61 = vpop.f32.mrf.mxu1  ;;  %v13325_v4 = vpop.f32.mrf.mxu2  ;;  %v5700_v51 = vunpack.c.l.b16 %v5408_v11  ;;  %v12012_v11 = vld [vmem:[#allocation15 + $0xf8] sm:$0xff]  ;;  %v5444_v5 = vshrl.u32 %v5269_v35, 16 }
 0x365   : > { %16509 = vst [vmem:[#allocation30_spill] sm:$0xff] %v13322_v61  ;;  %7239 = vmatpush.bf16.msra.mxu1 %v12012_v11  ;;  %v4635_v18 = vrot.slane %v4633_v1, 4 }
 0x366   : > { %v5728_v44 = vpack.c.b16 %v5701_v62, %v5700_v51  ;;  %v11973_v62 = vld [vmem:[#allocation2 + $0x9c] sm:$0xff] }
 0x367   : > { %11373 = vmatmul.msk.bf16.gmra.mxu2 %vm3653_vm7, %v5727_v0  ;;  %v5423_v0 = vshll.u32 %v5266_v37, 16 }
 0x368   : > { %11349 = vmatmul.msk.bf16.gmra.mxu1 %vm3653_vm7, %v11972_v23  ;;  %v4711_v23 = vunpack.c.l.b16 %v4630_v33  ;;  %v3880_v33 = vrot.slane %v3878_v32, 5 }
 0x369   : > { %v5425_v21 = vrot.slane %v5423_v0, 5 }
 0x36a   : > { %11248 = vmatmul.msk.bf16.gmra.mxu0 %vm3653_vm7, %v4734_v60  ;;  %v5435_v60 = vrot.slane %v5433_v6, 4  ;;  %v4735_v6 = vpack.c.b16 %v4711_v23, %v4710_v20  ;;  %v5441_v23 = vrot.slane %v5439_v2, 5  ;;  %v3881_v45 = vor.u32 %v3880_v33, %v3877_v12  ;;  %v11948_v20 = vld [vmem:[#allocation2 + $0xb4] sm:$0xff] }
 0x36b   : > { %v13329_v29 = vpop.f32.mrf.mxu0  ;;  %v5426_v0 = vor.u32 %v5425_v21, %v5422_v54  ;;  %v5447_v21 = vshll.u32 %v5269_v35, 16  ;;  %v4636_v2 = vrot.slane %v3849_v53, 5  ;;  %v5446_v33 = vrot.slane %v5444_v5, 4  ;;  %v5273_v53 = vld [vmem:[#allocation2 + $0x64] sm:$0xf] }
 0x36c   : > { %v13337_v34 = vpop.f32.mrf.mxu1  ;;  %v13343_v50 = vpop.f32.mrf.mxu2  ;;  %v5436_v37 = vor.u32 %v5435_v60, %v13341_v42  ;;  %v5270_v60 = vld [vmem:[#allocation2 + $0x58] sm:$0xf]  ;;  %v5272_v5 = vld [vmem:[#allocation2 + $0x60] sm:$0xf] }
 0x36d   : > { %16510 = vst [vmem:[#allocation31_spill] sm:$0xff] %v13337_v34  ;;  %v5427_v54 = vrot.slane %v5426_v0, 4  ;;  %v4637_v35 = vsel %vm13122_vm2, %v4635_v18, %v4636_v2  ;;  %v5449_v43 = vrot.slane %v5447_v21, 5  ;;  %v5481_v21 = vshrl.u32 %v5273_v53, 16 }
 0x36e   : > { %v5437_v22 = vrot.slane %v5436_v37, 4  ;;  %v5457_v37 = vshrl.u32 %v5270_v60, 16 }
 0x36f   : > { %v5432_v12 = vsel %vm13092_vm15, %v5427_v54, %v13341_v42  ;;  %v5477_v54 = vshll.u32 %v5273_v53, 16 }
 0x370   : > { %v5702_v42 = vunpack.c.l.b16 %v5432_v12  ;;  %v13388_v12 = vld [vmem:[#allocation2 + $0x70] sm:$0xf] }
 0x371   : > { %11176 = vmatmul.msk.bf16.gmra.mxu3 %vm3653_vm7, %v11947_v55  ;;  %v3888_v55 = vshrl.u32 %v13082_v14, 16  ;;  %v13354_v14 = vrot.slane %v3884_v13, 5  ;;  %v3894_v13 = vshll.u32 %v13099_v49, 16 }
 0x373   : > { %v13350_v59 = vpop.f32.mrf.mxu0  ;;  %v3890_v58 = vrot.slane %v3888_v55, 4  ;;  %v4516_v55 = vld [vmem:[#allocation2 + $0x60] sm:$0xe]  ;;  %v3896_v0 = vrot.slane %v3894_v13, 5 }
 0x374   : > { %v13356_v36 = vpop.f32.mrf.mxu1  ;;  %v13359_v51 = vpop.f32.mrf.mxu2  ;;  %v11218_v49 = vrot.slane %v4516_v55, 9  ;;  %v4713_v55 = vunpack.c.l.b16 %v4637_v35  ;;  %v5471_v35 = vshll.u32 %v5272_v5, 16 }
 0x375   : > { %16511 = vst [vmem:[#allocation32_spill] sm:$0xff] %v13356_v36  ;;  %v3891_v32 = vor.u32 %v3890_v58, %v13354_v14  ;;  %v3882_v58 = vrot.slane %v3881_v45, 4  ;;  %v3829_v45 = vld [vmem:[#allocation2 + $0x18] sm:$0xf] }
 0x376   : > { %v3926_v34 = vshll.u32 %v3829_v45, 16 }
 0x377   : > { %11374 = vmatmul.msk.bf16.gmra.mxu2 %vm3653_vm7, %v5728_v44  ;;  %v5453_v44 = vshll.u32 %v5270_v60, 16  ;;  %v3887_v13 = vsel %vm13092_vm15, %v3882_v58, %v13354_v14 }
 0x378   : > { %11350 = vmatmul.msk.bf16.gmra.mxu1 %vm3653_vm7, %v11973_v62  ;;  %v3892_v62 = vrot.slane %v3891_v32, 4  ;;  %v4267_v14 = vunpack.c.l.b16 %v3887_v13  ;;  %v5473_v13 = vrot.slane %v5471_v35, 5  ;;  %v3928_v17 = vrot.slane %v3926_v34, 5 }
 0x37a   : > { %11249 = vmatmul.msk.bf16.gmra.mxu0 %vm3653_vm7, %v4735_v6  ;;  %v5442_v6 = vsel %vm13092_vm15, %v5437_v22, %v5441_v23  ;;  %v13374_v22 = vrot.slane %v5453_v44, 5  ;;  %v5459_v23 = vrot.slane %v5457_v37, 4  ;;  %v3897_v18 = vsel %vm13092_vm15, %v3892_v62, %v3896_v0 }
 0x37b   : > { %v13367_v11 = vpop.f32.mrf.mxu0  ;;  %v5703_v60 = vunpack.c.l.b16 %v5442_v6  ;;  %v5450_v6 = vor.u32 %v5449_v43, %v5446_v33  ;;  %v4268_v58 = vunpack.c.l.b16 %v3897_v18  ;;  %v3932_v62 = vshll.u32 %v13154_v9, 16 }
 0x37c   : > { %v13378_v36 = vpop.f32.mrf.mxu2  ;;  %v13380_v32 = vpop.f32.mrf.mxu1  ;;  %v5460_v2 = vor.u32 %v5459_v23, %v13374_v22  ;;  %v3936_v0 = vshrl.u32 %v13154_v9, 16  ;;  %v13395_v33 = vrot.slane %v5477_v54, 5  ;;  %v5483_v23 = vrot.slane %v5481_v21, 4 }
 0x37d   : > { %16512 = vst [vmem:[#allocation33_spill] sm:$0xff] %v13380_v32  ;;  %v5729_v44 = vpack.c.b16 %v5703_v60, %v5702_v42  ;;  %v3923_v32 = vshrl.u32 %v3829_v45, 16  ;;  %v5451_v53 = vrot.slane %v5450_v6, 4  ;;  %v4640_v42 = vrot.slane %v13388_v12, 5 }
 0x37e   : > { %v4299_v9 = vpack.c.b16 %v4268_v58, %v4267_v14  ;;  %v3938_v54 = vrot.slane %v3936_v0, 4  ;;  %v5484_v6 = vor.u32 %v5483_v23, %v13395_v33  ;;  %v4517_v14 = vld [vmem:[#allocation2 + $0x6c] sm:$0xe] }
 0x37f   : > { %v3925_v18 = vrot.slane %v3923_v32, 4  ;;  %v5456_v32 = vsel %vm13092_vm15, %v5451_v53, %v13374_v22  ;;  %v4642_v34 = vrot.slane %v4640_v42, 4 }
 0x380   : > { %v5704_v53 = vunpack.c.l.b16 %v5456_v32 }
 0x381   : > { %11177 = vmatmul.msk.bf16.gmra.mxu3 %vm3653_vm7, %v11948_v20  ;;  %v4634_v20 = vsel %vm13122_vm2, %v11218_v49, %v4633_v1  ;;  %v5271_v1 = vld [vmem:[#allocation2 + $0x5c] sm:$0x1]  ;;  %v5468_v49 = vshrl.u32 %v5272_v5, 16  ;;  %v11974_v5 = vld [vmem:[#allocation2 + $0xa8] sm:$0xff]  ;;  %v3929_v0 = vor.u32 %v3928_v17, %v3925_v18 }
 0x382   : > { %v4712_v37 = vunpack.c.l.b16 %v4634_v20  ;;  %v5463_v43 = vshll.u32 %v5271_v1, 16  ;;  %v5461_v20 = vrot.slane %v5460_v2, 4  ;;  %v3852_v1 = vld [vmem:[#allocation2 + $0x74] sm:$0x1]  ;;  %v3498_v2 = vld [vmem:[#allocation2 + $0xc4] sm:$0xc] }
 0x383   : > { %v13390_v61 = vpop.f32.mrf.mxu0  ;;  %v5470_v45 = vrot.slane %v5468_v49, 4  ;;  %v3499_v12 = vsel %vm12936_vm11, %v13203_v10, %v3498_v2  ;;  %v4643_v22 = vrot.slane %v3852_v1, 5  ;;  %v5485_v10 = vrot.slane %v5484_v6, 4 }
 0x384   : > { %16513 = vst [vmem:[#allocation34_spill] sm:$0xff] %v13390_v61  ;;  %v4736_v60 = vpack.c.b16 %v4713_v55, %v4712_v37  ;;  %v13399_v38 = vpop.f32.mrf.mxu2  ;;  %v13401_v55 = vrot.slane %v3932_v62, 5  ;;  %v3832_v37 = vld [vmem:[#allocation2 + $0x24] sm:$0xf]  ;;  %v5465_v21 = vrot.slane %v5463_v43, 5  ;;  %v13411_v49 = vpop.f32.mrf.mxu1 }
 0x385   : > { %16514 = vst [vmem:[#allocation35_spill] sm:$0xff] %v13411_v49  ;;  %v5474_v58 = vor.u32 %v5473_v13, %v5470_v45  ;;  %v3947_v23 = vshrl.u32 %v3832_v37, 16  ;;  %v3950_v19 = vshll.u32 %v3832_v37, 16  ;;  %v3942_v45 = vshll.u32 %v13161_v28, 16  ;;  %v12011_v13 = vld [vmem:[#allocation15 + $0xf0] sm:$0xff]  ;;  %v12010_v28 = vld [vmem:[#allocation15 + $0xe8] sm:$0xff] }
 0x386   : > { %v5466_v35 = vsel %vm13092_vm15, %v5461_v20, %v5465_v21  ;;  %3500 = vst [vmem:[#allocation2 + $0xc4] sm:$0xc] %v3499_v12  ;;  %v3939_v43 = vor.u32 %v3938_v54, %v13401_v55  ;;  %v4644_v20 = vsel %vm13122_vm2, %v4642_v34, %v4643_v22  ;;  %v6674_v21 = vld [vmem:[#allocation2 + $0x18] sm:$0xf]  ;;  %7240 = vmatpush.bf16.msra.mxu1 %v12011_v13  ;;  %v3956_v12 = vshll.u32 %v13170_v41, 16 }
 0x387   : > { %11375 = vmatmul.msk.bf16.gmra.mxu2 %vm3653_vm7, %v5729_v44  ;;  %v5274_v44 = vld [vmem:[#allocation2 + $0x68] sm:$0x1]  ;;  %v5705_v17 = vunpack.c.l.b16 %v5466_v35  ;;  %v5475_v18 = vrot.slane %v5474_v58, 4  ;;  %v3949_v1 = vrot.slane %v3947_v23, 4  ;;  %v3952_v6 = vrot.slane %v3950_v19, 5 }
 0x388   : > { %11351 = vmatmul.msk.bf16.gmra.mxu1 %vm3653_vm7, %v11974_v5  ;;  %v5487_v62 = vshll.u32 %v5274_v44, 16  ;;  %v11219_v5 = vrot.slane %v4517_v14, 9  ;;  %v3940_v37 = vrot.slane %v3939_v43, 4  ;;  %v4715_v32 = vunpack.c.l.b16 %v4644_v20  ;;  %v6675_v14 = vld [vmem:[#allocation2 + $0x1c] sm:$0xf] }
 0x389   : > { %v3960_v35 = vshrl.u32 %v13170_v41, 16  ;;  %v3944_v58 = vrot.slane %v3942_v45, 5  ;;  %v5730_v22 = vpack.c.b16 %v5705_v17, %v5704_v53  ;;  %v13436_v23 = vld [vmem:[#allocation2 + $0x7c] sm:$0xf]  ;;  %v3953_v53 = vor.u32 %v3952_v6, %v3949_v1 }
 0x38a   : > { %11250 = vmatmul.msk.bf16.gmra.mxu0 %vm3653_vm7, %v4736_v60  ;;  %v5489_v44 = vrot.slane %v5487_v62, 5  ;;  %v4641_v54 = vsel %vm13122_vm2, %v11219_v5, %v4640_v42  ;;  %v6723_v62 = vshrl.u32 %v6674_v21, 16  ;;  %v5480_v42 = vsel %vm13092_vm15, %v5475_v18, %v13395_v33  ;;  %7241 = vmatpush.bf16.msra.mxu1 %v12010_v28  ;;  %v12009_v18 = vld [vmem:[#allocation15 + $0xe0] sm:$0xff] }
 0x38b   : > { %v13416_v60 = vpop.f32.mrf.mxu0  ;;  %v4714_v49 = vunpack.c.l.b16 %v4641_v54  ;;  %v3945_v41 = vsel %vm13092_vm15, %v3940_v37, %v3944_v58  ;;  %v6732_v5 = vshll.u32 %v6675_v14, 16  ;;  %v3958_v45 = vrot.slane %v3956_v12, 5  ;;  %v11975_v54 = vld [vmem:[#allocation2 + $0xb4] sm:$0xff]  ;;  %v5276_v58 = vld [vmem:[#allocation2 + $0x70] sm:$0xf] }
 0x38c   : > { %16515 = vst [vmem:[#allocation36_spill] sm:$0xff] %v13416_v60  ;;  %v13422_v2 = vpop.f32.mrf.mxu2  ;;  %v5490_v34 = vsel %vm13092_vm15, %v5485_v10, %v5489_v44  ;;  %v13444_v20 = vpop.f32.mrf.mxu1  ;;  %v3962_v13 = vrot.slane %v3960_v35, 4  ;;  %v4647_v17 = vrot.slane %v13436_v23, 5  ;;  %v6676_v44 = vld [vmem:[#allocation2 + $0x20] sm:$0x1]  ;;  %v13449_v37 = vunpack.c.l.b16 %v5480_v42 }
 0x38d   : > { %v13440_v10 = vunpack.c.l.b16 %v5490_v34  ;;  %16517 = vst [vmem:[#allocation38_spill] sm:$0xff] %v13444_v20  ;;  %v4737_v33 = vpack.c.b16 %v4715_v32, %v4714_v49  ;;  %v13451_v1 = vunpack.c.l.b16 %v3945_v41  ;;  %v3966_v6 = vshll.u32 %v13176_v8, 16  ;;  %v3835_v34 = vld [vmem:[#allocation2 + $0x30] sm:$0xf]  ;;  %v6677_v41 = vld [vmem:[#allocation2 + $0x24] sm:$0xf] }
 0x38e   : > { %7242 = vmatpush.bf16.msra.mxu1 %v12009_v18  ;;  %v3954_v28 = vrot.slane %v3953_v53, 4  ;;  %v13458_v12 = vrot.slane %v6732_v5, 5  ;;  %v4649_v8 = vrot.slane %v4647_v17, 4  ;;  %v3971_v23 = vshrl.u32 %v3835_v34, 16  ;;  %v4518_v53 = vld [vmem:[#allocation2 + $0x78] sm:$0xe] }
 0x38f   : > { %v5731_v35 = vpack.c.b16 %v13440_v10, %v13449_v37  ;;  %v3968_v5 = vrot.slane %v3966_v6, 5  ;;  %v3980_v18 = vshll.u32 %v13192_v46, 16  ;;  %v16519_v10 = vpack.c.b16 %v13134_v57, %v13132_v56 }
 0x390   : > { %v3959_v42 = vsel %vm13092_vm15, %v3954_v28, %v3958_v45  ;;  %v11220_v28 = vrot.slane %v4518_v53, 9 }
 0x391   : > { %11194 = vmatmul.msk.bf16.vlgmr.msrb.gmra.mxu3 %vm3653_vm7, %v4299_v9  ;;  %v3930_v9 = vrot.slane %v3929_v0, 4  ;;  %v6726_v0 = vshll.u32 %v6674_v21, 16  ;;  %v13475_v37 = vunpack.c.l.b16 %v3959_v42 }
 0x393   : > { %v3935_v43 = vsel %vm13092_vm15, %v3930_v9, %v13401_v55  ;;  %v13438_v19 = vpop.f32.mrf.mxu0  ;;  %v6736_v55 = vshrl.u32 %v6675_v14, 16  ;;  %v6725_v9 = vrot.slane %v6723_v62, 4  ;;  %v6728_v21 = vrot.slane %v6726_v0, 5  ;;  %v3855_v14 = vld [vmem:[#allocation2 + $0x80] sm:$0x1] }
 0x394   : > { %16516 = vst [vmem:[#allocation37_spill] sm:$0xff] %v13438_v19  ;;  %v13454_v49 = vpop.f32.mrf.mxu2  ;;  %v13456_v32 = vunpack.c.l.b16 %v3935_v43  ;;  %v3963_v62 = vor.u32 %v3962_v13, %v3958_v45  ;;  %v5501_v45 = vshll.u32 %v5276_v58, 16 }
 0x395   : > { %16518 = vst [vmem:[#allocation39_spill] sm:$0xff] %v13454_v49  ;;  %v6738_v0 = vrot.slane %v6736_v55, 4  ;;  %v6729_v43 = vor.u32 %v6728_v21, %v6725_v9  ;;  %v4650_v55 = vrot.slane %v3855_v14, 5  ;;  %v5505_v9 = vshrl.u32 %v5276_v58, 16  ;;  %v13482_v14 = vpop.f32.mrf.mxu1 }
 0x396   : > { %v3984_v21 = vshrl.u32 %v13192_v46, 16  ;;  %16521 = vst [vmem:[#allocation41_spill] sm:$0xff] %v13482_v14  ;;  %v13484_v46 = vrot.slane %v3980_v18, 5  ;;  %v6747_v18 = vshrl.u32 %v6677_v41, 16 }
 0x397   : > { %11376 = vmatmul.msk.bf16.gmra.mxu2 %vm3653_vm7, %v5730_v22  ;;  %v6742_v22 = vshll.u32 %v6676_v44, 16  ;;  %v5275_v44 = vld [vmem:[#allocation2 + $0x6c] sm:$0xf]  ;;  %v6739_v6 = vor.u32 %v6738_v0, %v13458_v12  ;;  %v4651_v56 = vsel %vm13122_vm2, %v4649_v8, %v4650_v55  ;;  %v6730_v57 = vrot.slane %v6729_v43, 4 }
 0x398   : > { %11352 = vmatmul.msk.bf16.gmra.mxu1 %vm3653_vm7, %v11975_v54  ;;  %v3964_v54 = vrot.slane %v3963_v62, 4  ;;  %v5492_v20 = vshrl.u32 %v5275_v44, 16  ;;  %v5495_v58 = vshll.u32 %v5275_v44, 16  ;;  %v6678_v62 = vld [vmem:[#allocation2 + $0x28] sm:$0xf]  ;;  %v4648_v0 = vsel %vm13122_vm2, %v11220_v28, %v4647_v17 }
 0x399   : > { %v5507_v53 = vrot.slane %v5505_v9, 4  ;;  %v3986_v8 = vrot.slane %v3984_v21, 4  ;;  %v4717_v43 = vunpack.c.l.b16 %v4651_v56  ;;  %v6740_v55 = vrot.slane %v6739_v6, 4  ;;  %v5277_v17 = vld [vmem:[#allocation2 + $0x74] sm:$0x1] }
 0x39a   : > { %11251 = vmatmul.msk.bf16.gmra.mxu0 %vm3653_vm7, %v4737_v33  ;;  %v3974_v33 = vshll.u32 %v3835_v34, 16  ;;  %v13478_v34 = vrot.slane %v6742_v22, 5  ;;  %v13490_v22 = vrot.slane %v5501_v45, 5  ;;  %v3990_v44 = vshll.u32 %v13201_v3, 16  ;;  %v13498_v9 = vld [vmem:[#allocation2 + $0x88] sm:$0xf] }
 0x39b   : > { %v13472_v13 = vpop.f32.mrf.mxu0  ;;  %v6756_v14 = vshll.u32 %v6678_v62, 16  ;;  %v4716_v25 = vunpack.c.l.b16 %v4648_v0  ;;  %v5494_v45 = vrot.slane %v5492_v20, 4  ;;  %v5497_v28 = vrot.slane %v5495_v58, 5 }
 0x39c   : > { %16520 = vst [vmem:[#allocation40_spill] sm:$0xff] %v13472_v13  ;;  %v3976_v63 = vrot.slane %v3974_v33, 5  ;;  %v13486_v42 = vpop.f32.mrf.mxu2  ;;  %v6735_v33 = vsel %vm13092_vm15, %v6730_v57, %v13458_v12  ;;  %v6760_v13 = vshrl.u32 %v6678_v62, 16  ;;  %v3987_v3 = vor.u32 %v3986_v8, %v13484_v46  ;;  %v13506_v12 = vld [vmem:[#allocation2 + $0x58] sm:$0xf] }
 0x39d   : > { %16522 = vst [vmem:[#allocation42_spill] sm:$0xff] %v13486_v42  ;;  %v6750_v6 = vshll.u32 %v6677_v41, 16  ;;  %v4738_v57 = vpack.c.b16 %v4717_v43, %v4716_v25  ;;  %v6745_v20 = vsel %vm13092_vm15, %v6740_v55, %v13478_v34  ;;  %v13512_v58 = vunpack.c.l.b16 %v6735_v33  ;;  %v6680_v8 = vld [vmem:[#allocation2 + $0x30] sm:$0xf]  ;;  %v11976_v25 = vld [vmem:[#allocation2 + $0xc0] sm:$0xff] }
 0x39e   : > { %v5511_v62 = vshll.u32 %v5277_v17, 16  ;;  %v4654_v0 = vrot.slane %v13498_v9, 5  ;;  %v6762_v41 = vrot.slane %v6760_v13, 4  ;;  %v6749_v34 = vrot.slane %v6747_v18, 4  ;;  %v13530_v13 = vld [vmem:[#allocation2 + $0x5c] sm:$0x1] }
 0x39f   : > { %v13527_v17 = vrot.slane %v3987_v3, 4  ;;  %v6752_v9 = vrot.slane %v6750_v6, 5  ;;  %v7460_v48 = vrot.slane %v13530_v13, 5 }
 0x3a0   : > { %v5513_v3 = vrot.slane %v5511_v62, 5  ;;  %v4656_v55 = vrot.slane %v4654_v0, 4 }
 0x3a1   : > { %11195 = vmatmul.msk.bf16.gmra.mxu3 %vm3653_vm7, %v16519_v10  ;;  %v3973_v10 = vrot.slane %v3971_v23, 4  ;;  %v3969_v23 = vsel %vm13092_vm15, %v3964_v54, %v3968_v5  ;;  %v5508_v5 = vor.u32 %v5507_v53, %v13490_v22  ;;  %v13519_v53 = vrot.slane %v6756_v14, 5 }
 0x3a2   : > { %v13503_v54 = vunpack.c.l.b16 %v3969_v23  ;;  %v6681_v23 = vld [vmem:[#allocation2 + $0x34] sm:$0xf]  ;;  %v6753_v61 = vor.u32 %v6752_v9, %v6749_v34 }
 0x3a3   : > { %v3977_v21 = vor.u32 %v3976_v63, %v3973_v10  ;;  %v13500_v56 = vpop.f32.mrf.mxu0  ;;  %v13514_v63 = vrot.slane %v3990_v44, 5  ;;  %v13516_v10 = vld [vmem:[#allocation2 + $0x2c] sm:$0x1]  ;;  %v5509_v33 = vrot.slane %v5508_v5, 4  ;;  %v6774_v5 = vshll.u32 %v6680_v8, 16 }
 0x3a4   : > { %16523 = vst [vmem:[#allocation43_spill] sm:$0xff] %v13500_v56  ;;  %v13525_v44 = vpop.f32.mrf.mxu2  ;;  %v6766_v14 = vshll.u32 %v13516_v10, 16  ;;  %v13532_v56 = vpop.f32.mrf.mxu1  ;;  %v6763_v6 = vor.u32 %v6762_v41, %v13519_v53  ;;  %v6780_v10 = vshll.u32 %v6681_v23, 16  ;;  %v6784_v60 = vshrl.u32 %v6681_v23, 16  ;;  %v11987_v23 = vld [vmem:[#allocation15 + $0xb0] sm:$0xff] }
 0x3a5   : > { %v13522_v43 = vrot.slane %v3977_v21, 4  ;;  %16524 = vst [vmem:[#allocation44_spill] sm:$0xff] %v13525_v44  ;;  %v5279_v21 = vld [vmem:[#allocation2 + $0x7c] sm:$0xf]  ;;  %v5514_v62 = vsel %vm13092_vm15, %v5509_v33, %v5513_v3  ;;  %6243 = vmatpush.bf16.msra.mxu3 %v11987_v23 }
 0x3a6   : > { %16525 = vst [vmem:[#allocation45_spill] sm:$0xff] %v13532_v56  ;;  %v16526_v56 = vrot.slane %v13506_v12, 5  ;;  %v5529_v7 = vshrl.u32 %v5279_v21, 16  ;;  %v13560_v3 = vrot.slane %v6780_v10, 5 }
 0x3a7   : > { %11377 = vmatmul.msk.bf16.gmra.mxu2 %vm3653_vm7, %v5731_v35  ;;  %v5498_v35 = vor.u32 %v5497_v28, %v5494_v45  ;;  %v3858_v45 = vld [vmem:[#allocation2 + $0x8c] sm:$0x1]  ;;  %v13537_v28 = vunpack.c.l.b16 %v6745_v20  ;;  %v16527_v20 = vpack.c.b16 %v13451_v1, %v13456_v32  ;;  %v11221_v32 = vrot.slane %v4519_v27, 9 }
 0x3a8   : > { %11353 = vmatmul.msk.bf16.gmra.mxu1 %vm3653_vm7, %v11976_v25  ;;  %v7459_v25 = vrot.slane %v16526_v56, 4  ;;  %v4657_v41 = vrot.slane %v3858_v45, 5  ;;  %v6776_v56 = vrot.slane %v6774_v5, 5  ;;  %v12015_v45 = vld [vmem:[#allocation15 + $0x110] sm:$0xff]  ;;  %v6682_v5 = vld [vmem:[#allocation2 + $0x38] sm:$0x1]  ;;  %v3983_v10 = vsel %vm13092_vm15, %v13522_v43, %v13484_v46 }
 0x3a9   : > { %v5499_v19 = vrot.slane %v5498_v35, 4  ;;  %v5525_v35 = vshll.u32 %v5279_v21, 16  ;;  %v5709_v21 = vunpack.c.l.b16 %v5514_v62  ;;  %v5531_v27 = vrot.slane %v5529_v7, 4  ;;  %7666 = vmatpush.bf16.msrb.mxu2 %v12015_v45 }
 0x3aa   : > { %11252 = vmatmul.msk.bf16.gmra.mxu0 %vm3653_vm7, %v4738_v57  ;;  %v6771_v57 = vshrl.u32 %v6680_v8, 16  ;;  %v5278_v8 = vld [vmem:[#allocation2 + $0x78] sm:$0xf]  ;;  %v13553_v42 = vsel %vm13122_vm2, %v7459_v25, %v7460_v48  ;;  %v4658_v33 = vsel %vm13122_vm2, %v4656_v55, %v4657_v41  ;;  %v4655_v48 = vsel %vm13122_vm2, %v11221_v32, %v4654_v0  ;;  %v5280_v32 = vld [vmem:[#allocation2 + $0x80] sm:$0x1] }
 0x3ab   : > { %v13547_v18 = vpop.f32.mrf.mxu0  ;;  %v5504_v1 = vsel %vm13092_vm15, %v5499_v19, %v13490_v22  ;;  %v5516_v34 = vshrl.u32 %v5278_v8, 16  ;;  %v5519_v9 = vshll.u32 %v5278_v8, 16  ;;  %v13566_v25 = vrot.slane %v5525_v35, 5  ;;  %v12007_v19 = vld [vmem:[#allocation15 + $0xd0] sm:$0xff]  ;;  %v3838_v8 = vld [vmem:[#allocation2 + $0x3c] sm:$0xf] }
 0x3ac   : > { %16528 = vst [vmem:[#allocation46_spill] sm:$0xff] %v13547_v18  ;;  %v6773_v44 = vrot.slane %v6771_v57, 4  ;;  %v6764_v57 = vrot.slane %v6763_v6, 4  ;;  %v6786_v22 = vrot.slane %v6784_v60, 4  ;;  %v5708_v55 = vunpack.c.l.b16 %v5504_v1  ;;  %6558 = vmatpush.bf16.msra.mxu0 %v12007_v19  ;;  %v13576_v23 = vpop.f32.mrf.mxu1  ;;  %v13578_v18 = vld [vmem:[#allocation2 + $0x94] sm:$0xf] }
 0x3ad   : > { %v4719_v41 = vunpack.c.l.b16 %v4658_v33  ;;  %v6768_v6 = vrot.slane %v6766_v14, 5  ;;  %v3993_v62 = vsel %vm13092_vm15, %v13527_v17, %v13514_v63  ;;  %v6754_v0 = vrot.slane %v6753_v61, 4  ;;  %16530 = vst [vmem:[#allocation48_spill] sm:$0xff] %v13576_v23 }
 0x3ae   : > { %v6777_v7 = vor.u32 %v6776_v56, %v6773_v44  ;;  %v6790_v35 = vshll.u32 %v6682_v5, 16  ;;  %v5732_v60 = vpack.c.b16 %v5709_v21, %v5708_v55  ;;  %v4718_v1 = vunpack.c.l.b16 %v4655_v48 }
 0x3af   : > { %v5518_v33 = vrot.slane %v5516_v34, 4  ;;  %v5521_v45 = vrot.slane %v5519_v9, 5  ;;  %v7147_v43 = vpack.c.b16 %v13537_v28, %v13512_v58  ;;  %v5532_v61 = vor.u32 %v5531_v27, %v13566_v25  ;;  %v3841_v34 = vld [vmem:[#allocation2 + $0x48] sm:$0xf] }
 0x3b0   : > { %v6769_v63 = vsel %vm13092_vm15, %v6764_v57, %v6768_v6  ;;  %v6787_v44 = vor.u32 %v6786_v22, %v13560_v3  ;;  %v4739_v17 = vpack.c.b16 %v4719_v41, %v4718_v1  ;;  %v13589_v14 = vunpack.c.l.b16 %v3983_v10  ;;  %v6683_v57 = vld [vmem:[#allocation2 + $0x3c] sm:$0xf] }
 0x3b1   : > { %11196 = vmatmul.msk.bf16.gmra.mxu3 %vm3653_vm7, %v16527_v20  ;;  %v13562_v20 = vpop.f32.mrf.mxu2  ;;  %v13591_v56 = vunpack.c.l.b16 %v3993_v62  ;;  %v6759_v21 = vsel %vm13092_vm15, %v6754_v0, %v13519_v53  ;;  %v5535_v58 = vshll.u32 %v5280_v32, 16  ;;  %v4661_v28 = vrot.slane %v13578_v18, 5  ;;  %v13605_v18 = vpop.f32.mrf.mxu3  ;;  %v3861_v0 = vld [vmem:[#allocation2 + $0x98] sm:$0x1] }
 0x3b2   : > { %16529 = vst [vmem:[#allocation47_spill] sm:$0xff] %v13562_v20  ;;  %v3995_v9 = vshrl.u32 %v3838_v8, 16  ;;  %v6778_v5 = vrot.slane %v6777_v7, 4  ;;  %v5522_v48 = vor.u32 %v5521_v45, %v5518_v33  ;;  %v13598_v27 = vunpack.c.l.b16 %v6769_v63 }
 0x3b3   : > { %v13580_v46 = vpop.f32.mrf.mxu0  ;;  %v3998_v19 = vshll.u32 %v3838_v8, 16  ;;  %v6792_v22 = vrot.slane %v6790_v35, 5  ;;  %v5533_v41 = vrot.slane %v5532_v61, 4  ;;  %v6788_v10 = vrot.slane %v6787_v44, 4  ;;  %16533 = vst [vmem:[#allocation51_spill] sm:$0xff] %v13605_v18 }
 0x3b4   : > { %16531 = vst [vmem:[#allocation49_spill] sm:$0xff] %v13580_v46  ;;  %v6783_v53 = vsel %vm13092_vm15, %v6778_v5, %v13560_v3  ;;  %v4019_v6 = vshrl.u32 %v3841_v34, 16  ;;  %v13610_v7 = vunpack.c.l.b16 %v6759_v21  ;;  %v5282_v8 = vld [vmem:[#allocation2 + $0x88] sm:$0xf]  ;;  %v4022_v35 = vshll.u32 %v3841_v34, 16  ;;  %v13624_v62 = vpop.f32.mrf.mxu1 }
 0x3b5   : > { %v5537_v1 = vrot.slane %v5535_v58, 5  ;;  %v4663_v32 = vrot.slane %v4661_v28, 4  ;;  %v3997_v33 = vrot.slane %v3995_v9, 4  ;;  %v6798_v45 = vshll.u32 %v6683_v57, 16  ;;  %v4520_v61 = vld [vmem:[#allocation2 + $0x90] sm:$0xe] }
 0x3b6   : > { %v5523_v3 = vrot.slane %v5522_v48, 4  ;;  %v4000_v44 = vrot.slane %v3998_v19, 5  ;;  %v16534_v21 = vpack.c.b16 %v13503_v54, %v13475_v37  ;;  %v4664_v9 = vrot.slane %v3861_v0, 5  ;;  %v5281_v5 = vld [vmem:[#allocation2 + $0x84] sm:$0xf]  ;;  %16536 = vst [vmem:[#allocation53_spill] sm:$0xff] %v13624_v62 }
 0x3b7   : > { %11378 = vmatmul.msk.bf16.gmra.mxu2 %vm3653_vm7, %v5732_v60  ;;  %v6795_v60 = vshrl.u32 %v6683_v57, 16  ;;  %v5538_v58 = vsel %vm13092_vm15, %v5533_v41, %v5537_v1  ;;  %v5549_v57 = vshll.u32 %v5282_v8, 16  ;;  %v5553_v48 = vshrl.u32 %v5282_v8, 16 }
 0x3b8   : > { %11546 = vmatmul.msk.bf16.vlgmr.msra.gmra.mxu1 %vm3653_vm7, %v7147_v43  ;;  %v13614_v43 = vunpack.c.l.b16 %v6783_v53  ;;  %v6793_v19 = vsel %vm13092_vm15, %v6788_v10, %v6792_v22  ;;  %v4021_v53 = vrot.slane %v4019_v6, 4  ;;  %v4024_v63 = vrot.slane %v4022_v35, 5 }
 0x3b9   : > { %v13600_v55 = vpop.f32.mrf.mxu2  ;;  %v6797_v23 = vrot.slane %v6795_v60, 4  ;;  %v5528_v37 = vsel %vm13092_vm15, %v5523_v3, %v13566_v25  ;;  %v11222_v54 = vrot.slane %v4520_v61, 9  ;;  %v4665_v41 = vsel %vm13122_vm2, %v4663_v32, %v4664_v9  ;;  %v12136_v3 = vld [vmem:[#allocation2 + $0x40] sm:$0xf]  ;;  %v13639_v32 = vld [vmem:[#allocation2 + $0x48] sm:$0xf] }
 0x3ba   : > { %11253 = vmatmul.msk.bf16.gmra.mxu0 %vm3653_vm7, %v4739_v17  ;;  %16532 = vst [vmem:[#allocation50_spill] sm:$0xff] %v13600_v55  ;;  %v3844_v17 = vld [vmem:[#allocation2 + $0x54] sm:$0xf]  ;;  %v6800_v0 = vrot.slane %v6798_v45, 5  ;;  %v5711_v1 = vunpack.c.l.b16 %v5538_v58  ;;  %v5543_v8 = vshll.u32 %v5281_v5, 16  ;;  %v13637_v10 = vrot.slane %v5549_v57, 5  ;;  %v13643_v55 = vpop.f32.mrf.mxu3 }
 0x3bb   : > { %v13620_v34 = vpop.f32.mrf.mxu0  ;;  %v4662_v22 = vsel %vm13122_vm2, %v11222_v54, %v4661_v28  ;;  %v5555_v6 = vrot.slane %v5553_v48, 4  ;;  %v4046_v35 = vshll.u32 %v3844_v17, 16  ;;  %v5710_v60 = vunpack.c.l.b16 %v5528_v37  ;;  %16538 = vst [vmem:[#allocation55_spill] sm:$0xff] %v13643_v55  ;;  %v5283_v54 = vld [vmem:[#allocation2 + $0x8c] sm:$0x1] }
 0x3bc   : > { %16535 = vst [vmem:[#allocation52_spill] sm:$0xff] %v13620_v34  ;;  %v4043_v34 = vshrl.u32 %v3844_v17, 16  ;;  %v4721_v25 = vunpack.c.l.b16 %v4665_v41  ;;  %v4004_v61 = vshll.u32 %v12136_v3, 16  ;;  %v4008_v46 = vshrl.u32 %v12136_v3, 16  ;;  %v13645_v37 = vld [vmem:[#allocation2 + $0xa0] sm:$0xf] }
 0x3bd   : > { %v4001_v45 = vor.u32 %v4000_v44, %v3997_v33  ;;  %v13641_v58 = vunpack.c.l.b16 %v6793_v19  ;;  %v4025_v9 = vor.u32 %v4024_v63, %v4021_v53  ;;  %v5733_v28 = vpack.c.b16 %v5711_v1, %v5710_v60  ;;  %v4521_v55 = vld [vmem:[#allocation2 + $0x9c] sm:$0xe] }
 0x3be   : > { %v4720_v57 = vunpack.c.l.b16 %v4662_v22  ;;  %v5545_v17 = vrot.slane %v5543_v8, 5  ;;  %v5556_v41 = vor.u32 %v5555_v6, %v13637_v10  ;;  %v13648_v3 = vrot.slane %v4043_v34, 4  ;;  %v13663_v8 = vpop.f32.mrf.mxu1 }
 0x3bf   : > { %v13650_v18 = vrot.slane %v4046_v35, 5  ;;  %v6819_v33 = vshrl.u32 %v13639_v32, 16  ;;  %v13656_v44 = vrot.slane %v4004_v61, 5  ;;  %v4010_v19 = vrot.slane %v4008_v46, 4  ;;  %16540 = vst [vmem:[#allocation57_spill] sm:$0xff] %v13663_v8 }
 0x3c0   : > { %v4740_v63 = vpack.c.b16 %v4721_v25, %v4720_v57  ;;  %v13658_v1 = vrot.slane %v4001_v45, 4  ;;  %v13666_v6 = vrot.slane %v4025_v9, 4  ;;  %v16541_v46 = vrot.slane %v13506_v12, 5  ;;  %v5284_v61 = vld [vmem:[#allocation2 + $0x90] sm:$0xf] }
 0x3c1   : > { %11197 = vmatmul.msk.bf16.gmra.mxu3 %vm3653_vm7, %v16534_v21  ;;  %v5540_v21 = vshrl.u32 %v5281_v5, 16  ;;  %v13633_v62 = vpop.f32.mrf.mxu2  ;;  %v6801_v5 = vor.u32 %v6800_v0, %v6797_v23  ;;  %v5559_v0 = vshll.u32 %v5283_v54, 16  ;;  %v5557_v25 = vrot.slane %v5556_v41, 4  ;;  %v5285_v45 = vld [vmem:[#allocation2 + $0x94] sm:$0xf] }
 0x3c2   : > { %16537 = vst [vmem:[#allocation54_spill] sm:$0xff] %v13633_v62  ;;  %v7361_v62 = vld [vmem:[#allocation2 + $0x54] sm:$0xe]  ;;  %v13678_v57 = vrot.slane %v6819_v33, 4  ;;  %v7552_v9 = vunpack.c.l.b16 %v13553_v42  ;;  %v4011_v54 = vor.u32 %v4010_v19, %v13656_v44  ;;  %v12138_v41 = vld [vmem:[#allocation2 + $0x4c] sm:$0xf]  ;;  %v16544_v19 = vpack.c.b16 %v13591_v56, %v13589_v14 }
 0x3c3   : > { %v5542_v48 = vrot.slane %v5540_v21, 4  ;;  %v11567_v53 = vrot.slane %v7361_v62, 9  ;;  %v4668_v21 = vrot.slane %v13645_v37, 5  ;;  %v13668_v35 = vrot.slane %v6801_v5, 4  ;;  %v3864_v37 = vld [vmem:[#allocation2 + $0xa4] sm:$0x1] }
 0x3c4   : > { %v13654_v23 = vpop.f32.mrf.mxu0  ;;  %v16543_v5 = vpack.c.b16 %v13598_v27, %v13610_v7  ;;  %v6684_v33 = vld [vmem:[#allocation2 + $0x40] sm:$0xf]  ;;  %v5564_v8 = vshrl.u32 %v5284_v61, 16  ;;  %v5567_v27 = vshll.u32 %v5284_v61, 16  ;;  %v5573_v7 = vshll.u32 %v5285_v45, 16 }
 0x3c5   : > { %16539 = vst [vmem:[#allocation56_spill] sm:$0xff] %v13654_v23  ;;  %v5546_v22 = vor.u32 %v5545_v17, %v5542_v48  ;;  %v7458_v62 = vsel %vm13122_vm2, %v11567_v53, %v16541_v46  ;;  %v12137_v48 = vld [vmem:[#allocation2 + $0x44] sm:$0x1]  ;;  %v6822_v53 = vshll.u32 %v13639_v32, 16  ;;  %v5561_v46 = vrot.slane %v5559_v0, 5 }
 0x3c6   : > { %v4014_v17 = vshll.u32 %v12137_v48, 16  ;;  %v7551_v34 = vunpack.c.l.b16 %v7458_v62  ;;  %v4671_v48 = vrot.slane %v3864_v37, 5  ;;  %v5577_v32 = vshrl.u32 %v5285_v45, 16  ;;  %v5286_v45 = vld [vmem:[#allocation2 + $0x98] sm:$0x1] }
 0x3c7   : > { %11379 = vmatmul.msk.bf16.gmra.mxu2 %vm3653_vm7, %v5733_v28  ;;  %v4049_v28 = vor.u32 %v13650_v18, %v13648_v3  ;;  %v4670_v18 = vrot.slane %v4668_v21, 4  ;;  %v4032_v3 = vshrl.u32 %v12138_v41, 16  ;;  %v5547_v42 = vrot.slane %v5546_v22, 4 }
 0x3c8   : > { %11547 = vmatmul.msk.bf16.gmra.mxu1 %vm3653_vm7, %v16543_v5  ;;  %v5562_v5 = vsel %vm13092_vm15, %v5557_v25, %v5561_v46  ;;  %v13693_v0 = vpack.c.b16 %v7552_v9, %v7551_v34  ;;  %v4012_v62 = vrot.slane %v4011_v54, 4  ;;  %v4016_v22 = vrot.slane %v4014_v17, 5 }
 0x3c9   : > { %v6804_v61 = vshll.u32 %v6684_v33, 16  ;;  %v5552_v14 = vsel %vm13092_vm15, %v5547_v42, %v13637_v10  ;;  %v11223_v56 = vrot.slane %v4521_v55, 9  ;;  %v6808_v25 = vshrl.u32 %v6684_v33, 16  ;;  %v13714_v42 = vpop.f32.mrf.mxu1 }
 0x3ca   : > { %11254 = vmatmul.msk.bf16.gmra.mxu0 %vm3653_vm7, %v4740_v63  ;;  %v13674_v60 = vpop.f32.mrf.mxu2  ;;  %v4028_v63 = vshll.u32 %v12138_v41, 16  ;;  %v13695_v41 = vpop.f32.mrf.mxu3  ;;  %v5713_v34 = vunpack.c.l.b16 %v5562_v5  ;;  %v5566_v9 = vrot.slane %v5564_v8, 4  ;;  %v5569_v46 = vrot.slane %v5567_v27, 5  ;;  %16548 = vst [vmem:[#allocation62_spill] sm:$0xff] %v13714_v42  ;;  %v13722_v27 = vld [vmem:[#allocation2 + $0x60] sm:$0xf] }
 0x3cb   : > { %16542 = vst [vmem:[#allocation58_spill] sm:$0xff] %v13674_v60  ;;  %v4034_v54 = vrot.slane %v4032_v3, 4  ;;  %v13710_v60 = vrot.slane %v5573_v7, 5  ;;  %v5579_v10 = vrot.slane %v5577_v32, 4  ;;  %v13712_v55 = vrot.slane %v4049_v28, 4 }
 0x3cc   : > { %16545 = vst [vmem:[#allocation59_spill] sm:$0xff] %v13695_v41  ;;  %v13697_v23 = vrot.slane %v4028_v63, 5  ;;  %v13704_v37 = vpop.f32.mrf.mxu0  ;;  %v4669_v63 = vsel %vm13122_vm2, %v11223_v56, %v4668_v21  ;;  %v4007_v8 = vsel %vm13092_vm15, %v13658_v1, %v13656_v44  ;;  %v4017_v3 = vsel %vm13092_vm15, %v4012_v62, %v4016_v22  ;;  %v12139_v7 = vld [vmem:[#allocation2 + $0x50] sm:$0x1]  ;;  %v13729_v44 = vld [vmem:[#allocation2 + $0x7c] sm:$0xf] }
 0x3cd   : > { %16546 = vst [vmem:[#allocation60_spill] sm:$0xff] %v13704_v37  ;;  %v5583_v21 = vshll.u32 %v5286_v45, 16  ;;  %v4038_v5 = vshll.u32 %v12139_v7, 16  ;;  %v13724_v28 = vrot.slane %v6804_v61, 5  ;;  %v6810_v32 = vrot.slane %v6808_v25, 4 }
 0x3ce   : > { %v5570_v42 = vor.u32 %v5569_v46, %v5566_v9  ;;  %v4035_v37 = vor.u32 %v4034_v54, %v13697_v23  ;;  %v7364_v1 = vld [vmem:[#allocation2 + $0x78] sm:$0xe]  ;;  %v5580_v62 = vor.u32 %v5579_v10, %v13710_v60  ;;  %v13732_v22 = vrot.slane %v6822_v53, 5  ;;  %v13737_v46 = vld [vmem:[#allocation2 + $0x80] sm:$0x1] }
 0x3cf   : > { %v4277_v25 = vunpack.c.l.b16 %v4007_v8  ;;  %v7478_v53 = vrot.slane %v13729_v44, 5  ;;  %v5585_v61 = vrot.slane %v5583_v21, 5  ;;  %v4040_v8 = vrot.slane %v4038_v5, 5  ;;  %v5288_v21 = vld [vmem:[#allocation2 + $0xa0] sm:$0xf] }
 0x3d0   : > { %v5571_v7 = vrot.slane %v5570_v42, 4  ;;  %v12140_v5 = vld [vmem:[#allocation2 + $0x58] sm:$0xf]  ;;  %v5597_v49 = vshll.u32 %v5288_v21, 16 }
 0x3d1   : > { %11198 = vmatmul.msk.bf16.gmra.mxu3 %vm3653_vm7, %v16544_v19  ;;  %v4672_v19 = vsel %vm13122_vm2, %v4670_v18, %v4671_v48  ;;  %v5712_v18 = vunpack.c.l.b16 %v5552_v14  ;;  %v6685_v48 = vld [vmem:[#allocation2 + $0x44] sm:$0x1]  ;;  %v4722_v14 = vunpack.c.l.b16 %v4669_v63  ;;  %v6811_v63 = vor.u32 %v6810_v32, %v13724_v28 }
 0x3d2   : > { %v13706_v17 = vpop.f32.mrf.mxu2  ;;  %v4723_v33 = vunpack.c.l.b16 %v4672_v19  ;;  %v6814_v9 = vshll.u32 %v6685_v48, 16  ;;  %v13742_v10 = vpop.f32.mrf.mxu3  ;;  %v6687_v48 = vld [vmem:[#allocation2 + $0x4c] sm:$0xf]  ;;  %v7481_v32 = vrot.slane %v13737_v46, 5 }
 0x3d3   : > { %16547 = vst [vmem:[#allocation61_spill] sm:$0xff] %v13706_v17  ;;  %v5734_v56 = vpack.c.b16 %v5713_v34, %v5712_v18  ;;  %v13727_v17 = vld [vmem:[#allocation2 + $0xac] sm:$0xf]  ;;  %v4278_v34 = vunpack.c.l.b16 %v4017_v3  ;;  %v11570_v18 = vrot.slane %v7364_v1, 9 }
 0x3d4   : > { %v4741_v45 = vpack.c.b16 %v4723_v33, %v4722_v14  ;;  %v4675_v54 = vrot.slane %v13727_v17, 5  ;;  %16549 = vst [vmem:[#allocation63_spill] sm:$0xff] %v13742_v10  ;;  %v5581_v33 = vrot.slane %v5580_v62, 4  ;;  %v7480_v14 = vrot.slane %v7478_v53, 4  ;;  %v5287_v10 = vld [vmem:[#allocation2 + $0x9c] sm:$0xf] }
 0x3d5   : > { %v7479_v17 = vsel %vm13122_vm2, %v11570_v18, %v7478_v53  ;;  %v4304_v19 = vpack.c.b16 %v4278_v34, %v4277_v25  ;;  %v6816_v42 = vrot.slane %v6814_v9, 5  ;;  %v4052_v62 = vshll.u32 %v12140_v5, 16  ;;  %v13760_v25 = vpop.f32.mrf.mxu1  ;;  %v4522_v34 = vld [vmem:[#allocation2 + $0xa8] sm:$0xe] }
 0x3d6   : > { %v4677_v18 = vrot.slane %v4675_v54, 4  ;;  %v6812_v53 = vrot.slane %v6811_v63, 4  ;;  %16553 = vst [vmem:[#allocation66_spill] sm:$0xff] %v13760_v25  ;;  %v5586_v9 = vsel %vm13092_vm15, %v5581_v33, %v5585_v61  ;;  %v5601_v63 = vshrl.u32 %v5288_v21, 16 }
 0x3d7   : > { %11380 = vmatmul.msk.bf16.gmra.mxu2 %vm3653_vm7, %v5734_v56  ;;  %v4036_v56 = vrot.slane %v4035_v37, 4  ;;  %v13750_v1 = vpop.f32.mrf.mxu0  ;;  %v3867_v37 = vld [vmem:[#allocation2 + $0xb0] sm:$0x1]  ;;  %v5588_v21 = vshrl.u32 %v5287_v10, 16 }
 0x3d8   : > { %16551 = vst [vmem:[#allocation65_spill] sm:$0xff] %v13750_v1  ;;  %v7482_v1 = vsel %vm13122_vm2, %v7480_v14, %v7481_v32  ;;  %v4678_v20 = vrot.slane %v3867_v37, 5  ;;  %v5576_v14 = vsel %vm13092_vm15, %v5571_v7, %v13710_v60  ;;  %v6817_v61 = vsel %vm13092_vm15, %v6812_v53, %v6816_v42 }
 0x3d9   : > { %v7558_v41 = vunpack.c.l.b16 %v7482_v1  ;;  %v4041_v32 = vsel %vm13092_vm15, %v4036_v56, %v4040_v8  ;;  %v5715_v37 = vunpack.c.l.b16 %v5586_v9  ;;  %v5591_v60 = vshll.u32 %v5287_v10, 16  ;;  %v6688_v9 = vld [vmem:[#allocation2 + $0x50] sm:$0x1] }
 0x3da   : > { %11255 = vmatmul.msk.bf16.gmra.mxu0 %vm3653_vm7, %v4741_v45  ;;  %v13745_v3 = vpop.f32.mrf.mxu2  ;;  %v16552_v45 = vpack.c.b16 %v13641_v58, %v13614_v43  ;;  %v6828_v43 = vshll.u32 %v6687_v48, 16  ;;  %v6832_v58 = vshrl.u32 %v6687_v48, 16  ;;  %v13786_v8 = vrot.slane %v5597_v49, 5 }
 0x3db   : > { %16550 = vst [vmem:[#allocation64_spill] sm:$0xff] %v13745_v3  ;;  %v4056_v3 = vshrl.u32 %v12140_v5, 16  ;;  %v13770_v5 = vrot.slane %v4052_v62, 5  ;;  %v5603_v62 = vrot.slane %v5601_v63, 4  ;;  %v16556_v10 = vshll.u32 %v13722_v27, 16 }
 0x3dc   : > { %11548 = vmatmul.msk.bf16.gmra.mxu1 %vm3653_vm7, %v16552_v45  ;;  %v7557_v45 = vunpack.c.l.b16 %v7479_v17  ;;  %v11224_v17 = vrot.slane %v4522_v34, 9  ;;  %v13780_v7 = vrot.slane %v6828_v43, 5  ;;  %v5714_v34 = vunpack.c.l.b16 %v5576_v14 }
 0x3dd   : > { %v4058_v33 = vrot.slane %v4056_v3, 4  ;;  %v16555_v3 = vshrl.u32 %v13722_v27, 16  ;;  %v13794_v43 = vrot.slane %v16556_v10, 5  ;;  %v4280_v49 = vunpack.c.l.b16 %v4041_v32  ;;  %v13806_v10 = vld [vmem:[#allocation2 + $0xb8] sm:$0xf] }
 0x3de   : > { %v13772_v48 = vpack.c.b16 %v7558_v41, %v7557_v45  ;;  %v4676_v41 = vsel %vm13122_vm2, %v11224_v17, %v4675_v54  ;;  %v4031_v54 = vsel %vm13092_vm15, %v13666_v6, %v13697_v23  ;;  %v7122_v45 = vunpack.c.l.b16 %v6817_v61  ;;  %v5289_v17 = vld [vmem:[#allocation2 + $0xa4] sm:$0x1]  ;;  %v12141_v32 = vld [vmem:[#allocation2 + $0x5c] sm:$0x1] }
 0x3df   : > { %v13790_v53 = vrot.slane %v16555_v3, 4  ;;  %v13804_v63 = vpop.f32.mrf.mxu0  ;;  %v5735_v14 = vpack.c.b16 %v5715_v37, %v5714_v34  ;;  %v4724_v27 = vunpack.c.l.b16 %v4676_v41  ;;  %v5593_v3 = vrot.slane %v5591_v60, 5  ;;  %v12142_v41 = vld [vmem:[#allocation2 + $0x64] sm:$0xf] }
 0x3e0   : > { %16557 = vst [vmem:[#allocation68_spill] sm:$0xff] %v13804_v63  ;;  %v5604_v23 = vor.u32 %v5603_v62, %v13786_v8  ;;  %v4059_v6 = vor.u32 %v4058_v33, %v13770_v5  ;;  %v4062_v25 = vshll.u32 %v12141_v32, 16  ;;  %v5607_v60 = vshll.u32 %v5289_v17, 16 }
 0x3e1   : > { %11199 = vmatmul.msk.bf16.gmra.mxu3 %vm3653_vm7, %v4304_v19  ;;  %v4679_v19 = vsel %vm13122_vm2, %v4677_v18, %v4678_v20  ;;  %v6834_v20 = vrot.slane %v6832_v58, 4  ;;  %v12006_v18 = vld [vmem:[#allocation15 + $0xc8] sm:$0xff]  ;;  %v6807_v58 = vsel %vm13092_vm15, %v13668_v35, %v13724_v28  ;;  %v13811_v28 = vpop.f32.mrf.mxu1  ;;  %v4682_v34 = vrot.slane %v13806_v10, 5 }
 0x3e2   : > { %v13782_v56 = vpop.f32.mrf.mxu2  ;;  %v4725_v42 = vunpack.c.l.b16 %v4679_v19  ;;  %6559 = vmatpush.bf16.msra.mxu0 %v12006_v18  ;;  %v5590_v19 = vrot.slane %v5588_v21, 4  ;;  %16558 = vst [vmem:[#allocation69_spill] sm:$0xff] %v13811_v28  ;;  %v7121_v37 = vunpack.c.l.b16 %v6807_v58  ;;  %v4076_v18 = vshll.u32 %v12142_v41, 16 }
 0x3e3   : > { %16554 = vst [vmem:[#allocation67_spill] sm:$0xff] %v13782_v56  ;;  %v6835_v35 = vor.u32 %v6834_v20, %v13780_v7  ;;  %v4080_v21 = vshrl.u32 %v12142_v41, 16  ;;  %v16559_v62 = vor.u32 %v13732_v22, %v13678_v57  ;;  %v6838_v32 = vshll.u32 %v6688_v9, 16  ;;  %v12005_v22 = vld [vmem:[#allocation15 + $0xc0] sm:$0xff]  ;;  %v5291_v9 = vld [vmem:[#allocation2 + $0xac] sm:$0xf] }
 0x3e4   : > { %v13778_v1 = vpop.f32.mrf.mxu3  ;;  %v4742_v61 = vpack.c.b16 %v4725_v42, %v4724_v27  ;;  %v4279_v20 = vunpack.c.l.b16 %v4031_v54  ;;  %v5594_v42 = vor.u32 %v5593_v3, %v5590_v19  ;;  %v6689_v27 = vld [vmem:[#allocation2 + $0x54] sm:$0xf]  ;;  %v5605_v10 = vrot.slane %v5604_v23, 4 }
 0x3e5   : > { %v13818_v33 = vrot.slane %v16559_v62, 4  ;;  %v4060_v41 = vrot.slane %v4059_v6, 4  ;;  %v4064_v28 = vrot.slane %v4062_v25, 5  ;;  %v6836_v57 = vrot.slane %v6835_v35, 4 }
 0x3e6   : > { %v4305_v62 = vpack.c.b16 %v4280_v49, %v4279_v20  ;;  %v4055_v54 = vsel %vm13092_vm15, %v13712_v55, %v13770_v5  ;;  %v13832_v19 = vrot.slane %v4076_v18, 5  ;;  %v4082_v3 = vrot.slane %v4080_v21, 4  ;;  %6560 = vmatpush.bf16.msra.mxu0 %v12005_v22  ;;  %v5290_v49 = vld [vmem:[#allocation2 + $0xa8] sm:$0xf] }
 0x3e7   : > { %11381 = vmatmul.msk.bf16.gmra.mxu2 %vm3653_vm7, %v5735_v14  ;;  %v7150_v14 = vpack.c.b16 %v7122_v45, %v7121_v37  ;;  %v3870_v45 = vld [vmem:[#allocation2 + $0xbc] sm:$0x1]  ;;  %v4523_v37 = vld [vmem:[#allocation2 + $0xb4] sm:$0xe]  ;;  %v4684_v23 = vrot.slane %v4682_v34, 4  ;;  %v6840_v6 = vrot.slane %v6838_v32, 5  ;;  %v4065_v32 = vsel %vm13092_vm15, %v4060_v41, %v4064_v28 }
 0x3e8   : > { %v6843_v25 = vshrl.u32 %v6689_v27, 16  ;;  %v5595_v35 = vrot.slane %v5594_v42, 4  ;;  %v6846_v20 = vshll.u32 %v6689_v27, 16  ;;  %v6856_v58 = vshrl.u32 %v13506_v12, 16 }
 0x3e9   : > { %v4685_v5 = vrot.slane %v3870_v45, 5  ;;  %v5621_v18 = vshll.u32 %v5291_v9, 16  ;;  %v5625_v21 = vshrl.u32 %v5291_v9, 16  ;;  %v11225_v42 = vrot.slane %v4523_v37, 9  ;;  %v13851_v9 = vpop.f32.mrf.mxu1 }
 0x3ea   : > { %11256 = vmatmul.msk.bf16.gmra.mxu0 %vm3653_vm7, %v4742_v61  ;;  %v13825_v17 = vpop.f32.mrf.mxu2  ;;  %v5609_v61 = vrot.slane %v5607_v60, 5  ;;  %v11986_v60 = vld [vmem:[#allocation15 + $0xa8] sm:$0xff]  ;;  %v6841_v27 = vsel %vm13092_vm15, %v6836_v57, %v6840_v6  ;;  %v5600_v22 = vsel %vm13092_vm15, %v5595_v35, %v13786_v8  ;;  %v5615_v45 = vshll.u32 %v5290_v49, 16  ;;  %16562 = vst [vmem:[#allocation72_spill] sm:$0xff] %v13851_v9 }
 0x3eb   : > { %16560 = vst [vmem:[#allocation70_spill] sm:$0xff] %v13825_v17  ;;  %v13839_v17 = vpop.f32.mrf.mxu0  ;;  %6244 = vmatpush.bf16.msra.mxu3 %v11986_v60  ;;  %v6845_v41 = vrot.slane %v6843_v25, 4  ;;  %v6848_v37 = vrot.slane %v6846_v20, 5  ;;  %v4683_v8 = vsel %vm13122_vm2, %v11225_v42, %v4682_v34  ;;  %v13861_v6 = vrot.slane %v5621_v18, 5  ;;  %v12143_v9 = vld [vmem:[#allocation2 + $0x68] sm:$0x1] }
 0x3ec   : > { %v13820_v63 = vpop.f32.mrf.mxu3  ;;  %11549 = vmatmul.msk.bf16.gmra.mxu1 %vm3653_vm7, %v7150_v14  ;;  %v6852_v14 = vshll.u32 %v13506_v12, 16  ;;  %v5610_v55 = vsel %vm13092_vm15, %v5605_v10, %v5609_v61  ;;  %16561 = vst [vmem:[#allocation71_spill] sm:$0xff] %v13839_v17  ;;  %v4083_v12 = vor.u32 %v4082_v3, %v13832_v19  ;;  %v4686_v10 = vsel %vm13122_vm2, %v4684_v23, %v4685_v5  ;;  %v5292_v20 = vld [vmem:[#allocation2 + $0xb0] sm:$0x1] }
 0x3ed   : > { %v5717_v28 = vunpack.c.l.b16 %v5610_v55  ;;  %v5627_v23 = vrot.slane %v5625_v21, 4  ;;  %v6858_v35 = vrot.slane %v6856_v58, 4  ;;  %v4281_v5 = vunpack.c.l.b16 %v4055_v54 }
 0x3ee   : > { %v13855_v57 = vrot.slane %v6852_v14, 5  ;;  %v4727_v60 = vunpack.c.l.b16 %v4686_v10  ;;  %v4086_v17 = vshll.u32 %v12143_v9, 16  ;;  %v4282_v56 = vunpack.c.l.b16 %v4065_v32  ;;  %v7365_v9 = vld [vmem:[#allocation2 + $0x84] sm:$0xe] }
 0x3ef   : > { %v6831_v25 = vsel %vm13092_vm15, %v13818_v33, %v13780_v7  ;;  %v5617_v55 = vrot.slane %v5615_v45, 5  ;;  %v4726_v18 = vunpack.c.l.b16 %v4683_v8  ;;  %v7124_v42 = vunpack.c.l.b16 %v6841_v27  ;;  %v13875_v45 = vld [vmem:[#allocation2 + $0x88] sm:$0xf] }
 0x3f0   : > { %v13867_v21 = vrot.slane %v4083_v12, 4  ;;  %v5628_v58 = vor.u32 %v5627_v23, %v13861_v6  ;;  %v6849_v54 = vor.u32 %v6848_v37, %v6845_v41  ;;  %v6862_v32 = vshll.u32 %v13530_v13, 16  ;;  %v13877_v12 = vld [vmem:[#allocation2 + $0x94] sm:$0xf] }
 0x3f1   : > { %11200 = vmatmul.msk.bf16.gmra.mxu3 %vm3653_vm7, %v4305_v62  ;;  %v5612_v62 = vshrl.u32 %v5290_v49, 16  ;;  %v5716_v49 = vunpack.c.l.b16 %v5600_v22  ;;  %v6859_v22 = vor.u32 %v6858_v35, %v13855_v57  ;;  %v4743_v7 = vpack.c.b16 %v4727_v60, %v4726_v18  ;;  %v13893_v35 = vld [vmem:[#allocation2 + $0x8c] sm:$0x1] }
 0x3f2   : > { %v13857_v3 = vpop.f32.mrf.mxu2  ;;  %v7123_v33 = vunpack.c.l.b16 %v6831_v25  ;;  %v5631_v10 = vshll.u32 %v5292_v20, 16  ;;  %v4306_v13 = vpack.c.b16 %v4282_v56, %v4281_v5  ;;  %v16567_v8 = vor.u32 %v13794_v43, %v13790_v53  ;;  %v13901_v53 = vpop.f32.mrf.mxu1  ;;  %v5294_v43 = vld [vmem:[#allocation2 + $0xb8] sm:$0xf] }
 0x3f3   : > { %16564 = vst [vmem:[#allocation74_spill] sm:$0xff] %v13857_v3  ;;  %v5614_v14 = vrot.slane %v5612_v62, 4  ;;  %v12014_v3 = vld [vmem:[#allocation15 + $0x108] sm:$0xff]  ;;  %v5736_v34 = vpack.c.b16 %v5717_v28, %v5716_v49  ;;  %v13873_v62 = vrot.slane %v4086_v17, 5  ;;  %v7366_v28 = vld [vmem:[#allocation2 + $0x90] sm:$0xe]  ;;  %v13879_v41 = vpop.f32.mrf.mxu0 }
 0x3f4   : > { %v13853_v61 = vpop.f32.mrf.mxu3  ;;  %7667 = vmatpush.bf16.msrb.mxu2 %v12014_v3  ;;  %16565 = vst [vmem:[#allocation75_spill] sm:$0xff] %v13879_v41  ;;  %v7151_v3 = vpack.c.b16 %v7124_v42, %v7123_v33  ;;  %v13887_v17 = vrot.slane %v16567_v8, 4  ;;  %v13895_v49 = vld [vmem:[#allocation2 + $0x98] sm:$0x1]  ;;  %v5629_v56 = vrot.slane %v5628_v58, 4  ;;  %v13899_v5 = vrot.slane %v6849_v54, 4 }
 0x3f5   : > { %16563 = vst [vmem:[#allocation73_spill] sm:$0xff] %v13853_v61  ;;  %v5618_v27 = vor.u32 %v5617_v55, %v5614_v14  ;;  %v6860_v25 = vrot.slane %v6859_v22, 4  ;;  %v6864_v20 = vrot.slane %v6862_v32, 5  ;;  %v6693_v14 = vld [vmem:[#allocation2 + $0x64] sm:$0xf]  ;;  %v11571_v55 = vrot.slane %v7365_v9, 9 }
 0x3f6   : > { %16569 = vst [vmem:[#allocation78_spill] sm:$0xff] %v13901_v53  ;;  %v11572_v18 = vrot.slane %v7366_v28, 9  ;;  %v7492_v42 = vrot.slane %v13877_v12, 5  ;;  %v5633_v33 = vrot.slane %v5631_v10, 5  ;;  %v7488_v58 = vrot.slane %v13893_v35, 5 }
 0x3f7   : > { %11382 = vmatmul.msk.bf16.gmra.mxu2 %vm3653_vm7, %v5736_v34  ;;  %v7485_v34 = vrot.slane %v13875_v45, 5  ;;  %v7495_v54 = vrot.slane %v13895_v49, 5  ;;  %v5293_v28 = vld [vmem:[#allocation2 + $0xb4] sm:$0xf]  ;;  %v5649_v10 = vshrl.u32 %v5294_v43, 16  ;;  %v6876_v23 = vshll.u32 %v6693_v14, 16 }
 0x3f8   : > { %v7494_v8 = vrot.slane %v7492_v42, 4  ;;  %v5634_v9 = vsel %vm13092_vm15, %v5629_v56, %v5633_v33  ;;  %v6880_v41 = vshrl.u32 %v6693_v14, 16  ;;  %v5636_v61 = vshrl.u32 %v5293_v28, 16 }
 0x3f9   : > { %v7486_v22 = vsel %vm13122_vm2, %v11571_v55, %v7485_v34  ;;  %v7487_v32 = vrot.slane %v7485_v34, 4 }
 0x3fa   : > { %11257 = vmatmul.msk.bf16.gmra.mxu0 %vm3653_vm7, %v4743_v7  ;;  %v13897_v60 = vpop.f32.mrf.mxu2  ;;  %v5619_v7 = vrot.slane %v5618_v27, 4  ;;  %v5645_v27 = vshll.u32 %v5294_v43, 16  ;;  %v7496_v34 = vsel %vm13122_vm2, %v7494_v8, %v7495_v54  ;;  %v5719_v43 = vunpack.c.l.b16 %v5634_v9 }
 0x3fb   : > { %16568 = vst [vmem:[#allocation77_spill] sm:$0xff] %v13897_v60  ;;  %v7489_v55 = vsel %vm13122_vm2, %v7487_v32, %v7488_v58  ;;  %v7562_v56 = vunpack.c.l.b16 %v7496_v34  ;;  %v5651_v58 = vrot.slane %v5649_v10, 4  ;;  %v6855_v8 = vsel %vm13092_vm15, %v13899_v5, %v13855_v57 }
 0x3fc   : > { %v13881_v37 = vpop.f32.mrf.mxu3  ;;  %11550 = vmatmul.msk.bf16.gmra.mxu1 %vm3653_vm7, %v7151_v3  ;;  %v7493_v3 = vsel %vm13122_vm2, %v11572_v18, %v7492_v42  ;;  %v5624_v53 = vsel %vm13092_vm15, %v5619_v7, %v13861_v6  ;;  %v6692_v18 = vld [vmem:[#allocation2 + $0x60] sm:$0xf]  ;;  %v7560_v42 = vunpack.c.l.b16 %v7489_v55  ;;  %v5639_v6 = vshll.u32 %v5293_v28, 16  ;;  %v12144_v28 = vld [vmem:[#allocation2 + $0x70] sm:$0xf] }
 0x3fd   : > { %16566 = vst [vmem:[#allocation76_spill] sm:$0xff] %v13881_v37  ;;  %v7561_v60 = vunpack.c.l.b16 %v7493_v3  ;;  %v6865_v37 = vsel %vm13092_vm15, %v6860_v25, %v6864_v20  ;;  %v13928_v7 = vrot.slane %v5645_v27, 5  ;;  %v5718_v3 = vunpack.c.l.b16 %v5624_v53  ;;  %v3850_v25 = vld [vmem:[#allocation2 + $0x6c] sm:$0xf] }
 0x3fe   : > { %v6867_v20 = vshrl.u32 %v6692_v18, 16  ;;  %v6870_v9 = vshll.u32 %v6692_v18, 16  ;;  %v4100_v55 = vshll.u32 %v12144_v28, 16  ;;  %v4104_v27 = vshrl.u32 %v12144_v28, 16 }
 0x3ff   : > { %v13932_v54 = vpack.c.b16 %v7562_v56, %v7561_v60  ;;  %v13940_v34 = vrot.slane %v6876_v23, 5  ;;  %v6882_v10 = vrot.slane %v6880_v41, 4  ;;  %v5737_v60 = vpack.c.b16 %v5719_v43, %v5718_v3  ;;  %v11989_v43 = vld [vmem:[#allocation2 + $0x18] sm:$0xff] }
 0x400   : > { %v4079_v53 = vsel %vm13092_vm15, %v13887_v17, %v13832_v19  ;;  %v16574_v57 = vsel %vm13092_vm15, %v13867_v21, %v13873_v62  ;;  %v7126_v18 = vunpack.c.l.b16 %v6865_v37  ;;  %v5638_v56 = vrot.slane %v5636_v61, 4 }
 0x401   : > { %11201 = vmatmul.msk.bf16.gmra.mxu3 %vm3653_vm7, %v4306_v13  ;;  %v7559_v13 = vunpack.c.l.b16 %v7486_v22  ;;  %v13934_v22 = vpop.f32.mrf.mxu0  ;;  %v4284_v5 = vunpack.c.l.b16 %v16574_v57  ;;  %v5641_v23 = vrot.slane %v5639_v6, 5  ;;  %v5652_v41 = vor.u32 %v5651_v58, %v13928_v7 }
 0x402   : > { %v13926_v14 = vpop.f32.mrf.mxu2  ;;  %16572 = vst [vmem:[#allocation81_spill] sm:$0xff] %v13934_v22  ;;  %v4091_v28 = vshrl.u32 %v3850_v25, 16  ;;  %v7125_v3 = vunpack.c.l.b16 %v6855_v8  ;;  %v4094_v22 = vshll.u32 %v3850_v25, 16  ;;  %v6869_v19 = vrot.slane %v6867_v20, 4 }
 0x403   : > { %16571 = vst [vmem:[#allocation80_spill] sm:$0xff] %v13926_v14  ;;  %v13930_v32 = vpack.c.b16 %v7560_v42, %v7559_v13  ;;  %v13942_v13 = vpop.f32.mrf.mxu1  ;;  %v5295_v42 = vld [vmem:[#allocation2 + $0xbc] sm:$0x1]  ;;  %v6872_v17 = vrot.slane %v6870_v9, 5  ;;  %v4106_v21 = vrot.slane %v4104_v27, 4  ;;  %v6883_v62 = vor.u32 %v6882_v10, %v13940_v34 }
 0x404   : > { %v13922_v33 = vpop.f32.mrf.mxu3  ;;  %16573 = vst [vmem:[#allocation82_spill] sm:$0xff] %v13942_v13  ;;  %v6694_v13 = vld [vmem:[#allocation2 + $0x68] sm:$0x1]  ;;  %v5655_v14 = vshll.u32 %v5295_v42, 16  ;;  %v4283_v61 = vunpack.c.l.b16 %v4079_v53  ;;  %v7152_v6 = vpack.c.b16 %v7126_v18, %v7125_v3  ;;  %v5653_v8 = vrot.slane %v5652_v41, 4 }
 0x405   : > { %16570 = vst [vmem:[#allocation79_spill] sm:$0xff] %v13922_v33  ;;  %v13955_v33 = vrot.slane %v4100_v55, 5  ;;  %v6886_v58 = vshll.u32 %v6694_v13, 16  ;;  %v4093_v20 = vrot.slane %v4091_v28, 4  ;;  %v4096_v9 = vrot.slane %v4094_v22, 5 }
 0x406   : > { %v4307_v25 = vpack.c.b16 %v4284_v5, %v4283_v61  ;;  %v5297_v55 = vld [vmem:[#allocation2 + $0xc4] sm:$0xf]  ;;  %v5657_v27 = vrot.slane %v5655_v14, 5  ;;  %v6873_v42 = vor.u32 %v6872_v17, %v6869_v19  ;;  %v13968_v53 = vld [vmem:[%s16486_s8] ss:$0 sm:$0xff] }
 0x407   : > { %11383 = vmatmul.msk.bf16.gmra.mxu2 %vm3653_vm7, %v5737_v60  ;;  %v5642_v60 = vor.u32 %v5641_v23, %v5638_v56  ;;  %v4107_v10 = vor.u32 %v4106_v21, %v13955_v33  ;;  %v6888_v18 = vrot.slane %v6886_v58, 5  ;;  %v6696_v56 = vld [vmem:[#allocation2 + $0x70] sm:$0xf]  ;;  %v5296_v14 = vld [vmem:[#allocation2 + $0xc0] sm:$0xf]  ;;  %v5669_v23 = vshll.u32 %v5297_v55, 16 }
 0x408   : > { %v5658_v22 = vsel %vm13092_vm15, %v5653_v8, %v5657_v27  ;;  %v5673_v41 = vshrl.u32 %v5297_v55, 16  ;;  %v3791_v28 = vadd.f32 %v13968_v53, %v13166_v39  ;;  %v4097_v3 = vor.u32 %v4096_v9, %v4093_v20  ;;  %v12145_v19 = vld [vmem:[#allocation2 + $0x74] sm:$0x1]  ;;  %v6695_v58 = vld [vmem:[#allocation2 + $0x6c] sm:$0xf] }
 0x409   : > { %v13970_v13 = vpop.f32.mrf.mxu0  ;;  %v5643_v5 = vrot.slane %v5642_v60, 4  ;;  %v4110_v17 = vshll.u32 %v12145_v19, 16  ;;  %v6874_v61 = vrot.slane %v6873_v42, 4  ;;  %v5721_v8 = vunpack.c.l.b16 %v5658_v22  ;;  %v12146_v22 = vld [vmem:[#allocation2 + $0x7c] sm:$0xf] }
 0x40a   : > { %11514 = vmatmul.msk.bf16.vlgmr.msra.gmra.mxu0 %vm3653_vm7, %v11989_v43  ;;  %v13961_v57 = vpop.f32.mrf.mxu2  ;;  %16577 = vst [vmem:[#allocation85_spill] sm:$0xff] %v13970_v13  ;;  %v6900_v55 = vshll.u32 %v6696_v56, 16  ;;  %v6904_v39 = vshrl.u32 %v6696_v56, 16  ;;  %v5663_v9 = vshll.u32 %v5296_v14, 16  ;;  %v13988_v19 = vrot.slane %v5669_v23, 5 }
 0x40b   : > { %16576 = vst [vmem:[#allocation84_spill] sm:$0xff] %v13961_v57  ;;  %v13977_v43 = vpop.f32.mrf.mxu1  ;;  %v5648_v21 = vsel %vm13092_vm15, %v5643_v5, %v13928_v7  ;;  %v4112_v42 = vrot.slane %v4110_v17, 5  ;;  %v6891_v5 = vshrl.u32 %v6695_v58, 16  ;;  %v4124_v13 = vshll.u32 %v12146_v22, 16 }
 0x40c   : > { %v13958_v37 = vpop.f32.mrf.mxu3  ;;  %11551 = vmatmul.msk.bf16.gmra.mxu1 %vm3653_vm7, %v7152_v6  ;;  %16578 = vst [vmem:[#allocation86_spill] sm:$0xff] %v13977_v43  ;;  %v5675_v43 = vrot.slane %v5673_v41, 4  ;;  %v5720_v7 = vunpack.c.l.b16 %v5648_v21  ;;  %v4128_v56 = vshrl.u32 %v12146_v22, 16  ;;  %v5298_v41 = vld [vmem:[#allocation2 + $0xc8] sm:$0x1]  ;;  %v13995_v21 = vrot.slane %v6900_v55, 5 }
 0x40d   : > { %16575 = vst [vmem:[#allocation83_spill] sm:$0xff] %v13958_v37  ;;  %v6884_v37 = vrot.slane %v6883_v62, 4  ;;  %v4108_v62 = vrot.slane %v4107_v10, 4  ;;  %v4098_v10 = vrot.slane %v4097_v3, 4  ;;  %v5665_v17 = vrot.slane %v5663_v9, 5 }
 0x40e   : > { %v5738_v57 = vpack.c.b16 %v5721_v8, %v5720_v7  ;;  %v5679_v7 = vshll.u32 %v5298_v41, 16  ;;  %v4130_v9 = vrot.slane %v4128_v56, 4  ;;  %v6893_v22 = vrot.slane %v6891_v5, 4 }
 0x40f   : > { %v6889_v6 = vsel %vm13092_vm15, %v6884_v37, %v6888_v18  ;;  %v6879_v37 = vsel %vm13092_vm15, %v6874_v61, %v13940_v34  ;;  %v3853_v18 = vld [vmem:[#allocation2 + $0x78] sm:$0xf]  ;;  %v4103_v61 = vsel %vm13092_vm15, %v4098_v10, %v13955_v33 }
 0x410   : > { %v7128_v23 = vunpack.c.l.b16 %v6889_v6  ;;  %v4115_v6 = vshrl.u32 %v3853_v18, 16  ;;  %v4118_v8 = vshll.u32 %v3853_v18, 16  ;;  %v4285_v10 = vunpack.c.l.b16 %v4103_v61 }
 0x411   : > { %11202 = vmatmul.msk.bf16.gmra.mxu3 %vm3653_vm7, %v4307_v25  ;;  %v5660_v25 = vshrl.u32 %v5296_v14, 16  ;;  %v4113_v14 = vsel %vm13092_vm15, %v4108_v62, %v4112_v42  ;;  %v13998_v34 = vpop.f32.mrf.mxu0  ;;  %v7127_v62 = vunpack.c.l.b16 %v6879_v37  ;;  %v6697_v42 = vld [vmem:[#allocation2 + $0x74] sm:$0x1] }
 0x412   : > { %v13986_v20 = vpop.f32.mrf.mxu2  ;;  %16581 = vst [vmem:[#allocation89_spill] sm:$0xff] %v13998_v34  ;;  %v4286_v55 = vunpack.c.l.b16 %v4113_v14  ;;  %v4120_v56 = vrot.slane %v4118_v8, 5 }
 0x413   : > { %16580 = vst [vmem:[#allocation88_spill] sm:$0xff] %v13986_v20  ;;  %v5662_v3 = vrot.slane %v5660_v25, 4  ;;  %v5676_v20 = vor.u32 %v5675_v43, %v13988_v19  ;;  %v14004_v25 = vrot.slane %v4124_v13, 5  ;;  %v14006_v43 = vpop.f32.mrf.mxu1  ;;  %v4117_v13 = vrot.slane %v4115_v6, 4 }
 0x414   : > { %v4396_v60 = vpop.f32.mrf.mxu3  ;;  %16582 = vst [vmem:[#allocation90_spill] sm:$0xff] %v14006_v43  ;;  %v4308_v41 = vpack.c.b16 %v4286_v55, %v4285_v10  ;;  %v5681_v43 = vrot.slane %v5679_v7, 5  ;;  %v6698_v55 = vld [vmem:[#allocation2 + $0x78] sm:$0xf]  ;;  %v6924_v10 = vshll.u32 %v13729_v44, 16 }
 0x415   : > { %v13984_v27 = vadd.f32 %v4396_v60, %v3791_v28  ;;  %v6894_v28 = vshll.u32 %v6695_v58, 16  ;;  %v12013_v60 = vld [vmem:[#allocation15 + $0x100] sm:$0xff]  ;;  %v5666_v37 = vor.u32 %v5665_v17, %v5662_v3  ;;  %v5677_v18 = vrot.slane %v5676_v20, 4 }
 0x416   : > { %7668 = vmatpush.bf16.msrb.mxu2 %v12013_v60  ;;  %v11990_v58 = vld [vmem:[#allocation2 + $0x24] sm:$0xff]  ;;  %v4131_v34 = vor.u32 %v4130_v9, %v14004_v25  ;;  %v4121_v61 = vor.u32 %v4120_v56, %v4117_v13  ;;  %v6918_v13 = vshll.u32 %v6698_v55, 16 }
 0x417   : > { %16579 = vst [vmem:[#allocation87_spill] sm:$0xff] %v13984_v27  ;;  %v6906_v27 = vrot.slane %v6904_v39, 4  ;;  %11384 = vmatmul.msk.bf16.gmra.mxu2 %vm3653_vm7, %v5738_v57  ;;  %v7153_v57 = vpack.c.b16 %v7128_v23, %v7127_v62  ;;  %v6896_v60 = vrot.slane %v6894_v28, 5  ;;  %v12147_v23 = vld [vmem:[#allocation2 + $0x80] sm:$0x1]  ;;  %v5667_v28 = vrot.slane %v5666_v37, 4 }
 0x418   : > { %v4134_v62 = vshll.u32 %v12147_v23, 16  ;;  %v5682_v20 = vsel %vm13092_vm15, %v5677_v18, %v5681_v43  ;;  %v4132_v6 = vrot.slane %v4131_v34, 4  ;;  %v7356_v18 = vld [vmem:[#allocation2 + $0x18] sm:$0xe]  ;;  %v4122_v56 = vrot.slane %v4121_v61, 4 }
 0x419   : > { %v6907_v14 = vor.u32 %v6906_v27, %v13995_v21  ;;  %v6897_v5 = vor.u32 %v6896_v60, %v6893_v22  ;;  %v3793_v27 = vadd.f32 %v13968_v53, %v13194_v47  ;;  %v5672_v17 = vsel %vm13092_vm15, %v5667_v28, %v13988_v19  ;;  %v14024_v7 = vpop.f32.mrf.mxu0  ;;  %v12148_v23 = vld [vmem:[#allocation2 + $0x1c] sm:$0xf] }
 0x41a   : > { %11515 = vmatmul.msk.bf16.gmra.mxu0 %vm3653_vm7, %v11990_v58  ;;  %v14011_v33 = vpop.f32.mrf.mxu2  ;;  %v6910_v58 = vshll.u32 %v6697_v42, 16  ;;  %16584 = vst [vmem:[#allocation92_spill] sm:$0xff] %v14024_v7  ;;  %v4136_v42 = vrot.slane %v4134_v62, 5  ;;  %v6928_v19 = vshrl.u32 %v13729_v44, 16  ;;  %v5722_v37 = vunpack.c.l.b16 %v5672_v17  ;;  %v12149_v44 = vld [vmem:[#allocation2 + $0x88] sm:$0xf] }
 0x41b   : > { %16583 = vst [vmem:[#allocation91_spill] sm:$0xff] %v14011_v33  ;;  %v6908_v3 = vrot.slane %v6907_v14, 4  ;;  %v6898_v22 = vrot.slane %v6897_v5, 4  ;;  %v14034_v34 = vpop.f32.mrf.mxu1  ;;  %v6915_v14 = vshrl.u32 %v6698_v55, 16  ;;  %v7422_v62 = vrot.slane %v12148_v23, 5 }
 0x41c   : > { %v14008_v39 = vpop.f32.mrf.mxu3  ;;  %11552 = vmatmul.msk.bf16.gmra.mxu1 %vm3653_vm7, %v7153_v57  ;;  %v6912_v8 = vrot.slane %v6910_v58, 5  ;;  %v5723_v57 = vunpack.c.l.b16 %v5682_v20  ;;  %16587 = vst [vmem:[#allocation95_spill] sm:$0xff] %v14034_v34  ;;  %v3856_v20 = vld [vmem:[#allocation2 + $0x84] sm:$0xf]  ;;  %v3794_v17 = vadd.f32 %v13968_v53, %v13221_v15  ;;  %v14043_v61 = vrot.slane %v6924_v10, 5 }
 0x41d   : > { %v6903_v58 = vsel %vm13092_vm15, %v6898_v22, %v13995_v21  ;;  %v6930_v55 = vrot.slane %v6928_v19, 4  ;;  %v4127_v21 = vsel %vm13092_vm15, %v4122_v56, %v14004_v25  ;;  %v4142_v23 = vshll.u32 %v3856_v20, 16 }
 0x41e   : > { %v6913_v47 = vsel %vm13092_vm15, %v6908_v3, %v6912_v8  ;;  %v5739_v5 = vpack.c.b16 %v5723_v57, %v5722_v37  ;;  %v4148_v3 = vshll.u32 %v12149_v44, 16  ;;  %v11562_v8 = vrot.slane %v7356_v18, 9  ;;  %v12150_v18 = vld [vmem:[#allocation2 + $0x28] sm:$0xf] }
 0x41f   : > { %v7130_v28 = vunpack.c.l.b16 %v6913_v47  ;;  %v6917_v57 = vrot.slane %v6915_v14, 4  ;;  %v7424_v47 = vrot.slane %v7422_v62, 4  ;;  %v4139_v37 = vshrl.u32 %v3856_v20, 16 }
 0x420   : > { %v14050_v10 = vrot.slane %v4148_v3, 5  ;;  %v4287_v56 = vunpack.c.l.b16 %v4127_v21  ;;  %v6931_v14 = vor.u32 %v6930_v55, %v14043_v61  ;;  %v7357_v3 = vld [vmem:[#allocation2 + $0x24] sm:$0xe] }
 0x421   : > { %11203 = vmatmul.msk.bf16.gmra.mxu3 %vm3653_vm7, %v4308_v41  ;;  %v4137_v41 = vsel %vm13092_vm15, %v4132_v6, %v4136_v42  ;;  %v11991_v6 = vld [vmem:[#allocation2 + $0x30] sm:$0xff]  ;;  %v6920_v42 = vrot.slane %v6918_v13, 5  ;;  %v14057_v13 = vpop.f32.mrf.mxu0 }
 0x422   : > { %v14028_v43 = vpop.f32.mrf.mxu2  ;;  %v4288_v22 = vunpack.c.l.b16 %v4137_v41  ;;  %16590 = vst [vmem:[#allocation98_spill] sm:$0xff] %v14057_v13  ;;  %v7423_v41 = vsel %vm13122_vm2, %v11562_v8, %v7422_v62  ;;  %v3795_v62 = vadd.f32 %v13968_v53, %v13261_v24  ;;  %v6932_v8 = vrot.slane %v6931_v14, 4  ;;  %v3859_v24 = vld [vmem:[#allocation2 + $0x90] sm:$0xf] }
 0x423   : > { %16586 = vst [vmem:[#allocation94_spill] sm:$0xff] %v14028_v43  ;;  %v6921_v20 = vor.u32 %v6920_v42, %v6917_v57  ;;  %v11563_v57 = vrot.slane %v7357_v3, 9  ;;  %v11985_v42 = vld [vmem:[#allocation15 + $0xa0] sm:$0xff] }
 0x424   : > { %v4401_v9 = vpop.f32.mrf.mxu3  ;;  %6245 = vmatpush.bf16.msra.mxu3 %v11985_v42 }
 0x425   : > { %v14026_v60 = vadd.f32 %v4401_v9, %v3793_v27  ;;  %v4152_v27 = vshrl.u32 %v12149_v44, 16  ;;  %v7129_v9 = vunpack.c.l.b16 %v6903_v58  ;;  %v12151_v58 = vld [vmem:[#allocation2 + $0x20] sm:$0x1] }
 0x427   : > { %16585 = vst [vmem:[#allocation93_spill] sm:$0xff] %v14026_v60  ;;  %11385 = vmatmul.msk.bf16.gmra.mxu2 %vm3653_vm7, %v5739_v5  ;;  %v7154_v15 = vpack.c.b16 %v7130_v28, %v7129_v9  ;;  %v4154_v19 = vrot.slane %v4152_v27, 4  ;;  %v7429_v5 = vrot.slane %v12150_v18, 5  ;;  %v7425_v28 = vrot.slane %v12151_v58, 5 }
 0x428   : > { %v4309_v27 = vpack.c.b16 %v4288_v22, %v4287_v56  ;;  %v6934_v9 = vshll.u32 %v13737_v46, 16  ;;  %v3796_v46 = vadd.f32 %v13968_v53, %v13273_v30  ;;  %v7541_v22 = vunpack.c.l.b16 %v7423_v41 }
 0x429   : > { %v7426_v55 = vsel %vm13122_vm2, %v7424_v47, %v7425_v28  ;;  %v4155_v21 = vor.u32 %v4154_v19, %v14050_v10  ;;  %v7431_v13 = vrot.slane %v7429_v5, 4  ;;  %v14075_v28 = vsel %vm13122_vm2, %v11563_v57, %v7429_v5 }
 0x42a   : > { %11516 = vmatmul.msk.bf16.gmra.mxu0 %vm3653_vm7, %v11991_v6  ;;  %v14054_v25 = vpop.f32.mrf.mxu2  ;;  %v4141_v6 = vrot.slane %v4139_v37, 4  ;;  %v6922_v37 = vrot.slane %v6921_v20, 4  ;;  %v7542_v56 = vunpack.c.l.b16 %v7426_v55  ;;  %v6936_v58 = vrot.slane %v6934_v9, 5 }
 0x42b   : > { %16589 = vst [vmem:[#allocation97_spill] sm:$0xff] %v14054_v25  ;;  %v4156_v14 = vrot.slane %v4155_v21, 4  ;;  %v6948_v9 = vshll.u32 %v13875_v45, 16  ;;  %v6952_v55 = vshrl.u32 %v13875_v45, 16  ;;  %v4163_v21 = vshrl.u32 %v3859_v24, 16 }
 0x42c   : > { %v4403_v44 = vpop.f32.mrf.mxu3  ;;  %11553 = vmatmul.msk.bf16.gmra.mxu1 %vm3653_vm7, %v7154_v15  ;;  %v12152_v15 = vld [vmem:[#allocation2 + $0x8c] sm:$0x1]  ;;  %v6927_v30 = vsel %vm13092_vm15, %v6922_v37, %v14043_v61  ;;  %v6937_v5 = vsel %vm13092_vm15, %v6932_v8, %v6936_v58  ;;  %v7573_v42 = vpack.c.b16 %v7542_v56, %v7541_v22  ;;  %v12155_v37 = vld [vmem:[#allocation2 + $0x34] sm:$0xf]  ;;  %v6704_v45 = vld [vmem:[#allocation2 + $0x90] sm:$0xf] }
 0x42d   : > { %v14052_v34 = vadd.f32 %v4403_v44, %v3794_v17  ;;  %v4144_v17 = vrot.slane %v4142_v23, 5  ;;  %v14063_v44 = vpop.f32.mrf.mxu1  ;;  %v4158_v18 = vshll.u32 %v12152_v15, 16  ;;  %v12153_v23 = vld [vmem:[#allocation2 + $0x2c] sm:$0x1]  ;;  %v4166_v15 = vshll.u32 %v3859_v24, 16 }
 0x42e   : > { %16591 = vst [vmem:[#allocation99_spill] sm:$0xff] %v14063_v44  ;;  %v7432_v47 = vrot.slane %v12153_v23, 5  ;;  %v7436_v23 = vrot.slane %v12155_v37, 5  ;;  %v7132_v58 = vunpack.c.l.b16 %v6937_v5  ;;  %v14100_v22 = vrot.slane %v6948_v9, 5  ;;  %v11992_v37 = vld [vmem:[#allocation2 + $0x3c] sm:$0xff] }
 0x42f   : > { %16588 = vst [vmem:[#allocation96_spill] sm:$0xff] %v14052_v34  ;;  %v4145_v19 = vor.u32 %v4144_v17, %v4141_v6  ;;  %v4160_v3 = vrot.slane %v4158_v18, 5  ;;  %v6701_v17 = vld [vmem:[#allocation2 + $0x84] sm:$0xf]  ;;  %v12154_v18 = vld [vmem:[#allocation2 + $0x94] sm:$0xf] }
 0x430   : > { %v14082_v41 = vsel %vm13122_vm2, %v7431_v13, %v7432_v47  ;;  %v4172_v61 = vshll.u32 %v12154_v18, 16  ;;  %v4176_v57 = vshrl.u32 %v12154_v18, 16  ;;  %v14093_v47 = vpop.f32.mrf.mxu0  ;;  %v6942_v44 = vshll.u32 %v6701_v17, 16 }
 0x431   : > { %11204 = vmatmul.msk.bf16.gmra.mxu3 %vm3653_vm7, %v4309_v27  ;;  %v4146_v13 = vrot.slane %v4145_v19, 4  ;;  %16594 = vst [vmem:[#allocation102_spill] sm:$0xff] %v14093_v47  ;;  %v4161_v8 = vsel %vm13092_vm15, %v4156_v14, %v4160_v3  ;;  %v7131_v18 = vunpack.c.l.b16 %v6927_v30  ;;  %v6954_v56 = vrot.slane %v6952_v55, 4  ;;  %v7358_v19 = vld [vmem:[#allocation2 + $0x30] sm:$0xe] }
 0x432   : > { %v14086_v6 = vpop.f32.mrf.mxu2  ;;  %v4165_v47 = vrot.slane %v4163_v21, 4  ;;  %v4168_v14 = vrot.slane %v4166_v15, 5  ;;  %v14105_v3 = vrot.slane %v4172_v61, 5  ;;  %v4178_v5 = vrot.slane %v4176_v57, 4 }
 0x433   : > { %16593 = vst [vmem:[#allocation101_spill] sm:$0xff] %v14086_v6  ;;  %v4151_v24 = vsel %vm13092_vm15, %v4146_v13, %v14050_v10  ;;  %v6963_v7 = vshrl.u32 %v6704_v45, 16  ;;  %v6972_v6 = vshll.u32 %v13877_v12, 16  ;;  %v6976_v10 = vshrl.u32 %v13877_v12, 16 }
 0x434   : > { %v4406_v27 = vpop.f32.mrf.mxu3  ;;  %v7155_v9 = vpack.c.b16 %v7132_v58, %v7131_v18  ;;  %v6944_v13 = vrot.slane %v6942_v44, 5  ;;  %v4289_v15 = vunpack.c.l.b16 %v4151_v24  ;;  %v6955_v61 = vor.u32 %v6954_v56, %v14100_v22 }
 0x435   : > { %v14084_v20 = vadd.f32 %v4406_v27, %v3795_v62  ;;  %v7543_v62 = vunpack.c.l.b16 %v14075_v28  ;;  %v6939_v27 = vshrl.u32 %v6701_v17, 16  ;;  %v14102_v28 = vpop.f32.mrf.mxu1  ;;  %v4290_v17 = vunpack.c.l.b16 %v4161_v8 }
 0x436   : > { %16595 = vst [vmem:[#allocation103_spill] sm:$0xff] %v14102_v28  ;;  %v6966_v28 = vshll.u32 %v6704_v45, 16  ;;  %v11564_v57 = vrot.slane %v7358_v19, 9  ;;  %v7544_v8 = vunpack.c.l.b16 %v14082_v41  ;;  %v4169_v12 = vor.u32 %v4168_v14, %v4165_v47  ;;  %v12156_v45 = vld [vmem:[#allocation2 + $0x98] sm:$0x1] }
 0x437   : > { %16592 = vst [vmem:[#allocation100_spill] sm:$0xff] %v14084_v20  ;;  %11594 = vmatmul.msk.bf16.vlgmr.msrb.gmra.mxu2 %vm3653_vm7, %v7573_v42  ;;  %v6941_v55 = vrot.slane %v6939_v27, 4  ;;  %v4179_v25 = vor.u32 %v4178_v5, %v14105_v3  ;;  %v4310_v58 = vpack.c.b16 %v4290_v17, %v4289_v15  ;;  %v6958_v44 = vshll.u32 %v13893_v35, 16 }
 0x438   : > { %v14119_v27 = vrot.slane %v6972_v6, 5  ;;  %v4182_v18 = vshll.u32 %v12156_v45, 16  ;;  %v6968_v56 = vrot.slane %v6966_v28, 5  ;;  %v3797_v19 = vadd.f32 %v13968_v53, %v13293_v31  ;;  %v14132_v6 = vpop.f32.mrf.mxu0  ;;  %v12157_v28 = vld [vmem:[#allocation2 + $0x38] sm:$0x1] }
 0x439   : > { %v6945_v24 = vor.u32 %v6944_v13, %v6941_v55  ;;  %v14125_v41 = vadd.f32 %v13968_v53, %v13307_v16  ;;  %v6956_v47 = vrot.slane %v6955_v61, 4  ;;  %v14130_v35 = vsel %vm13122_vm2, %v11564_v57, %v7436_v23  ;;  %16598 = vst [vmem:[#allocation106_spill] sm:$0xff] %v14132_v6  ;;  %v3862_v31 = vld [vmem:[#allocation2 + $0x9c] sm:$0xf] }
 0x43a   : > { %11517 = vmatmul.msk.bf16.gmra.mxu0 %vm3653_vm7, %v11992_v37  ;;  %v14112_v21 = vpop.f32.mrf.mxu2  ;;  %v7438_v37 = vrot.slane %v7436_v23, 4  ;;  %v7574_v14 = vpack.c.b16 %v7544_v8, %v7543_v62  ;;  %v4170_v5 = vrot.slane %v4169_v12, 4  ;;  %v7439_v17 = vrot.slane %v12157_v28, 5  ;;  %v14157_v28 = vld [vmem:[#allocation2 + $0x40] sm:$0xf] }
 0x43b   : > { %16597 = vst [vmem:[#allocation105_spill] sm:$0xff] %v14112_v21  ;;  %v6946_v23 = vrot.slane %v6945_v24, 4 }
 0x43c   : > { %v4408_v30 = vpop.f32.mrf.mxu3  ;;  %11554 = vmatmul.msk.bf16.gmra.mxu1 %vm3653_vm7, %v7155_v9  ;;  %v12158_v9 = vld [vmem:[#allocation2 + $0xa0] sm:$0xf]  ;;  %v7440_v57 = vsel %vm13122_vm2, %v7438_v37, %v7439_v17  ;;  %v4187_v37 = vshrl.u32 %v3862_v31, 16  ;;  %v14160_v17 = vld [vmem:[#allocation2 + $0x9c] sm:$0xf] }
 0x43d   : > { %v14110_v42 = vadd.f32 %v4408_v30, %v3796_v46  ;;  %v6978_v46 = vrot.slane %v6976_v10, 4  ;;  %v6965_v30 = vrot.slane %v6963_v7, 4  ;;  %v4180_v7 = vrot.slane %v4179_v25, 4  ;;  %v14135_v15 = vpop.f32.mrf.mxu1 }
 0x43e   : > { %v6960_v10 = vrot.slane %v6958_v44, 5  ;;  %v4196_v55 = vshll.u32 %v12158_v9, 16  ;;  %v4200_v16 = vshrl.u32 %v12158_v9, 16  ;;  %16599 = vst [vmem:[#allocation107_spill] sm:$0xff] %v14135_v15  ;;  %v4175_v25 = vsel %vm13092_vm15, %v4170_v5, %v14105_v3 }
 0x43f   : > { %16596 = vst [vmem:[#allocation104_spill] sm:$0xff] %v14110_v42  ;;  %v6979_v13 = vor.u32 %v6978_v46, %v14119_v27  ;;  %v6969_v62 = vor.u32 %v6968_v56, %v6965_v30  ;;  %v6982_v44 = vshll.u32 %v13895_v49, 16  ;;  %v6951_v45 = vsel %vm13092_vm15, %v6946_v23, %v14100_v22 }
 0x440   : > { %v6961_v12 = vsel %vm13092_vm15, %v6956_v47, %v6960_v10  ;;  %v7545_v30 = vunpack.c.l.b16 %v14130_v35  ;;  %v14155_v56 = vrot.slane %v4196_v55, 5  ;;  %v4202_v3 = vrot.slane %v4200_v16, 4  ;;  %v11993_v35 = vld [vmem:[#allocation2 + $0x48] sm:$0xff] }
 0x441   : > { %11205 = vmatmul.msk.bf16.gmra.mxu3 %vm3653_vm7, %v4310_v58  ;;  %v4184_v58 = vrot.slane %v4182_v18, 5  ;;  %v4190_v18 = vshll.u32 %v3862_v31, 16  ;;  %v7134_v47 = vunpack.c.l.b16 %v6961_v12  ;;  %v7546_v5 = vunpack.c.l.b16 %v7440_v57 }
 0x442   : > { %v14152_v24 = vpop.f32.mrf.mxu2  ;;  %v6970_v49 = vrot.slane %v6969_v62, 4  ;;  %v4291_v22 = vunpack.c.l.b16 %v4175_v25  ;;  %v7133_v31 = vunpack.c.l.b16 %v6951_v45  ;;  %v6984_v9 = vrot.slane %v6982_v44, 5  ;;  %v14173_v62 = vld [vmem:[#allocation2 + $0xa0] sm:$0xf]  ;;  %v14199_v25 = vld [vmem:[#allocation2 + $0xb8] sm:$0xf] }
 0x443   : > { %v4185_v46 = vsel %vm13092_vm15, %v4180_v7, %v4184_v58  ;;  %16601 = vst [vmem:[#allocation109_spill] sm:$0xff] %v14152_v24  ;;  %v14163_v55 = vrot.slane %v4187_v37, 4  ;;  %v14165_v16 = vrot.slane %v4190_v18, 5  ;;  %v4203_v23 = vor.u32 %v4202_v3, %v14155_v56  ;;  %v14186_v37 = vld [vmem:[#allocation2 + $0xa4] sm:$0x1] }
 0x444   : > { %v4411_v61 = vpop.f32.mrf.mxu3  ;;  %v4292_v10 = vunpack.c.l.b16 %v4185_v46  ;;  %v6975_v58 = vsel %vm13092_vm15, %v6970_v49, %v14119_v27  ;;  %v3799_v12 = vadd.f32 %v13968_v53, %v13319_v40  ;;  %v14181_v44 = vadd.f32 %v13968_v53, %v13329_v29  ;;  %v14183_v46 = vpop.f32.mrf.mxu0  ;;  %v14188_v18 = vld [vmem:[#allocation2 + $0xb0] sm:$0x1]  ;;  %v7367_v3 = vld [vmem:[#allocation2 + $0x9c] sm:$0xe] }
 0x445   : > { %v14139_v8 = vadd.f32 %v4411_v61, %v3797_v19  ;;  %v6980_v19 = vrot.slane %v6979_v13, 4  ;;  %v12160_v13 = vld [vmem:[#allocation2 + $0xa4] sm:$0x1]  ;;  %16602 = vst [vmem:[#allocation110_spill] sm:$0xff] %v14183_v46  ;;  %v7156_v45 = vpack.c.b16 %v7134_v47, %v7133_v31  ;;  %v14195_v29 = vunpack.c.l.b16 %v6975_v58  ;;  %v14201_v47 = vpop.f32.mrf.mxu1 }
 0x446   : > { %v4206_v61 = vshll.u32 %v12160_v13, 16  ;;  %v4311_v40 = vpack.c.b16 %v4292_v10, %v4291_v22  ;;  %v14197_v13 = vld [vmem:[#allocation2 + $0xac] sm:$0xf]  ;;  %16604 = vst [vmem:[#allocation112_spill] sm:$0xff] %v14201_v47  ;;  %v4193_v31 = vor.u32 %v14165_v16, %v14163_v55  ;;  %v7370_v22 = vld [vmem:[#allocation2 + $0xc0] sm:$0xe] }
 0x447   : > { %16600 = vst [vmem:[#allocation108_spill] sm:$0xff] %v14139_v8  ;;  %11595 = vmatmul.msk.bf16.gmra.mxu2 %vm3653_vm7, %v7574_v14  ;;  %v6985_v57 = vsel %vm13092_vm15, %v6980_v19, %v6984_v9  ;;  %v7368_v19 = vld [vmem:[#allocation2 + $0xa8] sm:$0xe]  ;;  %v14193_v9 = vpack.c.b16 %v7546_v5, %v7545_v30  ;;  %v6996_v30 = vshll.u32 %v14173_v62, 16  ;;  %v14211_v5 = vld [vmem:[#allocation2 + $0xc4] sm:$0xf] }
 0x448   : > { %v14206_v14 = vrot.slane %v4206_v61, 5  ;;  %v4204_v10 = vrot.slane %v4203_v23, 4  ;;  %v7000_v58 = vshrl.u32 %v14173_v62, 16  ;;  %v11573_v7 = vrot.slane %v7367_v3, 9 }
 0x449   : > { %v11574_v47 = vrot.slane %v7368_v19, 9  ;;  %v7499_v55 = vrot.slane %v14173_v62, 5  ;;  %v7506_v16 = vrot.slane %v14197_v13, 5  ;;  %v7502_v23 = vrot.slane %v14186_v37, 5 }
 0x44a   : > { %11518 = vmatmul.msk.bf16.gmra.mxu0 %vm3653_vm7, %v11993_v35  ;;  %v7369_v35 = vld [vmem:[#allocation2 + $0xb4] sm:$0xe]  ;;  %v14221_v15 = vpop.f32.mrf.mxu2  ;;  %v7509_v46 = vrot.slane %v14188_v18, 5  ;;  %v11576_v6 = vrot.slane %v7370_v22, 9  ;;  %v7520_v3 = vrot.slane %v14211_v5, 5 }
 0x44b   : > { %v11575_v61 = vrot.slane %v7369_v35, 9  ;;  %16605 = vst [vmem:[#allocation113_spill] sm:$0xff] %v14221_v15  ;;  %v7500_v19 = vsel %vm13122_vm2, %v11573_v7, %v7499_v55  ;;  %v7501_v62 = vrot.slane %v7499_v55, 4  ;;  %v7507_v35 = vsel %vm13122_vm2, %v11574_v47, %v7506_v16 }
 0x44c   : > { %v4413_v27 = vpop.f32.mrf.mxu3  ;;  %11555 = vmatmul.msk.bf16.gmra.mxu1 %vm3653_vm7, %v7156_v45  ;;  %v14216_v45 = vld [vmem:[#allocation2 + $0xc8] sm:$0x1]  ;;  %v7508_v24 = vrot.slane %v7506_v16, 4  ;;  %v7565_v55 = vunpack.c.l.b16 %v7507_v35  ;;  %v7521_v34 = vsel %vm13122_vm2, %v11576_v6, %v7520_v3 }
 0x44d   : > { %v14191_v49 = vadd.f32 %v4413_v27, %v14125_v41  ;;  %v14208_v41 = vunpack.c.l.b16 %v6985_v57  ;;  %v14214_v27 = vld [vmem:[#allocation2 + $0xbc] sm:$0x1]  ;;  %v7513_v57 = vrot.slane %v14199_v25, 5  ;;  %v7523_v43 = vrot.slane %v14216_v45, 5 }
 0x44e   : > { %v7503_v22 = vsel %vm13122_vm2, %v7501_v62, %v7502_v23  ;;  %v7510_v7 = vsel %vm13122_vm2, %v7508_v24, %v7509_v46  ;;  %v7522_v23 = vrot.slane %v7520_v3, 4  ;;  %v12161_v62 = vld [vmem:[#allocation2 + $0xac] sm:$0xf]  ;;  %v3865_v46 = vld [vmem:[#allocation2 + $0xa8] sm:$0xf]  ;;  %v7002_v3 = vrot.slane %v7000_v58, 4 }
 0x44f   : > { %16603 = vst [vmem:[#allocation111_spill] sm:$0xff] %v14191_v49  ;;  %v7514_v15 = vsel %vm13122_vm2, %v11575_v61, %v7513_v57  ;;  %v7515_v21 = vrot.slane %v7513_v57, 4  ;;  %v7563_v49 = vunpack.c.l.b16 %v7500_v19  ;;  %v7564_v47 = vunpack.c.l.b16 %v7503_v22  ;;  %v14243_v57 = vpop.f32.mrf.mxu0  ;;  %v7359_v58 = vld [vmem:[#allocation2 + $0x3c] sm:$0xe] }
 0x450   : > { %v7566_v16 = vunpack.c.l.b16 %v7510_v7  ;;  %16606 = vst [vmem:[#allocation114_spill] sm:$0xff] %v14243_v57  ;;  %v7567_v42 = vunpack.c.l.b16 %v7514_v15  ;;  %v4194_v19 = vrot.slane %v4193_v31, 4  ;;  %v4220_v60 = vshll.u32 %v12161_v62, 16 }
 0x451   : > { %11206 = vmatmul.msk.bf16.gmra.mxu3 %vm3653_vm7, %v4311_v40  ;;  %v7516_v40 = vrot.slane %v14214_v27, 5  ;;  %v14247_v24 = vpack.c.b16 %v7564_v47, %v7563_v49  ;;  %v4224_v15 = vshrl.u32 %v12161_v62, 16  ;;  %v7524_v6 = vsel %vm13122_vm2, %v7522_v23, %v7523_v43  ;;  %v12162_v43 = vld [vmem:[#allocation2 + $0x44] sm:$0x1] }
 0x452   : > { %v14260_v31 = vrot.slane %v6996_v30, 5  ;;  %v7569_v49 = vunpack.c.l.b16 %v7521_v34  ;;  %v4199_v22 = vsel %vm13092_vm15, %v4194_v19, %v14155_v56  ;;  %v7446_v30 = vrot.slane %v12162_v43, 5  ;;  %v14271_v7 = vpop.f32.mrf.mxu2 }
 0x453   : > { %v7517_v61 = vsel %vm13122_vm2, %v7515_v21, %v7516_v40  ;;  %v4209_v21 = vsel %vm13092_vm15, %v4204_v10, %v14206_v14  ;;  %v7570_v40 = vunpack.c.l.b16 %v7524_v6  ;;  %v11994_v14 = vld [vmem:[#allocation2 + $0x54] sm:$0xff]  ;;  %v4214_v47 = vshll.u32 %v3865_v46, 16 }
 0x454   : > { %v4416_v33 = vpop.f32.mrf.mxu3  ;;  %v7568_v20 = vunpack.c.l.b16 %v7517_v61  ;;  %v4294_v34 = vunpack.c.l.b16 %v4209_v21  ;;  %v14276_v56 = vrot.slane %v4220_v60, 5  ;;  %v4226_v61 = vrot.slane %v4224_v15, 4 }
 0x455   : > { %v14239_v8 = vadd.f32 %v4416_v33, %v3799_v12  ;;  %v14249_v33 = vpack.c.b16 %v7566_v16, %v7565_v55  ;;  %v14251_v12 = vpop.f32.mrf.mxu1  ;;  %v4211_v55 = vshrl.u32 %v3865_v46, 16  ;;  %v16610_v23 = vshll.u32 %v14160_v17, 16 }
 0x456   : > { %16607 = vst [vmem:[#allocation115_spill] sm:$0xff] %v14251_v12  ;;  %v14256_v35 = vpack.c.b16 %v7568_v20, %v7567_v42  ;;  %v7157_v20 = vpack.c.b16 %v14208_v41, %v14195_v29  ;;  %v16608_v42 = vrot.slane %v14157_v28, 5  ;;  %v16609_v29 = vshrl.u32 %v14160_v17, 16 }
 0x457   : > { %11596 = vmatmul.msk.bf16.gmra.mxu2 %vm3653_vm7, %v14193_v9  ;;  %v14273_v9 = vpack.c.b16 %v7570_v40, %v7569_v49  ;;  %v6992_v19 = vrot.slane %v16610_v23, 5  ;;  %v4293_v21 = vunpack.c.l.b16 %v4199_v22  ;;  %v7003_v46 = vor.u32 %v7002_v3, %v14260_v31 }
 0x458   : > { %v7445_v10 = vrot.slane %v16608_v42, 4  ;;  %v6989_v41 = vrot.slane %v16609_v29, 4  ;;  %v11565_v6 = vrot.slane %v7359_v58, 9  ;;  %v4213_v15 = vrot.slane %v4211_v55, 4  ;;  %v14290_v42 = vpop.f32.mrf.mxu0 }
 0x459   : > { %v4312_v49 = vpack.c.b16 %v4294_v34, %v4293_v21  ;;  %v4216_v40 = vrot.slane %v4214_v47, 5  ;;  %16611 = vst [vmem:[#allocation116_spill] sm:$0xff] %v14290_v42  ;;  %v4227_v17 = vor.u32 %v4226_v61, %v14276_v56  ;;  %v16612_v3 = vrot.slane %v14157_v28, 5  ;;  %v12192_v42 = vld [vmem:[#allocation2 + $0x80] sm:$0x1] }
 0x45a   : > { %11519 = vmatmul.msk.bf16.gmra.mxu0 %vm3653_vm7, %v11994_v14  ;;  %v7447_v60 = vsel %vm13122_vm2, %v7445_v10, %v7446_v30  ;;  %v7006_v14 = vshll.u32 %v14186_v37, 16  ;;  %v12163_v30 = vld [vmem:[#allocation2 + $0xb0] sm:$0x1]  ;;  %v3801_v37 = vadd.f32 %v13968_v53, %v13350_v59  ;;  %v14302_v28 = vpop.f32.mrf.mxu2  ;;  %v7020_v21 = vshll.u32 %v14197_v13, 16 }
 0x45b   : > { %v7444_v22 = vsel %vm13122_vm2, %v11565_v6, %v16612_v3  ;;  %v7548_v10 = vunpack.c.l.b16 %v7447_v60  ;;  %v4230_v34 = vshll.u32 %v12163_v30, 16  ;;  %v4217_v58 = vor.u32 %v4216_v40, %v4213_v15  ;;  %16614 = vst [vmem:[#allocation118_spill] sm:$0xff] %v14302_v28  ;;  %v12164_v60 = vld [vmem:[#allocation2 + $0x4c] sm:$0xf] }
 0x45c   : > { %v4418_v16 = vpop.f32.mrf.mxu3  ;;  %11556 = vmatmul.msk.bf16.gmra.mxu1 %vm3653_vm7, %v7157_v20  ;;  %v7004_v20 = vrot.slane %v7003_v46, 4  ;;  %v7008_v55 = vrot.slane %v7006_v14, 5  ;;  %v4228_v61 = vrot.slane %v4227_v17, 4  ;;  %v7024_v46 = vshrl.u32 %v14197_v13, 16 }
 0x45d   : > { %v14283_v62 = vadd.f32 %v4418_v16, %v14181_v44  ;;  %v6993_v44 = vor.u32 %v6992_v19, %v6989_v41  ;;  %v14298_v43 = vpop.f32.mrf.mxu1  ;;  %v7547_v16 = vunpack.c.l.b16 %v7444_v22  ;;  %v6710_v41 = vld [vmem:[#allocation2 + $0xa8] sm:$0xf]  ;;  %v4232_v59 = vrot.slane %v4230_v34, 5  ;;  %v3868_v22 = vld [vmem:[#allocation2 + $0xb4] sm:$0xf] }
 0x45e   : > { %16613 = vst [vmem:[#allocation117_spill] sm:$0xff] %v14298_v43  ;;  %v7009_v19 = vsel %vm13092_vm15, %v7004_v20, %v7008_v55  ;;  %v4218_v15 = vrot.slane %v4217_v58, 4  ;;  %v7011_v14 = vshrl.u32 %v6710_v41, 16  ;;  %v7014_v17 = vshll.u32 %v6710_v41, 16  ;;  %v12165_v20 = vld [vmem:[#allocation2 + $0xb8] sm:$0xf] }
 0x45f   : > { %v6994_v29 = vrot.slane %v6993_v44, 4  ;;  %v7576_v6 = vpack.c.b16 %v7548_v10, %v7547_v16  ;;  %v4233_v44 = vsel %vm13092_vm15, %v4228_v61, %v4232_v59  ;;  %v7138_v3 = vunpack.c.l.b16 %v7009_v19  ;;  %v11995_v55 = vld [vmem:[#allocation2 + $0x60] sm:$0xff]  ;;  %v7360_v59 = vld [vmem:[#allocation2 + $0x48] sm:$0xe] }
 0x460   : > { %v4244_v30 = vshll.u32 %v12165_v20, 16  ;;  %v14315_v13 = vrot.slane %v7020_v21, 5  ;;  %v7026_v10 = vrot.slane %v7024_v46, 4  ;;  %v3802_v34 = vadd.f32 %v13968_v53, %v13367_v11  ;;  %v14319_v58 = vpop.f32.mrf.mxu0 }
 0x461   : > { %11207 = vmatmul.msk.bf16.gmra.mxu3 %vm3653_vm7, %v4312_v49  ;;  %v7450_v49 = vrot.slane %v12164_v60, 5  ;;  %v6999_v40 = vsel %vm13092_vm15, %v6994_v29, %v14260_v31  ;;  %16615 = vst [vmem:[#allocation119_spill] sm:$0xff] %v14319_v58  ;;  %v4223_v31 = vsel %vm13092_vm15, %v4218_v15, %v14276_v56  ;;  %v4296_v61 = vunpack.c.l.b16 %v4233_v44  ;;  %v12166_v15 = vld [vmem:[#allocation2 + $0x50] sm:$0x1] }
 0x462   : > { %v4235_v29 = vshrl.u32 %v3868_v22, 16  ;;  %v4238_v41 = vshll.u32 %v3868_v22, 16  ;;  %v7013_v19 = vrot.slane %v7011_v14, 4  ;;  %v4246_v60 = vrot.slane %v4244_v30, 5  ;;  %v14332_v14 = vpop.f32.mrf.mxu2 }
 0x463   : > { %v7452_v16 = vrot.slane %v7450_v49, 4  ;;  %v4295_v56 = vunpack.c.l.b16 %v4223_v31  ;;  %v7027_v44 = vor.u32 %v7026_v10, %v14315_v13  ;;  %16616 = vst [vmem:[#allocation120_spill] sm:$0xff] %v14332_v14  ;;  %v11566_v12 = vrot.slane %v7360_v59, 9 }
 0x464   : > { %v4421_v47 = vpop.f32.mrf.mxu3  ;;  %v7030_v30 = vshll.u32 %v14188_v18, 16 }
 0x465   : > { %v14304_v23 = vadd.f32 %v4421_v47, %v3801_v37  ;;  %v4248_v37 = vshrl.u32 %v12165_v20, 16  ;;  %v7137_v47 = vunpack.c.l.b16 %v6999_v40  ;;  %v14325_v21 = vpop.f32.mrf.mxu1  ;;  %v7016_v20 = vrot.slane %v7014_v17, 5 }
 0x466   : > { %v7453_v40 = vrot.slane %v12166_v15, 5  ;;  %v4313_v22 = vpack.c.b16 %v4296_v61, %v4295_v56  ;;  %v4240_v17 = vrot.slane %v4238_v41, 5  ;;  %v7451_v10 = vsel %vm13122_vm2, %v11566_v12, %v7450_v49 }
 0x467   : > { %11597 = vmatmul.msk.bf16.gmra.mxu2 %vm3653_vm7, %v7576_v6  ;;  %v7158_v11 = vpack.c.b16 %v7138_v3, %v7137_v47  ;;  %v4250_v6 = vrot.slane %v4248_v37, 4  ;;  %v4237_v37 = vrot.slane %v4235_v29, 4  ;;  %v7028_v31 = vrot.slane %v7027_v44, 4  ;;  %v12167_v47 = vld [vmem:[#allocation2 + $0xbc] sm:$0x1] }
 0x468   : > { %v7454_v3 = vsel %vm13122_vm2, %v7452_v16, %v7453_v40  ;;  %v3803_v61 = vadd.f32 %v13968_v53, %v13325_v4  ;;  %v7032_v59 = vrot.slane %v7030_v30, 5  ;;  %v14342_v16 = vpop.f32.mrf.mxu0  ;;  %v7549_v29 = vunpack.c.l.b16 %v7451_v10 }
 0x469   : > { %16617 = vst [vmem:[#allocation121_spill] sm:$0xff] %v14342_v16  ;;  %v4241_v41 = vor.u32 %v4240_v17, %v4237_v37  ;;  %v7044_v49 = vshll.u32 %v14199_v25, 16  ;;  %v7048_v15 = vshrl.u32 %v14199_v25, 16 }
 0x46a   : > { %11520 = vmatmul.msk.bf16.gmra.mxu0 %vm3653_vm7, %v11995_v55  ;;  %v7017_v55 = vor.u32 %v7016_v20, %v7013_v19  ;;  %v6713_v20 = vld [vmem:[#allocation2 + $0xb4] sm:$0xf]  ;;  %v7033_v12 = vsel %vm13092_vm15, %v7028_v31, %v7032_v59 }
 0x46b   : > { %v4242_v30 = vrot.slane %v4241_v41, 4  ;;  %v7140_v17 = vunpack.c.l.b16 %v7033_v12  ;;  %v7046_v10 = vrot.slane %v7044_v49, 5  ;;  %v7050_v31 = vrot.slane %v7048_v15, 4 }
 0x46c   : > { %v4423_v46 = vpop.f32.mrf.mxu3  ;;  %11557 = vmatmul.msk.bf16.gmra.mxu1 %vm3653_vm7, %v7158_v11  ;;  %v7550_v11 = vunpack.c.l.b16 %v7454_v3  ;;  %v7018_v19 = vrot.slane %v7017_v55, 4  ;;  %v7035_v3 = vshrl.u32 %v6713_v20, 16  ;;  %v14357_v55 = vpop.f32.mrf.mxu2  ;;  %v7054_v12 = vshll.u32 %v14214_v27, 16 }
 0x46d   : > { %v14328_v43 = vadd.f32 %v4423_v46, %v3802_v34  ;;  %v4251_v34 = vor.u32 %v4250_v6, %v4246_v60  ;;  %v4254_v46 = vshll.u32 %v12167_v47, 16  ;;  %v14350_v4 = vpop.f32.mrf.mxu1  ;;  %16618 = vst [vmem:[#allocation122_spill] sm:$0xff] %v14357_v55  ;;  %v4247_v25 = vsel %vm13092_vm15, %v4242_v30, %v4246_v60  ;;  %v11996_v47 = vld [vmem:[#allocation2 + $0x6c] sm:$0xff] }
 0x46e   : > { %v7577_v44 = vpack.c.b16 %v7550_v11, %v7549_v29  ;;  %v5933_v30 = vld [vmem:[#allocation2 + $0xc] sm:$0xe]  ;;  %v7056_v27 = vrot.slane %v7054_v12, 5 }
 0x46f   : > { %v4252_v6 = vrot.slane %v4251_v34, 4  ;;  %v4256_v40 = vrot.slane %v4254_v46, 5  ;;  %v7038_v34 = vshll.u32 %v6713_v20, 16 }
 0x470   : > { %v14367_v20 = vpop.f32.mrf.mxu0 }
 0x471   : > { %11208 = vmatmul.msk.bf16.gmra.mxu3 %vm3653_vm7, %v4313_v22  ;;  %v7023_v22 = vsel %vm13092_vm15, %v7018_v19, %v14315_v13  ;;  %v4257_v37 = vsel %vm13092_vm15, %v4252_v6, %v4256_v40  ;;  %v3804_v13 = vadd.f32 %v13968_v53, %v13343_v50  ;;  %v7040_v29 = vrot.slane %v7038_v34, 5  ;;  %16619 = vst [vmem:[#allocation123_spill] sm:$0xff] %v14367_v20  ;;  %v12168_v50 = vld [vmem:[#allocation2 + $0x10] sm:$0xf] }
 0x472   : > { %v7139_v46 = vunpack.c.l.b16 %v7023_v22  ;;  %v4297_v6 = vunpack.c.l.b16 %v4247_v25  ;;  %v7051_v19 = vor.u32 %v7050_v31, %v7046_v10  ;;  %v5999_v53 = vrot.slane %v12168_v50, 5 }
 0x474   : > { %v4426_v18 = vpop.f32.mrf.mxu3  ;;  %v7159_v59 = vpack.c.b16 %v7140_v17, %v7139_v46  ;;  %v7052_v40 = vrot.slane %v7051_v19, 4  ;;  %v6001_v17 = vrot.slane %v5999_v53, 4  ;;  %v7072_v46 = vshrl.u32 %v14211_v5, 16 }
 0x475   : > { %v14344_v56 = vadd.f32 %v4426_v18, %v3803_v61  ;;  %v4298_v61 = vunpack.c.l.b16 %v4257_v37  ;;  %v7037_v18 = vrot.slane %v7035_v3, 4  ;;  %v14371_v49 = vpop.f32.mrf.mxu1  ;;  %v14381_v3 = vpop.f32.mrf.mxu2 }
 0x476   : > { %16620 = vst [vmem:[#allocation124_spill] sm:$0xff] %v14381_v3  ;;  %v7057_v25 = vsel %vm13092_vm15, %v7052_v40, %v7056_v27  ;;  %v7074_v40 = vrot.slane %v7072_v46, 4 }
 0x477   : > { %11598 = vmatmul.msk.bf16.gmra.mxu2 %vm3653_vm7, %v7577_v44  ;;  %v4314_v60 = vpack.c.b16 %v4298_v61, %v4297_v6  ;;  %v7041_v15 = vor.u32 %v7040_v29, %v7037_v18  ;;  %v14377_v44 = vld [vmem:[%s16486_s8] ss:$0 sm:$0xff]  ;;  %v12170_v61 = vld [vmem:[#allocation2 + $0x14] sm:$0x1]  ;;  %v7142_v19 = vunpack.c.l.b16 %v7057_v25 }
 0x478   : > { %v3805_v22 = vadd.f32 %v14377_v44, %v13359_v51  ;;  %v6716_v51 = vld [vmem:[#allocation2 + $0xc0] sm:$0xf]  ;;  %v14391_v18 = vpop.f32.mrf.mxu0 }
 0x479   : > { %v7042_v34 = vrot.slane %v7041_v15, 4  ;;  %16621 = vst [vmem:[#allocation125_spill] sm:$0xff] %v14391_v18  ;;  %v7059_v50 = vshrl.u32 %v6716_v51, 16 }
 0x47a   : > { %11521 = vmatmul.msk.bf16.gmra.mxu0 %vm3653_vm7, %v11996_v47  ;;  %v7068_v47 = vshll.u32 %v14211_v5, 16  ;;  %v7062_v5 = vshll.u32 %v6716_v51, 16 }
 0x47b   : > { %v7061_v46 = vrot.slane %v7059_v50, 4 }
 0x47c   : > { %v4428_v11 = vpop.f32.mrf.mxu3  ;;  %11558 = vmatmul.msk.bf16.gmra.mxu1 %vm3653_vm7, %v7159_v59  ;;  %v7047_v59 = vsel %vm13092_vm15, %v7042_v34, %v7046_v10  ;;  %v7070_v15 = vrot.slane %v7068_v47, 5  ;;  %v11997_v10 = vld [vmem:[#allocation2 + $0x78] sm:$0xff] }
 0x47d   : > { %v14365_v41 = vadd.f32 %v4428_v11, %v3804_v13  ;;  %v11386_v13 = vrot.slane %v5933_v30, 9  ;;  %v6002_v11 = vrot.slane %v12170_v61, 5  ;;  %v7141_v30 = vunpack.c.l.b16 %v7047_v59  ;;  %v12172_v59 = vld [vmem:[#allocation2 + $0x68] sm:$0x1] }
 0x47e   : > { %v7064_v61 = vrot.slane %v7062_v5, 5 }
 0x47f   : > { %v6000_v29 = vsel %vm13122_vm2, %v11386_v13, %v5999_v53  ;;  %v6003_v6 = vsel %vm13122_vm2, %v6001_v17, %v6002_v11  ;;  %v3806_v53 = vadd.f32 %v14377_v44, %v13378_v36  ;;  %v7160_v34 = vpack.c.b16 %v7142_v19, %v7141_v30  ;;  %v14404_v13 = vpop.f32.mrf.mxu2 }
 0x480   : > { %v6119_v27 = vunpack.c.l.b16 %v6003_v6  ;;  %v6118_v17 = vunpack.c.l.b16 %v6000_v29  ;;  %16622 = vst [vmem:[#allocation126_spill] sm:$0xff] %v14404_v13  ;;  %v7075_v11 = vor.u32 %v7074_v40, %v7070_v15  ;;  %v7467_v36 = vrot.slane %v12172_v59, 5  ;;  %v12173_v29 = vld [vmem:[#allocation2 + $0x1c] sm:$0xf]  ;;  %v14413_v5 = vpop.f32.mrf.mxu0  ;;  %v16655_v13 = vld [vmem:[#allocation34_spill] sm:$0xff] }
 0x481   : > { %11209 = vmatmul.msk.bf16.gmra.mxu3 %vm3653_vm7, %v4314_v60  ;;  %v12171_v60 = vld [vmem:[#allocation2 + $0x64] sm:$0xf]  ;;  %v7078_v6 = vshll.u32 %v14216_v45, 16  ;;  %v7065_v30 = vor.u32 %v7064_v61, %v7061_v46  ;;  %16623 = vst [vmem:[#allocation127_spill] sm:$0xff] %v14413_v5  ;;  %v3807_v40 = vadd.f32 %v14377_v44, %v13399_v38  ;;  %v5938_v5 = vld [vmem:[#allocation2 + $0x48] sm:$0xe] }
 0x482   : > { %v7464_v12 = vrot.slane %v12171_v60, 5  ;;  %v6150_v51 = vpack.c.b16 %v6119_v27, %v6118_v17  ;;  %v6006_v60 = vrot.slane %v12173_v29, 5  ;;  %v7076_v50 = vrot.slane %v7075_v11, 4  ;;  %v12174_v11 = vld [vmem:[#allocation2 + $0x20] sm:$0x1] }
 0x483   : > { %v7080_v27 = vrot.slane %v7078_v6, 5  ;;  %v6009_v59 = vrot.slane %v12174_v11, 5  ;;  %v11391_v18 = vrot.slane %v5938_v5, 9  ;;  %v12185_v5 = vld [vmem:[#allocation2 + $0x58] sm:$0xf] }
 0x484   : > { %v4431_v37 = vpop.f32.mrf.mxu3  ;;  %v7466_v25 = vrot.slane %v7464_v12, 4 }
 0x485   : > { %v14383_v31 = vadd.f32 %v4431_v37, %v3805_v22  ;;  %v14397_v22 = vpop.f32.mrf.mxu1  ;;  %v7081_v46 = vsel %vm13092_vm15, %v7076_v50, %v7080_v27  ;;  %v11998_v50 = vld [vmem:[#allocation2 + $0x84] sm:$0xff]  ;;  %v3808_v27 = vadd.f32 %v14377_v44, %v13422_v2 }
 0x486   : > { %v12177_v2 = vld [vmem:[#allocation2 + $0x28] sm:$0xf] }
 0x487   : > { %11599 = vmatmul.msk.bf16.gmra.mxu2 %vm3653_vm7, %v13693_v0  ;;  %v7362_v0 = vld [vmem:[#allocation2 + $0x60] sm:$0xe]  ;;  %v14425_v38 = vpop.f32.mrf.mxu2 }
 0x488   : > { %v11568_v19 = vrot.slane %v7362_v0, 9  ;;  %16624 = vst [vmem:[#allocation128_spill] sm:$0xff] %v14425_v38  ;;  %v12186_v38 = vld [vmem:[#allocation2 + $0x5c] sm:$0x1] }
 0x48a   : > { %11522 = vmatmul.msk.bf16.gmra.mxu0 %vm3653_vm7, %v11997_v10  ;;  %v7468_v10 = vsel %vm13122_vm2, %v7466_v25, %v7467_v36  ;;  %v7066_v25 = vrot.slane %v7065_v30, 4 }
 0x48b   : > { %v7554_v17 = vunpack.c.l.b16 %v7468_v10  ;;  %v12175_v10 = vld [vmem:[#allocation2 + $0x70] sm:$0xf] }
 0x48c   : > { %v4433_v37 = vpop.f32.mrf.mxu3  ;;  %11559 = vmatmul.msk.bf16.gmra.mxu1 %vm3653_vm7, %v7160_v34  ;;  %v6008_v34 = vrot.slane %v6006_v60, 4 }
 0x48d   : > { %v14406_v47 = vadd.f32 %v4433_v37, %v3806_v53  ;;  %v7465_v53 = vsel %vm13122_vm2, %v11568_v19, %v7464_v12  ;;  %v14419_v45 = vpop.f32.mrf.mxu1  ;;  %v7071_v12 = vsel %vm13092_vm15, %v7066_v25, %v7070_v15  ;;  %v7144_v19 = vunpack.c.l.b16 %v7081_v46  ;;  %v14436_v15 = vpop.f32.mrf.mxu0 }
 0x48e   : > { %v7553_v61 = vunpack.c.l.b16 %v7465_v53  ;;  %v6010_v29 = vsel %vm13122_vm2, %v6008_v34, %v6009_v59  ;;  %v7143_v53 = vunpack.c.l.b16 %v7071_v12  ;;  %16625 = vst [vmem:[#allocation129_spill] sm:$0xff] %v14436_v15  ;;  %v12176_v59 = vld [vmem:[#allocation2 + $0x74] sm:$0x1] }
 0x48f   : > { %v7474_v12 = vrot.slane %v12176_v59, 5 }
 0x490   : > { %v7579_v36 = vpack.c.b16 %v7554_v17, %v7553_v61  ;;  %v7161_v34 = vpack.c.b16 %v7144_v19, %v7143_v53 }
 0x491   : > { %11418 = vmatmul.msk.bf16.vlgmr.msra.gmra.mxu3 %vm3653_vm7, %v6150_v51  ;;  %v5934_v51 = vld [vmem:[#allocation2 + $0x18] sm:$0xe] }
 0x492   : > { %v11387_v6 = vrot.slane %v5934_v51, 9 }
 0x494   : > { %v4436_v37 = vpop.f32.mrf.mxu3  ;;  %v6007_v30 = vsel %vm13122_vm2, %v11387_v6, %v6006_v60  ;;  %v7363_v60 = vld [vmem:[#allocation2 + $0x6c] sm:$0xe]  ;;  %v14444_v6 = vpop.f32.mrf.mxu2 }
 0x495   : > { %v14421_v0 = vadd.f32 %v4436_v37, %v3807_v40  ;;  %v7471_v40 = vrot.slane %v12175_v10, 5  ;;  %v6121_v37 = vunpack.c.l.b16 %v6010_v29  ;;  %v6120_v25 = vunpack.c.l.b16 %v6007_v30  ;;  %v14441_v61 = vpop.f32.mrf.mxu1  ;;  %16626 = vst [vmem:[#allocation130_spill] sm:$0xff] %v14444_v6  ;;  %v16627_v10 = vld [vmem:[#allocation39_spill] sm:$0xff] }
 0x496   : > { %v11569_v29 = vrot.slane %v7363_v60, 9  ;;  %v3809_v30 = vadd.f32 %v14377_v44, %v16627_v10  ;;  %v12184_v6 = vld [vmem:[#allocation2 + $0x50] sm:$0x1] }
 0x497   : > { %11600 = vmatmul.msk.bf16.gmra.mxu2 %vm3653_vm7, %v7579_v36  ;;  %v7473_v46 = vrot.slane %v7471_v40, 4  ;;  %v6151_v11 = vpack.c.b16 %v6121_v37, %v6120_v25  ;;  %v6013_v36 = vrot.slane %v12177_v2, 5  ;;  %v14455_v25 = vpop.f32.mrf.mxu0 }
 0x498   : > { %16628 = vst [vmem:[#allocation39_spill] sm:$0xff] %v14455_v25  ;;  %v12181_v25 = vld [vmem:[#allocation2 + $0x40] sm:$0xf] }
 0x499   : > { %v7475_v19 = vsel %vm13122_vm2, %v7473_v46, %v7474_v12  ;;  %v6015_v37 = vrot.slane %v6013_v36, 4  ;;  %v11999_v12 = vld [vmem:[#allocation2 + $0x90] sm:$0xff] }
 0x49a   : > { %11523 = vmatmul.msk.bf16.gmra.mxu0 %vm3653_vm7, %v11998_v50  ;;  %v7472_v50 = vsel %vm13122_vm2, %v11569_v29, %v7471_v40  ;;  %v16629_v29 = vld [vmem:[#allocation42_spill] sm:$0xff] }
 0x49b   : > { %v7555_v59 = vunpack.c.l.b16 %v7472_v50 }
 0x49c   : > { %v4438_v17 = vpop.f32.mrf.mxu3  ;;  %11560 = vmatmul.msk.bf16.gmra.mxu1 %vm3653_vm7, %v7161_v34  ;;  %v5935_v34 = vld [vmem:[#allocation2 + $0x24] sm:$0xe]  ;;  %v14464_v10 = vpop.f32.mrf.mxu2 }
 0x49d   : > { %v14439_v51 = vadd.f32 %v4438_v17, %v3808_v27  ;;  %v7556_v27 = vunpack.c.l.b16 %v7475_v19  ;;  %v11388_v15 = vrot.slane %v5935_v34, 9  ;;  %v3810_v19 = vadd.f32 %v14377_v44, %v16629_v29  ;;  %16630 = vst [vmem:[#allocation42_spill] sm:$0xff] %v14464_v10  ;;  %v14722_v14 = vpop.f32.mrf.mxu1 }
 0x49f   : > { %v7580_v2 = vpack.c.b16 %v7556_v27, %v7555_v59  ;;  %v6014_v40 = vsel %vm13122_vm2, %v11388_v15, %v6013_v36  ;;  %v12179_v59 = vld [vmem:[#allocation2 + $0x34] sm:$0xf] }
 0x4a0   : > { %v6122_v27 = vunpack.c.l.b16 %v6014_v40  ;;  %v16632_v15 = vld [vmem:[#allocation44_spill] sm:$0xff] }
 0x4a1   : > { %11419 = vmatmul.msk.bf16.gmra.mxu3 %vm3653_vm7, %v6151_v11  ;;  %v12178_v11 = vld [vmem:[#allocation2 + $0x2c] sm:$0x1]  ;;  %v3811_v36 = vadd.f32 %v14377_v44, %v16632_v15  ;;  %v16634_v15 = vld [vmem:[#allocation47_spill] sm:$0xff] }
 0x4a2   : > { %v6016_v60 = vrot.slane %v12178_v11, 5  ;;  %v6020_v11 = vrot.slane %v12179_v59, 5  ;;  %v12000_v59 = vld [vmem:[#allocation2 + $0x9c] sm:$0xff] }
 0x4a4   : > { %v4441_v53 = vpop.f32.mrf.mxu3  ;;  %v6017_v46 = vsel %vm13122_vm2, %v6015_v37, %v6016_v60  ;;  %v14469_v37 = vpop.f32.mrf.mxu0 }
 0x4a5   : > { %v14453_v17 = vadd.f32 %v4441_v53, %v3809_v30  ;;  %v6123_v30 = vunpack.c.l.b16 %v6017_v46  ;;  %16631 = vst [vmem:[#allocation131_spill] sm:$0xff] %v14469_v37  ;;  %v14474_v29 = vpop.f32.mrf.mxu2 }
 0x4a6   : > { %16633 = vst [vmem:[#allocation44_spill] sm:$0xff] %v14474_v29  ;;  %v6027_v29 = vrot.slane %v12181_v25, 5 }
 0x4a7   : > { %11601 = vmatmul.msk.bf16.gmra.mxu2 %vm3653_vm7, %v7580_v2  ;;  %v6152_v34 = vpack.c.b16 %v6123_v30, %v6122_v27  ;;  %v6022_v2 = vrot.slane %v6020_v11, 4 }
 0x4aa   : > { %11524 = vmatmul.msk.bf16.gmra.mxu0 %vm3653_vm7, %v11999_v12  ;;  %v5936_v12 = vld [vmem:[#allocation2 + $0x30] sm:$0xe] }
 0x4ab   : > { %v11389_v40 = vrot.slane %v5936_v12, 9 }
 0x4ac   : > { %v4443_v50 = vpop.f32.mrf.mxu3  ;;  %v14480_v27 = vpop.f32.mrf.mxu0 }
 0x4ad   : > { %v14467_v53 = vadd.f32 %v4443_v50, %v3810_v19  ;;  %v12180_v19 = vld [vmem:[#allocation2 + $0x38] sm:$0x1] }
 0x4ae   : > { %v6023_v50 = vrot.slane %v12180_v19, 5 }
 0x4b0   : > { %v6024_v30 = vsel %vm13122_vm2, %v6022_v2, %v6023_v50  ;;  %v14491_v2 = vpop.f32.mrf.mxu2 }
 0x4b1   : > { %11420 = vmatmul.msk.bf16.gmra.mxu3 %vm3653_vm7, %v6152_v34  ;;  %v6021_v34 = vsel %vm13122_vm2, %v11389_v40, %v6020_v11  ;;  %16636 = vst [vmem:[#allocation132_spill] sm:$0xff] %v14491_v2 }
 0x4b2   : > { %v6124_v19 = vunpack.c.l.b16 %v6021_v34 }
 0x4b4   : > { %v4446_v60 = vpop.f32.mrf.mxu3  ;;  %v14496_v40 = vpop.f32.mrf.mxu0 }
 0x4b5   : > { %v14476_v46 = vadd.f32 %v4446_v60, %v3811_v36  ;;  %v3812_v36 = vadd.f32 %v14377_v44, %v16634_v15  ;;  %v6125_v60 = vunpack.c.l.b16 %v6024_v30  ;;  %v6029_v30 = vrot.slane %v6027_v29, 4 }
 0x4b7   : > { %11602 = vmatmul.msk.bf16.gmra.mxu2 %vm3653_vm7, %v13772_v48  ;;  %v6153_v50 = vpack.c.b16 %v6125_v60, %v6124_v19  ;;  %v16637_v48 = vld [vmem:[#allocation51_spill] sm:$0xff] }
 0x4b8   : > { %v3813_v11 = vadd.f32 %v14377_v44, %v16637_v48  ;;  %v14502_v19 = vpop.f32.mrf.mxu2 }
 0x4b9   : > { %16639 = vst [vmem:[#allocation133_spill] sm:$0xff] %v14502_v19 }
 0x4ba   : > { %11525 = vmatmul.msk.bf16.gmra.mxu0 %vm3653_vm7, %v12000_v59  ;;  %v5937_v59 = vld [vmem:[#allocation2 + $0x3c] sm:$0xe] }
 0x4bb   : > { %v11390_v34 = vrot.slane %v5937_v59, 9 }
 0x4bc   : > { %v4448_v37 = vpop.f32.mrf.mxu3 }
 0x4bd   : > { %v14489_v12 = vadd.f32 %v4448_v37, %v3812_v36  ;;  %v12182_v37 = vld [vmem:[#allocation2 + $0x44] sm:$0x1]  ;;  %v6028_v25 = vsel %vm13122_vm2, %v11390_v34, %v6027_v29 }
 0x4be   : > { %v6030_v36 = vrot.slane %v12182_v37, 5  ;;  %v12183_v37 = vld [vmem:[#allocation2 + $0x4c] sm:$0xf] }
 0x4bf   : > { %16635 = vst [vmem:[#allocation47_spill] sm:$0xff] %v14489_v12 }
 0x4c0   : > { %v6031_v60 = vsel %vm13122_vm2, %v6029_v30, %v6030_v36  ;;  %v6034_v30 = vrot.slane %v12183_v37, 5  ;;  %v16641_v36 = vld [vmem:[#allocation59_spill] sm:$0xff]  ;;  %v14516_v19 = vpop.f32.mrf.mxu2 }
 0x4c1   : > { %11421 = vmatmul.msk.bf16.gmra.mxu3 %vm3653_vm7, %v6153_v50  ;;  %v12001_v50 = vld [vmem:[#allocation2 + $0xa8] sm:$0xff]  ;;  %v6127_v48 = vunpack.c.l.b16 %v6031_v60  ;;  %16642 = vst [vmem:[#allocation59_spill] sm:$0xff] %v14516_v19  ;;  %v6041_v19 = vrot.slane %v12185_v5, 5 }
 0x4c2   : > { %v6036_v34 = vrot.slane %v6034_v30, 4 }
 0x4c4   : > { %v4451_v15 = vpop.f32.mrf.mxu3 }
 0x4c5   : > { %v14498_v10 = vadd.f32 %v4451_v15, %v3813_v11  ;;  %v6126_v11 = vunpack.c.l.b16 %v6028_v25  ;;  %v14511_v15 = vpop.f32.mrf.mxu0 }
 0x4c7   : > { %16638 = vst [vmem:[#allocation51_spill] sm:$0xff] %v14498_v10  ;;  %11603 = vmatmul.msk.bf16.gmra.mxu2 %vm3653_vm7, %v13930_v32  ;;  %v6154_v59 = vpack.c.b16 %v6127_v48, %v6126_v11  ;;  %v3815_v32 = vadd.f32 %v14377_v44, %v16641_v36  ;;  %v6035_v11 = vsel %vm13122_vm2, %v11391_v18, %v6034_v30  ;;  %v6043_v30 = vrot.slane %v6041_v19, 4 }
 0x4ca   : > { %11526 = vmatmul.msk.bf16.gmra.mxu0 %vm3653_vm7, %v12001_v50  ;;  %v6037_v50 = vrot.slane %v12184_v6, 5  ;;  %v6128_v6 = vunpack.c.l.b16 %v6035_v11 }
 0x4cc   : > { %v14508_v2 = vpop.f32.mrf.mxu3  ;;  %v6038_v48 = vsel %vm13122_vm2, %v6036_v34, %v6037_v50 }
 0x4cd   : > { %16640 = vst [vmem:[#allocation134_spill] sm:$0xff] %v14508_v2  ;;  %v14520_v25 = vpop.f32.mrf.mxu0  ;;  %v6129_v37 = vunpack.c.l.b16 %v6038_v48  ;;  %v5939_v48 = vld [vmem:[#allocation2 + $0x54] sm:$0xe]  ;;  %v6065_v2 = vrot.slane %v12192_v42, 5 }
 0x4ce   : > { %v11392_v11 = vrot.slane %v5939_v48, 9 }
 0x4d1   : > { %11422 = vmatmul.msk.bf16.gmra.mxu3 %vm3653_vm7, %v6154_v59  ;;  %v12002_v59 = vld [vmem:[#allocation2 + $0xb4] sm:$0xff] }
 0x4d4   : > { %v4456_v29 = vpop.f32.mrf.mxu3 }
 0x4d5   : > { %v14518_v60 = vadd.f32 %v4456_v29, %v3815_v32  ;;  %v14531_v32 = vpop.f32.mrf.mxu2  ;;  %v6155_v29 = vpack.c.b16 %v6129_v37, %v6128_v6  ;;  %v14534_v34 = vpop.f32.mrf.mxu0  ;;  %v12521_v6 = vmov 0.0  }
 0x4d6   : > { %7783 = vst.msk [vmem:[#allocation3 + $0x8] sm:$0xff] %vm3653_vm7, %v12521_v6 }
 0x4d7   : > { %16643 = vst [vmem:[#allocation135_spill] sm:$0xff] %v14518_v60  ;;  %11604 = vmatmul.msk.bf16.gmra.mxu2 %vm3653_vm7, %v13932_v54  ;;  %v3817_v54 = vadd.f32 %v14377_v44, %v13778_v1  ;;  %v6042_v1 = vsel %vm13122_vm2, %v11392_v11, %v6041_v19  ;;  %v14711_v60 = vld [vmem:[#allocation16 + $0x7] ss:$0 sm:$0xff] }
 0x4d8   : > { %7782 = vst.msk [vmem:[#allocation3] sm:$0xff] %vm3653_vm7, %v12521_v6 }
 0x4d9   : > { %7786 = vst.msk [vmem:[#allocation3 + $0x18] sm:$0xff] %vm3653_vm7, %v12521_v6 }
 0x4da   : > { %11527 = vmatmul.msk.bf16.gmra.mxu0 %vm3653_vm7, %v12002_v59  ;;  %v6044_v59 = vrot.slane %v12186_v38, 5  ;;  %v12003_v38 = vld [vmem:[#allocation2 + $0xc0] sm:$0xff]  ;;  %7787 = vst.msk [vmem:[#allocation3 + $0x20] sm:$0xff] %vm3653_vm7, %v12521_v6 }
 0x4db   : > { %7789 = vst.msk [vmem:[#allocation3 + $0x30] sm:$0xff] %vm3653_vm7, %v12521_v6 }
 0x4dc   : > { %v14528_v36 = vpop.f32.mrf.mxu3  ;;  %v6045_v37 = vsel %vm13122_vm2, %v6043_v30, %v6044_v59  ;;  %v6130_v30 = vunpack.c.l.b16 %v6042_v1  ;;  %7790 = vst.msk [vmem:[#allocation3 + $0x38] sm:$0xff] %vm3653_vm7, %v12521_v6  ;;  %v12187_v59 = vld [vmem:[#allocation2 + $0x64] sm:$0xf] }
 0x4dd   : > { %16644 = vst [vmem:[#allocation136_spill] sm:$0xff] %v14528_v36  ;;  %v14540_v20 = vpop.f32.mrf.mxu2  ;;  %v6131_v5 = vunpack.c.l.b16 %v6045_v37  ;;  %v7876_v48 = vld [vmem:[#allocation3 + $0x8] sm:$0xff]  ;;  %v6048_v11 = vrot.slane %v12187_v59, 5  ;;  %v16656_v36 = vld [vmem:[#allocation23_spill] sm:$0xff] }
 0x4de   : > { %7792 = vst.msk [vmem:[#allocation3 + $0x48] sm:$0xff] %vm3653_vm7, %v12521_v6 }
 0x4df   : > { %7793 = vst.msk [vmem:[#allocation3 + $0x50] sm:$0xff] %vm3653_vm7, %v12521_v6  ;;  %v6050_v59 = vrot.slane %v6048_v11, 4 }
 0x4e0   : > { %7795 = vst.msk [vmem:[#allocation3 + $0x60] sm:$0xff] %vm3653_vm7, %v12521_v6 }
 0x4e1   : > { %11423 = vmatmul.msk.bf16.gmra.mxu3 %vm3653_vm7, %v6155_v29  ;;  %v3818_v29 = vadd.f32 %v14377_v44, %v13820_v63  ;;  %v6156_v63 = vpack.c.b16 %v6131_v5, %v6130_v30  ;;  %7796 = vst.msk [vmem:[#allocation3 + $0x68] sm:$0xff] %vm3653_vm7, %v12521_v6 }
 0x4e2   : > { %7798 = vst.msk [vmem:[#allocation3 + $0x78] sm:$0xff] %vm3653_vm7, %v12521_v6 }
 0x4e3   : > { %7799 = vst.msk [vmem:[#allocation3 + $0x80] sm:$0xff] %vm3653_vm7, %v12521_v6 }
 0x4e4   : > { %v4461_v18 = vpop.f32.mrf.mxu3  ;;  %7801 = vst.msk [vmem:[#allocation3 + $0x90] sm:$0xff] %vm3653_vm7, %v12521_v6 }
 0x4e5   : > { %v14538_v50 = vadd.f32 %v4461_v18, %v3817_v54  ;;  %v14558_v54 = vpop.f32.mrf.mxu0  ;;  %v14576_v1 = vpop.f32.mrf.mxu2  ;;  %7802 = vst.msk [vmem:[#allocation3 + $0x98] sm:$0xff] %vm3653_vm7, %v12521_v6 }
 0x4e6   : > { %7804 = vst.msk [vmem:[#allocation3 + $0xa8] sm:$0xff] %vm3653_vm7, %v12521_v6 }
 0x4e7   : > { %16645 = vst [vmem:[#allocation137_spill] sm:$0xff] %v14538_v50  ;;  %11605 = vmatmul.msk.bf16.gmra.mxu2 %vm3653_vm7, %v14247_v24  ;;  %v14561_v24 = vld [vmem:[#allocation16] ss:$0 sm:$0xff]  ;;  %v14626_v50 = vld [vmem:[#allocation16 + $0x2] ss:$0 sm:$0xff] }
 0x4e8   : > { %v7910_v37 = vmul.f32 %v14561_v24, %v7876_v48  ;;  %7805 = vst.msk [vmem:[#allocation3 + $0xb0] sm:$0xff] %vm3653_vm7, %v12521_v6 }
 0x4e9   : > { %7807 = vst.msk [vmem:[#allocation3 + $0xc0] sm:$0xff] %vm3653_vm7, %v12521_v6 }
 0x4ea   : > { %11528 = vmatmul.msk.bf16.gmra.mxu0 %vm3653_vm7, %v12003_v38  ;;  %v7875_v38 = vld [vmem:[#allocation3] sm:$0xff]  ;;  %v7944_v5 = vsel %vm3653_vm7, %v7910_v37, 0.0  ;;  %v5940_v37 = vld [vmem:[#allocation2 + $0x60] sm:$0xe]  ;;  %7808 = vst.msk [vmem:[#allocation3 + $0xc8] sm:$0xff] %vm3653_vm7, %v12521_v6 }
 0x4eb   : > { %7945 = vadd.xlane.f32.xlu0 %v7944_v5  ;;  %7810 = vst.msk [vmem:[#allocation3 + $0xd8] sm:$0xff] %vm3653_vm7, %v12521_v6 }
 0x4ec   : > { %v4463_v18 = vpop.f32.mrf.mxu3  ;;  %7811 = vst.msk [vmem:[#allocation3 + $0xe0] sm:$0xff] %vm3653_vm7, %v12521_v6 }
 0x4ed   : > { %v14565_v19 = vadd.f32 %v4463_v18, %v3818_v29  ;;  %v7909_v29 = vmul.f32 %v14561_v24, %v7875_v38  ;;  %v16647_v18 = vld [vmem:[#allocation73_spill] sm:$0xff]  ;;  %7813 = vst.msk [vmem:[#allocation3 + $0xf0] sm:$0xff] %vm3653_vm7, %v12521_v6 }
 0x4ee   : > { %v3819_v30 = vadd.f32 %v14377_v44, %v16647_v18  ;;  %7814 = vst.msk [vmem:[#allocation3 + $0xf8] sm:$0xff] %vm3653_vm7, %v12521_v6 }
 0x4ef   : > { %16646 = vst [vmem:[#allocation138_spill] sm:$0xff] %v14565_v19  ;;  %v7941_v48 = vsel %vm3653_vm7, %v7909_v29, 0.0  ;;  %v12188_v19 = vld [vmem:[#allocation2 + $0x68] sm:$0x1]  ;;  %v11393_v29 = vrot.slane %v5940_v37, 9 }
 0x4f0   : > { %7942 = vadd.xlane.f32.xlu2 %v7941_v48  ;;  %v6051_v18 = vrot.slane %v12188_v19, 5  ;;  %v16649_v48 = vld [vmem:[#allocation76_spill] sm:$0xff]  ;;  %7816 = vst.msk [vmem:[#allocation3 + $0x108] sm:$0xff] %vm3653_vm7, %v12521_v6 }
 0x4f1   : > { %11424 = vmatmul.msk.bf16.gmra.mxu3 %vm3653_vm7, %v6156_v63  ;;  %v6049_v19 = vsel %vm13122_vm2, %v11393_v29, %v6048_v11  ;;  %v8069_v29 = vld [vmem:[#allocation3 + $0x1] sm:$0xff]  ;;  %7817 = vst.msk [vmem:[#allocation3 + $0x110] sm:$0xff] %vm3653_vm7, %v12521_v6 }
 0x4f2   : > { %v6052_v5 = vsel %vm13122_vm2, %v6050_v59, %v6051_v18  ;;  %v14616_v59 = vpop.f32.mrf.mxu2  ;;  %v6132_v11 = vunpack.c.l.b16 %v6049_v19  ;;  %7819 = vst.msk [vmem:[#allocation3 + $0x120] sm:$0xff] %vm3653_vm7, %v12521_v6 }
 0x4f3   : > { %v6133_v37 = vunpack.c.l.b16 %v6052_v5  ;;  %7820 = vst.msk [vmem:[#allocation3 + $0x128] sm:$0xff] %vm3653_vm7, %v12521_v6 }
 0x4f4   : > { %v4466_v63 = vpop.f32.mrf.mxu3  ;;  %7822 = vst.msk [vmem:[#allocation3 + $0x138] sm:$0xff] %vm3653_vm7, %v12521_v6 }
 0x4f5   : > { %v14592_v38 = vadd.f32 %v4466_v63, %v3819_v30  ;;  %v14612_v30 = vld [vmem:[#allocation16 + $0x1] ss:$0 sm:$0xff]  ;;  %v3820_v63 = vadd.f32 %v14377_v44, %v16649_v48  ;;  %v6157_v48 = vpack.c.b16 %v6133_v37, %v6132_v11  ;;  %7823 = vst.msk [vmem:[#allocation3 + $0x140] sm:$0xff] %vm3653_vm7, %v12521_v6 }
 0x4f6   : > { %v8103_v5 = vmul.f32 %v14612_v30, %v8069_v29  ;;  %7825 = vst.msk [vmem:[#allocation3 + $0x150] sm:$0xff] %vm3653_vm7, %v12521_v6 }
 0x4f7   : > { %16648 = vst [vmem:[#allocation73_spill] sm:$0xff] %v14592_v38  ;;  %11606 = vmatmul.msk.bf16.gmra.mxu2 %vm3653_vm7, %v14249_v33  ;;  %v8263_v38 = vld [vmem:[#allocation3 + $0x2] sm:$0xff] }
 0x4f8   : > { %v8135_v19 = vsel %vm3653_vm7, %v8103_v5, 0.0  ;;  %7826 = vst.msk [vmem:[#allocation3 + $0x158] sm:$0xff] %vm3653_vm7, %v12521_v6 }
 0x4f9   : > { %8136 = vadd.xlane.f32.xlu0 %v8135_v19  ;;  %7828 = vst.msk [vmem:[#allocation3 + $0x168] sm:$0xff] %vm3653_vm7, %v12521_v6 }
 0x4fa   : > { %7829 = vst.msk [vmem:[#allocation3 + $0x170] sm:$0xff] %vm3653_vm7, %v12521_v6 }
 0x4fb   : > { %7831 = vst.msk [vmem:[#allocation3 + $0x180] sm:$0xff] %vm3653_vm7, %v12521_v6 }
 0x4fc   : > { %v4468_v18 = vpop.f32.mrf.mxu3  ;;  %7832 = vst.msk [vmem:[#allocation3 + $0x188] sm:$0xff] %vm3653_vm7, %v12521_v6 }
 0x4fd   : > { %v14622_v33 = vadd.f32 %v4468_v18, %v3820_v63  ;;  %v8297_v63 = vmul.f32 %v14626_v50, %v8263_v38  ;;  %v12189_v18 = vld [vmem:[#allocation2 + $0x70] sm:$0xf]  ;;  %7834 = vst.msk [vmem:[#allocation3 + $0x198] sm:$0xff] %vm3653_vm7, %v12521_v6 }
 0x4fe   : > { %v16651_v38 = vld [vmem:[#allocation79_spill] sm:$0xff]  ;;  %7835 = vst.msk [vmem:[#allocation3 + $0x1a0] sm:$0xff] %vm3653_vm7, %v12521_v6 }
 0x4ff   : > { %16650 = vst [vmem:[#allocation76_spill] sm:$0xff] %v14622_v33  ;;  %v6055_v33 = vrot.slane %v12189_v18, 5  ;;  %v8329_v37 = vsel %vm3653_vm7, %v8297_v63, 0.0  ;;  %v3821_v11 = vadd.f32 %v14377_v44, %v16651_v38  ;;  %v5941_v63 = vld [vmem:[#allocation2 + $0x6c] sm:$0xe] }
 0x500   : > { %8330 = vadd.xlane.f32.xlu2 %v8329_v37  ;;  %v12190_v18 = vld [vmem:[#allocation2 + $0x74] sm:$0x1]  ;;  %v11394_v38 = vrot.slane %v5941_v63, 9  ;;  %7785 = vst.msk [vmem:[#allocation3 + $0x10] sm:$0x3] %vm7784_vm3, %v12521_v6 }
 0x501   : > { %11425 = vmatmul.msk.bf16.gmra.mxu3 %vm3653_vm7, %v6157_v48  ;;  %v6057_v5 = vrot.slane %v6055_v33, 4  ;;  %v14649_v48 = vpop.f32.mrf.mxu2  ;;  %v6058_v37 = vrot.slane %v12190_v18, 5  ;;  %v16653_v18 = vld [vmem:[#allocation83_spill] sm:$0xff]  ;;  %7788 = vst.msk [vmem:[#allocation3 + $0x28] sm:$0x3] %vm7784_vm3, %v12521_v6 }
 0x502   : > { %v16654_v63 = vld [vmem:[#allocation87_spill] sm:$0xff]  ;;  %7791 = vst.msk [vmem:[#allocation3 + $0x40] sm:$0x3] %vm7784_vm3, %v12521_v6 }
 0x503   : > { %v4905_v16 = vadd.f32 %v16655_v13, %v16654_v63  ;;  %7794 = vst.msk [vmem:[#allocation3 + $0x58] sm:$0x3] %vm7784_vm3, %v12521_v6 }
 0x504   : > { %v4471_v29 = vpop.f32.mrf.mxu3  ;;  %7797 = vst.msk [vmem:[#allocation3 + $0x70] sm:$0x3] %vm7784_vm3, %v12521_v6 }
 0x505   : > { %v14651_v19 = vadd.f32 %v4471_v29, %v3821_v11  ;;  %v6059_v11 = vsel %vm13122_vm2, %v6057_v5, %v6058_v37  ;;  %v6056_v29 = vsel %vm13122_vm2, %v11394_v38, %v6055_v33  ;;  %7800 = vst.msk [vmem:[#allocation3 + $0x88] sm:$0x3] %vm7784_vm3, %v12521_v6  ;;  %v9264_v55 = vld [vmem:[#allocation3 + $0x199] sm:$0xff] }
 0x506   : > { %v6135_v5 = vunpack.c.l.b16 %v6059_v11  ;;  %v6134_v33 = vunpack.c.l.b16 %v6056_v29  ;;  %7803 = vst.msk [vmem:[#allocation3 + $0xa0] sm:$0x3] %vm7784_vm3, %v12521_v6  ;;  %v16659_v29 = vld [vmem:[#allocation36_spill] sm:$0xff] }
 0x507   : > { %16652 = vst [vmem:[#allocation79_spill] sm:$0xff] %v14651_v19  ;;  %11607 = vmatmul.msk.bf16.gmra.mxu2 %vm3653_vm7, %v14256_v35  ;;  %v3822_v19 = vadd.f32 %v14377_v44, %v16653_v18  ;;  %v3792_v35 = vadd.f32 %v14377_v44, %v16656_v36  ;;  %v16658_v18 = vld [vmem:[#allocation24_spill] sm:$0xff] }
 0x508   : > { %v6158_v11 = vpack.c.b16 %v6135_v5, %v6134_v33  ;;  %v5219_v63 = vadd.f32 %v16658_v18, %v4905_v16  ;;  %v12191_v44 = vld [vmem:[#allocation2 + $0x7c] sm:$0xf]  ;;  %7806 = vst.msk [vmem:[#allocation3 + $0xb8] sm:$0x3] %vm7784_vm3, %v12521_v6  ;;  %v16660_v16 = vld [vmem:[#allocation50_spill] sm:$0xff] }
 0x509   : > { %v4477_v13 = vadd.f32 %v14008_v39, %v3792_v35  ;;  %v14688_v38 = vpop.f32.mrf.mxu2  ;;  %v6062_v36 = vrot.slane %v12191_v44, 5  ;;  %v9071_v39 = vld [vmem:[#allocation3 + $0x1a0] sm:$0xff]  ;;  %v8264_v33 = vld [vmem:[#allocation3 + $0xa] sm:$0xff]  ;;  %7809 = vst.msk [vmem:[#allocation3 + $0xd0] sm:$0x3] %vm7784_vm3, %v12521_v6 }
 0x50a   : > { %v5901_v35 = vadd.f32 %v16660_v16, %v5219_v63  ;;  %v5942_v44 = vld [vmem:[#allocation2 + $0x78] sm:$0xe]  ;;  %v8298_v58 = vmul.f32 %v14626_v50, %v8264_v33  ;;  %7812 = vst.msk [vmem:[#allocation3 + $0xe8] sm:$0x3] %vm7784_vm3, %v12521_v6  ;;  %v9070_v16 = vld [vmem:[#allocation3 + $0x198] sm:$0xff] }
 0x50b   : > { %v4906_v5 = vadd.f32 %v16659_v29, %v4477_v13  ;;  %v6064_v13 = vrot.slane %v6062_v36, 4  ;;  %v14713_v29 = vpop.f32.mrf.mxu0  ;;  %7815 = vst.msk [vmem:[#allocation3 + $0x100] sm:$0x3] %vm7784_vm3, %v12521_v6 }
 0x50c   : > { %v4473_v37 = vpop.f32.mrf.mxu3  ;;  %v8332_v33 = vsel %vm3653_vm7, %v8298_v58, 0.0  ;;  %7818 = vst.msk [vmem:[#allocation3 + $0x118] sm:$0x3] %vm7784_vm3, %v12521_v6  ;;  %v9298_v58 = vmul.f32 %v14711_v60, %v9264_v55 }
 0x50d   : > { %v14681_v3 = vadd.f32 %v4473_v37, %v3822_v19  ;;  %v14698_v19 = vld [vmem:[#allocation16 + $0x6] ss:$0 sm:$0xff]  ;;  %8333 = vadd.xlane.f32.xlu0 %v8332_v33  ;;  %7821 = vst.msk [vmem:[#allocation3 + $0x130] sm:$0x3] %vm7784_vm3, %v12521_v6  ;;  %v6066_v42 = vsel %vm13122_vm2, %v6064_v13, %v6065_v2  ;;  %v16664_v13 = vld [vmem:[#allocation54_spill] sm:$0xff] }
 0x50e   : > { %v8070_v37 = vld [vmem:[#allocation3 + $0x9] sm:$0xff]  ;;  %v9105_v18 = vmul.f32 %v14698_v19, %v9071_v39  ;;  %7824 = vst.msk [vmem:[#allocation3 + $0x148] sm:$0x3] %vm7784_vm3, %v12521_v6 }
 0x50f   : > { %16657 = vst [vmem:[#allocation83_spill] sm:$0xff] %v14681_v3 }
 0x510   : > { %v9199_v39 = vsel %vm3653_vm7, %v9105_v18, 0.0  ;;  %7827 = vst.msk [vmem:[#allocation3 + $0x160] sm:$0x3] %vm7784_vm3, %v12521_v6 }
 0x511   : > { %11426 = vmatmul.msk.bf16.gmra.mxu3 %vm3653_vm7, %v6158_v11  ;;  %v8104_v11 = vmul.f32 %v14612_v30, %v8070_v37  ;;  %9200 = vadd.xlane.f32.xlu2 %v9199_v39  ;;  %v11395_v39 = vrot.slane %v5942_v44, 9  ;;  %v16663_v44 = vld [vmem:[#allocation37_spill] sm:$0xff]  ;;  %7830 = vst.msk [vmem:[#allocation3 + $0x178] sm:$0x3] %vm7784_vm3, %v12521_v6 }
 0x512   : > { %7833 = vst.msk [vmem:[#allocation3 + $0x190] sm:$0x3] %vm7784_vm3, %v12521_v6 }
 0x513   : > { %v8138_v37 = vsel %vm3653_vm7, %v8104_v11, 0.0  ;;  %v9104_v11 = vmul.f32 %v14698_v19, %v9070_v16  ;;  %v6063_v55 = vsel %vm13122_vm2, %v11395_v39, %v6062_v36  ;;  %7836 = vst.msk [vmem:[#allocation3 + $0x1a8] sm:$0x3] %vm7784_vm3, %v12521_v6  ;;  %v14758_v39 = vpop.f32.mrf.mxu0  ;;  %v12193_v6 = vld [vmem:[#allocation2 + $0x88] sm:$0xf] }
 0x514   : > { %v6247_v3 = vpop.f32.mrf.mxu3  ;;  %8139 = vadd.xlane.f32.xlu1 %v8138_v37  ;;  %v14734_v37 = vpop.f32.mrf.mxu2 }
 0x515   : > { %v6327_v63 = vadd.f32 %v6247_v3, %v5901_v35  ;;  %v16661_v35 = vld [vmem:[#allocation25_spill] sm:$0xff]  ;;  %v9196_v33 = vsel %vm3653_vm7, %v9104_v11, 0.0  ;;  %v14762_v11 = vpop.f32.mrf.mxu1 }
 0x516   : > { %v5220_v18 = vadd.f32 %v16661_v35, %v4906_v5  ;;  %v16662_v5 = vld [vmem:[#allocation93_spill] sm:$0xff]  ;;  %v6136_v35 = vunpack.c.l.b16 %v6063_v55 }
 0x517   : > { %v6642_v3 = vadd.f32 %v14480_v27, %v6327_v63  ;;  %11608 = vmatmul.msk.bf16.gmra.mxu2 %vm3653_vm7, %v14273_v9  ;;  %v4907_v63 = vadd.f32 %v16663_v44, %v16662_v5  ;;  %v6069_v5 = vrot.slane %v12193_v6, 5  ;;  %v14766_v55 = vld [vmem:[#allocation16 + $0x4] ss:$0 sm:$0xff]  ;;  %v16666_v44 = vld [vmem:[#allocation96_spill] sm:$0xff]  ;;  %v5943_v6 = vld [vmem:[#allocation2 + $0x84] sm:$0xe] }
 0x518   : > { %v5902_v16 = vadd.f32 %v16664_v13, %v5220_v18 }
 0x519   : > { %v7324_v27 = vadd.f32 %v14325_v21, %v6642_v3  ;;  %v6137_v21 = vunpack.c.l.b16 %v6066_v42  ;;  %v9390_v3 = vsel %vm3653_vm7, %v9298_v58, 0.0  ;;  %v16665_v42 = vld [vmem:[#allocation26_spill] sm:$0xff] }
 0x51a   : > { %9391 = vadd.xlane.f32.xlu0 %v9390_v3 }
 0x51b   : > { %v7750_v2 = vadd.f32 %v14531_v32, %v7324_v27  ;;  %v6159_v18 = vpack.c.b16 %v6137_v21, %v6136_v35  ;;  %v5221_v27 = vadd.f32 %v16665_v42, %v4907_v63  ;;  %v16668_v21 = vld [vmem:[#allocation58_spill] sm:$0xff]  ;;  %v9265_v63 = vld [vmem:[#allocation3 + $0x1a1] sm:$0xff]  ;;  %v6071_v35 = vrot.slane %v6069_v5, 4 }
 0x51c   : > { %v6249_v9 = vpop.f32.mrf.mxu3  ;;  %9197 = vadd.xlane.f32.xlu1 %v9196_v33 }
 0x51d   : > { %v6328_v36 = vadd.f32 %v6249_v9, %v5902_v16  ;;  %7838 = vst.msk [vmem:[#allocation3 + $0x19] sm:$0xff] %vm3653_vm7, %v7750_v2  ;;  %v16667_v2 = vld [vmem:[#allocation40_spill] sm:$0xff]  ;;  %v14770_v16 = vpop.f32.mrf.mxu2  ;;  %v5903_v33 = vadd.f32 %v16668_v21, %v5221_v27  ;;  %v16669_v27 = vld [vmem:[#allocation27_spill] sm:$0xff] }
 0x51e   : > { %v4908_v13 = vadd.f32 %v16667_v2, %v16666_v44  ;;  %v12194_v2 = vld [vmem:[#allocation2 + $0x8c] sm:$0x1] }
 0x51f   : > { %v6643_v32 = vadd.f32 %v14496_v40, %v6328_v36  ;;  %v6072_v21 = vrot.slane %v12194_v2, 5 }
 0x521   : > { %v7325_v58 = vadd.f32 %v14350_v4, %v6643_v32  ;;  %11427 = vmatmul.msk.bf16.gmra.mxu3 %vm3653_vm7, %v6159_v18  ;;  %v9299_v4 = vmul.f32 %v14711_v60, %v9265_v63  ;;  %v14783_v63 = vpop.f32.mrf.mxu0 }
 0x523   : > { %v7751_v40 = vadd.f32 %v14540_v20, %v7325_v58  ;;  %v9393_v44 = vsel %vm3653_vm7, %v9299_v4, 0.0  ;;  %v5222_v58 = vadd.f32 %v16669_v27, %v4908_v13  ;;  %v11396_v4 = vrot.slane %v5943_v6, 9  ;;  %v16670_v13 = vld [vmem:[#allocation100_spill] sm:$0xff] }
 0x524   : > { %v6252_v9 = vpop.f32.mrf.mxu3  ;;  %v8651_v36 = vld [vmem:[#allocation3 + $0x19] sm:$0xff]  ;;  %9394 = vadd.xlane.f32.xlu1 %v9393_v44  ;;  %v14791_v44 = vpop.f32.mrf.mxu1 }
 0x525   : > { %7839 = vst.msk [vmem:[#allocation3 + $0x21] sm:$0xff] %vm3653_vm7, %v7751_v40  ;;  %v6329_v3 = vadd.f32 %v6252_v9, %v5903_v33  ;;  %v8685_v32 = vmul.f32 %v14766_v55, %v8651_v36  ;;  %v8105_v18 = vmul.f32 %v14612_v30, %v8651_v36  ;;  %v7877_v42 = vld [vmem:[#allocation3 + $0x18] sm:$0xff]  ;;  %v14799_v57 = vpop.f32.mrf.mxu2 }
 0x526   : > { %v7911_v36 = vmul.f32 %v14561_v24, %v7877_v42 }
 0x527   : > { %v6644_v20 = vadd.f32 %v14511_v15, %v6329_v3  ;;  %v8717_v40 = vsel %vm3653_vm7, %v8685_v32, 0.0  ;;  %v8141_v33 = vsel %vm3653_vm7, %v8105_v18, 0.0  ;;  %v6073_v15 = vsel %vm13122_vm2, %v6071_v35, %v6072_v21  ;;  %v16671_v3 = vld [vmem:[#allocation43_spill] sm:$0xff]  ;;  %v16672_v18 = vld [vmem:[#allocation61_spill] sm:$0xff] }
 0x528   : > { %8718 = vadd.xlane.f32.xlu0 %v8717_v40  ;;  %8142 = vadd.xlane.f32.xlu2 %v8141_v33  ;;  %v4909_v27 = vadd.f32 %v16671_v3, %v16670_v13  ;;  %v5904_v2 = vadd.f32 %v16672_v18, %v5222_v58  ;;  %v6139_v6 = vunpack.c.l.b16 %v6073_v15  ;;  %v7947_v35 = vsel %vm3653_vm7, %v7911_v36, 0.0  ;;  %v16673_v3 = vld [vmem:[#allocation28_spill] sm:$0xff]  ;;  %v14812_v36 = vld [vmem:[#allocation16 + $0x5] ss:$0 sm:$0xff] }
 0x529   : > { %v7326_v9 = vadd.f32 %v14371_v49, %v6644_v20  ;;  %v6070_v49 = vsel %vm13122_vm2, %v11396_v4, %v6069_v5  ;;  %v14807_v4 = vld [vmem:[#allocation16 + $0x3] ss:$0 sm:$0xff]  ;;  %v14818_v28 = vpop.f32.mrf.mxu0 }
 0x52a   : > { %v5223_v18 = vadd.f32 %v16673_v3, %v4909_v27  ;;  %v5944_v3 = vld [vmem:[#allocation2 + $0x90] sm:$0xe] }
 0x52b   : > { %v7752_v32 = vadd.f32 %v14576_v1, %v7326_v9  ;;  %v6138_v9 = vunpack.c.l.b16 %v6070_v49  ;;  %v12195_v49 = vld [vmem:[#allocation2 + $0x94] sm:$0xf] }
 0x52c   : > { %v6254_v20 = vpop.f32.mrf.mxu3  ;;  %v14797_v40 = vld [vmem:[#allocation3 + $0x21] sm:$0xff]  ;;  %7948 = vadd.xlane.f32.xlu1 %v7947_v35  ;;  %v6076_v10 = vrot.slane %v12195_v49, 5 }
 0x52d   : > { %v7878_v33 = vld [vmem:[#allocation3 + $0x20] sm:$0xff]  ;;  %7840 = vst.msk [vmem:[#allocation3 + $0x31] sm:$0xff] %vm3653_vm7, %v7752_v32  ;;  %v6330_v21 = vadd.f32 %v6254_v20, %v5904_v2  ;;  %v8106_v1 = vmul.f32 %v14612_v30, %v14797_v40  ;;  %v6160_v32 = vpack.c.b16 %v6139_v6, %v6138_v9  ;;  %v8491_v6 = vmul.f32 %v14807_v4, %v7877_v42  ;;  %v14828_v49 = vpop.f32.mrf.mxu2 }
 0x52e   : > { %v7912_v58 = vmul.f32 %v14561_v24, %v7878_v33  ;;  %v8846_v20 = vld [vmem:[#allocation3 + $0x22] sm:$0xff] }
 0x52f   : > { %v6645_v5 = vadd.f32 %v14520_v25, %v6330_v21  ;;  %v8144_v13 = vsel %vm3653_vm7, %v8106_v1, 0.0  ;;  %v16674_v25 = vld [vmem:[#allocation104_spill] sm:$0xff]  ;;  %v16675_v21 = vld [vmem:[#allocation46_spill] sm:$0xff] }
 0x530   : > { %v7950_v15 = vsel %vm3653_vm7, %v7912_v58, 0.0  ;;  %8145 = vadd.xlane.f32.xlu0 %v8144_v13  ;;  %v4910_v1 = vadd.f32 %v16675_v21, %v16674_v25  ;;  %v16676_v35 = vld [vmem:[#allocation64_spill] sm:$0xff]  ;;  %v14825_v13 = vpop.f32.mrf.mxu1 }
 0x531   : > { %v7327_v2 = vadd.f32 %v14397_v22, %v6645_v5  ;;  %7951 = vadd.xlane.f32.xlu2 %v7950_v15  ;;  %11428 = vmatmul.msk.bf16.gmra.mxu3 %vm3653_vm7, %v6160_v32  ;;  %v5905_v58 = vadd.f32 %v16676_v35, %v5223_v18  ;;  %v8880_v22 = vmul.f32 %v14812_v36, %v8846_v20  ;;  %v6078_v32 = vrot.slane %v6076_v10, 4  ;;  %v12196_v25 = vld [vmem:[#allocation2 + $0x98] sm:$0x1] }
 0x532   : > { %v8300_v5 = vmul.f32 %v14626_v50, %v8846_v20  ;;  %v6079_v21 = vrot.slane %v12196_v25, 5  ;;  %v8265_v35 = vld [vmem:[#allocation3 + $0x1a] sm:$0xff] }
 0x533   : > { %v7753_v27 = vadd.f32 %v14616_v59, %v7327_v2  ;;  %v8523_v59 = vsel %vm3653_vm7, %v8491_v6, 0.0  ;;  %v16677_v2 = vld [vmem:[#allocation29_spill] sm:$0xff]  ;;  %v8914_v20 = vsel %vm3653_vm7, %v8880_v22, 0.0  ;;  %v16678_v6 = vld [vmem:[#allocation108_spill] sm:$0xff] }
 0x534   : > { %v6257_v9 = vpop.f32.mrf.mxu3  ;;  %v5224_v18 = vadd.f32 %v16677_v2, %v4910_v1  ;;  %8524 = vadd.xlane.f32.xlu1 %v8523_v59  ;;  %v8338_v12 = vsel %vm3653_vm7, %v8300_v5, 0.0  ;;  %v8299_v5 = vmul.f32 %v14626_v50, %v8265_v35 }
 0x535   : > { %7841 = vst.msk [vmem:[#allocation3 + $0x39] sm:$0xff] %vm3653_vm7, %v7753_v27  ;;  %v6331_v15 = vadd.f32 %v6257_v9, %v5905_v58  ;;  %v11397_v27 = vrot.slane %v5944_v3, 9  ;;  %v14836_v9 = vld [vmem:[#allocation3 + $0x30] sm:$0xff] }
 0x536   : > { %v16680_v3 = vld [vmem:[#allocation67_spill] sm:$0xff] }
 0x537   : > { %v6646_v42 = vadd.f32 %v14534_v34, %v6331_v15  ;;  %v6080_v34 = vsel %vm13122_vm2, %v6078_v32, %v6079_v21  ;;  %v6077_v1 = vsel %vm13122_vm2, %v11397_v27, %v6076_v10  ;;  %v16679_v15 = vld [vmem:[#allocation49_spill] sm:$0xff]  ;;  %v5906_v2 = vadd.f32 %v16680_v3, %v5224_v18  ;;  %v14850_v32 = vpop.f32.mrf.mxu0  ;;  %v16681_v18 = vld [vmem:[#allocation30_spill] sm:$0xff] }
 0x538   : > { %8915 = vadd.xlane.f32.xlu0 %v8914_v20  ;;  %v4911_v59 = vadd.f32 %v16679_v15, %v16678_v6  ;;  %v6141_v25 = vunpack.c.l.b16 %v6080_v34  ;;  %v6140_v21 = vunpack.c.l.b16 %v6077_v1  ;;  %v14853_v20 = vpop.f32.mrf.mxu1  ;;  %v14860_v15 = vpop.f32.mrf.mxu2  ;;  %v14863_v1 = vld [vmem:[#allocation3 + $0x31] sm:$0xff]  ;;  %v12197_v3 = vld [vmem:[#allocation2 + $0xa0] sm:$0xf] }
 0x539   : > { %v7328_v58 = vadd.f32 %v14419_v45, %v6646_v42  ;;  %8339 = vadd.xlane.f32.xlu2 %v8338_v12  ;;  %v8492_v12 = vmul.f32 %v14807_v4, %v7878_v33  ;;  %v8493_v42 = vmul.f32 %v14807_v4, %v14836_v9 }
 0x53a   : > { %v6161_v34 = vpack.c.b16 %v6141_v25, %v6140_v21  ;;  %v9268_v21 = vmul.f32 %v14711_v60, %v14863_v1 }
 0x53b   : > { %v7754_v22 = vadd.f32 %v14649_v48, %v7328_v58  ;;  %v8335_v48 = vsel %vm3653_vm7, %v8299_v5, 0.0  ;;  %v5225_v58 = vadd.f32 %v16681_v18, %v4911_v59  ;;  %v8526_v33 = vsel %vm3653_vm7, %v8492_v12, 0.0  ;;  %v16683_v59 = vld [vmem:[#allocation52_spill] sm:$0xff] }
 0x53c   : > { %v6259_v45 = vpop.f32.mrf.mxu3  ;;  %8336 = vadd.xlane.f32.xlu1 %v8335_v48  ;;  %v8529_v6 = vsel %vm3653_vm7, %v8493_v42, 0.0  ;;  %v6083_v5 = vrot.slane %v12197_v3, 5  ;;  %v8686_v12 = vmul.f32 %v14766_v55, %v14797_v40  ;;  %v16684_v42 = vld [vmem:[#allocation70_spill] sm:$0xff]  ;;  %v16685_v40 = vld [vmem:[#allocation31_spill] sm:$0xff]  ;;  %v9300_v3 = vsel %vm3653_vm7, %v9268_v21, 0.0 }
 0x53d   : > { %7842 = vst.msk [vmem:[#allocation3 + $0x49] sm:$0xff] %vm3653_vm7, %v7754_v22  ;;  %v6332_v10 = vadd.f32 %v6259_v45, %v5906_v2  ;;  %v5907_v25 = vadd.f32 %v16684_v42, %v5225_v58  ;;  %v12198_v58 = vld [vmem:[#allocation2 + $0xa4] sm:$0x1]  ;;  %v14886_v42 = vld [vmem:[#allocation3 + $0x38] sm:$0xff]  ;;  %v16687_v21 = vld [vmem:[#allocation74_spill] sm:$0xff] }
 0x53e   : > { %v6085_v18 = vrot.slane %v6083_v5, 4 }
 0x53f   : > { %v6647_v27 = vadd.f32 %v14558_v54, %v6332_v10  ;;  %v16682_v54 = vld [vmem:[#allocation111_spill] sm:$0xff] }
 0x540   : > { %8530 = vadd.xlane.f32.xlu0 %v8529_v6  ;;  %v4912_v2 = vadd.f32 %v16683_v59, %v16682_v54  ;;  %v14883_v59 = vpop.f32.mrf.mxu1 }
 0x541   : > { %v7329_v22 = vadd.f32 %v14441_v61, %v6647_v27  ;;  %8527 = vadd.xlane.f32.xlu2 %v8526_v33  ;;  %11429 = vmatmul.msk.bf16.gmra.mxu3 %vm3653_vm7, %v6161_v34  ;;  %v8879_v61 = vmul.f32 %v14812_v36, %v8265_v35  ;;  %v5945_v27 = vld [vmem:[#allocation2 + $0x9c] sm:$0xe]  ;;  %v14876_v33 = vpop.f32.mrf.mxu0 }
 0x542   : > { %v5226_v34 = vadd.f32 %v16685_v40, %v4912_v2  ;;  %v11398_v54 = vrot.slane %v5945_v27, 9 }
 0x543   : > { %v7755_v45 = vadd.f32 %v14688_v38, %v7329_v22  ;;  %v8720_v38 = vsel %vm3653_vm7, %v8686_v12, 0.0  ;;  %v6086_v22 = vrot.slane %v12198_v58, 5  ;;  %v8911_v35 = vsel %vm3653_vm7, %v8879_v61, 0.0  ;;  %v16686_v12 = vld [vmem:[#allocation56_spill] sm:$0xff] }
 0x544   : > { %v6262_v10 = vpop.f32.mrf.mxu3  ;;  %8721 = vadd.xlane.f32.xlu1 %v8720_v38  ;;  %v6084_v2 = vsel %vm13122_vm2, %v11398_v54, %v6083_v5  ;;  %v7913_v38 = vmul.f32 %v14561_v24, %v14836_v9  ;;  %v16688_v58 = vld [vmem:[#allocation32_spill] sm:$0xff] }
 0x545   : > { %7843 = vst.msk [vmem:[#allocation3 + $0x51] sm:$0xff] %vm3653_vm7, %v7755_v45  ;;  %v6333_v48 = vadd.f32 %v6262_v10, %v5907_v25  ;;  %v4913_v25 = vadd.f32 %v16686_v12, %v14239_v8  ;;  %v14894_v10 = vpop.f32.mrf.mxu2 }
 0x547   : > { %v6648_v6 = vadd.f32 %v14713_v29, %v6333_v48  ;;  %v6087_v29 = vsel %vm13122_vm2, %v6085_v18, %v6086_v22  ;;  %v5908_v48 = vadd.f32 %v16687_v21, %v5226_v34  ;;  %v7914_v18 = vmul.f32 %v14561_v24, %v14886_v42  ;;  %v16690_v21 = vld [vmem:[#allocation77_spill] sm:$0xff] }
 0x548   : > { %9301 = vadd.xlane.f32.xlu0 %v9300_v3  ;;  %v6143_v5 = vunpack.c.l.b16 %v6087_v29  ;;  %v5227_v22 = vadd.f32 %v16688_v58, %v4913_v25  ;;  %v7953_v34 = vsel %vm3653_vm7, %v7913_v38, 0.0  ;;  %v12199_v29 = vld [vmem:[#allocation2 + $0xac] sm:$0xf]  ;;  %v14918_v25 = vpop.f32.mrf.mxu1 }
 0x549   : > { %v7330_v45 = vadd.f32 %v14722_v14, %v6648_v6  ;;  %8912 = vadd.xlane.f32.xlu2 %v8911_v35  ;;  %v8107_v14 = vmul.f32 %v14612_v30, %v14863_v1  ;;  %v6142_v6 = vunpack.c.l.b16 %v6084_v2  ;;  %v7956_v35 = vsel %vm3653_vm7, %v7914_v18, 0.0  ;;  %v14910_v54 = vpop.f32.mrf.mxu0 }
 0x54a   : > { %v6090_v2 = vrot.slane %v12199_v29, 5 }
 0x54b   : > { %v7756_v61 = vadd.f32 %v14734_v37, %v7330_v45  ;;  %v8147_v40 = vsel %vm3653_vm7, %v8107_v14, 0.0  ;;  %v6162_v3 = vpack.c.b16 %v6143_v5, %v6142_v6  ;;  %v14913_v45 = vld [vmem:[#allocation3 + $0x32] sm:$0xff]  ;;  %v9074_v14 = vmul.f32 %v14698_v19, %v14836_v9  ;;  %v16691_v6 = vld [vmem:[#allocation33_spill] sm:$0xff] }
 0x54c   : > { %v6264_v27 = vpop.f32.mrf.mxu3  ;;  %8148 = vadd.xlane.f32.xlu1 %v8147_v40  ;;  %v8301_v38 = vmul.f32 %v14626_v50, %v14913_v45  ;;  %v5946_v5 = vld [vmem:[#allocation2 + $0xa8] sm:$0xe] }
 0x54d   : > { %7844 = vst.msk [vmem:[#allocation3 + $0x61] sm:$0xff] %vm3653_vm7, %v7756_v61  ;;  %v6334_v8 = vadd.f32 %v6264_v27, %v5908_v48  ;;  %v8687_v27 = vmul.f32 %v14766_v55, %v14863_v1  ;;  %v14928_v18 = vpop.f32.mrf.mxu2 }
 0x54f   : > { %v6649_v37 = vadd.f32 %v14758_v39, %v6334_v8  ;;  %v16689_v39 = vld [vmem:[#allocation60_spill] sm:$0xff]  ;;  %v6092_v8 = vrot.slane %v6090_v2, 4  ;;  %v8723_v1 = vsel %vm3653_vm7, %v8687_v27, 0.0 }
 0x550   : > { %7957 = vadd.xlane.f32.xlu0 %v7956_v35  ;;  %v4914_v12 = vadd.f32 %v16689_v39, %v14283_v62  ;;  %v11399_v35 = vrot.slane %v5946_v5, 9  ;;  %v16692_v39 = vld [vmem:[#allocation65_spill] sm:$0xff] }
 0x551   : > { %v7331_v24 = vadd.f32 %v14762_v11, %v6649_v37  ;;  %7954 = vadd.xlane.f32.xlu2 %v7953_v34  ;;  %11430 = vmatmul.msk.bf16.gmra.mxu3 %vm3653_vm7, %v6162_v3  ;;  %v5909_v11 = vadd.f32 %v16690_v21, %v5227_v22  ;;  %v12200_v37 = vld [vmem:[#allocation2 + $0xb0] sm:$0x1]  ;;  %v8268_v22 = vld [vmem:[#allocation3 + $0x3a] sm:$0xff]  ;;  %v8341_v34 = vsel %vm3653_vm7, %v8301_v38, 0.0 }
 0x552   : > { %v5228_v40 = vadd.f32 %v16691_v6, %v4914_v12  ;;  %v6093_v58 = vrot.slane %v12200_v37, 5  ;;  %v6091_v29 = vsel %vm13122_vm2, %v11399_v35, %v6090_v2  ;;  %v4915_v12 = vadd.f32 %v16692_v39, %v14304_v23  ;;  %v14954_v2 = vpop.f32.mrf.mxu1  ;;  %v14964_v35 = vld [vmem:[#allocation16 + $0x8] ss:$0 sm:$0xff] }
 0x553   : > { %v7757_v61 = vadd.f32 %v14770_v16, %v7331_v24  ;;  %v9106_v16 = vsel %vm3653_vm7, %v9074_v14, 0.0  ;;  %v14937_v24 = vld [vmem:[#allocation3 + $0x39] sm:$0xff]  ;;  %v8302_v21 = vmul.f32 %v14626_v50, %v8268_v22  ;;  %v6144_v5 = vunpack.c.l.b16 %v6091_v29 }
 0x554   : > { %v6267_v48 = vpop.f32.mrf.mxu3  ;;  %9107 = vadd.xlane.f32.xlu1 %v9106_v16  ;;  %v8108_v27 = vmul.f32 %v14612_v30, %v14937_v24  ;;  %v8688_v38 = vmul.f32 %v14766_v55, %v14937_v24  ;;  %v16695_v29 = vld [vmem:[#allocation68_spill] sm:$0xff] }
 0x555   : > { %7845 = vst.msk [vmem:[#allocation3 + $0x69] sm:$0xff] %vm3653_vm7, %v7757_v61  ;;  %v6335_v62 = vadd.f32 %v6267_v48, %v5909_v11  ;;  %v14945_v61 = vpop.f32.mrf.mxu0  ;;  %v14957_v16 = vpop.f32.mrf.mxu2 }
 0x557   : > { %v6650_v9 = vadd.f32 %v14783_v63, %v6335_v62  ;;  %v6094_v63 = vsel %vm13122_vm2, %v6092_v8, %v6093_v58  ;;  %v12201_v8 = vld [vmem:[#allocation2 + $0xb8] sm:$0xf]  ;;  %v8150_v58 = vsel %vm3653_vm7, %v8108_v27, 0.0 }
 0x558   : > { %8342 = vadd.xlane.f32.xlu0 %v8341_v34  ;;  %v6145_v62 = vunpack.c.l.b16 %v6094_v63 }
 0x559   : > { %v7332_v3 = vadd.f32 %v14791_v44, %v6650_v9  ;;  %8724 = vadd.xlane.f32.xlu2 %v8723_v1  ;;  %v16693_v44 = vld [vmem:[#allocation80_spill] sm:$0xff]  ;;  %v8344_v9 = vsel %vm3653_vm7, %v8302_v21, 0.0  ;;  %v8726_v1 = vsel %vm3653_vm7, %v8688_v38, 0.0 }
 0x55a   : > { %v5910_v11 = vadd.f32 %v16693_v44, %v5228_v40  ;;  %v16694_v40 = vld [vmem:[#allocation35_spill] sm:$0xff]  ;;  %v6163_v34 = vpack.c.b16 %v6145_v62, %v6144_v5  ;;  %v12202_v62 = vld [vmem:[#allocation2 + $0xbc] sm:$0x1] }
 0x55b   : > { %v7758_v14 = vadd.f32 %v14799_v57, %v7332_v3  ;;  %v6097_v57 = vrot.slane %v12201_v8, 5  ;;  %v5229_v37 = vadd.f32 %v16694_v40, %v4915_v12  ;;  %v8494_v12 = vmul.f32 %v14807_v4, %v14886_v42  ;;  %v5947_v44 = vld [vmem:[#allocation2 + $0xb4] sm:$0xe] }
 0x55c   : > { %v6269_v48 = vpop.f32.mrf.mxu3  ;;  %8345 = vadd.xlane.f32.xlu1 %v8344_v9  ;;  %v16697_v9 = vld [vmem:[#allocation38_spill] sm:$0xff] }
 0x55d   : > { %7846 = vst.msk [vmem:[#allocation3 + $0x79] sm:$0xff] %vm3653_vm7, %v7758_v14  ;;  %v6336_v23 = vadd.f32 %v6269_v48, %v5910_v11  ;;  %v6099_v63 = vrot.slane %v6097_v57, 4  ;;  %v16696_v14 = vld [vmem:[#allocation84_spill] sm:$0xff]  ;;  %v8882_v48 = vmul.f32 %v14812_v36, %v8268_v22  ;;  %v14976_v27 = vpop.f32.mrf.mxu0  ;;  %v8532_v5 = vsel %vm3653_vm7, %v8494_v12, 0.0 }
 0x55e   : > { %v5911_v21 = vadd.f32 %v16696_v14, %v5229_v37 }
 0x55f   : > { %v6651_v6 = vadd.f32 %v14818_v28, %v6336_v23  ;;  %v4916_v28 = vadd.f32 %v16695_v29, %v14328_v43  ;;  %v6100_v43 = vrot.slane %v12202_v62, 5  ;;  %v11400_v23 = vrot.slane %v5947_v44, 9 }
 0x560   : > { %8727 = vadd.xlane.f32.xlu0 %v8726_v1 }
 0x561   : > { %v7333_v3 = vadd.f32 %v14825_v13, %v6651_v6  ;;  %8151 = vadd.xlane.f32.xlu2 %v8150_v58  ;;  %11431 = vmatmul.msk.bf16.gmra.mxu3 %vm3653_vm7, %v6163_v34  ;;  %v9463_v13 = vmul.f32 %v14964_v35, %v8268_v22  ;;  %v5230_v6 = vadd.f32 %v16697_v9, %v4916_v28  ;;  %v16698_v22 = vld [vmem:[#allocation71_spill] sm:$0xff]  ;;  %v8920_v58 = vsel %vm3653_vm7, %v8882_v48, 0.0  ;;  %v14990_v34 = vpop.f32.mrf.mxu2 }
 0x562   : > { %v6101_v40 = vsel %vm13122_vm2, %v6099_v63, %v6100_v43  ;;  %v4917_v37 = vadd.f32 %v16698_v22, %v14344_v56  ;;  %v6098_v29 = vsel %vm13122_vm2, %v11400_v23, %v6097_v57  ;;  %v8881_v56 = vmul.f32 %v14812_v36, %v14913_v45  ;;  %v7371_v23 = vld [vmem:[#allocation2 + $0xcc] sm:$0xe] }
 0x563   : > { %v7759_v39 = vadd.f32 %v14828_v49, %v7333_v3  ;;  %v14979_v49 = vpop.f32.mrf.mxu1  ;;  %v9497_v1 = vsel %vm3653_vm7, %v9463_v13, 0.0  ;;  %v6147_v63 = vunpack.c.l.b16 %v6101_v40  ;;  %v6146_v44 = vunpack.c.l.b16 %v6098_v29  ;;  %v6720_v13 = vld [vmem:[#allocation2 + $0xd0] sm:$0xf] }
 0x564   : > { %v6272_v11 = vpop.f32.mrf.mxu3  ;;  %8533 = vadd.xlane.f32.xlu1 %v8532_v5  ;;  %v7527_v5 = vrot.slane %v6720_v13, 5  ;;  %v11577_v40 = vrot.slane %v7371_v23, 9 }
 0x565   : > { %7847 = vst.msk [vmem:[#allocation3 + $0x81] sm:$0xff] %vm3653_vm7, %v7759_v39  ;;  %v6337_v38 = vadd.f32 %v6272_v11, %v5911_v21  ;;  %v16699_v39 = vld [vmem:[#allocation88_spill] sm:$0xff]  ;;  %v9075_v21 = vmul.f32 %v14698_v19, %v14886_v42  ;;  %v16700_v11 = vld [vmem:[#allocation41_spill] sm:$0xff]  ;;  %v6164_v43 = vpack.c.b16 %v6147_v63, %v6146_v44  ;;  %v15009_v9 = vpop.f32.mrf.mxu0  ;;  %v8917_v42 = vsel %vm3653_vm7, %v8881_v56, 0.0 }
 0x566   : > { %v5912_v12 = vadd.f32 %v16699_v39, %v5230_v6  ;;  %v5231_v48 = vadd.f32 %v16700_v11, %v4917_v37  ;;  %v9269_v6 = vmul.f32 %v14711_v60, %v14937_v24  ;;  %v9042_v24 = vld [vmem:[#allocation3 + $0x48] sm:$0xff]  ;;  %v7528_v39 = vsel %vm13122_vm2, %v11577_v40, %v7527_v5 }
 0x567   : > { %v6652_v8 = vadd.f32 %v14850_v32, %v6337_v38  ;;  %v14993_v32 = vld [vmem:[#allocation3 + $0x49] sm:$0xff]  ;;  %v16701_v38 = vld [vmem:[#allocation75_spill] sm:$0xff]  ;;  %v9109_v22 = vsel %vm3653_vm7, %v9075_v21, 0.0  ;;  %v7092_v21 = vshll.u32 %v6720_v13, 16 }
 0x568   : > { %9498 = vadd.xlane.f32.xlu0 %v9497_v1  ;;  %v4918_v62 = vadd.f32 %v16701_v38, %v14365_v41  ;;  %v16702_v41 = vld [vmem:[#allocation91_spill] sm:$0xff]  ;;  %v7529_v1 = vrot.slane %v7527_v5, 4  ;;  %v5948_v11 = vld [vmem:[#allocation2 + $0xc0] sm:$0xe] }
 0x569   : > { %v7334_v3 = vadd.f32 %v14853_v20, %v6652_v8  ;;  %8921 = vadd.xlane.f32.xlu2 %v8920_v58  ;;  %v8109_v20 = vmul.f32 %v14612_v30, %v14993_v32  ;;  %v5913_v58 = vadd.f32 %v16702_v41, %v5231_v48  ;;  %v15029_v44 = vpop.f32.mrf.mxu2  ;;  %v7094_v5 = vrot.slane %v7092_v21, 5 }
 0x56a   : > { %v11401_v41 = vrot.slane %v5948_v11, 9 }
 0x56b   : > { %v7760_v28 = vadd.f32 %v14860_v15, %v7334_v3  ;;  %v6721_v15 = vld [vmem:[#allocation2 + $0xd4] sm:$0x1]  ;;  %v8153_v37 = vsel %vm3653_vm7, %v8109_v20, 0.0  ;;  %v12004_v3 = vld [vmem:[#allocation2 + $0xcc] sm:$0xff]  ;;  %v15018_v29 = vpop.f32.mrf.mxu1  ;;  %v7096_v20 = vshrl.u32 %v6720_v13, 16 }
 0x56c   : > { %v6274_v14 = vpop.f32.mrf.mxu3  ;;  %v7530_v8 = vrot.slane %v6721_v15, 5  ;;  %8918 = vadd.xlane.f32.xlu1 %v8917_v42  ;;  %11529 = vmatmul.msk.bf16.gmra.mxu0 %vm3653_vm7, %v12004_v3 }
 0x56d   : > { %7848 = vst.msk [vmem:[#allocation3 + $0x91] sm:$0xff] %vm3653_vm7, %v7760_v28  ;;  %v6338_v57 = vadd.f32 %v6274_v14, %v5912_v12  ;;  %v12203_v28 = vld [vmem:[#allocation2 + $0xc4] sm:$0xf]  ;;  %v7571_v14 = vunpack.c.l.b16 %v7528_v39  ;;  %v7098_v42 = vrot.slane %v7096_v20, 4 }
 0x56e   : > { %v6104_v56 = vrot.slane %v12203_v28, 5  ;;  %v7531_v12 = vsel %vm13122_vm2, %v7529_v1, %v7530_v8  ;;  %v7102_v8 = vshll.u32 %v6721_v15, 16  ;;  %v16703_v39 = vld [vmem:[#allocation45_spill] sm:$0xff] }
 0x56f   : > { %v6653_v30 = vadd.f32 %v14876_v33, %v6338_v57  ;;  %v9462_v33 = vmul.f32 %v14964_v35, %v14913_v45  ;;  %v7572_v48 = vunpack.c.l.b16 %v7531_v12  ;;  %v7099_v1 = vor.u32 %v7098_v42, %v7094_v5 }
 0x570   : > { %8154 = vadd.xlane.f32.xlu0 %v8153_v37  ;;  %v6106_v40 = vrot.slane %v6104_v56, 4  ;;  %v15034_v37 = vpop.xlane.xlu0 %7945  ;;  %v7104_v3 = vrot.slane %v7102_v8, 5  ;;  %v5232_v12 = vadd.f32 %v16703_v39, %v4918_v62  ;;  %v16705_v8 = vld [vmem:[#allocation94_spill] sm:$0xff] }
 0x571   : > { %v7335_v63 = vadd.f32 %v14883_v59, %v6653_v30  ;;  %9110 = vadd.xlane.f32.xlu2 %v9109_v22  ;;  %11432 = vmatmul.msk.bf16.gmra.mxu3 %vm3653_vm7, %v6164_v43  ;;  %v6719_v59 = vld [vmem:[#allocation2 + $0xcc] sm:$0xf]  ;;  %v9076_v43 = vmul.f32 %v14698_v19, %v9042_v24  ;;  %v7588_v22 = vpack.c.b16 %v7572_v48, %v7571_v14  ;;  %v7100_v20 = vrot.slane %v7099_v1, 4 }
 0x572   : > { %v7083_v57 = vshrl.u32 %v6719_v59, 16  ;;  %v7086_v38 = vshll.u32 %v6719_v59, 16  ;;  %v12204_v59 = vld [vmem:[#allocation2 + $0xc8] sm:$0x1] }
 0x573   : > { %v7761_v45 = vadd.f32 %v14894_v10, %v7335_v63  ;;  %v9303_v63 = vsel %vm3653_vm7, %v9269_v6, 0.0  ;;  %v6107_v15 = vrot.slane %v12204_v59, 5  ;;  %11609 = vmatmul.msk.bf16.gmra.mxu2 %vm3653_vm7, %v7588_v22  ;;  %v9112_v14 = vsel %vm3653_vm7, %v9076_v43, 0.0  ;;  %v16704_v6 = vld [vmem:[#allocation81_spill] sm:$0xff] }
 0x574   : > { %v6277_v23 = vpop.f32.mrf.mxu3  ;;  %v7085_v13 = vrot.slane %v7083_v57, 4  ;;  %v7088_v10 = vrot.slane %v7086_v38, 5  ;;  %9304 = vadd.xlane.f32.xlu1 %v9303_v63  ;;  %v4919_v48 = vadd.f32 %v16704_v6, %v14383_v31  ;;  %v7105_v38 = vsel %vm13092_vm15, %v7100_v20, %v7104_v3  ;;  %v15058_v43 = vld [vmem:[#allocation16] ss:$0 sm:$0xff] }
 0x575   : > { %7849 = vst.msk [vmem:[#allocation3 + $0x99] sm:$0xff] %vm3653_vm7, %v7761_v45  ;;  %v6339_v30 = vadd.f32 %v6277_v23, %v5913_v58  ;;  %v9494_v58 = vsel %vm3653_vm7, %v9462_v33, 0.0  ;;  %v15042_v45 = vpop.f32.mrf.mxu0  ;;  %v6108_v62 = vsel %vm13122_vm2, %v6106_v40, %v6107_v15  ;;  %v6105_v33 = vsel %vm13122_vm2, %v11401_v41, %v6104_v56  ;;  %v15055_v23 = vpop.f32.mrf.mxu1 }
 0x576   : > { %v7089_v21 = vor.u32 %v7088_v10, %v7085_v13  ;;  %v7915_v42 = vmul.f32 %v15058_v43, %v9042_v24  ;;  %v7146_v40 = vunpack.c.l.b16 %v7105_v38  ;;  %v8495_v31 = vmul.f32 %v14807_v4, %v9042_v24  ;;  %v15067_v41 = vpop.f32.mrf.mxu2  ;;  %v16706_v24 = vld [vmem:[#allocation48_spill] sm:$0xff] }
 0x577   : > { %v6654_v28 = vadd.f32 %v14910_v54, %v6339_v30  ;;  %v15045_v54 = vld [vmem:[#allocation3 + $0x52] sm:$0xff]  ;;  %v5914_v30 = vadd.f32 %v16705_v8, %v5232_v12  ;;  %v6149_v56 = vunpack.c.l.b16 %v6108_v62  ;;  %v6148_v1 = vunpack.c.l.b16 %v6105_v33  ;;  %v16708_v62 = vld [vmem:[#allocation97_spill] sm:$0xff] }
 0x578   : > { %9113 = vadd.xlane.f32.xlu0 %v9112_v14  ;;  %v7090_v57 = vrot.slane %v7089_v21, 4  ;;  %v8304_v52 = vmul.f32 %v14626_v50, %v15045_v54  ;;  %v7959_v3 = vsel %vm3653_vm7, %v7915_v42, 0.0  ;;  %v5233_v39 = vadd.f32 %v16706_v24, %v4919_v48  ;;  %v15077_v59 = vpop.xlane.xlu0 %8136  ;;  %v16709_v42 = vld [vmem:[#allocation53_spill] sm:$0xff] }
 0x579   : > { %v7336_v11 = vadd.f32 %v14918_v25, %v6654_v28  ;;  %9495 = vadd.xlane.f32.xlu2 %v9494_v58  ;;  %v15072_v28 = vpop.xlane.xlu2 %7942  ;;  %v8535_v26 = vsel %vm3653_vm7, %v8495_v31, 0.0  ;;  %v6165_v12 = vpack.c.b16 %v6149_v56, %v6148_v1  ;;  %v15080_v58 = vld [vmem:[#allocation3 + $0x50] sm:$0xff]  ;;  %v9270_v48 = vmul.f32 %v14711_v60, %v14993_v32  ;;  %v15120_v1 = vld [vmem:[#allocation16 + $0x1] ss:$0 sm:$0xff] }
 0x57a   : > { %v7095_v13 = vsel %vm13092_vm15, %v7090_v57, %v7094_v5  ;;  %v8350_v5 = vsel %vm3653_vm7, %v8304_v52, 0.0  ;;  %v8496_v33 = vmul.f32 %v14807_v4, %v15080_v58  ;;  %v15111_v52 = vld [vmem:[#allocation3 + $0x4a] sm:$0xff] }
 0x57b   : > { %v7762_v25 = vadd.f32 %v14928_v18, %v7336_v11  ;;  %v7145_v10 = vunpack.c.l.b16 %v7095_v13  ;;  %v8689_v11 = vmul.f32 %v14766_v55, %v14993_v32  ;;  %v16710_v13 = vld [vmem:[#allocation89_spill] sm:$0xff] }
 0x57c   : > { %v6279_v22 = vpop.f32.mrf.mxu3  ;;  %7960 = vadd.xlane.f32.xlu1 %v7959_v3  ;;  %v8538_v32 = vsel %vm3653_vm7, %v8496_v33, 0.0  ;;  %v16711_v3 = vld [vmem:[#allocation101_spill] sm:$0xff]  ;;  %v8884_v33 = vmul.f32 %v14812_v36, %v15045_v54 }
 0x57d   : > { %7850 = vst.msk [vmem:[#allocation3 + $0xa9] sm:$0xff] %vm3653_vm7, %v7762_v25  ;;  %v6340_v18 = vadd.f32 %v6279_v22, %v5914_v30  ;;  %v7162_v50 = vpack.c.b16 %v7146_v40, %v7145_v10  ;;  %v15086_v21 = vpop.f32.mrf.mxu0  ;;  %v15096_v57 = vpop.f32.mrf.mxu1  ;;  %v9306_v30 = vsel %vm3653_vm7, %v9270_v48, 0.0  ;;  %v15106_v40 = vld [vmem:[#allocation3 + $0x51] sm:$0xff] }
 0x57e   : > { %v15099_v38 = vpop.f32.mrf.mxu2 }
 0x57f   : > { %v6655_v63 = vadd.f32 %v14945_v61, %v6340_v18  ;;  %11561 = vmatmul.msk.bf16.gmra.mxu1 %vm3653_vm7, %v7162_v50  ;;  %v16707_v61 = vld [vmem:[#allocation85_spill] sm:$0xff]  ;;  %v4921_v18 = vadd.f32 %v16710_v13, %v14421_v0  ;;  %v7916_v50 = vmul.f32 %v15058_v43, %v15080_v58  ;;  %v8926_v13 = vsel %vm3653_vm7, %v8884_v33, 0.0 }
 0x580   : > { %8351 = vadd.xlane.f32.xlu0 %v8350_v5  ;;  %v4920_v14 = vadd.f32 %v16707_v61, %v14406_v47 }
 0x581   : > { %v7337_v15 = vadd.f32 %v14954_v2, %v6655_v63  ;;  %8536 = vadd.xlane.f32.xlu2 %v8535_v26  ;;  %11433 = vmatmul.msk.bf16.gmra.mxu3 %vm3653_vm7, %v6165_v12  ;;  %v5915_v2 = vadd.f32 %v16708_v62, %v5233_v39  ;;  %v15109_v31 = vpop.xlane.xlu2 %8330  ;;  %v8883_v39 = vmul.f32 %v14812_v36, %v15111_v52 }
 0x582   : > { %v5234_v8 = vadd.f32 %v16709_v42, %v4920_v14 }
 0x583   : > { %v7763_v20 = vadd.f32 %v14957_v16, %v7337_v15  ;;  %v8729_v16 = vsel %vm3653_vm7, %v8689_v11, 0.0  ;;  %v16712_v15 = vld [vmem:[#allocation57_spill] sm:$0xff]  ;;  %v8923_v14 = vsel %vm3653_vm7, %v8883_v39, 0.0 }
 0x584   : > { %v6282_v6 = vpop.f32.mrf.mxu3  ;;  %8730 = vadd.xlane.f32.xlu1 %v8729_v16  ;;  %v5916_v63 = vadd.f32 %v16711_v3, %v5234_v8  ;;  %v5235_v61 = vadd.f32 %v16712_v15, %v4921_v18 }
 0x585   : > { %7851 = vst.msk [vmem:[#allocation3 + $0xb1] sm:$0xff] %vm3653_vm7, %v7763_v20  ;;  %v6341_v47 = vadd.f32 %v6282_v6, %v5915_v2  ;;  %v15129_v26 = vpop.f32.mrf.mxu0  ;;  %v7962_v20 = vsel %vm3653_vm7, %v7916_v50, 0.0 }
 0x586   : > { %v15139_v11 = vpop.f32.mrf.mxu2 }
 0x587   : > { %v6656_v25 = vadd.f32 %v14976_v27, %v6341_v47  ;;  %v15113_v56 = vpop.xlane.xlu1 %8139  ;;  %v15115_v27 = vpop.xlane.xlu0 %8333  ;;  %v16716_v47 = vld [vmem:[#allocation105_spill] sm:$0xff] }
 0x588   : > { %8539 = vadd.xlane.f32.xlu0 %v8538_v32  ;;  %v5917_v16 = vadd.f32 %v16716_v47, %v5235_v61  ;;  %v16722_v47 = vld [vmem:[#allocation66_spill] sm:$0xff] }
 0x589   : > { %v7338_v22 = vadd.f32 %v14979_v49, %v6656_v25  ;;  %9307 = vadd.xlane.f32.xlu2 %v9306_v30  ;;  %v8110_v49 = vmul.f32 %v15120_v1, %v15106_v40  ;;  %v15142_v2 = vpop.xlane.xlu2 %9200  ;;  %v16717_v25 = vld [vmem:[#allocation92_spill] sm:$0xff]  ;;  %v15156_v30 = vld [vmem:[#allocation16 + $0x2] ss:$0 sm:$0xff] }
 0x58a   : > { %16713 = vst [vmem:[#allocation87_spill] sm:$0xff] %v15142_v2  ;;  %v4922_v42 = vadd.f32 %v16717_v25, %v14439_v51  ;;  %v8303_v32 = vmul.f32 %v15156_v30, %v15111_v52  ;;  %v15359_v2 = vld [vmem:[#allocation4] ss:$0 sm:$0xff] }
 0x58b   : > { %v7764_v10 = vadd.f32 %v14990_v34, %v7338_v22  ;;  %v15132_v34 = vpop.f32.mrf.mxu1  ;;  %v8156_v5 = vsel %vm3653_vm7, %v8110_v49, 0.0 }
 0x58c   : > { %v6284_v24 = vpop.f32.mrf.mxu3  ;;  %8157 = vadd.xlane.f32.xlu1 %v8156_v5  ;;  %v16720_v5 = vld [vmem:[#allocation98_spill] sm:$0xff] }
 0x58d   : > { %7852 = vst.msk [vmem:[#allocation3 + $0xc1] sm:$0xff] %vm3653_vm7, %v7764_v10  ;;  %v6342_v0 = vadd.f32 %v6284_v24, %v5916_v63  ;;  %v15161_v22 = vpop.f32.mrf.mxu0  ;;  %v8347_v10 = vsel %vm3653_vm7, %v8303_v32, 0.0  ;;  %v15171_v24 = vld [vmem:[#allocation3 + $0x60] sm:$0xff] }
 0x58e   : > { %v15173_v39 = vpop.f32.mrf.mxu2 }
 0x58f   : > { %v6657_v12 = vadd.f32 %v15009_v9, %v6342_v0  ;;  %v15144_v6 = vpop.xlane.xlu1 %9197  ;;  %v15146_v48 = vpop.xlane.xlu0 %9391  ;;  %v9077_v0 = vmul.f32 %v14698_v19, %v15080_v58 }
 0x590   : > { %8924 = vadd.xlane.f32.xlu0 %v8923_v14  ;;  %16714 = vst [vmem:[#allocation34_spill] sm:$0xff] %v15144_v6  ;;  %v16746_v6 = vld [vmem:[#allocation90_spill] sm:$0xff] }
 0x591   : > { %v7339_v62 = vadd.f32 %v15018_v29, %v6657_v12  ;;  %7963 = vadd.xlane.f32.xlu2 %v7962_v20  ;;  %16715 = vst [vmem:[#allocation23_spill] sm:$0xff] %v15146_v48  ;;  %v9271_v29 = vmul.f32 %v14711_v60, %v15106_v40  ;;  %v16718_v60 = vld [vmem:[#allocation62_spill] sm:$0xff]  ;;  %v4923_v12 = vadd.f32 %v16720_v5, %v14453_v17  ;;  %v9115_v19 = vsel %vm3653_vm7, %v9077_v0, 0.0 }
 0x592   : > { %v5236_v49 = vadd.f32 %v16718_v60, %v4922_v42  ;;  %v8690_v20 = vmul.f32 %v14766_v55, %v15106_v40  ;;  %v8657_v40 = vld [vmem:[#allocation3 + $0x61] sm:$0xff] }
 0x593   : > { %v7765_v9 = vadd.f32 %v15029_v44, %v7339_v62  ;;  %v9309_v51 = vsel %vm3653_vm7, %v9271_v29, 0.0  ;;  %v15168_v3 = vpop.f32.mrf.mxu1  ;;  %v7917_v62 = vmul.f32 %v15058_v43, %v15171_v24 }
 0x594   : > { %v6287_v8 = vpop.f32.mrf.mxu3  ;;  %8927 = vadd.xlane.f32.xlu1 %v8926_v13  ;;  %v8732_v58 = vsel %vm3653_vm7, %v8690_v20, 0.0 }
 0x595   : > { %7853 = vst.msk [vmem:[#allocation3 + $0xc9] sm:$0xff] %vm3653_vm7, %v7765_v9  ;;  %v6343_v44 = vadd.f32 %v6287_v8, %v5917_v16  ;;  %v7965_v33 = vsel %vm3653_vm7, %v7917_v62, 0.0  ;;  %v5237_v16 = vadd.f32 %v16722_v47, %v4923_v12  ;;  %v15197_v25 = vpop.f32.mrf.mxu0  ;;  %v16723_v8 = vld [vmem:[#allocation102_spill] sm:$0xff]  ;;  %v16725_v12 = vld [vmem:[#allocation69_spill] sm:$0xff] }
 0x596   : > { %v4924_v29 = vadd.f32 %v16723_v8, %v14467_v53  ;;  %v8691_v53 = vmul.f32 %v14766_v55, %v8657_v40  ;;  %v15225_v55 = vld [vmem:[#allocation3 + $0x69] sm:$0xff] }
 0x597   : > { %v6658_v18 = vadd.f32 %v15042_v45, %v6343_v44  ;;  %v15175_v50 = vpop.xlane.xlu1 %9394 }
 0x598   : > { %9310 = vadd.xlane.f32.xlu0 %v9309_v51  ;;  %16719 = vst [vmem:[#allocation24_spill] sm:$0xff] %v15175_v50  ;;  %v8735_v5 = vsel %vm3653_vm7, %v8691_v53, 0.0 }
 0x599   : > { %v7340_v63 = vadd.f32 %v15055_v23, %v6658_v18  ;;  %8348 = vadd.xlane.f32.xlu2 %v8347_v10  ;;  %v16721_v23 = vld [vmem:[#allocation109_spill] sm:$0xff] }
 0x59a   : > { %v5918_v14 = vadd.f32 %v16721_v23, %v5236_v49  ;;  %v16724_v10 = vld [vmem:[#allocation113_spill] sm:$0xff]  ;;  %v15217_v49 = vpop.f32.mrf.mxu2  ;;  %v5238_v23 = vadd.f32 %v16725_v12, %v4924_v29  ;;  %v16727_v29 = vld [vmem:[#allocation72_spill] sm:$0xff] }
 0x59b   : > { %v7766_v45 = vadd.f32 %v15067_v41, %v7340_v63  ;;  %v15182_v15 = vpop.xlane.xlu0 %8718  ;;  %v15184_v61 = vpop.xlane.xlu2 %8142  ;;  %v5919_v60 = vadd.f32 %v16724_v10, %v5237_v16 }
 0x59c   : > { %v6289_v41 = vpop.f32.mrf.mxu3  ;;  %9116 = vadd.xlane.f32.xlu1 %v9115_v19  ;;  %v15202_v32 = vpop.f32.mrf.mxu1 }
 0x59d   : > { %7854 = vst.msk [vmem:[#allocation3 + $0xd9] sm:$0xff] %vm3653_vm7, %v7766_v45  ;;  %v6344_v9 = vadd.f32 %v6289_v41, %v5918_v14  ;;  %v16726_v14 = vld [vmem:[#allocation106_spill] sm:$0xff]  ;;  %v15230_v62 = vpop.f32.mrf.mxu0 }
 0x59e   : > { %v4925_v20 = vadd.f32 %v16726_v14, %v14476_v46  ;;  %v8112_v46 = vmul.f32 %v15120_v1, %v15225_v55 }
 0x59f   : > { %v6659_v17 = vadd.f32 %v15086_v21, %v6344_v9  ;;  %v15204_v44 = vpop.xlane.xlu1 %7948  ;;  %v9464_v21 = vmul.f32 %v14964_v35, %v15111_v52 }
 0x5a0   : > { %7966 = vadd.xlane.f32.xlu0 %v7965_v33  ;;  %v8162_v8 = vsel %vm3653_vm7, %v8112_v46, 0.0  ;;  %v16731_v46 = vld [vmem:[#allocation78_spill] sm:$0xff] }
 0x5a1   : > { %8733 = vadd.xlane.f32.xlu2 %v8732_v58  ;;  %v7341_v42 = vadd.f32 %v15096_v57, %v6659_v17  ;;  %v9465_v57 = vmul.f32 %v14964_v35, %v15045_v54  ;;  %v9500_v52 = vsel %vm3653_vm7, %v9464_v21, 0.0  ;;  %v5920_v58 = vadd.f32 %v14271_v7, %v5238_v23  ;;  %v15271_v23 = vld [vmem:[#allocation16 + $0x6] ss:$0 sm:$0xff] }
 0x5a2   : > { %v5239_v21 = vadd.f32 %v16727_v29, %v4925_v20 }
 0x5a3   : > { %v7767_v13 = vadd.f32 %v15099_v38, %v7341_v42  ;;  %v15209_v18 = vpop.xlane.xlu0 %8145  ;;  %v9503_v0 = vsel %vm3653_vm7, %v9465_v57, 0.0  ;;  %v16729_v57 = vld [vmem:[#allocation110_spill] sm:$0xff] }
 0x5a4   : > { %v15211_v51 = vpop.xlane.xlu2 %7951  ;;  %v6292_v63 = vpop.f32.mrf.mxu3  ;;  %9501 = vadd.xlane.f32.xlu1 %v9500_v52 }
 0x5a5   : > { %7855 = vst.msk [vmem:[#allocation3 + $0xe1] sm:$0xff] %vm3653_vm7, %v7767_v13  ;;  %v6345_v45 = vadd.f32 %v6292_v63, %v5919_v60  ;;  %v15245_v33 = vpop.f32.mrf.mxu1  ;;  %v15255_v13 = vld [vmem:[#allocation3 + $0x6a] sm:$0xff]  ;;  %v16728_v60 = vld [vmem:[#allocation47_spill] sm:$0xff]  ;;  %v6617_v14 = vpop.f32.mrf.mxu0 }
 0x5a6   : > { %v4926_v53 = vadd.f32 %v16729_v57, %v16728_v60  ;;  %v16734_v60 = vld [vmem:[#allocation120_spill] sm:$0xff] }
 0x5a7   : > { %v6660_v38 = vadd.f32 %v15129_v26, %v6345_v45  ;;  %v15232_v41 = vpop.xlane.xlu1 %8524  ;;  %v8497_v26 = vmul.f32 %v14807_v4, %v15171_v24  ;;  %v15248_v4 = vpop.f32.mrf.mxu2  ;;  %v15262_v45 = vld [vmem:[#allocation16 + $0x7] ss:$0 sm:$0xff] }
 0x5a8   : > { %8736 = vadd.xlane.f32.xlu0 %v8735_v5  ;;  %v16730_v5 = vld [vmem:[#allocation118_spill] sm:$0xff] }
 0x5a9   : > { %9504 = vadd.xlane.f32.xlu2 %v9503_v0  ;;  %v7342_v54 = vadd.f32 %v15132_v34, %v6660_v38  ;;  %v8111_v34 = vmul.f32 %v15120_v1, %v8657_v40  ;;  %v5921_v12 = vadd.f32 %v16730_v5, %v5239_v21 }
 0x5ab   : > { %v7768_v9 = vadd.f32 %v15139_v11, %v7342_v54  ;;  %v15237_v19 = vpop.xlane.xlu0 %8915  ;;  %v8541_v11 = vsel %vm3653_vm7, %v8497_v26, 0.0  ;;  %v8159_v7 = vsel %vm3653_vm7, %v8111_v34, 0.0  ;;  %v8886_v54 = vmul.f32 %v14812_v36, %v15255_v13 }
 0x5ac   : > { %v15239_v17 = vpop.xlane.xlu2 %8339  ;;  %v6294_v47 = vpop.f32.mrf.mxu3  ;;  %8542 = vadd.xlane.f32.xlu1 %v8541_v11  ;;  %v16732_v11 = vld [vmem:[#allocation51_spill] sm:$0xff] }
 0x5ad   : > { %7856 = vst.msk [vmem:[#allocation3 + $0xf1] sm:$0xff] %vm3653_vm7, %v7768_v9  ;;  %v6346_v16 = vadd.f32 %v6294_v47, %v5920_v58  ;;  %v8932_v34 = vsel %vm3653_vm7, %v8886_v54, 0.0  ;;  %v5240_v47 = vadd.f32 %v16731_v46, %v4926_v53  ;;  %v8306_v53 = vmul.f32 %v15156_v30, %v15255_v13  ;;  %v16737_v46 = vld [vmem:[#allocation82_spill] sm:$0xff] }
 0x5af   : > { %v6661_v42 = vadd.f32 %v15161_v22, %v6346_v16  ;;  %v15260_v63 = vpop.xlane.xlu1 %8336  ;;  %v9272_v22 = vmul.f32 %v15262_v45, %v8657_v40  ;;  %v7725_v36 = vpop.f32.mrf.mxu2  ;;  %v5922_v57 = vadd.f32 %v16734_v60, %v5240_v47 }
 0x5b0   : > { %8163 = vadd.xlane.f32.xlu0 %v8162_v8 }
 0x5b1   : > { %8160 = vadd.xlane.f32.xlu2 %v8159_v7  ;;  %v7343_v10 = vadd.f32 %v15168_v3, %v6661_v42  ;;  %v9078_v3 = vmul.f32 %v15271_v23, %v15171_v24  ;;  %v9312_v26 = vsel %vm3653_vm7, %v9272_v22, 0.0  ;;  %v7884_v24 = vld [vmem:[#allocation3 + $0x68] sm:$0xff] }
 0x5b2   : > { %v16733_v42 = vld [vmem:[#allocation114_spill] sm:$0xff]  ;;  %v7918_v29 = vmul.f32 %v15058_v43, %v7884_v24  ;;  %v12210_v22 = vld [vmem:[%s16486_s8] ss:$0 sm:$0xff] }
 0x5b3   : > { %v7769_v52 = vadd.f32 %v15173_v39, %v7343_v10  ;;  %v15268_v0 = vpop.xlane.xlu0 %8530  ;;  %v15278_v39 = vpop.f32.mrf.mxu1  ;;  %v9118_v58 = vsel %vm3653_vm7, %v9078_v3, 0.0  ;;  %v4927_v7 = vadd.f32 %v16733_v42, %v16732_v11  ;;  %v16736_v3 = vld [vmem:[#allocation134_spill] sm:$0xff]  ;;  %v16738_v42 = vld [vmem:[#allocation116_spill] sm:$0xff] }
 0x5b4   : > { %v15266_v38 = vpop.xlane.xlu2 %8527  ;;  %v6297_v20 = vpop.f32.mrf.mxu3  ;;  %9313 = vadd.xlane.f32.xlu1 %v9312_v26 }
 0x5b5   : > { %7857 = vst.msk [vmem:[#allocation3 + $0xf9] sm:$0xff] %vm3653_vm7, %v7769_v52  ;;  %v6347_v40 = vadd.f32 %v6297_v20, %v5921_v12  ;;  %v16735_v52 = vld [vmem:[#allocation55_spill] sm:$0xff]  ;;  %v6619_v20 = vpop.f32.mrf.mxu0  ;;  %v5241_v47 = vadd.f32 %v16737_v46, %v4927_v7 }
 0x5b6   : > { %v3814_v5 = vadd.f32 %v12210_v22, %v16735_v52  ;;  %v16739_v52 = vld [vmem:[#allocation122_spill] sm:$0xff] }
 0x5b7   : > { %v6662_v9 = vadd.f32 %v15197_v25, %v6347_v40  ;;  %v15288_v8 = vpop.xlane.xlu1 %8721  ;;  %v7968_v40 = vsel %vm3653_vm7, %v7918_v29, 0.0  ;;  %v7727_v60 = vpop.f32.mrf.mxu2  ;;  %v5923_v7 = vadd.f32 %v16739_v52, %v5241_v47 }
 0x5b8   : > { %8933 = vadd.xlane.f32.xlu0 %v8932_v34  ;;  %v4499_v54 = vadd.f32 %v16736_v3, %v3814_v5  ;;  %v8271_v34 = vld [vmem:[#allocation3 + $0x62] sm:$0xff]  ;;  %v15322_v5 = vld [vmem:[#allocation16 + $0x3] ss:$0 sm:$0xff] }
 0x5b9   : > { %9119 = vadd.xlane.f32.xlu2 %v9118_v58  ;;  %v7344_v16 = vadd.f32 %v15202_v32, %v6662_v9  ;;  %v9079_v32 = vmul.f32 %v15271_v23, %v7884_v24  ;;  %v8356_v9 = vsel %vm3653_vm7, %v8306_v53, 0.0  ;;  %v8305_v29 = vmul.f32 %v15156_v30, %v8271_v34 }
 0x5bb   : > { %v7770_v25 = vadd.f32 %v15217_v49, %v7344_v16  ;;  %v15294_v10 = vpop.xlane.xlu0 %9301  ;;  %v9121_v58 = vsel %vm3653_vm7, %v9079_v32, 0.0  ;;  %v7301_v16 = vpop.f32.mrf.mxu1 }
 0x5bc   : > { %v15292_v21 = vpop.xlane.xlu2 %8912  ;;  %v6299_v12 = vpop.f32.mrf.mxu3  ;;  %7969 = vadd.xlane.f32.xlu1 %v7968_v40 }
 0x5bd   : > { %7858 = vst.msk [vmem:[#allocation3 + $0x109] sm:$0xff] %vm3653_vm7, %v7770_v25  ;;  %v6348_v49 = vadd.f32 %v6299_v12, %v5922_v57  ;;  %v4928_v25 = vadd.f32 %v16738_v42, %v4499_v54  ;;  %v8498_v12 = vmul.f32 %v15322_v5, %v7884_v24  ;;  %v8353_v54 = vsel %vm3653_vm7, %v8305_v29, 0.0  ;;  %v6622_v46 = vpop.f32.mrf.mxu0  ;;  %v15331_v24 = vld [vmem:[#allocation3 + $0x78] sm:$0xff] }
 0x5be   : > { %v16742_v42 = vld [vmem:[#allocation119_spill] sm:$0xff] }
 0x5bf   : > { %v6663_v26 = vadd.f32 %v15230_v62, %v6348_v49  ;;  %v15313_v57 = vpop.xlane.xlu1 %8148  ;;  %v8544_v40 = vsel %vm3653_vm7, %v8498_v12, 0.0 }
 0x5c0   : > { %9122 = vadd.xlane.f32.xlu0 %v9121_v58 }
 0x5c1   : > { %8357 = vadd.xlane.f32.xlu2 %v8356_v9  ;;  %v7345_v11 = vadd.f32 %v15245_v33, %v6663_v26  ;;  %v9466_v33 = vmul.f32 %v14964_v35, %v8271_v34  ;;  %v16740_v9 = vld [vmem:[#allocation86_spill] sm:$0xff] }
 0x5c2   : > { %v5242_v58 = vadd.f32 %v16740_v9, %v4928_v25  ;;  %v7730_v9 = vpop.f32.mrf.mxu2 }
 0x5c3   : > { %v7771_v62 = vadd.f32 %v15248_v4, %v7345_v11  ;;  %v15319_v32 = vpop.xlane.xlu0 %7957  ;;  %v9506_v26 = vsel %vm3653_vm7, %v9466_v33, 0.0  ;;  %v16741_v11 = vld [vmem:[#allocation135_spill] sm:$0xff]  ;;  %v7304_v52 = vpop.f32.mrf.mxu1 }
 0x5c4   : > { %v15317_v53 = vpop.xlane.xlu2 %7954  ;;  %v6302_v49 = vpop.f32.mrf.mxu3  ;;  %8354 = vadd.xlane.f32.xlu1 %v8353_v54  ;;  %v15347_v54 = vld [vmem:[#allocation16 + $0x5] ss:$0 sm:$0xff] }
 0x5c5   : > { %7859 = vst.msk [vmem:[#allocation3 + $0x111] sm:$0xff] %vm3653_vm7, %v7771_v62  ;;  %v6349_v3 = vadd.f32 %v6302_v49, %v5923_v7  ;;  %v4929_v62 = vadd.f32 %v16742_v42, %v16741_v11  ;;  %v16743_v49 = vld [vmem:[#allocation124_spill] sm:$0xff] }
 0x5c7   : > { %v6664_v4 = vadd.f32 %v6617_v14, %v6349_v3  ;;  %v15336_v29 = vpop.xlane.xlu1 %9107  ;;  %v15338_v14 = vld [vmem:[#allocation16 + $0x4] ss:$0 sm:$0xff]  ;;  %v5924_v3 = vadd.f32 %v16743_v49, %v5242_v58  ;;  %v5243_v50 = vadd.f32 %v16746_v6, %v4929_v62 }
 0x5c8   : > { %9507 = vadd.xlane.f32.xlu0 %v9506_v26  ;;  %v8692_v7 = vmul.f32 %v15338_v14, %v15225_v55 }
 0x5c9   : > { %8545 = vadd.xlane.f32.xlu2 %v8544_v40  ;;  %v7346_v47 = vadd.f32 %v15278_v39, %v6664_v4  ;;  %v8885_v39 = vmul.f32 %v15347_v54, %v8271_v34  ;;  %v8499_v4 = vmul.f32 %v15322_v5, %v15331_v24  ;;  %v16744_v40 = vld [vmem:[#allocation63_spill] sm:$0xff] }
 0x5ca   : > { %v3816_v26 = vadd.f32 %v12210_v22, %v16744_v40  ;;  %v8738_v48 = vsel %vm3653_vm7, %v8692_v7, 0.0  ;;  %v15361_v22 = vld [vmem:[#allocation3 + $0x79] sm:$0xff]  ;;  %v9467_v7 = vmul.f32 %v14964_v35, %v15255_v13 }
 0x5cb   : > { %v7772_v12 = vadd.f32 %v7725_v36, %v7346_v47  ;;  %v15344_v33 = vpop.xlane.xlu0 %8342  ;;  %v16745_v47 = vld [vmem:[#allocation136_spill] sm:$0xff]  ;;  %v8929_v49 = vsel %vm3653_vm7, %v8885_v39, 0.0  ;;  %v8547_v34 = vsel %vm3653_vm7, %v8499_v4, 0.0  ;;  %v16748_v4 = vld [vmem:[#allocation126_spill] sm:$0xff] }
 0x5cc   : > { %v15342_v25 = vpop.xlane.xlu2 %8724  ;;  %v6304_v11 = vpop.f32.mrf.mxu3  ;;  %v4501_v42 = vadd.f32 %v16745_v47, %v3816_v26  ;;  %8739 = vadd.xlane.f32.xlu1 %v8738_v48  ;;  %v8038_v48 = vadd.f32 %v15359_v2, %v15034_v37  ;;  %v8037_v37 = vadd.f32 %v15359_v2, %v15072_v28  ;;  %v15388_v28 = vld [vmem:[#allocation3 + $0x80] sm:$0xff] }
 0x5cd   : > { %7860 = vst.msk [vmem:[#allocation3 + $0x121] sm:$0xff] %vm3653_vm7, %v7772_v12  ;;  %v6350_v36 = vadd.f32 %v6304_v11, %v5924_v3  ;;  %v16747_v3 = vld [vmem:[#allocation121_spill] sm:$0xff]  ;;  %v6624_v26 = vpop.f32.mrf.mxu0  ;;  %v5925_v11 = vadd.f32 %v16748_v4, %v5243_v50  ;;  %v7306_v47 = vpop.f32.mrf.mxu1 }
 0x5ce   : > { %v4930_v40 = vadd.f32 %v16747_v3, %v4501_v42  ;;  %v8232_v13 = vadd.f32 %v15113_v56, %v8038_v48  ;;  %v8231_v3 = vadd.f32 %v15077_v59, %v8037_v37  ;;  %v16750_v4 = vld [vmem:[#allocation137_spill] sm:$0xff]  ;;  %v16751_v56 = vld [vmem:[#allocation123_spill] sm:$0xff]  ;;  %v16752_v59 = vld [vmem:[#allocation128_spill] sm:$0xff] }
 0x5cf   : > { %v6665_v58 = vadd.f32 %v6619_v20, %v6350_v36  ;;  %v15366_v20 = vpop.xlane.xlu1 %8345  ;;  %v9274_v36 = vmul.f32 %v15262_v45, %v15361_v22  ;;  %v4931_v48 = vadd.f32 %v16751_v56, %v16750_v4  ;;  %v16753_v4 = vld [vmem:[#allocation99_spill] sm:$0xff] }
 0x5d0   : > { %8548 = vadd.xlane.f32.xlu0 %v8547_v34  ;;  %v16749_v34 = vld [vmem:[#allocation95_spill] sm:$0xff] }
 0x5d1   : > { %8930 = vadd.xlane.f32.xlu2 %v8929_v49  ;;  %v7347_v12 = vadd.f32 %v7301_v16, %v6665_v58  ;;  %v9273_v16 = vmul.f32 %v15262_v45, %v15225_v55  ;;  %v9509_v58 = vsel %vm3653_vm7, %v9467_v7, 0.0  ;;  %v9318_v49 = vsel %vm3653_vm7, %v9274_v36, 0.0 }
 0x5d2   : > { %v8426_v7 = vadd.f32 %v15115_v27, %v8232_v13  ;;  %v8425_v27 = vadd.f32 %v15109_v31, %v8231_v3  ;;  %v5245_v31 = vadd.f32 %v16753_v4, %v4931_v48  ;;  %v9080_v48 = vmul.f32 %v15271_v23, %v15331_v24  ;;  %v8274_v4 = vld [vmem:[#allocation3 + $0x82] sm:$0xff] }
 0x5d3   : > { %v7773_v39 = vadd.f32 %v7727_v60, %v7347_v12  ;;  %v15372_v62 = vpop.xlane.xlu0 %8727  ;;  %v7732_v60 = vpop.f32.mrf.mxu2  ;;  %v9315_v55 = vsel %vm3653_vm7, %v9273_v16, 0.0  ;;  %v5244_v12 = vadd.f32 %v16749_v34, %v4930_v40 }
 0x5d4   : > { %v15370_v6 = vpop.xlane.xlu2 %8151  ;;  %v6307_v42 = vpop.f32.mrf.mxu3  ;;  %9510 = vadd.xlane.f32.xlu1 %v9509_v58  ;;  %v8620_v58 = vadd.f32 %v15266_v38, %v8426_v7  ;;  %v15414_v38 = vld [vmem:[#allocation3 + $0x7a] sm:$0xff]  ;;  %v16754_v7 = vld [vmem:[#allocation138_spill] sm:$0xff] }
 0x5d5   : > { %7861 = vst.msk [vmem:[#allocation3 + $0x129] sm:$0xff] %vm3653_vm7, %v7773_v39  ;;  %v6351_v35 = vadd.f32 %v6307_v42, %v5925_v11  ;;  %v5926_v37 = vadd.f32 %v16752_v59, %v5244_v12  ;;  %v7920_v42 = vmul.f32 %v15058_v43, %v15388_v28 }
 0x5d6   : > { %v8814_v56 = vadd.f32 %v15288_v8, %v8620_v58 }
 0x5d7   : > { %v6666_v50 = vadd.f32 %v6622_v46, %v6351_v35  ;;  %v15393_v11 = vpop.xlane.xlu1 %8533  ;;  %v8113_v46 = vmul.f32 %v15120_v1, %v15361_v22  ;;  %v6627_v35 = vpop.f32.mrf.mxu0 }
 0x5d8   : > { %9319 = vadd.xlane.f32.xlu0 %v9318_v49 }
 0x5d9   : > { %9316 = vadd.xlane.f32.xlu2 %v9315_v55  ;;  %v7348_v39 = vadd.f32 %v7304_v52, %v6666_v50  ;;  %v7919_v52 = vmul.f32 %v15058_v43, %v15331_v24  ;;  %v7309_v50 = vpop.f32.mrf.mxu1  ;;  %v8619_v55 = vadd.f32 %v15232_v41, %v8425_v27  ;;  %v8165_v49 = vsel %vm3653_vm7, %v8113_v46, 0.0  ;;  %v16755_v46 = vld [vmem:[#allocation125_spill] sm:$0xff]  ;;  %v16756_v27 = vld [vmem:[#allocation130_spill] sm:$0xff] }
 0x5da   : > { %v5927_v8 = vadd.f32 %v16756_v27, %v5245_v31  ;;  %v9008_v24 = vadd.f32 %v15237_v19, %v8814_v56  ;;  %v15445_v19 = vld [vmem:[#allocation3 + $0x81] sm:$0xff] }
 0x5db   : > { %v7774_v16 = vadd.f32 %v7730_v9, %v7348_v39  ;;  %v15399_v40 = vpop.xlane.xlu0 %9498  ;;  %v7971_v12 = vsel %vm3653_vm7, %v7919_v52, 0.0  ;;  %v7974_v39 = vsel %vm3653_vm7, %v7920_v42, 0.0  ;;  %v7735_v3 = vpop.f32.mrf.mxu2 }
 0x5dc   : > { %v15397_v36 = vpop.xlane.xlu2 %8921  ;;  %v6309_v13 = vpop.f32.mrf.mxu3  ;;  %8166 = vadd.xlane.f32.xlu1 %v8165_v49  ;;  %v16757_v49 = vld [vmem:[#allocation103_spill] sm:$0xff] }
 0x5dd   : > { %7862 = vst.msk [vmem:[#allocation3 + $0x139] sm:$0xff] %vm3653_vm7, %v7774_v16  ;;  %v6352_v9 = vadd.f32 %v6309_v13, %v5926_v37  ;;  %v8813_v16 = vadd.f32 %v15182_v15, %v8619_v55  ;;  %v8307_v13 = vmul.f32 %v15156_v30, %v15414_v38 }
 0x5df   : > { %v6667_v34 = vadd.f32 %v6624_v26, %v6352_v9  ;;  %v4932_v26 = vadd.f32 %v16755_v46, %v16754_v7  ;;  %v15421_v59 = vpop.xlane.xlu1 %8918  ;;  %v9007_v58 = vadd.f32 %v15292_v21, %v8813_v16  ;;  %v6629_v9 = vpop.f32.mrf.mxu0  ;;  %v8359_v31 = vsel %vm3653_vm7, %v8307_v13, 0.0  ;;  %v16759_v7 = vld [vmem:[#allocation127_spill] sm:$0xff] }
 0x5e0   : > { %7975 = vadd.xlane.f32.xlu0 %v7974_v39 }
 0x5e1   : > { %7972 = vadd.xlane.f32.xlu2 %v7971_v12  ;;  %v7349_v41 = vadd.f32 %v7306_v47, %v6667_v34  ;;  %v8693_v47 = vmul.f32 %v15338_v14, %v15361_v22  ;;  %v9202_v55 = vadd.f32 %v15336_v29, %v9007_v58  ;;  %v9124_v22 = vsel %vm3653_vm7, %v9080_v48, 0.0  ;;  %v16758_v29 = vld [vmem:[#allocation73_spill] sm:$0xff] }
 0x5e2   : > { %v5246_v34 = vadd.f32 %v16757_v49, %v4932_v26  ;;  %v4933_v46 = vadd.f32 %v16759_v7, %v16758_v29  ;;  %v8308_v48 = vmul.f32 %v15156_v30, %v8274_v4  ;;  %v8114_v58 = vmul.f32 %v15120_v1, %v15445_v19 }
 0x5e3   : > { %v7775_v37 = vadd.f32 %v7732_v60, %v7349_v41  ;;  %v15425_v42 = vpop.xlane.xlu0 %8154  ;;  %v8741_v39 = vsel %vm3653_vm7, %v8693_v47, 0.0  ;;  %v7311_v41 = vpop.f32.mrf.mxu1 }
 0x5e4   : > { %v9111_v52 = vpop.xlane.xlu2 %9110  ;;  %v6312_v15 = vpop.f32.mrf.mxu3  ;;  %9125 = vadd.xlane.f32.xlu1 %v9124_v22  ;;  %v8168_v22 = vsel %vm3653_vm7, %v8114_v58, 0.0 }
 0x5e5   : > { %7863 = vst.msk [vmem:[#allocation3 + $0x141] sm:$0xff] %vm3653_vm7, %v7775_v37  ;;  %v6353_v60 = vadd.f32 %v6312_v15, %v5927_v8  ;;  %v9203_v12 = vadd.f32 %v9111_v52, %v9008_v24  ;;  %v7737_v16 = vpop.f32.mrf.mxu2  ;;  %v16760_v37 = vld [vmem:[#allocation42_spill] sm:$0xff] }
 0x5e6   : > { %v5928_v52 = vadd.f32 %v16760_v37, %v5246_v34  ;;  %v16761_v34 = vld [vmem:[#allocation107_spill] sm:$0xff]  ;;  %v16764_v37 = vld [vmem:[#allocation44_spill] sm:$0xff] }
 0x5e7   : > { %v6668_v21 = vadd.f32 %v6627_v35, %v6353_v60  ;;  %v9305_v26 = vpop.xlane.xlu1 %9304  ;;  %v9396_v35 = vadd.f32 %v15294_v10, %v9202_v55  ;;  %v8362_v60 = vsel %vm3653_vm7, %v8308_v48, 0.0 }
 0x5e8   : > { %8360 = vadd.xlane.f32.xlu0 %v8359_v31  ;;  %v9397_v27 = vadd.f32 %v9305_v26, %v9203_v12  ;;  %v5247_v12 = vadd.f32 %v16761_v34, %v4933_v46  ;;  %v16763_v31 = vld [vmem:[#allocation129_spill] sm:$0xff]  ;;  %v8500_v26 = vmul.f32 %v15322_v5, %v15388_v28 }
 0x5e9   : > { %8742 = vadd.xlane.f32.xlu2 %v8741_v39  ;;  %v7350_v56 = vadd.f32 %v7309_v50, %v6668_v21  ;;  %v8694_v50 = vmul.f32 %v15338_v14, %v15445_v19  ;;  %v6632_v21 = vpop.f32.mrf.mxu0  ;;  %v16762_v39 = vld [vmem:[#allocation76_spill] sm:$0xff] }
 0x5ea   : > { %v5929_v46 = vadd.f32 %v16764_v37, %v5247_v12 }
 0x5eb   : > { %v7776_v8 = vadd.f32 %v7735_v3, %v7350_v56  ;;  %v15453_v13 = vpop.xlane.xlu0 %9113  ;;  %v9591_v3 = vadd.f32 %v15399_v40, %v9397_v27  ;;  %v8744_v49 = vsel %vm3653_vm7, %v8694_v50, 0.0  ;;  %v4934_v56 = vadd.f32 %v16763_v31, %v16762_v39  ;;  %v7314_v29 = vpop.f32.mrf.mxu1  ;;  %v15486_v27 = vld [vmem:[#allocation16 + $0x8] ss:$0 sm:$0xff] }
 0x5ec   : > { %v9496_v47 = vpop.xlane.xlu2 %9495  ;;  %v6314_v15 = vpop.f32.mrf.mxu3  ;;  %8363 = vadd.xlane.f32.xlu1 %v8362_v60  ;;  %v8550_v50 = vsel %vm3653_vm7, %v8500_v26, 0.0  ;;  %v15494_v60 = vld [vmem:[#allocation3 + $0x91] sm:$0xff] }
 0x5ed   : > { %v9590_v10 = vadd.f32 %v9496_v47, %v9396_v35  ;;  %7864 = vst.msk [vmem:[#allocation3 + $0x151] sm:$0xff] %vm3653_vm7, %v7776_v8  ;;  %v6354_v24 = vadd.f32 %v6314_v15, %v5928_v52  ;;  %v8888_v52 = vmul.f32 %v15347_v54, %v8274_v4  ;;  %v7740_v8 = vpop.f32.mrf.mxu2 }
 0x5ee   : > { %9624 = vst.msk [vmem:[%s15462_s14 + $0x8] sm:$0xff] %vm9622_vm4, %v9591_v3  ;;  %v16765_v3 = vld [vmem:[#allocation112_spill] sm:$0xff] }
 0x5ef   : > { %9623 = vst.msk [vmem:[%s15462_s14] sm:$0xff] %vm9622_vm4, %v9590_v10  ;;  %v6669_v55 = vadd.f32 %v6629_v9, %v6354_v24  ;;  %v15476_v7 = vpop.xlane.xlu1 %7960  ;;  %v8938_v10 = vsel %vm3653_vm7, %v8888_v52, 0.0  ;;  %v5248_v24 = vadd.f32 %v16765_v3, %v4934_v56  ;;  %v16768_v56 = vld [vmem:[#allocation132_spill] sm:$0xff]  ;;  %v16770_v3 = vld [vmem:[#allocation83_spill] sm:$0xff] }
 0x5f0   : > { %8745 = vadd.xlane.f32.xlu0 %v8744_v49 }
 0x5f1   : > { %8169 = vadd.xlane.f32.xlu2 %v8168_v22  ;;  %v7351_v40 = vadd.f32 %v7311_v41, %v6669_v55  ;;  %v9469_v41 = vmul.f32 %v15486_v27, %v8274_v4  ;;  %v16766_v55 = vld [vmem:[#allocation79_spill] sm:$0xff]  ;;  %v6634_v34 = vpop.f32.mrf.mxu0  ;;  %v5930_v26 = vadd.f32 %v16768_v56, %v5248_v24 }
 0x5f2   : > { %v16767_v22 = vld [vmem:[#allocation39_spill] sm:$0xff] }
 0x5f3   : > { %v7777_v9 = vadd.f32 %v7737_v16, %v7351_v40  ;;  %v15482_v35 = vpop.xlane.xlu0 %8351  ;;  %v9515_v15 = vsel %vm3653_vm7, %v9469_v41, 0.0  ;;  %v4935_v49 = vadd.f32 %v16767_v22, %v16766_v55  ;;  %v7316_v37 = vpop.f32.mrf.mxu1  ;;  %v16771_v24 = vld [vmem:[#allocation131_spill] sm:$0xff]  ;;  %v9275_v22 = vmul.f32 %v15262_v45, %v15445_v19 }
 0x5f4   : > { %v15480_v48 = vpop.xlane.xlu2 %8536  ;;  %v6317_v47 = vpop.f32.mrf.mxu3  ;;  %8551 = vadd.xlane.f32.xlu1 %v8550_v50  ;;  %v8040_v19 = vadd.f32 %v15359_v2, %v15211_v51 }
 0x5f5   : > { %7865 = vst.msk [vmem:[#allocation3 + $0x159] sm:$0xff] %vm3653_vm7, %v7777_v9  ;;  %v6355_v58 = vadd.f32 %v6317_v47, %v5929_v46  ;;  %v9081_v9 = vmul.f32 %v15271_v23, %v15388_v28  ;;  %v7742_v41 = vpop.f32.mrf.mxu2  ;;  %v9048_v28 = vld [vmem:[#allocation3 + $0x90] sm:$0xff] }
 0x5f6   : > { %v8234_v51 = vadd.f32 %v15209_v18, %v8040_v19 }
 0x5f7   : > { %v6670_v16 = vadd.f32 %v6632_v21, %v6355_v58  ;;  %v15498_v12 = vpop.xlane.xlu1 %8730  ;;  %v8887_v21 = vmul.f32 %v15347_v54, %v15414_v38  ;;  %v9127_v58 = vsel %vm3653_vm7, %v9081_v9, 0.0  ;;  %v9468_v9 = vmul.f32 %v15486_v27, %v15414_v38  ;;  %v16773_v38 = vld [vmem:[#allocation117_spill] sm:$0xff] }
 0x5f8   : > { %9516 = vadd.xlane.f32.xlu0 %v9515_v15 }
 0x5f9   : > { %8939 = vadd.xlane.f32.xlu2 %v8938_v10  ;;  %v7352_v4 = vadd.f32 %v7314_v29, %v6670_v16  ;;  %v8115_v29 = vmul.f32 %v15120_v1, %v15494_v60  ;;  %v16769_v16 = vld [vmem:[#allocation115_spill] sm:$0xff] }
 0x5fa   : > { %v5249_v10 = vadd.f32 %v16769_v16, %v4935_v49 }
 0x5fb   : > { %v7778_v40 = vadd.f32 %v7740_v8, %v7352_v4  ;;  %v15504_v31 = vpop.xlane.xlu0 %8539  ;;  %v8935_v8 = vsel %vm3653_vm7, %v8887_v21, 0.0  ;;  %v8171_v50 = vsel %vm3653_vm7, %v8115_v29, 0.0  ;;  %v4936_v4 = vadd.f32 %v16771_v24, %v16770_v3  ;;  %v6637_v21 = vpop.f32.mrf.mxu0 }
 0x5fc   : > { %v15502_v39 = vpop.xlane.xlu2 %9307  ;;  %v6319_v46 = vpop.f32.mrf.mxu3  ;;  %8936 = vadd.xlane.f32.xlu1 %v8935_v8  ;;  %v9082_v29 = vmul.f32 %v15271_v23, %v9048_v28 }
 0x5fd   : > { %7866 = vst.msk [vmem:[#allocation3 + $0x169] sm:$0xff] %vm3653_vm7, %v7778_v40  ;;  %v6356_v52 = vadd.f32 %v6319_v46, %v5930_v26  ;;  %v16772_v26 = vld [vmem:[#allocation133_spill] sm:$0xff]  ;;  %v7319_v46 = vpop.f32.mrf.mxu1  ;;  %v7745_v8 = vpop.f32.mrf.mxu2  ;;  %v5250_v16 = vadd.f32 %v16773_v38, %v4936_v4 }
 0x5fe   : > { %v5931_v49 = vadd.f32 %v16772_v26, %v5249_v10  ;;  %v15537_v10 = vld [vmem:[#allocation3 + $0x9a] sm:$0xff] }
 0x5ff   : > { %v6671_v47 = vadd.f32 %v6634_v34, %v6356_v52  ;;  %v15518_v55 = vpop.xlane.xlu1 %8157 }
 0x600   : > { %8172 = vadd.xlane.f32.xlu0 %v8171_v50  ;;  %v9130_v50 = vsel %vm3653_vm7, %v9082_v29, 0.0  ;;  %v8310_v29 = vmul.f32 %v15156_v30, %v15537_v10 }
 0x601   : > { %9128 = vadd.xlane.f32.xlu2 %v9127_v58  ;;  %v7353_v15 = vadd.f32 %v7316_v37, %v6671_v47  ;;  %v9512_v58 = vsel %vm3653_vm7, %v9468_v9, 0.0  ;;  %v8501_v9 = vmul.f32 %v15322_v5, %v9048_v28 }
 0x603   : > { %v7779_v34 = vadd.f32 %v7742_v41, %v7353_v15  ;;  %v15522_v40 = vpop.xlane.xlu0 %8924  ;;  %v9321_v41 = vsel %vm3653_vm7, %v9275_v22, 0.0  ;;  %v8039_v15 = vadd.f32 %v15359_v2, %v15204_v44  ;;  %v7921_v22 = vmul.f32 %v15058_v43, %v9048_v28 }
 0x604   : > { %v15524_v56 = vpop.xlane.xlu2 %7963  ;;  %v6322_v37 = vpop.f32.mrf.mxu3  ;;  %9322 = vadd.xlane.f32.xlu1 %v9321_v41  ;;  %v8428_v44 = vadd.f32 %v15239_v17, %v8234_v51  ;;  %v8368_v17 = vsel %vm3653_vm7, %v8310_v29, 0.0 }
 0x605   : > { %7867 = vst.msk [vmem:[#allocation3 + $0x171] sm:$0xff] %vm3653_vm7, %v7779_v34  ;;  %v6357_v52 = vadd.f32 %v6322_v37, %v5931_v49  ;;  %v16774_v49 = vld [vmem:[#allocation59_spill] sm:$0xff]  ;;  %v8233_v18 = vadd.f32 %v15184_v61, %v8039_v15  ;;  %v7977_v19 = vsel %vm3653_vm7, %v7921_v22, 0.0  ;;  %v7321_v41 = vpop.f32.mrf.mxu1  ;;  %v8695_v15 = vmul.f32 %v15338_v14, %v15494_v60 }
 0x606   : > { %v5932_v4 = vadd.f32 %v16774_v49, %v5250_v16  ;;  %v8468_v61 = vld [vmem:[#allocation3 + $0x98] sm:$0xff] }
 0x607   : > { %v6672_v47 = vadd.f32 %v6637_v21, %v6357_v52  ;;  %v15542_v24 = vpop.xlane.xlu1 %8927  ;;  %v8622_v52 = vadd.f32 %v15393_v11, %v8428_v44  ;;  %v8502_v49 = vmul.f32 %v15322_v5, %v8468_v61 }
 0x608   : > { %9131 = vadd.xlane.f32.xlu0 %v9130_v50 }
 0x609   : > { %9513 = vadd.xlane.f32.xlu2 %v9512_v58  ;;  %v7354_v3 = vadd.f32 %v7319_v46, %v6672_v47  ;;  %v6639_v46 = vpop.f32.mrf.mxu0  ;;  %v8553_v47 = vsel %vm3653_vm7, %v8501_v9, 0.0  ;;  %v7747_v58 = vpop.f32.mrf.mxu2  ;;  %v8816_v11 = vadd.f32 %v15372_v62, %v8622_v52  ;;  %v8747_v9 = vsel %vm3653_vm7, %v8695_v15, 0.0 }
 0x60a   : > { %v8556_v44 = vsel %vm3653_vm7, %v8502_v49, 0.0 }
 0x60b   : > { %v7780_v21 = vadd.f32 %v7745_v8, %v7354_v3  ;;  %v9311_v34 = vpop.xlane.xlu0 %9310  ;;  %v8427_v8 = vadd.f32 %v15260_v63, %v8233_v18 }
 0x60c   : > { %v15545_v26 = vpop.xlane.xlu2 %8348  ;;  %v6324_v37 = vpop.f32.mrf.mxu3  ;;  %7978 = vadd.xlane.f32.xlu1 %v7977_v19 }
 0x60d   : > { %7868 = vst.msk [vmem:[#allocation3 + $0x181] sm:$0xff] %vm3653_vm7, %v7780_v21  ;;  %v6358_v43 = vadd.f32 %v6324_v37, %v5932_v4  ;;  %v8621_v50 = vadd.f32 %v15268_v0, %v8427_v8  ;;  %v9276_v21 = vmul.f32 %v15262_v45, %v15494_v60  ;;  %v9010_v0 = vadd.f32 %v15397_v36, %v8816_v11  ;;  %v8082_v60 = vld [vmem:[#allocation3 + $0x99] sm:$0xff] }
 0x60e   : > { %v8855_v36 = vld [vmem:[#allocation3 + $0x92] sm:$0xff] }
 0x60f   : > { %v6673_v28 = vadd.f32 %v6639_v46, %v6358_v43  ;;  %v9117_v16 = vpop.xlane.xlu1 %9116  ;;  %v8815_v63 = vadd.f32 %v15342_v25, %v8621_v50  ;;  %v9324_v29 = vsel %vm3653_vm7, %v9276_v21, 0.0  ;;  %v8116_v46 = vmul.f32 %v15120_v1, %v8082_v60  ;;  %v7889_v21 = vld [vmem:[#allocation3 + $0xa8] sm:$0xff] }
 0x610   : > { %8369 = vadd.xlane.f32.xlu0 %v8368_v17  ;;  %v9205_v4 = vadd.f32 %v9117_v16, %v9010_v0  ;;  %v8889_v19 = vmul.f32 %v15347_v54, %v8855_v36  ;;  %v8890_v17 = vmul.f32 %v15347_v54, %v15537_v10  ;;  %v8309_v11 = vmul.f32 %v15156_v30, %v8855_v36 }
 0x611   : > { %8554 = vadd.xlane.f32.xlu2 %v8553_v47  ;;  %v7355_v38 = vadd.f32 %v7321_v41, %v6673_v28  ;;  %v9009_v62 = vadd.f32 %v15421_v59, %v8815_v63  ;;  %v15583_v41 = vld [vmem:[#allocation16] ss:$0 sm:$0xff]  ;;  %v8174_v47 = vsel %vm3653_vm7, %v8116_v46, 0.0  ;;  %v8041_v16 = vadd.f32 %v15359_v2, %v15317_v53 }
 0x612   : > { %v9399_v18 = vadd.f32 %v9311_v34, %v9205_v4  ;;  %v7922_v8 = vmul.f32 %v15583_v41, %v8468_v61  ;;  %v8941_v1 = vsel %vm3653_vm7, %v8889_v19, 0.0  ;;  %v8944_v15 = vsel %vm3653_vm7, %v8890_v17, 0.0 }
 0x613   : > { %v7781_v3 = vadd.f32 %v7747_v58, %v7355_v38  ;;  %v15566_v22 = vpop.xlane.xlu0 %7966  ;;  %v9204_v25 = vadd.f32 %v15453_v13, %v9009_v62  ;;  %v9277_v38 = vmul.f32 %v15262_v45, %v8082_v60  ;;  %v8235_v49 = vadd.f32 %v15313_v57, %v8041_v16 }
 0x614   : > { %v15564_v51 = vpop.xlane.xlu2 %8733  ;;  %8748 = vadd.xlane.f32.xlu1 %v8747_v9  ;;  %v9083_v62 = vmul.f32 %v15271_v23, %v8468_v61  ;;  %v7923_v53 = vmul.f32 %v15583_v41, %v7889_v21  ;;  %v8696_v9 = vmul.f32 %v15338_v14, %v8082_v60  ;;  %v8663_v61 = vld [vmem:[#allocation3 + $0xa9] sm:$0xff]  ;;  %v9470_v60 = vmul.f32 %v15486_v27, %v8855_v36  ;;  %v15632_v36 = vld [vmem:[#allocation3 + $0xb1] sm:$0xff] }
 0x615   : > { %7869 = vst.msk [vmem:[#allocation3 + $0x189] sm:$0xff] %vm3653_vm7, %v7781_v3  ;;  %v9398_v59 = vadd.f32 %v15502_v39, %v9204_v25  ;;  %v7980_v39 = vsel %vm3653_vm7, %v7922_v8, 0.0  ;;  %v9327_v63 = vsel %vm3653_vm7, %v9277_v38, 0.0  ;;  %v8365_v3 = vsel %vm3653_vm7, %v8309_v11, 0.0  ;;  %v15641_v38 = vld [vmem:[#allocation16 + $0x1] ss:$0 sm:$0xff] }
 0x616   : > { %v8429_v25 = vadd.f32 %v15344_v33, %v8235_v49  ;;  %v8750_v57 = vsel %vm3653_vm7, %v8696_v9, 0.0  ;;  %v9518_v8 = vsel %vm3653_vm7, %v9470_v60, 0.0  ;;  %v8118_v11 = vmul.f32 %v15641_v38, %v15632_v36 }
 0x617   : > { %v9502_v37 = vpop.xlane.xlu1 %9501  ;;  %v8117_v16 = vmul.f32 %v15641_v38, %v8663_v61 }
 0x618   : > { %8557 = vadd.xlane.f32.xlu0 %v8556_v44  ;;  %v9592_v43 = vadd.f32 %v9502_v37, %v9398_v59  ;;  %v9133_v44 = vsel %vm3653_vm7, %v9083_v62, 0.0  ;;  %v7983_v59 = vsel %vm3653_vm7, %v7923_v53, 0.0  ;;  %v8858_v62 = vld [vmem:[#allocation3 + $0xb2] sm:$0xff] }
 0x619   : > { %9325 = vadd.xlane.f32.xlu2 %v9324_v29  ;;  %v8623_v29 = vadd.f32 %v15480_v48, %v8429_v25  ;;  %v8697_v48 = vmul.f32 %v15338_v14, %v8663_v61  ;;  %v8177_v49 = vsel %vm3653_vm7, %v8117_v16, 0.0 }
 0x61a   : > { %9625 = vst.msk [vmem:[%s15462_s14 + $0x10] sm:$0xff] %vm9622_vm4, %v9592_v43  ;;  %v9471_v43 = vmul.f32 %v15486_v27, %v15537_v10 }
 0x61b   : > { %v15580_v13 = vpop.xlane.xlu0 %8736  ;;  %v8817_v37 = vadd.f32 %v15498_v12, %v8623_v29  ;;  %v8753_v12 = vsel %vm3653_vm7, %v8697_v48, 0.0  ;;  %v8892_v29 = vmul.f32 %v15347_v54, %v8858_v62 }
 0x61c   : > { %v9505_v52 = vpop.xlane.xlu2 %9504  ;;  %8175 = vadd.xlane.f32.xlu1 %v8174_v47  ;;  %v8042_v47 = vadd.f32 %v15359_v2, %v15319_v32 }
 0x61d   : > { %v9593_v28 = vadd.f32 %v9505_v52, %v9399_v18  ;;  %v9011_v52 = vadd.f32 %v15522_v40, %v8817_v37  ;;  %v8503_v40 = vmul.f32 %v15322_v5, %v7889_v21 }
 0x61f   : > { %9626 = vst.msk [vmem:[%s15462_s14 + $0x18] sm:$0xff] %vm9622_vm4, %v9593_v28  ;;  %v15593_v34 = vpop.xlane.xlu1 %8542  ;;  %v9521_v28 = vsel %vm3653_vm7, %v9471_v43, 0.0  ;;  %v8559_v32 = vsel %vm3653_vm7, %v8503_v40, 0.0 }
 0x620   : > { %8942 = vadd.xlane.f32.xlu0 %v8941_v1 }
 0x621   : > { %7981 = vadd.xlane.f32.xlu2 %v7980_v39 }
 0x623   : > { %v15599_v50 = vpop.xlane.xlu0 %8163 }
 0x624   : > { %v15597_v58 = vpop.xlane.xlu2 %8160  ;;  %8945 = vadd.xlane.f32.xlu1 %v8944_v15  ;;  %v8236_v15 = vadd.f32 %v15370_v6, %v8042_v47  ;;  %v9278_v6 = vmul.f32 %v15262_v45, %v8663_v61 }
 0x627   : > { %v9314_v0 = vpop.xlane.xlu1 %9313 }
 0x628   : > { %9328 = vadd.xlane.f32.xlu0 %v9327_v63 }
 0x629   : > { %8366 = vadd.xlane.f32.xlu2 %v8365_v3  ;;  %v8180_v3 = vsel %vm3653_vm7, %v8118_v11, 0.0 }
 0x62b   : > { %v15610_v30 = vpop.xlane.xlu0 %8933 }
 0x62c   : > { %v9120_v4 = vpop.xlane.xlu2 %9119  ;;  %9134 = vadd.xlane.f32.xlu1 %v9133_v44  ;;  %v9084_v44 = vmul.f32 %v15271_v23, %v7889_v21 }
 0x62d   : > { %v9206_v19 = vadd.f32 %v9120_v4, %v9011_v52 }
 0x62e   : > { %v9136_v37 = vsel %vm3653_vm7, %v9084_v44, 0.0 }
 0x62f   : > { %v15620_v46 = vpop.xlane.xlu1 %7969  ;;  %v9400_v10 = vadd.f32 %v9314_v0, %v9206_v19  ;;  %v8430_v0 = vadd.f32 %v15366_v20, %v8236_v15  ;;  %v9330_v20 = vsel %vm3653_vm7, %v9278_v6, 0.0  ;;  %v15672_v19 = vld [vmem:[#allocation16 + $0x2] ss:$0 sm:$0xff] }
 0x630   : > { %7984 = vadd.xlane.f32.xlu0 %v7983_v59 }
 0x631   : > { %8751 = vadd.xlane.f32.xlu2 %v8750_v57  ;;  %v8624_v4 = vadd.f32 %v15504_v31, %v8430_v0  ;;  %v8950_v57 = vsel %vm3653_vm7, %v8892_v29, 0.0  ;;  %v7890_v31 = vld [vmem:[#allocation3 + $0xb0] sm:$0xff] }
 0x632   : > { %v7924_v43 = vmul.f32 %v15583_v41, %v7890_v31  ;;  %v8504_v15 = vmul.f32 %v15322_v5, %v7890_v31 }
 0x633   : > { %v9123_v33 = vpop.xlane.xlu0 %9122  ;;  %v8818_v59 = vadd.f32 %v15564_v51, %v8624_v4  ;;  %v9085_v51 = vmul.f32 %v15271_v23, %v7890_v31  ;;  %v8698_v4 = vmul.f32 %v15338_v14, %v15632_v36 }
 0x634   : > { %v15623_v18 = vpop.xlane.xlu2 %8357  ;;  %9519 = vadd.xlane.f32.xlu1 %v9518_v8  ;;  %v8312_v8 = vmul.f32 %v15672_v19, %v8858_v62 }
 0x635   : > { %v9012_v61 = vadd.f32 %v15542_v24, %v8818_v59  ;;  %v9139_v47 = vsel %vm3653_vm7, %v9085_v51, 0.0 }
 0x636   : > { %v8374_v40 = vsel %vm3653_vm7, %v8312_v8, 0.0  ;;  %v9279_v8 = vmul.f32 %v15262_v45, %v15632_v36 }
 0x637   : > { %v15636_v1 = vpop.xlane.xlu1 %8354  ;;  %v9207_v60 = vadd.f32 %v9123_v33, %v9012_v61  ;;  %v8277_v33 = vld [vmem:[#allocation3 + $0xaa] sm:$0xff] }
 0x638   : > { %8754 = vadd.xlane.f32.xlu0 %v8753_v12  ;;  %v8311_v23 = vmul.f32 %v15672_v19, %v8277_v33  ;;  %v9472_v16 = vmul.f32 %v15486_v27, %v8277_v33  ;;  %v8891_v59 = vmul.f32 %v15347_v54, %v8277_v33 }
 0x639   : > { %9522 = vadd.xlane.f32.xlu2 %v9521_v28  ;;  %v7986_v28 = vsel %vm3653_vm7, %v7924_v43, 0.0 }
 0x63a   : > { %v8947_v31 = vsel %vm3653_vm7, %v8891_v59, 0.0 }
 0x63b   : > { %v9508_v17 = vpop.xlane.xlu0 %9507 }
 0x63c   : > { %v15639_v39 = vpop.xlane.xlu2 %8545  ;;  %v9594_v63 = vadd.f32 %v9508_v17, %v9400_v10  ;;  %8560 = vadd.xlane.f32.xlu1 %v8559_v32  ;;  %v9524_v32 = vsel %vm3653_vm7, %v9472_v16, 0.0 }
 0x63e   : > { %9627 = vst.msk [vmem:[%s15462_s14 + $0x20] sm:$0xff] %vm9622_vm4, %v9594_v63  ;;  %v8371_v63 = vsel %vm3653_vm7, %v8311_v23, 0.0 }
 0x63f   : > { %v15654_v53 = vpop.xlane.xlu1 %8739 }
 0x640   : > { %8181 = vadd.xlane.f32.xlu0 %v8180_v3  ;;  %v8562_v3 = vsel %vm3653_vm7, %v8504_v15, 0.0 }
 0x641   : > { %8178 = vadd.xlane.f32.xlu2 %v8177_v49  ;;  %v8471_v49 = vld [vmem:[#allocation3 + $0xc0] sm:$0xff] }
 0x642   : > { %v8505_v44 = vmul.f32 %v15322_v5, %v8471_v49  ;;  %v7925_v16 = vmul.f32 %v15583_v41, %v8471_v49 }
 0x643   : > { %v15659_v25 = vpop.xlane.xlu0 %8548 }
 0x644   : > { %v15657_v9 = vpop.xlane.xlu2 %8930  ;;  %9331 = vadd.xlane.f32.xlu1 %v9330_v20  ;;  %v8756_v20 = vsel %vm3653_vm7, %v8698_v4, 0.0  ;;  %v15739_v4 = vld [vmem:[#allocation3 + $0xc2] sm:$0xff] }
 0x647   : > { %v9511_v48 = vpop.xlane.xlu1 %9510 }
 0x648   : > { %8951 = vadd.xlane.f32.xlu0 %v8950_v57  ;;  %v8565_v57 = vsel %vm3653_vm7, %v8505_v44, 0.0 }
 0x649   : > { %9137 = vadd.xlane.f32.xlu2 %v9136_v37  ;;  %v9246_v37 = vld [vmem:[#allocation3 + $0xc1] sm:$0xff] }
 0x64a   : > { %v9280_v51 = vmul.f32 %v15262_v45, %v9246_v37  ;;  %v8119_v45 = vmul.f32 %v15641_v38, %v9246_v37 }
 0x64b   : > { %v15669_v52 = vpop.xlane.xlu0 %9319 }
 0x64c   : > { %v9317_v21 = vpop.xlane.xlu2 %9316  ;;  %7987 = vadd.xlane.f32.xlu1 %v7986_v28 }
 0x64d   : > { %v9401_v12 = vadd.f32 %v9317_v21, %v9207_v60  ;;  %v9473_v60 = vmul.f32 %v15486_v27, %v8858_v62  ;;  %v9336_v62 = vsel %vm3653_vm7, %v9280_v51, 0.0 }
 0x64f   : > { %v9595_v24 = vadd.f32 %v9511_v48, %v9401_v12  ;;  %v15680_v10 = vpop.xlane.xlu1 %8166  ;;  %v8044_v48 = vadd.f32 %v15359_v2, %v15524_v56  ;;  %v8043_v12 = vadd.f32 %v15359_v2, %v15476_v7  ;;  %v9527_v28 = vsel %vm3653_vm7, %v9473_v60, 0.0 }
 0x650   : > { %9140 = vadd.xlane.f32.xlu0 %v9139_v47  ;;  %v9333_v56 = vsel %vm3653_vm7, %v9279_v8, 0.0  ;;  %v15721_v47 = vld [vmem:[#allocation3 + $0xc8] sm:$0xff]  ;;  %v8699_v60 = vmul.f32 %v15338_v14, %v9246_v37 }
 0x651   : > { %9628 = vst.msk [vmem:[%s15462_s14 + $0x28] sm:$0xff] %vm9622_vm4, %v9595_v24  ;;  %8375 = vadd.xlane.f32.xlu2 %v8374_v40  ;;  %v8238_v24 = vadd.f32 %v15518_v55, %v8044_v48  ;;  %v8237_v33 = vadd.f32 %v15425_v42, %v8043_v12  ;;  %v7926_v23 = vmul.f32 %v15583_v41, %v15721_v47 }
 0x653   : > { %v15685_v11 = vpop.xlane.xlu0 %7975  ;;  %v8432_v7 = vadd.f32 %v15482_v35, %v8238_v24  ;;  %v8431_v15 = vadd.f32 %v15545_v26, %v8237_v33  ;;  %v7989_v35 = vsel %vm3653_vm7, %v7925_v16, 0.0  ;;  %v8666_v24 = vld [vmem:[#allocation3 + $0xc9] sm:$0xff] }
 0x654   : > { %v15683_v17 = vpop.xlane.xlu2 %7972  ;;  %8372 = vadd.xlane.f32.xlu1 %v8371_v63  ;;  %v8700_v33 = vmul.f32 %v15338_v14, %v8666_v24  ;;  %v8506_v14 = vmul.f32 %v15322_v5, %v15721_v47  ;;  %v8893_v5 = vmul.f32 %v15347_v54, %v15739_v4 }
 0x655   : > { %v8626_v63 = vadd.f32 %v15639_v39, %v8432_v7  ;;  %v8625_v42 = vadd.f32 %v15593_v34, %v8431_v15  ;;  %v15745_v39 = vld [vmem:[#allocation16 + $0x6] ss:$0 sm:$0xff] }
 0x656   : > { %v9086_v34 = vmul.f32 %v15745_v39, %v8471_v49  ;;  %v8280_v49 = vld [vmem:[#allocation3 + $0xca] sm:$0xff]  ;;  %v8762_v15 = vsel %vm3653_vm7, %v8700_v33, 0.0 }
 0x657   : > { %v9126_v0 = vpop.xlane.xlu1 %9125  ;;  %v8820_v44 = vadd.f32 %v15654_v53, %v8626_v63  ;;  %v8819_v59 = vadd.f32 %v15580_v13, %v8625_v42 }
 0x658   : > { %9525 = vadd.xlane.f32.xlu0 %v9524_v32  ;;  %v8183_v32 = vsel %vm3653_vm7, %v8119_v45, 0.0  ;;  %v9142_v13 = vsel %vm3653_vm7, %v9086_v34, 0.0  ;;  %v8120_v45 = vmul.f32 %v15641_v38, %v8666_v24  ;;  %v8087_v34 = vld [vmem:[#allocation3 + $0xd9] sm:$0xff] }
 0x659   : > { %8563 = vadd.xlane.f32.xlu2 %v8562_v3  ;;  %v7992_v3 = vsel %vm3653_vm7, %v7926_v23, 0.0  ;;  %v9013_v48 = vadd.f32 %v15657_v9, %v8819_v59  ;;  %v9014_v53 = vadd.f32 %v15610_v30, %v8820_v44  ;;  %v8314_v9 = vmul.f32 %v15672_v19, %v8280_v49 }
 0x65b   : > { %v15696_v29 = vpop.xlane.xlu0 %8360  ;;  %v9208_v51 = vadd.f32 %v9126_v0, %v9013_v48  ;;  %v8380_v16 = vsel %vm3653_vm7, %v8314_v9, 0.0  ;;  %v8121_v48 = vmul.f32 %v15641_v38, %v8087_v34 }
 0x65c   : > { %v15694_v6 = vpop.xlane.xlu2 %8742  ;;  %8757 = vadd.xlane.f32.xlu1 %v8756_v20 }
 0x65d   : > { %v9402_v30 = vadd.f32 %v15669_v52, %v9208_v51  ;;  %v8186_v52 = vsel %vm3653_vm7, %v8120_v45, 0.0  ;;  %v8953_v51 = vsel %vm3653_vm7, %v8893_v5, 0.0 }
 0x65f   : > { %v15703_v61 = vpop.xlane.xlu1 %8363 }
 0x660   : > { %8566 = vadd.xlane.f32.xlu0 %v8565_v57 }
 0x661   : > { %8948 = vadd.xlane.f32.xlu2 %v8947_v31  ;;  %v8313_v31 = vmul.f32 %v15672_v19, %v15739_v4 }
 0x663   : > { %v15710_v21 = vpop.xlane.xlu0 %8745  ;;  %v8377_v12 = vsel %vm3653_vm7, %v8313_v31, 0.0 }
 0x664   : > { %v15708_v43 = vpop.xlane.xlu2 %8169  ;;  %9528 = vadd.xlane.f32.xlu1 %v9527_v28  ;;  %v8759_v28 = vsel %vm3653_vm7, %v8699_v60, 0.0 }
 0x667   : > { %v15724_v40 = vpop.xlane.xlu1 %8551 }
 0x668   : > { %9337 = vadd.xlane.f32.xlu0 %v9336_v62 }
 0x669   : > { %9334 = vadd.xlane.f32.xlu2 %v9333_v56 }
 0x66b   : > { %v9517_v55 = vpop.xlane.xlu0 %9516 }
 0x66c   : > { %v15728_v36 = vpop.xlane.xlu2 %8939  ;;  %8184 = vadd.xlane.f32.xlu1 %v8183_v32  ;;  %v9475_v32 = vmul.f32 %v15486_v27, %v8280_v49 }
 0x66e   : > { %v9533_v44 = vsel %vm3653_vm7, %v9475_v32, 0.0 }
 0x66f   : > { %v15743_v26 = vpop.xlane.xlu1 %8936 }
 0x670   : > { %7993 = vadd.xlane.f32.xlu0 %v7992_v3  ;;  %v8894_v3 = vmul.f32 %v15347_v54, %v8280_v49  ;;  %v15800_v49 = vld [vmem:[#allocation16 + $0x7] ss:$0 sm:$0xff] }
 0x671   : > { %7990 = vadd.xlane.f32.xlu2 %v7989_v35  ;;  %v8568_v35 = vsel %vm3653_vm7, %v8506_v14, 0.0  ;;  %v15829_v14 = vld [vmem:[#allocation16 + $0x3] ss:$0 sm:$0xff] }
 0x672   : > { %v8956_v59 = vsel %vm3653_vm7, %v8894_v3, 0.0 }
 0x673   : > { %v15748_v57 = vpop.xlane.xlu0 %8172 }
 0x674   : > { %v9129_v20 = vpop.xlane.xlu2 %9128  ;;  %9143 = vadd.xlane.f32.xlu1 %v9142_v13  ;;  %v8189_v13 = vsel %vm3653_vm7, %v8121_v48, 0.0  ;;  %v8474_v48 = vld [vmem:[#allocation3 + $0xe0] sm:$0xff] }
 0x675   : > { %v9209_v8 = vadd.f32 %v9129_v20, %v9014_v53  ;;  %v9087_v53 = vmul.f32 %v15745_v39, %v15721_v47 }
 0x677   : > { %v9323_v37 = vpop.xlane.xlu1 %9322 }
 0x678   : > { %8378 = vadd.xlane.f32.xlu0 %v8377_v12  ;;  %v9403_v0 = vadd.f32 %v9323_v37, %v9209_v8  ;;  %v9145_v8 = vsel %vm3653_vm7, %v9087_v53, 0.0  ;;  %v9054_v12 = vld [vmem:[#allocation3 + $0xd8] sm:$0xff] }
 0x679   : > { %8760 = vadd.xlane.f32.xlu2 %v8759_v28  ;;  %v9281_v28 = vmul.f32 %v15800_v49, %v8666_v24  ;;  %v9088_v47 = vmul.f32 %v15745_v39, %v9054_v12  ;;  %v15815_v24 = vld [vmem:[#allocation3 + $0xe2] sm:$0xff]  ;;  %v8507_v32 = vmul.f32 %v15829_v14, %v9054_v12 }
 0x67a   : > { %v9597_v23 = vadd.f32 %v9517_v55, %v9403_v0  ;;  %v8046_v0 = vadd.f32 %v15359_v2, %v15620_v46 }
 0x67b   : > { %v15760_v56 = vpop.xlane.xlu0 %9131  ;;  %v9148_v33 = vsel %vm3653_vm7, %v9088_v47, 0.0  ;;  %v8571_v5 = vsel %vm3653_vm7, %v8507_v32, 0.0 }
 0x67c   : > { %v9514_v62 = vpop.xlane.xlu2 %9513  ;;  %9630 = vst.msk [vmem:[%s15462_s14 + $0x38] sm:$0xff] %vm9622_vm4, %v9597_v23  ;;  %8381 = vadd.xlane.f32.xlu1 %v8380_v16  ;;  %v15821_v16 = vld [vmem:[#allocation4] ss:$0 sm:$0xff] }
 0x67d   : > { %v9596_v7 = vadd.f32 %v9514_v62, %v9402_v30  ;;  %v9474_v30 = vmul.f32 %v15486_v27, %v15739_v4  ;;  %v9339_v62 = vsel %vm3653_vm7, %v9281_v28, 0.0  ;;  %v7927_v4 = vmul.f32 %v15583_v41, %v9054_v12 }
 0x67e   : > { %v8045_v2 = vadd.f32 %v15821_v16, %v15566_v22  ;;  %v8508_v12 = vmul.f32 %v15829_v14, %v8474_v48  ;;  %v9282_v28 = vmul.f32 %v15800_v49, %v8087_v34 }
 0x67f   : > { %9629 = vst.msk [vmem:[%s15462_s14 + $0x30] sm:$0xff] %vm9622_vm4, %v9596_v7  ;;  %v15771_v63 = vpop.xlane.xlu1 %7978  ;;  %v9530_v45 = vsel %vm3653_vm7, %v9474_v30, 0.0  ;;  %v8240_v7 = vadd.f32 %v15599_v50, %v8046_v0 }
 0x680   : > { %8763 = vadd.xlane.f32.xlu0 %v8762_v15  ;;  %v8239_v3 = vadd.f32 %v15597_v58, %v8045_v2  ;;  %v15841_v58 = vld [vmem:[#allocation16 + $0x4] ss:$0 sm:$0xff] }
 0x681   : > { %8187 = vadd.xlane.f32.xlu2 %v8186_v52  ;;  %v8316_v52 = vmul.f32 %v15672_v19, %v15815_v24  ;;  %v8434_v50 = vadd.f32 %v15623_v18, %v8240_v7 }
 0x682   : > { %v8433_v22 = vadd.f32 %v15636_v1, %v8239_v3 }
 0x683   : > { %v15777_v55 = vpop.xlane.xlu0 %8369 }
 0x684   : > { %v15775_v42 = vpop.xlane.xlu2 %8554  ;;  %8569 = vadd.xlane.f32.xlu1 %v8568_v35  ;;  %v8628_v35 = vadd.f32 %v15724_v40, %v8434_v50  ;;  %v8627_v53 = vadd.f32 %v15659_v25, %v8433_v22  ;;  %v8701_v40 = vmul.f32 %v15841_v58, %v8087_v34  ;;  %v8861_v34 = vld [vmem:[#allocation3 + $0xda] sm:$0xff]  ;;  %v7928_v50 = vmul.f32 %v15583_v41, %v8474_v48 }
 0x686   : > { %v8822_v18 = vadd.f32 %v15710_v21, %v8628_v35  ;;  %v8765_v30 = vsel %vm3653_vm7, %v8701_v40, 0.0 }
 0x687   : > { %v15784_v20 = vpop.xlane.xlu1 %8748 }
 0x688   : > { %9534 = vadd.xlane.f32.xlu0 %v9533_v44  ;;  %v7995_v44 = vsel %vm3653_vm7, %v7927_v4, 0.0  ;;  %v9016_v47 = vadd.f32 %v15728_v36, %v8822_v18  ;;  %v8315_v18 = vmul.f32 %v15672_v19, %v8861_v34 }
 0x689   : > { %8957 = vadd.xlane.f32.xlu2 %v8956_v59  ;;  %v8386_v59 = vsel %vm3653_vm7, %v8316_v52, 0.0  ;;  %v15861_v52 = vld [vmem:[#allocation16 + $0x5] ss:$0 sm:$0xff] }
 0x68a   : > { %v8895_v32 = vmul.f32 %v15861_v52, %v8861_v34  ;;  %v8896_v22 = vmul.f32 %v15861_v52, %v15815_v24 }
 0x68b   : > { %v15790_v60 = vpop.xlane.xlu0 %8557 }
 0x68c   : > { %v15788_v31 = vpop.xlane.xlu2 %9325  ;;  %8954 = vadd.xlane.f32.xlu1 %v8953_v51  ;;  %v8962_v40 = vsel %vm3653_vm7, %v8896_v22, 0.0 }
 0x68f   : > { %v15798_v54 = vpop.xlane.xlu1 %8175 }
 0x690   : > { %8190 = vadd.xlane.f32.xlu0 %v8189_v13  ;;  %v8821_v13 = vadd.f32 %v15694_v6, %v8627_v53  ;;  %v8574_v6 = vsel %vm3653_vm7, %v8508_v12, 0.0  ;;  %v8383_v12 = vsel %vm3653_vm7, %v8315_v18, 0.0 }
 0x691   : > { %9146 = vadd.xlane.f32.xlu2 %v9145_v8 }
 0x692   : > { %v9015_v25 = vadd.f32 %v15743_v26, %v8821_v13 }
 0x693   : > { %v15803_v37 = vpop.xlane.xlu0 %8942 }
 0x694   : > { %v15805_v9 = vpop.xlane.xlu2 %7981  ;;  %9340 = vadd.xlane.f32.xlu1 %v9339_v62  ;;  %v9210_v0 = vadd.f32 %v15760_v56, %v9015_v25  ;;  %v8088_v62 = vld [vmem:[#allocation3 + $0xe1] sm:$0xff] }
 0x695   : > { %v8122_v26 = vmul.f32 %v15641_v38, %v8088_v62  ;;  %v9283_v53 = vmul.f32 %v15800_v49, %v8088_v62 }
 0x696   : > { %v9404_v36 = vadd.f32 %v15788_v31, %v9210_v0  ;;  %v8959_v31 = vsel %vm3653_vm7, %v8895_v32, 0.0  ;;  %v9477_v32 = vmul.f32 %v15486_v27, %v15815_v24 }
 0x697   : > { %v15818_v23 = vpop.xlane.xlu1 %8945  ;;  %v8192_v35 = vsel %vm3653_vm7, %v8122_v26, 0.0  ;;  %v9345_v13 = vsel %vm3653_vm7, %v9283_v53, 0.0 }
 0x698   : > { %9149 = vadd.xlane.f32.xlu0 %v9148_v33  ;;  %v9342_v33 = vsel %vm3653_vm7, %v9282_v28, 0.0  ;;  %v7895_v28 = vld [vmem:[#allocation3 + $0xf0] sm:$0xff] }
 0x699   : > { %9531 = vadd.xlane.f32.xlu2 %v9530_v45 }
 0x69b   : > { %v9329_v46 = vpop.xlane.xlu0 %9328 }
 0x69c   : > { %v15825_v15 = vpop.xlane.xlu2 %8366  ;;  %7996 = vadd.xlane.f32.xlu1 %v7995_v44 }
 0x69f   : > { %v9135_v51 = vpop.xlane.xlu1 %9134 }
 0x6a0   : > { %8387 = vadd.xlane.f32.xlu0 %v8386_v59  ;;  %v9211_v21 = vadd.f32 %v9135_v51, %v9016_v47  ;;  %v8047_v51 = vadd.f32 %v15821_v16, %v15683_v17  ;;  %v7929_v17 = vmul.f32 %v15583_v41, %v7895_v28 }
 0x6a1   : > { %8572 = vadd.xlane.f32.xlu2 %v8571_v5 }
 0x6a2   : > { %v9405_v7 = vadd.f32 %v9329_v46, %v9211_v21  ;;  %v7998_v46 = vsel %vm3653_vm7, %v7928_v50, 0.0  ;;  %v8241_v47 = vadd.f32 %v15680_v10, %v8047_v51  ;;  %v9089_v21 = vmul.f32 %v15745_v39, %v8474_v48  ;;  %v8669_v48 = vld [vmem:[#allocation3 + $0xf1] sm:$0xff] }
 0x6a3   : > { %v15845_v1 = vpop.xlane.xlu0 %7984  ;;  %v8001_v26 = vsel %vm3653_vm7, %v7929_v17, 0.0  ;;  %v8123_v51 = vmul.f32 %v15641_v38, %v8669_v48 }
 0x6a4   : > { %v15847_v8 = vpop.xlane.xlu2 %8751  ;;  %8766 = vadd.xlane.f32.xlu1 %v8765_v30 }
 0x6a7   : > { %v9520_v45 = vpop.xlane.xlu1 %9519 }
 0x6a8   : > { %8575 = vadd.xlane.f32.xlu0 %v8574_v6  ;;  %v9598_v4 = vadd.f32 %v9520_v45, %v9404_v36  ;;  %v8702_v6 = vmul.f32 %v15841_v58, %v8088_v62  ;;  %v9151_v45 = vsel %vm3653_vm7, %v9089_v21, 0.0  ;;  %v9476_v62 = vmul.f32 %v15486_v27, %v8861_v34  ;;  %v15911_v34 = vld [vmem:[#allocation3 + $0xf9] sm:$0xff] }
 0x6a9   : > { %9343 = vadd.xlane.f32.xlu2 %v9342_v33  ;;  %v8435_v33 = vadd.f32 %v15696_v29, %v8241_v47  ;;  %v8509_v27 = vmul.f32 %v15829_v14, %v7895_v28  ;;  %v8124_v18 = vmul.f32 %v15641_v38, %v15911_v34  ;;  %v8195_v47 = vsel %vm3653_vm7, %v8123_v51, 0.0  ;;  %v8864_v21 = vld [vmem:[#allocation3 + $0xfa] sm:$0xff]  ;;  %v15962_v51 = vld [vmem:[#allocation16 + $0x8] ss:$0 sm:$0xff] }
 0x6aa   : > { %9631 = vst.msk [vmem:[%s15462_s14 + $0x40] sm:$0xff] %vm9622_vm4, %v9598_v4  ;;  %v8768_v10 = vsel %vm3653_vm7, %v8702_v6, 0.0 }
 0x6ab   : > { %v15859_v2 = vpop.xlane.xlu0 %8754  ;;  %v8629_v36 = vadd.f32 %v15775_v42, %v8435_v33  ;;  %v8703_v42 = vmul.f32 %v15841_v58, %v8669_v48 }
 0x6ac   : > { %v9523_v56 = vpop.xlane.xlu2 %9522  ;;  %8193 = vadd.xlane.f32.xlu1 %v8192_v35  ;;  %v9536_v35 = vsel %vm3653_vm7, %v9476_v62, 0.0 }
 0x6ad   : > { %v9599_v3 = vadd.f32 %v9523_v56, %v9405_v7  ;;  %v8823_v7 = vadd.f32 %v15784_v20, %v8629_v36  ;;  %v8771_v20 = vsel %vm3653_vm7, %v8703_v42, 0.0  ;;  %v8898_v36 = vmul.f32 %v15861_v52, %v8864_v21 }
 0x6af   : > { %9632 = vst.msk [vmem:[%s15462_s14 + $0x48] sm:$0xff] %vm9622_vm4, %v9599_v3  ;;  %v15872_v44 = vpop.xlane.xlu1 %8560  ;;  %v9017_v50 = vadd.f32 %v15803_v37, %v8823_v7 }
 0x6b0   : > { %8960 = vadd.xlane.f32.xlu0 %v8959_v31  ;;  %v9539_v31 = vsel %vm3653_vm7, %v9477_v32, 0.0 }
 0x6b1   : > { %7999 = vadd.xlane.f32.xlu2 %v7998_v46  ;;  %v8048_v46 = vadd.f32 %v15821_v16, %v15685_v11  ;;  %v8198_v11 = vsel %vm3653_vm7, %v8124_v18, 0.0 }
 0x6b3   : > { %v15876_v59 = vpop.xlane.xlu0 %8181 }
 0x6b4   : > { %v15878_v5 = vpop.xlane.xlu2 %8178  ;;  %8963 = vadd.xlane.f32.xlu1 %v8962_v40  ;;  %v8242_v40 = vadd.f32 %v15708_v43, %v8048_v46  ;;  %v9284_v43 = vmul.f32 %v15800_v49, %v8669_v48  ;;  %v8283_v46 = vld [vmem:[#allocation3 + $0xf2] sm:$0xff] }
 0x6b7   : > { %v9332_v25 = vpop.xlane.xlu1 %9331 }
 0x6b8   : > { %9346 = vadd.xlane.f32.xlu0 %v9345_v13 }
 0x6b9   : > { %8384 = vadd.xlane.f32.xlu2 %v8383_v12  ;;  %v8577_v12 = vsel %vm3653_vm7, %v8509_v27, 0.0 }
 0x6bb   : > { %v15889_v30 = vpop.xlane.xlu0 %8951 }
 0x6bc   : > { %v9138_v0 = vpop.xlane.xlu2 %9137  ;;  %9152 = vadd.xlane.f32.xlu1 %v9151_v45  ;;  %v9090_v45 = vmul.f32 %v15745_v39, %v7895_v28 }
 0x6bd   : > { %v9212_v3 = vadd.f32 %v9138_v0, %v9017_v50 }
 0x6be   : > { %v9154_v7 = vsel %vm3653_vm7, %v9090_v45, 0.0 }
 0x6bf   : > { %v15899_v4 = vpop.xlane.xlu1 %7987  ;;  %v9406_v37 = vadd.f32 %v9332_v25, %v9212_v3  ;;  %v8436_v25 = vadd.f32 %v15703_v61, %v8242_v40  ;;  %v9348_v61 = vsel %vm3653_vm7, %v9284_v43, 0.0  ;;  %v8318_v3 = vmul.f32 %v15672_v19, %v8864_v21 }
 0x6c0   : > { %8002 = vadd.xlane.f32.xlu0 %v8001_v26  ;;  %v9478_v40 = vmul.f32 %v15962_v51, %v8283_v46  ;;  %v8704_v43 = vmul.f32 %v15841_v58, %v15911_v34 }
 0x6c1   : > { %8769 = vadd.xlane.f32.xlu2 %v8768_v10  ;;  %v8630_v0 = vadd.f32 %v15790_v60, %v8436_v25  ;;  %v8968_v10 = vsel %vm3653_vm7, %v8898_v36, 0.0  ;;  %v7896_v60 = vld [vmem:[#allocation3 + $0xf8] sm:$0xff]  ;;  %v8477_v25 = vld [vmem:[#allocation3 + $0x108] sm:$0xff] }
 0x6c2   : > { %v7930_v32 = vmul.f32 %v15583_v41, %v7896_v60  ;;  %v9091_v50 = vmul.f32 %v15745_v39, %v7896_v60 }
 0x6c3   : > { %v9141_v56 = vpop.xlane.xlu0 %9140  ;;  %v8824_v26 = vadd.f32 %v15847_v8, %v8630_v0 }
 0x6c4   : > { %v15902_v29 = vpop.xlane.xlu2 %8375  ;;  %9537 = vadd.xlane.f32.xlu1 %v9536_v35 }
 0x6c5   : > { %v9018_v48 = vadd.f32 %v15818_v23, %v8824_v26  ;;  %v9157_v23 = vsel %vm3653_vm7, %v9091_v50, 0.0  ;;  %v8511_v26 = vmul.f32 %v15829_v14, %v8477_v25 }
 0x6c7   : > { %v15915_v22 = vpop.xlane.xlu1 %8372  ;;  %v9213_v62 = vadd.f32 %v9141_v56, %v9018_v48  ;;  %v8392_v56 = vsel %vm3653_vm7, %v8318_v3, 0.0  ;;  %v9252_v48 = vld [vmem:[#allocation3 + $0x109] sm:$0xff] }
 0x6c8   : > { %8772 = vadd.xlane.f32.xlu0 %v8771_v20  ;;  %v8004_v20 = vsel %vm3653_vm7, %v7930_v32, 0.0  ;;  %v8050_v32 = vadd.f32 %v15821_v16, %v15805_v9  ;;  %v9286_v3 = vmul.f32 %v15800_v49, %v9252_v48 }
 0x6c9   : > { %9540 = vadd.xlane.f32.xlu2 %v9539_v31 }
 0x6cb   : > { %v9526_v24 = vpop.xlane.xlu0 %9525 }
 0x6cc   : > { %v15918_v53 = vpop.xlane.xlu2 %8563  ;;  %v9600_v13 = vadd.f32 %v9526_v24, %v9406_v37  ;;  %8578 = vadd.xlane.f32.xlu1 %v8577_v12  ;;  %v8317_v37 = vmul.f32 %v15672_v19, %v8283_v46 }
 0x6ce   : > { %9633 = vst.msk [vmem:[%s15462_s14 + $0x50] sm:$0xff] %vm9622_vm4, %v9600_v13  ;;  %v8510_v13 = vmul.f32 %v15829_v14, %v7896_v60  ;;  %v8389_v12 = vsel %vm3653_vm7, %v8317_v37, 0.0  ;;  %v8583_v60 = vsel %vm3653_vm7, %v8511_v26, 0.0 }
 0x6cf   : > { %v15931_v17 = vpop.xlane.xlu1 %8757 }
 0x6d0   : > { %8199 = vadd.xlane.f32.xlu0 %v8198_v11  ;;  %v9542_v11 = vsel %vm3653_vm7, %v9478_v40, 0.0 }
 0x6d1   : > { %8196 = vadd.xlane.f32.xlu2 %v8195_v47  ;;  %v8580_v47 = vsel %vm3653_vm7, %v8510_v13, 0.0 }
 0x6d3   : > { %v15934_v6 = vpop.xlane.xlu0 %8566 }
 0x6d4   : > { %v15936_v33 = vpop.xlane.xlu2 %8948  ;;  %9349 = vadd.xlane.f32.xlu1 %v9348_v61  ;;  %v8897_v61 = vmul.f32 %v15861_v52, %v8283_v46  ;;  %v15998_v46 = vld [vmem:[#allocation3 + $0x110] sm:$0xff] }
 0x6d7   : > { %v9529_v42 = vpop.xlane.xlu1 %9528 }
 0x6d8   : > { %8969 = vadd.xlane.f32.xlu0 %v8968_v10  ;;  %v8774_v10 = vsel %vm3653_vm7, %v8704_v43, 0.0 }
 0x6d9   : > { %9155 = vadd.xlane.f32.xlu2 %v9154_v7  ;;  %v8965_v7 = vsel %vm3653_vm7, %v8897_v61, 0.0  ;;  %v16016_v61 = vld [vmem:[#allocation3 + $0x10a] sm:$0xff] }
 0x6db   : > { %v15946_v28 = vpop.xlane.xlu0 %9337 }
 0x6dc   : > { %v9335_v8 = vpop.xlane.xlu2 %9334  ;;  %8005 = vadd.xlane.f32.xlu1 %v8004_v20  ;;  %v8049_v20 = vadd.f32 %v15821_v16, %v15771_v63 }
 0x6dd   : > { %v9407_v35 = vadd.f32 %v9335_v8, %v9213_v62 }
 0x6df   : > { %v9601_v31 = vadd.f32 %v9529_v42, %v9407_v35  ;;  %v15955_v27 = vpop.xlane.xlu1 %8184  ;;  %v9479_v42 = vmul.f32 %v15962_v51, %v8864_v21  ;;  %v9285_v35 = vmul.f32 %v15800_v49, %v15911_v34  ;;  %v9354_v21 = vsel %vm3653_vm7, %v9286_v3, 0.0 }
 0x6e0   : > { %9158 = vadd.xlane.f32.xlu0 %v9157_v23  ;;  %v8244_v23 = vadd.f32 %v15798_v54, %v8050_v32  ;;  %v8125_v34 = vmul.f32 %v15641_v38, %v9252_v48  ;;  %v7932_v54 = vmul.f32 %v15583_v41, %v15998_v46 }
 0x6e1   : > { %9634 = vst.msk [vmem:[%s15462_s14 + $0x58] sm:$0xff] %vm9622_vm4, %v9601_v31  ;;  %8393 = vadd.xlane.f32.xlu2 %v8392_v56  ;;  %v9545_v31 = vsel %vm3653_vm7, %v9479_v42, 0.0  ;;  %v9351_v9 = vsel %vm3653_vm7, %v9285_v35, 0.0  ;;  %v8243_v56 = vadd.f32 %v15748_v57, %v8049_v20  ;;  %v8705_v42 = vmul.f32 %v15841_v58, %v9252_v48 }
 0x6e2   : > { %v8438_v63 = vadd.f32 %v15777_v55, %v8244_v23  ;;  %v8201_v43 = vsel %vm3653_vm7, %v8125_v34, 0.0  ;;  %v8010_v26 = vsel %vm3653_vm7, %v7932_v54, 0.0  ;;  %v8672_v23 = vld [vmem:[#allocation3 + $0x111] sm:$0xff] }
 0x6e3   : > { %v15958_v24 = vpop.xlane.xlu0 %7993  ;;  %v8126_v34 = vmul.f32 %v15641_v38, %v8672_v23 }
 0x6e4   : > { %v15960_v18 = vpop.xlane.xlu2 %7990  ;;  %8390 = vadd.xlane.f32.xlu1 %v8389_v12  ;;  %v7931_v12 = vmul.f32 %v15583_v41, %v8477_v25 }
 0x6e6   : > { %v8007_v55 = vsel %vm3653_vm7, %v7931_v12, 0.0 }
 0x6e7   : > { %v9144_v0 = vpop.xlane.xlu1 %9143 }
 0x6e8   : > { %9543 = vadd.xlane.f32.xlu0 %v9542_v11  ;;  %v8437_v11 = vadd.f32 %v15825_v15, %v8243_v56  ;;  %v8706_v56 = vmul.f32 %v15841_v58, %v8672_v23 }
 0x6e9   : > { %8581 = vadd.xlane.f32.xlu2 %v8580_v47  ;;  %v8632_v47 = vadd.f32 %v15918_v53, %v8438_v63  ;;  %v9092_v53 = vmul.f32 %v15745_v39, %v8477_v25  ;;  %v8777_v25 = vsel %vm3653_vm7, %v8705_v42, 0.0  ;;  %v8093_v42 = vld [vmem:[#allocation3 + $0x121] sm:$0xff] }
 0x6ea   : > { %v8631_v57 = vadd.f32 %v15872_v44, %v8437_v11  ;;  %v8780_v11 = vsel %vm3653_vm7, %v8706_v56, 0.0 }
 0x6eb   : > { %v15971_v36 = vpop.xlane.xlu0 %8378 }
 0x6ec   : > { %v15973_v45 = vpop.xlane.xlu2 %8760  ;;  %8775 = vadd.xlane.f32.xlu1 %v8774_v10  ;;  %v8826_v10 = vadd.f32 %v15931_v17, %v8632_v47  ;;  %v8825_v41 = vadd.f32 %v15859_v2, %v8631_v57  ;;  %v9160_v17 = vsel %vm3653_vm7, %v9092_v53, 0.0  ;;  %v8512_v57 = vmul.f32 %v15829_v14, %v15998_v46 }
 0x6ee   : > { %v9019_v32 = vadd.f32 %v15936_v33, %v8825_v41  ;;  %v9020_v3 = vadd.f32 %v15889_v30, %v8826_v10  ;;  %v8586_v53 = vsel %vm3653_vm7, %v8512_v57, 0.0  ;;  %v8051_v57 = vadd.f32 %v15821_v16, %v15845_v1 }
 0x6ef   : > { %v15980_v62 = vpop.xlane.xlu1 %8381 }
 0x6f0   : > { %8584 = vadd.xlane.f32.xlu0 %v8583_v60  ;;  %v9214_v35 = vadd.f32 %v9144_v0, %v9019_v32 }
 0x6f1   : > { %8966 = vadd.xlane.f32.xlu2 %v8965_v7  ;;  %v8319_v7 = vmul.f32 %v15672_v19, %v16016_v61 }
 0x6f2   : > { %v9408_v30 = vadd.f32 %v15946_v28, %v9214_v35  ;;  %v8204_v28 = vsel %vm3653_vm7, %v8126_v34, 0.0  ;;  %v8052_v34 = vadd.f32 %v15821_v16, %v15899_v4 }
 0x6f3   : > { %v15985_v8 = vpop.xlane.xlu0 %8763  ;;  %v8395_v20 = vsel %vm3653_vm7, %v8319_v7, 0.0 }
 0x6f4   : > { %v15987_v50 = vpop.xlane.xlu2 %8187  ;;  %9546 = vadd.xlane.f32.xlu1 %v9545_v31  ;;  %v8286_v31 = vld [vmem:[#allocation3 + $0x112] sm:$0xff] }
 0x6f5   : > { %v8320_v33 = vmul.f32 %v15672_v19, %v8286_v31  ;;  %v8900_v10 = vmul.f32 %v15861_v52, %v8286_v31 }
 0x6f7   : > { %v16001_v37 = vpop.xlane.xlu1 %8569  ;;  %v8398_v12 = vsel %vm3653_vm7, %v8320_v33, 0.0  ;;  %v8974_v7 = vsel %vm3653_vm7, %v8900_v10, 0.0 }
 0x6f8   : > { %9355 = vadd.xlane.f32.xlu0 %v9354_v21 }
 0x6f9   : > { %9352 = vadd.xlane.f32.xlu2 %v9351_v9 }
 0x6fb   : > { %v9535_v40 = vpop.xlane.xlu0 %9534 }
 0x6fc   : > { %v16005_v13 = vpop.xlane.xlu2 %8957  ;;  %8202 = vadd.xlane.f32.xlu1 %v8201_v43 }
 0x6ff   : > { %v16020_v15 = vpop.xlane.xlu1 %8954 }
 0x700   : > { %8011 = vadd.xlane.f32.xlu0 %v8010_v26 }
 0x701   : > { %8008 = vadd.xlane.f32.xlu2 %v8007_v55  ;;  %v9481_v55 = vmul.f32 %v15962_v51, %v8286_v31 }
 0x703   : > { %v8191_v44 = vpop.xlane.xlu0 %8190 }
 0x704   : > { %v9147_v60 = vpop.xlane.xlu2 %9146  ;;  %9161 = vadd.xlane.f32.xlu1 %v9160_v17 }
 0x705   : > { %v9215_v2 = vadd.f32 %v9147_v60, %v9020_v3  ;;  %v9551_v60 = vsel %vm3653_vm7, %v9481_v55, 0.0  ;;  %v8899_v3 = vmul.f32 %v15861_v52, %v16016_v61 }
 0x707   : > { %v9341_v48 = vpop.xlane.xlu1 %9340 }
 0x708   : > { %8396 = vadd.xlane.f32.xlu0 %v8395_v20  ;;  %v9409_v0 = vadd.f32 %v9341_v48, %v9215_v2  ;;  %v9093_v2 = vmul.f32 %v15745_v39, %v15998_v46  ;;  %v8971_v20 = vsel %vm3653_vm7, %v8899_v3, 0.0  ;;  %v9060_v48 = vld [vmem:[#allocation3 + $0x120] sm:$0xff]  ;;  %v9480_v46 = vmul.f32 %v15962_v51, %v16016_v61 }
 0x709   : > { %8778 = vadd.xlane.f32.xlu2 %v8777_v25  ;;  %v8246_v61 = vadd.f32 %v15876_v59, %v8052_v34  ;;  %v8245_v59 = vadd.f32 %v15878_v5, %v8051_v57  ;;  %v8707_v5 = vmul.f32 %v15841_v58, %v8093_v42 }
 0x70a   : > { %v9603_v54 = vadd.f32 %v9535_v40, %v9409_v0  ;;  %v9163_v25 = vsel %vm3653_vm7, %v9093_v2, 0.0 }
 0x70b   : > { %v16033_v21 = vpop.xlane.xlu0 %9149  ;;  %v8439_v2 = vadd.f32 %v15915_v22, %v8245_v59 }
 0x70c   : > { %v9532_v9 = vpop.xlane.xlu2 %9531  ;;  %9636 = vst.msk [vmem:[%s15462_s14 + $0x68] sm:$0xff] %vm9622_vm4, %v9603_v54  ;;  %8399 = vadd.xlane.f32.xlu1 %v8398_v12  ;;  %v9548_v12 = vsel %vm3653_vm7, %v9480_v46, 0.0 }
 0x70d   : > { %v9602_v63 = vadd.f32 %v9532_v9, %v9408_v30  ;;  %v9287_v30 = vmul.f32 %v15800_v49, %v8672_v23 }
 0x70f   : > { %9635 = vst.msk [vmem:[%s15462_s14 + $0x60] sm:$0xff] %vm9622_vm4, %v9602_v63  ;;  %v7997_v47 = vpop.xlane.xlu1 %7996  ;;  %v9357_v63 = vsel %vm3653_vm7, %v9287_v30, 0.0 }
 0x710   : > { %8781 = vadd.xlane.f32.xlu0 %v8780_v11  ;;  %v8055_v43 = vadd.f32 %v15821_v16, %v7997_v47  ;;  %v16084_v11 = vld [vmem:[#allocation3 + $0x12a] sm:$0xff]  ;;  %v16089_v47 = vld [vmem:[#allocation16] ss:$0 sm:$0xff] }
 0x711   : > { %8205 = vadd.xlane.f32.xlu2 %v8204_v28  ;;  %v7933_v4 = vmul.f32 %v16089_v47, %v9060_v48  ;;  %v8322_v10 = vmul.f32 %v15672_v19, %v16084_v11  ;;  %v8480_v19 = vld [vmem:[#allocation3 + $0x128] sm:$0xff]  ;;  %v8902_v59 = vmul.f32 %v15861_v52, %v16084_v11 }
 0x712   : > { %v8249_v41 = vadd.f32 %v8191_v44, %v8055_v43  ;;  %v8127_v44 = vmul.f32 %v15641_v38, %v8093_v42  ;;  %v9094_v38 = vmul.f32 %v15745_v39, %v9060_v48  ;;  %v8514_v22 = vmul.f32 %v15829_v14, %v8480_v19 }
 0x713   : > { %v16047_v40 = vpop.xlane.xlu0 %8387  ;;  %v8404_v1 = vsel %vm3653_vm7, %v8322_v10, 0.0  ;;  %v7934_v57 = vmul.f32 %v16089_v47, %v8480_v19 }
 0x714   : > { %v16049_v26 = vpop.xlane.xlu2 %8572  ;;  %8587 = vadd.xlane.f32.xlu1 %v8586_v53  ;;  %v8207_v31 = vsel %vm3653_vm7, %v8127_v44, 0.0  ;;  %v9166_v23 = vsel %vm3653_vm7, %v9094_v38, 0.0  ;;  %v8513_v53 = vmul.f32 %v15829_v14, %v9060_v48  ;;  %v8013_v44 = vsel %vm3653_vm7, %v7933_v4, 0.0 }
 0x715   : > { %v8592_v46 = vsel %vm3653_vm7, %v8514_v22, 0.0 }
 0x717   : > { %v16056_v32 = vpop.xlane.xlu1 %8766 }
 0x718   : > { %9552 = vadd.xlane.f32.xlu0 %v9551_v60  ;;  %v8440_v60 = vadd.f32 %v15902_v29, %v8246_v61 }
 0x719   : > { %8975 = vadd.xlane.f32.xlu2 %v8974_v7 }
 0x71a   : > { %v8634_v3 = vadd.f32 %v16001_v37, %v8440_v60 }
 0x71b   : > { %v16060_v35 = vpop.xlane.xlu0 %8575 }
 0x71c   : > { %v16062_v17 = vpop.xlane.xlu2 %9343  ;;  %8972 = vadd.xlane.f32.xlu1 %v8971_v20  ;;  %v8589_v20 = vsel %vm3653_vm7, %v8513_v53, 0.0  ;;  %v8828_v29 = vadd.f32 %v15985_v8, %v8634_v3  ;;  %v8016_v53 = vsel %vm3653_vm7, %v7934_v57, 0.0 }
 0x71e   : > { %v9022_v30 = vadd.f32 %v16005_v13, %v8828_v29 }
 0x71f   : > { %v8194_v33 = vpop.xlane.xlu1 %8193 }
 0x720   : > { %8208 = vadd.xlane.f32.xlu0 %v8207_v31  ;;  %v8633_v31 = vadd.f32 %v15934_v6, %v8439_v2  ;;  %v8783_v6 = vsel %vm3653_vm7, %v8707_v5, 0.0  ;;  %v8053_v5 = vadd.f32 %v15821_v16, %v15960_v18 }
 0x721   : > { %9164 = vadd.xlane.f32.xlu2 %v9163_v25 }
 0x722   : > { %v8827_v37 = vadd.f32 %v15973_v45, %v8633_v31  ;;  %v8094_v45 = vld [vmem:[#allocation3 + $0x129] sm:$0xff] }
 0x723   : > { %v16071_v0 = vpop.xlane.xlu0 %8960  ;;  %v16139_v31 = vld [vmem:[#allocation16 + $0x2] ss:$0 sm:$0xff] }
 0x724   : > { %v8000_v9 = vpop.xlane.xlu2 %7999  ;;  %9358 = vadd.xlane.f32.xlu1 %v9357_v63 }
 0x725   : > { %v8056_v56 = vadd.f32 %v15821_v16, %v8000_v9  ;;  %v9021_v9 = vadd.f32 %v16020_v15, %v8827_v37  ;;  %v16119_v15 = vld [vmem:[#allocation16 + $0x1] ss:$0 sm:$0xff]  ;;  %v8980_v37 = vsel %vm3653_vm7, %v8902_v59, 0.0 }
 0x726   : > { %v8128_v63 = vmul.f32 %v16119_v15, %v8094_v45 }
 0x727   : > { %v16080_v54 = vadd.f32 %v8194_v33, %v8056_v56  ;;  %v16087_v28 = vpop.xlane.xlu1 %8963  ;;  %v9288_v33 = vmul.f32 %v15800_v49, %v8093_v42  ;;  %v9216_v8 = vadd.f32 %v16033_v21, %v9021_v9  ;;  %v8867_v42 = vld [vmem:[#allocation3 + $0x122] sm:$0xff] }
 0x728   : > { %9167 = vadd.xlane.f32.xlu0 %v9166_v23  ;;  %v8901_v4 = vmul.f32 %v15861_v52, %v8867_v42  ;;  %v8210_v10 = vsel %vm3653_vm7, %v8128_v63, 0.0  ;;  %v8321_v29 = vmul.f32 %v16139_v31, %v8867_v42  ;;  %v9482_v63 = vmul.f32 %v15962_v51, %v8867_v42 }
 0x729   : > { %9549 = vadd.xlane.f32.xlu2 %v9548_v12  ;;  %v9360_v56 = vsel %vm3653_vm7, %v9288_v33, 0.0  ;;  %v9410_v13 = vadd.f32 %v16062_v17, %v9216_v8  ;;  %v16136_v3 = vadd.f32 %v16047_v40, %v16080_v54  ;;  %v16147_v54 = vld [vmem:[#allocation3 + $0x138] sm:$0xff]  ;;  %v9095_v33 = vmul.f32 %v15745_v39, %v8480_v19 }
 0x72a   : > { %v8977_v17 = vsel %vm3653_vm7, %v8901_v4, 0.0  ;;  %v8401_v40 = vsel %vm3653_vm7, %v8321_v29, 0.0  ;;  %v8675_v19 = vld [vmem:[#allocation3 + $0x139] sm:$0xff]  ;;  %v9554_v57 = vsel %vm3653_vm7, %v9482_v63, 0.0 }
 0x72b   : > { %v9347_v43 = vpop.xlane.xlu0 %9346 }
 0x72c   : > { %v8385_v55 = vpop.xlane.xlu2 %8384  ;;  %8014 = vadd.xlane.f32.xlu1 %v8013_v44 }
 0x72d   : > { %v8443_v7 = vadd.f32 %v8385_v55, %v8249_v41 }
 0x72f   : > { %v9153_v41 = vpop.xlane.xlu1 %9152 }
 0x730   : > { %8405 = vadd.xlane.f32.xlu0 %v8404_v1  ;;  %v9217_v38 = vadd.f32 %v9153_v41, %v9022_v30 }
 0x731   : > { %8590 = vadd.xlane.f32.xlu2 %v8589_v20  ;;  %v9289_v20 = vmul.f32 %v15800_v49, %v8094_v45 }
 0x732   : > { %v9411_v23 = vadd.f32 %v9347_v43, %v9217_v38  ;;  %v7935_v38 = vmul.f32 %v16089_v47, %v16147_v54 }
 0x733   : > { %v8003_v25 = vpop.xlane.xlu0 %8002 }
 0x734   : > { %v16108_v48 = vpop.xlane.xlu2 %8769  ;;  %8784 = vadd.xlane.f32.xlu1 %v8783_v6  ;;  %v8057_v43 = vadd.f32 %v15821_v16, %v8003_v25  ;;  %v9363_v25 = vsel %vm3653_vm7, %v9289_v20, 0.0  ;;  %v8708_v6 = vmul.f32 %v15841_v58, %v8094_v45 }
 0x736   : > { %v8786_v39 = vsel %vm3653_vm7, %v8708_v6, 0.0 }
 0x737   : > { %v9538_v34 = vpop.xlane.xlu1 %9537 }
 0x738   : > { %8593 = vadd.xlane.f32.xlu0 %v8592_v46  ;;  %v9604_v21 = vadd.f32 %v9538_v34, %v9410_v13 }
 0x739   : > { %9361 = vadd.xlane.f32.xlu2 %v9360_v56  ;;  %v9169_v56 = vsel %vm3653_vm7, %v9095_v33, 0.0 }
 0x73a   : > { %9637 = vst.msk [vmem:[%s15462_s14 + $0x70] sm:$0xff] %vm9622_vm4, %v9604_v21  ;;  %v9483_v21 = vmul.f32 %v15962_v51, %v16084_v11  ;;  %v8054_v11 = vadd.f32 %v15821_v16, %v15958_v24 }
 0x73b   : > { %v8773_v12 = vpop.xlane.xlu0 %8772 }
 0x73c   : > { %v9541_v61 = vpop.xlane.xlu2 %9540  ;;  %8211 = vadd.xlane.f32.xlu1 %v8210_v10  ;;  %v16175_v10 = vld [vmem:[#allocation3 + $0x141] sm:$0xff] }
 0x73d   : > { %v9605_v55 = vadd.f32 %v9541_v61, %v9411_v23 }
 0x73f   : > { %9638 = vst.msk [vmem:[%s15462_s14 + $0x78] sm:$0xff] %vm9622_vm4, %v9605_v55  ;;  %v8579_v60 = vpop.xlane.xlu1 %8578  ;;  %v9557_v55 = vsel %vm3653_vm7, %v9483_v21, 0.0 }
 0x740   : > { %8978 = vadd.xlane.f32.xlu0 %v8977_v17  ;;  %v8637_v44 = vadd.f32 %v8579_v60, %v8443_v7  ;;  %v8247_v7 = vadd.f32 %v15955_v27, %v8053_v5  ;;  %v8019_v27 = vsel %vm3653_vm7, %v7935_v38, 0.0  ;;  %v8515_v17 = vmul.f32 %v15829_v14, %v16147_v54 }
 0x741   : > { %8017 = vadd.xlane.f32.xlu2 %v8016_v53 }
 0x742   : > { %v16151_v30 = vadd.f32 %v8773_v12, %v8637_v44  ;;  %v8441_v8 = vadd.f32 %v15971_v36, %v8247_v7  ;;  %v8130_v44 = vmul.f32 %v16119_v15, %v16175_v10  ;;  %v8595_v29 = vsel %vm3653_vm7, %v8515_v17, 0.0 }
 0x743   : > { %v8200_v2 = vpop.xlane.xlu0 %8199 }
 0x744   : > { %v8197_v1 = vpop.xlane.xlu2 %8196  ;;  %8981 = vadd.xlane.f32.xlu1 %v8980_v37  ;;  %v8635_v46 = vadd.f32 %v16049_v26, %v8441_v8  ;;  %v8709_v26 = vmul.f32 %v15841_v58, %v8675_v19  ;;  %v8216_v24 = vsel %vm3653_vm7, %v8130_v44, 0.0  ;;  %v16191_v37 = vld [vmem:[#allocation3 + $0x142] sm:$0xff]  ;;  %v8710_v44 = vmul.f32 %v15841_v58, %v16175_v10  ;;  %v9258_v58 = vld [vmem:[#allocation3 + $0x151] sm:$0xff] }
 0x745   : > { %v8251_v41 = vadd.f32 %v8197_v1, %v8057_v43  ;;  %v8248_v1 = vadd.f32 %v15987_v50, %v8054_v11  ;;  %v9290_v50 = vmul.f32 %v15800_v49, %v8675_v19  ;;  %v8904_v33 = vmul.f32 %v15861_v52, %v16191_v37  ;;  %v7902_v49 = vld [vmem:[#allocation3 + $0x140] sm:$0xff] }
 0x746   : > { %v8829_v13 = vadd.f32 %v16056_v32, %v8635_v46  ;;  %v8789_v42 = vsel %vm3653_vm7, %v8709_v26, 0.0  ;;  %v8289_v26 = vld [vmem:[#allocation3 + $0x13a] sm:$0xff] }
 0x747   : > { %v9350_v22 = vpop.xlane.xlu1 %9349  ;;  %v9366_v8 = vsel %vm3653_vm7, %v9290_v50, 0.0 }
 0x748   : > { %9364 = vadd.xlane.f32.xlu0 %v9363_v25  ;;  %v9023_v12 = vadd.f32 %v16071_v0, %v8829_v13 }
 0x749   : > { %8402 = vadd.xlane.f32.xlu2 %v8401_v40 }
 0x74b   : > { %v16153_v9 = vpop.xlane.xlu0 %8969 }
 0x74c   : > { %v9156_v18 = vpop.xlane.xlu2 %9155  ;;  %9170 = vadd.xlane.f32.xlu1 %v9169_v56 }
 0x74d   : > { %v9218_v4 = vadd.f32 %v9156_v18, %v9023_v12  ;;  %v16199_v18 = vld [vmem:[#allocation16 + $0x6] ss:$0 sm:$0xff] }
 0x74e   : > { %v9097_v13 = vmul.f32 %v16199_v18, %v7902_v49 }
 0x74f   : > { %v8006_v34 = vpop.xlane.xlu1 %8005  ;;  %v9412_v53 = vadd.f32 %v9350_v22, %v9218_v4 }
 0x750   : > { %8020 = vadd.xlane.f32.xlu0 %v8019_v27  ;;  %v8058_v45 = vadd.f32 %v15821_v16, %v8006_v34  ;;  %v8324_v34 = vmul.f32 %v16139_v31, %v16191_v37 }
 0x751   : > { %8787 = vadd.xlane.f32.xlu2 %v8786_v39 }
 0x752   : > { %v8252_v61 = vadd.f32 %v8200_v2, %v8058_v45  ;;  %v8129_v2 = vmul.f32 %v16119_v15, %v8675_v19 }
 0x753   : > { %v9159_v36 = vpop.xlane.xlu0 %9158 }
 0x754   : > { %v8394_v23 = vpop.xlane.xlu2 %8393  ;;  %9555 = vadd.xlane.f32.xlu1 %v9554_v57  ;;  %v8213_v5 = vsel %vm3653_vm7, %v8129_v2, 0.0 }
 0x755   : > { %v16171_v32 = vadd.f32 %v8394_v23, %v8252_v61  ;;  %v8323_v61 = vmul.f32 %v16139_v31, %v8289_v26 }
 0x757   : > { %v8391_v0 = vpop.xlane.xlu1 %8390  ;;  %v8407_v17 = vsel %vm3653_vm7, %v8323_v61, 0.0  ;;  %v16273_v61 = vld [vmem:[#allocation16 + $0x4] ss:$0 sm:$0xff] }
 0x758   : > { %8790 = vadd.xlane.f32.xlu0 %v8789_v42  ;;  %v8445_v43 = vadd.f32 %v8391_v0, %v8251_v41  ;;  %v8442_v41 = vadd.f32 %v15980_v62, %v8248_v1  ;;  %v9096_v62 = vmul.f32 %v16199_v18, %v16147_v54  ;;  %v7936_v54 = vmul.f32 %v16089_v47, %v7902_v49 }
 0x759   : > { %9558 = vadd.xlane.f32.xlu2 %v9557_v55  ;;  %v9484_v42 = vmul.f32 %v15962_v51, %v8289_v26  ;;  %v8516_v55 = vmul.f32 %v15829_v14, %v7902_v49 }
 0x75a   : > { %v8636_v25 = vadd.f32 %v16060_v35, %v8442_v41  ;;  %v8986_v35 = vsel %vm3653_vm7, %v8904_v33, 0.0  ;;  %v9172_v46 = vsel %vm3653_vm7, %v9096_v62, 0.0  ;;  %v8022_v45 = vsel %vm3653_vm7, %v7936_v54, 0.0  ;;  %v16242_v62 = vld [vmem:[#allocation16 + $0x7] ss:$0 sm:$0xff] }
 0x75b   : > { %v9544_v60 = vpop.xlane.xlu0 %9543 }
 0x75c   : > { %v8582_v59 = vpop.xlane.xlu2 %8581  ;;  %v9606_v20 = vadd.f32 %v9544_v60, %v9412_v53  ;;  %8596 = vadd.xlane.f32.xlu1 %v8595_v29  ;;  %v8830_v38 = vadd.f32 %v16108_v48, %v8636_v25  ;;  %v8483_v60 = vld [vmem:[#allocation3 + $0x150] sm:$0xff]  ;;  %v8792_v25 = vsel %vm3653_vm7, %v8710_v44, 0.0 }
 0x75d   : > { %v8638_v21 = vadd.f32 %v8582_v59, %v16136_v3  ;;  %v8598_v3 = vsel %vm3653_vm7, %v8516_v55, 0.0  ;;  %v8517_v29 = vmul.f32 %v15829_v14, %v8483_v60  ;;  %v9485_v14 = vmul.f32 %v15962_v51, %v16191_v37  ;;  %v16250_v37 = vld [vmem:[#allocation3 + $0x158] sm:$0xff] }
 0x75e   : > { %9639 = vst.msk [vmem:[%s15462_s14 + $0x80] sm:$0xff] %vm9622_vm4, %v9606_v20  ;;  %v9024_v56 = vadd.f32 %v16087_v28, %v8830_v38  ;;  %v9175_v28 = vsel %vm3653_vm7, %v9097_v13, 0.0  ;;  %v9292_v38 = vmul.f32 %v16242_v62, %v9258_v58 }
 0x75f   : > { %v8776_v40 = vpop.xlane.xlu1 %8775 }
 0x760   : > { %8217 = vadd.xlane.f32.xlu0 %v8216_v24  ;;  %v9219_v27 = vadd.f32 %v9159_v36, %v9024_v56  ;;  %v8410_v36 = vsel %vm3653_vm7, %v8324_v34, 0.0  ;;  %v8832_v0 = vadd.f32 %v8776_v40, %v8638_v21  ;;  %v8903_v24 = vmul.f32 %v15861_v52, %v8289_v26 }
 0x761   : > { %8214 = vadd.xlane.f32.xlu2 %v8213_v5  ;;  %v8601_v40 = vsel %vm3653_vm7, %v8517_v29, 0.0  ;;  %v9372_v49 = vsel %vm3653_vm7, %v9292_v38, 0.0  ;;  %v8131_v56 = vmul.f32 %v16119_v15, %v9258_v58  ;;  %v9098_v26 = vmul.f32 %v16199_v18, %v8483_v60  ;;  %v16306_v38 = vld [vmem:[#allocation16 + $0x5] ss:$0 sm:$0xff] }
 0x762   : > { %v9026_v2 = vadd.f32 %v16153_v9, %v8832_v0  ;;  %v8983_v50 = vsel %vm3653_vm7, %v8903_v24, 0.0 }
 0x763   : > { %v8585_v7 = vpop.xlane.xlu0 %8584  ;;  %v8219_v34 = vsel %vm3653_vm7, %v8131_v56, 0.0  ;;  %v9178_v55 = vsel %vm3653_vm7, %v9098_v26, 0.0 }
 0x764   : > { %v16195_v22 = vpop.xlane.xlu2 %8966  ;;  %v8639_v6 = vadd.f32 %v8585_v7, %v8445_v43  ;;  %9367 = vadd.xlane.f32.xlu1 %v9366_v8  ;;  %v9560_v43 = vsel %vm3653_vm7, %v9484_v42, 0.0 }
 0x767   : > { %v9547_v39 = vpop.xlane.xlu1 %9546 }
 0x768   : > { %8987 = vadd.xlane.f32.xlu0 %v8986_v35  ;;  %v9563_v35 = vsel %vm3653_vm7, %v9485_v14, 0.0 }
 0x769   : > { %9173 = vadd.xlane.f32.xlu2 %v9172_v46 }
 0x76b   : > { %v16209_v19 = vpop.xlane.xlu0 %9355 }
 0x76c   : > { %v9353_v48 = vpop.xlane.xlu2 %9352  ;;  %8023 = vadd.xlane.f32.xlu1 %v8022_v45 }
 0x76d   : > { %v9413_v63 = vadd.f32 %v9353_v48, %v9219_v27  ;;  %v7937_v48 = vmul.f32 %v16089_v47, %v8483_v60 }
 0x76f   : > { %v9607_v23 = vadd.f32 %v9547_v39, %v9413_v63  ;;  %v8203_v12 = vpop.xlane.xlu1 %8202  ;;  %v8025_v45 = vsel %vm3653_vm7, %v7937_v48, 0.0 }
 0x770   : > { %9176 = vadd.xlane.f32.xlu0 %v9175_v28 }
 0x771   : > { %9640 = vst.msk [vmem:[%s15462_s14 + $0x88] sm:$0xff] %vm9622_vm4, %v9607_v23  ;;  %8411 = vadd.xlane.f32.xlu2 %v8410_v36 }
 0x773   : > { %v8012_v4 = vpop.xlane.xlu0 %8011 }
 0x774   : > { %v8009_v57 = vpop.xlane.xlu2 %8008  ;;  %8408 = vadd.xlane.f32.xlu1 %v8407_v17  ;;  %v8060_v9 = vadd.f32 %v15821_v16, %v8012_v4  ;;  %v8711_v4 = vmul.f32 %v16273_v61, %v9258_v58  ;;  %v8292_v17 = vld [vmem:[#allocation3 + $0x15a] sm:$0xff] }
 0x775   : > { %v8059_v11 = vadd.f32 %v15821_v16, %v8009_v57  ;;  %v9025_v57 = vadd.f32 %v16195_v22, %v16151_v30  ;;  %v8326_v60 = vmul.f32 %v16139_v31, %v8292_v17 }
 0x777   : > { %v8253_v53 = vadd.f32 %v8203_v12, %v8059_v11  ;;  %v9162_v59 = vpop.xlane.xlu1 %9161  ;;  %v8416_v24 = vsel %vm3653_vm7, %v8326_v60, 0.0 }
 0x778   : > { %9561 = vadd.xlane.f32.xlu0 %v9560_v43  ;;  %v9220_v42 = vadd.f32 %v9162_v59, %v9025_v57  ;;  %v8678_v43 = vld [vmem:[#allocation3 + $0x159] sm:$0xff] }
 0x779   : > { %8599 = vadd.xlane.f32.xlu2 %v8598_v3 }
 0x77a   : > { %v9414_v30 = vadd.f32 %v16209_v19, %v9220_v42 }
 0x77b   : > { %v8397_v1 = vpop.xlane.xlu0 %8396 }
 0x77c   : > { %v8779_v20 = vpop.xlane.xlu2 %8778  ;;  %v16232_v5 = vadd.f32 %v8397_v1, %v8253_v53  ;;  %8793 = vadd.xlane.f32.xlu1 %v8792_v25  ;;  %v8795_v53 = vsel %vm3653_vm7, %v8711_v4, 0.0  ;;  %v8132_v1 = vmul.f32 %v16119_v15, %v8678_v43  ;;  %v9293_v4 = vmul.f32 %v16242_v62, %v8678_v43 }
 0x77d   : > { %v16234_v41 = vadd.f32 %v8779_v20, %v8639_v6  ;;  %v9291_v6 = vmul.f32 %v16242_v62, %v16175_v10  ;;  %v7938_v10 = vmul.f32 %v16089_v47, %v16250_v37 }
 0x77e   : > { %v8222_v19 = vsel %vm3653_vm7, %v8132_v1, 0.0 }
 0x77f   : > { %v8400_v7 = vpop.xlane.xlu1 %8399  ;;  %v9369_v16 = vsel %vm3653_vm7, %v9291_v6, 0.0  ;;  %v8028_v63 = vsel %vm3653_vm7, %v7938_v10, 0.0  ;;  %v8906_v6 = vmul.f32 %v16306_v38, %v8292_v17 }
 0x780   : > { %8602 = vadd.xlane.f32.xlu0 %v8601_v40 }
 0x781   : > { %8984 = vadd.xlane.f32.xlu2 %v8983_v50  ;;  %v16294_v50 = vld [vmem:[#allocation16 + $0x3] ss:$0 sm:$0xff] }
 0x782   : > { %v8518_v58 = vmul.f32 %v16294_v50, %v16250_v37 }
 0x783   : > { %v8782_v52 = vpop.xlane.xlu0 %8781 }
 0x784   : > { %v8206_v33 = vpop.xlane.xlu2 %8205  ;;  %9564 = vadd.xlane.f32.xlu1 %v9563_v35  ;;  %v8604_v35 = vsel %vm3653_vm7, %v8518_v58, 0.0 }
 0x785   : > { %v8254_v8 = vadd.f32 %v8206_v33, %v8060_v9  ;;  %v16298_v9 = vld [vmem:[#allocation4] ss:$0 sm:$0xff]  ;;  %v9487_v33 = vmul.f32 %v15962_v51, %v8292_v17 }
 0x787   : > { %v8588_v46 = vpop.xlane.xlu1 %8587  ;;  %v16264_v23 = vadd.f32 %v8400_v7, %v8254_v8 }
 0x788   : > { %9373 = vadd.xlane.f32.xlu0 %v9372_v49  ;;  %v8640_v27 = vadd.f32 %v8588_v46, %v16171_v32  ;;  %v16266_v32 = vld [vmem:[#allocation3 + $0x152] sm:$0xff]  ;;  %v9569_v49 = vsel %vm3653_vm7, %v9487_v33, 0.0  ;;  %v8099_v46 = vld [vmem:[#allocation3 + $0x169] sm:$0xff] }
 0x789   : > { %9370 = vadd.xlane.f32.xlu2 %v9369_v16  ;;  %v8325_v12 = vmul.f32 %v16139_v31, %v16266_v32  ;;  %v8992_v16 = vsel %vm3653_vm7, %v8906_v6, 0.0  ;;  %v8133_v48 = vmul.f32 %v16119_v15, %v8099_v46 }
 0x78a   : > { %v16259_v13 = vadd.f32 %v8782_v52, %v8640_v27  ;;  %v8905_v27 = vmul.f32 %v16306_v38, %v16266_v32 }
 0x78b   : > { %v9553_v39 = vpop.xlane.xlu0 %9552  ;;  %v8413_v0 = vsel %vm3653_vm7, %v8325_v12, 0.0  ;;  %v8225_v26 = vsel %vm3653_vm7, %v8133_v48, 0.0 }
 0x78c   : > { %v16254_v54 = vpop.xlane.xlu2 %8975  ;;  %8220 = vadd.xlane.f32.xlu1 %v8219_v34  ;;  %v9099_v34 = vmul.f32 %v16199_v18, %v16250_v37 }
 0x78d   : > { %v9028_v33 = vadd.f32 %v16254_v54, %v16259_v13 }
 0x78f   : > { %v16268_v28 = vpop.xlane.xlu1 %8972 }
 0x790   : > { %8029 = vadd.xlane.f32.xlu0 %v8028_v63  ;;  %v9027_v6 = vadd.f32 %v16268_v28, %v16234_v41 }
 0x791   : > { %8026 = vadd.xlane.f32.xlu2 %v8025_v45  ;;  %v8989_v45 = vsel %vm3653_vm7, %v8905_v27, 0.0  ;;  %v8100_v27 = vld [vmem:[#allocation3 + $0x171] sm:$0xff] }
 0x792   : > { %v8134_v41 = vmul.f32 %v16119_v15, %v8100_v27 }
 0x793   : > { %v8209_v36 = vpop.xlane.xlu0 %8208 }
 0x794   : > { %v9165_v21 = vpop.xlane.xlu2 %9164  ;;  %9179 = vadd.xlane.f32.xlu1 %v9178_v55 }
 0x795   : > { %v9221_v11 = vadd.f32 %v9165_v21, %v9026_v2  ;;  %v8712_v2 = vmul.f32 %v16273_v61, %v8678_v43  ;;  %v9066_v21 = vld [vmem:[#allocation3 + $0x168] sm:$0xff]  ;;  %v16335_v43 = vld [vmem:[#allocation3 + $0x172] sm:$0xff] }
 0x796   : > { %v9100_v37 = vmul.f32 %v16199_v18, %v9066_v21  ;;  %v7939_v60 = vmul.f32 %v16089_v47, %v9066_v21 }
 0x797   : > { %v9359_v3 = vpop.xlane.xlu1 %9358  ;;  %v8798_v25 = vsel %vm3653_vm7, %v8712_v2, 0.0 }
 0x798   : > { %8414 = vadd.xlane.f32.xlu0 %v8413_v0  ;;  %v9415_v22 = vadd.f32 %v9359_v3, %v9221_v11  ;;  %v9375_v11 = vsel %vm3653_vm7, %v9293_v4, 0.0  ;;  %v9184_v17 = vsel %vm3653_vm7, %v9100_v37, 0.0  ;;  %v8031_v2 = vsel %vm3653_vm7, %v7939_v60, 0.0 }
 0x799   : > { %8796 = vadd.xlane.f32.xlu2 %v8795_v53 }
 0x79a   : > { %v9609_v29 = vadd.f32 %v9553_v39, %v9415_v22  ;;  %v8519_v22 = vmul.f32 %v16294_v50, %v9066_v21  ;;  %v8228_v21 = vsel %vm3653_vm7, %v8134_v41, 0.0 }
 0x79b   : > { %v16283_v59 = vpop.xlane.xlu0 %9167 }
 0x79c   : > { %v9550_v44 = vpop.xlane.xlu2 %9549  ;;  %9642 = vst.msk [vmem:[%s15462_s14 + $0x98] sm:$0xff] %vm9622_vm4, %v9609_v29  ;;  %8417 = vadd.xlane.f32.xlu1 %v8416_v24  ;;  %v8486_v29 = vld [vmem:[#allocation3 + $0x170] sm:$0xff] }
 0x79d   : > { %v9608_v20 = vadd.f32 %v9550_v44, %v9414_v30  ;;  %v8520_v58 = vmul.f32 %v16294_v50, %v8486_v29 }
 0x79f   : > { %9641 = vst.msk [vmem:[%s15462_s14 + $0x90] sm:$0xff] %vm9622_vm4, %v9608_v20  ;;  %v8015_v40 = vpop.xlane.xlu1 %8014  ;;  %v8607_v20 = vsel %vm3653_vm7, %v8519_v22, 0.0 }
 0x7a0   : > { %8799 = vadd.xlane.f32.xlu0 %v8798_v25  ;;  %v8061_v7 = vadd.f32 %v16298_v9, %v8015_v40  ;;  %v8713_v25 = vmul.f32 %v16273_v61, %v8099_v46 }
 0x7a1   : > { %8223 = vadd.xlane.f32.xlu2 %v8222_v19 }
 0x7a2   : > { %v8255_v8 = vadd.f32 %v8209_v36, %v8061_v7  ;;  %v9181_v36 = vsel %vm3653_vm7, %v9099_v34, 0.0  ;;  %v9294_v7 = vmul.f32 %v16242_v62, %v8099_v46  ;;  %v8873_v46 = vld [vmem:[#allocation3 + $0x16a] sm:$0xff] }
 0x7a3   : > { %v16301_v14 = vpop.xlane.xlu0 %8405 }
 0x7a4   : > { %v16303_v52 = vpop.xlane.xlu2 %8590  ;;  %8605 = vadd.xlane.f32.xlu1 %v8604_v35  ;;  %v8801_v35 = vsel %vm3653_vm7, %v8713_v25, 0.0 }
 0x7a7   : > { %v16312_v56 = vpop.xlane.xlu1 %8784 }
 0x7a8   : > { %9570 = vadd.xlane.f32.xlu0 %v9569_v49  ;;  %v9222_v49 = vadd.f32 %v16283_v59, %v9027_v6  ;;  %v8907_v59 = vmul.f32 %v16306_v38, %v8873_v46 }
 0x7a9   : > { %8993 = vadd.xlane.f32.xlu2 %v8992_v16  ;;  %v8610_v16 = vsel %vm3653_vm7, %v8520_v58, 0.0 }
 0x7ab   : > { %v8594_v39 = vpop.xlane.xlu0 %8593 }
 0x7ac   : > { %v9362_v10 = vpop.xlane.xlu2 %9361  ;;  %v16320_v63 = vadd.f32 %v8594_v39, %v16264_v23  ;;  %8990 = vadd.xlane.f32.xlu1 %v8989_v45  ;;  %v9486_v23 = vmul.f32 %v15962_v51, %v16266_v32  ;;  %v8328_v32 = vmul.f32 %v16139_v31, %v16335_v43  ;;  %v9378_v39 = vsel %vm3653_vm7, %v9294_v7, 0.0 }
 0x7ad   : > { %v9416_v54 = vadd.f32 %v9362_v10, %v9222_v49  ;;  %v8995_v10 = vsel %vm3653_vm7, %v8907_v59, 0.0 }
 0x7ae   : > { %v9566_v53 = vsel %vm3653_vm7, %v9486_v23, 0.0  ;;  %v8422_v1 = vsel %vm3653_vm7, %v8328_v32, 0.0  ;;  %v8681_v32 = vld [vmem:[#allocation3 + $0x181] sm:$0xff] }
 0x7af   : > { %v8212_v12 = vpop.xlane.xlu1 %8211 }
 0x7b0   : > { %8226 = vadd.xlane.f32.xlu0 %v8225_v26  ;;  %v7940_v26 = vmul.f32 %v16089_v47, %v8486_v29  ;;  %v8908_v47 = vmul.f32 %v16306_v38, %v16335_v43 }
 0x7b1   : > { %9182 = vadd.xlane.f32.xlu2 %v9181_v36 }
 0x7b2   : > { %v8034_v15 = vsel %vm3653_vm7, %v7940_v26, 0.0  ;;  %v8998_v60 = vsel %vm3653_vm7, %v8908_v47, 0.0 }
 0x7b3   : > { %v16326_v57 = vpop.xlane.xlu0 %8978 }
 0x7b4   : > { %v8018_v42 = vpop.xlane.xlu2 %8017  ;;  %9376 = vadd.xlane.f32.xlu1 %v9375_v11  ;;  %v9295_v11 = vmul.f32 %v16242_v62, %v8100_v27 }
 0x7b5   : > { %v8062_v55 = vadd.f32 %v16298_v9, %v8018_v42 }
 0x7b7   : > { %v8256_v0 = vadd.f32 %v8212_v12, %v8062_v55  ;;  %v16337_v3 = vpop.xlane.xlu1 %8981 }
 0x7b8   : > { %9185 = vadd.xlane.f32.xlu0 %v9184_v17  ;;  %v8327_v17 = vmul.f32 %v16139_v31, %v8873_v46  ;;  %v8715_v31 = vmul.f32 %v16273_v61, %v8681_v32 }
 0x7b9   : > { %9567 = vadd.xlane.f32.xlu2 %v9566_v53  ;;  %v16373_v42 = vadd.f32 %v16301_v14, %v8256_v0  ;;  %v9101_v0 = vmul.f32 %v16199_v18, %v8486_v29  ;;  %v16392_v29 = vld [vmem:[#allocation3 + $0x18a] sm:$0xff] }
 0x7ba   : > { %v8807_v25 = vsel %vm3653_vm7, %v8715_v31, 0.0 }
 0x7bb   : > { %v9365_v30 = vpop.xlane.xlu0 %9364 }
 0x7bc   : > { %v8403_v51 = vpop.xlane.xlu2 %8402  ;;  %8032 = vadd.xlane.f32.xlu1 %v8031_v2 }
 0x7bd   : > { %v8449_v44 = vadd.f32 %v8403_v51, %v8255_v8  ;;  %v8419_v51 = vsel %vm3653_vm7, %v8327_v17, 0.0 }
 0x7bf   : > { %v9171_v24 = vpop.xlane.xlu1 %9170 }
 0x7c0   : > { %8423 = vadd.xlane.f32.xlu0 %v8422_v1  ;;  %v9223_v8 = vadd.f32 %v9171_v24, %v9028_v33  ;;  %v8714_v1 = vmul.f32 %v16273_v61, %v8100_v27  ;;  %v9187_v24 = vsel %vm3653_vm7, %v9101_v0, 0.0  ;;  %v16395_v33 = vld [vmem:[#allocation16 + $0x8] ss:$0 sm:$0xff] }
 0x7c1   : > { %8608 = vadd.xlane.f32.xlu2 %v8607_v20  ;;  %v8641_v20 = vadd.f32 %v16303_v52, %v16232_v5  ;;  %v9488_v6 = vmul.f32 %v16395_v33, %v8873_v46  ;;  %v9489_v49 = vmul.f32 %v16395_v33, %v16335_v43 }
 0x7c2   : > { %v9417_v28 = vadd.f32 %v9365_v30, %v9223_v8  ;;  %v9381_v30 = vsel %vm3653_vm7, %v9295_v11, 0.0 }
 0x7c3   : > { %v8021_v19 = vpop.xlane.xlu0 %8020  ;;  %v8835_v58 = vadd.f32 %v16312_v56, %v8641_v20  ;;  %v9572_v56 = vsel %vm3653_vm7, %v9488_v6, 0.0  ;;  %v9575_v41 = vsel %vm3653_vm7, %v9489_v49, 0.0  ;;  %v9491_v6 = vmul.f32 %v16395_v33, %v16392_v29 }
 0x7c4   : > { %v16347_v40 = vpop.xlane.xlu2 %8787  ;;  %8802 = vadd.xlane.f32.xlu1 %v8801_v35  ;;  %v8063_v12 = vadd.f32 %v16298_v9, %v8021_v19  ;;  %v8804_v19 = vsel %vm3653_vm7, %v8714_v1, 0.0  ;;  %v8910_v35 = vmul.f32 %v16306_v38, %v16392_v29 }
 0x7c5   : > { %v8836_v17 = vadd.f32 %v16347_v40, %v16320_v63  ;;  %v9581_v49 = vsel %vm3653_vm7, %v9491_v6, 0.0 }
 0x7c6   : > { %v9004_v46 = vsel %vm3653_vm7, %v8910_v35, 0.0 }
 0x7c7   : > { %v9556_v13 = vpop.xlane.xlu1 %9555  ;;  %v9030_v0 = vadd.f32 %v16337_v3, %v8836_v17 }
 0x7c8   : > { %8611 = vadd.xlane.f32.xlu0 %v8610_v16  ;;  %v9610_v48 = vadd.f32 %v9556_v13, %v9416_v54  ;;  %v9029_v16 = vadd.f32 %v16326_v57, %v8835_v58  ;;  %v8487_v13 = vld [vmem:[#allocation3 + $0x180] sm:$0xff] }
 0x7c9   : > { %9379 = vadd.xlane.f32.xlu2 %v9378_v39  ;;  %v8521_v43 = vmul.f32 %v16294_v50, %v8487_v13 }
 0x7ca   : > { %9643 = vst.msk [vmem:[%s15462_s14 + $0xa0] sm:$0xff] %vm9622_vm4, %v9610_v48 }
 0x7cb   : > { %v8791_v34 = vpop.xlane.xlu0 %8790 }
 0x7cc   : > { %v9559_v45 = vpop.xlane.xlu2 %9558  ;;  %8229 = vadd.xlane.f32.xlu1 %v8228_v21 }
 0x7cd   : > { %v9611_v36 = vadd.f32 %v9559_v45, %v9417_v28  ;;  %v9069_v28 = vld [vmem:[#allocation3 + $0x188] sm:$0xff] }
 0x7ce   : > { %v9103_v26 = vmul.f32 %v16199_v18, %v9069_v28  ;;  %v8522_v11 = vmul.f32 %v16294_v50, %v9069_v28 }
 0x7cf   : > { %9644 = vst.msk [vmem:[%s15462_s14 + $0xa8] sm:$0xff] %vm9622_vm4, %v9611_v36  ;;  %v8597_v4 = vpop.xlane.xlu1 %8596  ;;  %v9102_v36 = vmul.f32 %v16199_v18, %v8487_v13 }
 0x7d0   : > { %8996 = vadd.xlane.f32.xlu0 %v8995_v10  ;;  %v8643_v37 = vadd.f32 %v8597_v4, %v8449_v44  ;;  %v8613_v10 = vsel %vm3653_vm7, %v8521_v43, 0.0  ;;  %v9456_v4 = vld [vmem:[#allocation3 + $0x182] sm:$0xff] }
 0x7d1   : > { %8035 = vadd.xlane.f32.xlu2 %v8034_v15  ;;  %v9193_v15 = vsel %vm3653_vm7, %v9103_v26, 0.0  ;;  %v9490_v18 = vmul.f32 %v16395_v33, %v9456_v4  ;;  %v8909_v20 = vmul.f32 %v16306_v38, %v9456_v4 }
 0x7d2   : > { %v16381_v22 = vadd.f32 %v8791_v34, %v8643_v37  ;;  %v9296_v37 = vmul.f32 %v16242_v62, %v8681_v32  ;;  %v8616_v32 = vsel %vm3653_vm7, %v8522_v11, 0.0 }
 0x7d3   : > { %v8218_v23 = vpop.xlane.xlu0 %8217  ;;  %v9001_v3 = vsel %vm3653_vm7, %v8909_v20, 0.0 }
 0x7d4   : > { %v8215_v55 = vpop.xlane.xlu2 %8214  ;;  %8999 = vadd.xlane.f32.xlu1 %v8998_v60  ;;  %v9384_v60 = vsel %vm3653_vm7, %v9296_v37, 0.0 }
 0x7d5   : > { %v8257_v53 = vadd.f32 %v8215_v55, %v8063_v12  ;;  %v9190_v12 = vsel %vm3653_vm7, %v9102_v36, 0.0 }
 0x7d7   : > { %v9368_v14 = vpop.xlane.xlu1 %9367 }
 0x7d8   : > { %9382 = vadd.xlane.f32.xlu0 %v9381_v30  ;;  %v9459_v30 = vld [vmem:[#allocation3 + $0x1a2] sm:$0xff] }
 0x7d9   : > { %8420 = vadd.xlane.f32.xlu2 %v8419_v51  ;;  %v9578_v51 = vsel %vm3653_vm7, %v9490_v18, 0.0  ;;  %v9493_v50 = vmul.f32 %v16395_v33, %v9459_v30 }
 0x7db   : > { %v16383_v44 = vpop.xlane.xlu0 %8987 }
 0x7dc   : > { %v9174_v2 = vpop.xlane.xlu2 %9173  ;;  %9188 = vadd.xlane.f32.xlu1 %v9187_v24 }
 0x7dd   : > { %v9224_v39 = vadd.f32 %v9174_v2, %v9029_v16 }
 0x7df   : > { %v8024_v7 = vpop.xlane.xlu1 %8023  ;;  %v9418_v57 = vadd.f32 %v9368_v14, %v9224_v39  ;;  %v8682_v14 = vld [vmem:[#allocation3 + $0x189] sm:$0xff] }
 0x7e0   : > { %8808 = vadd.xlane.f32.xlu0 %v8807_v25  ;;  %v8064_v5 = vadd.f32 %v16298_v9, %v8024_v7  ;;  %v8716_v63 = vmul.f32 %v16273_v61, %v8682_v14  ;;  %v9587_v25 = vsel %vm3653_vm7, %v9493_v50, 0.0 }
 0x7e1   : > { %8805 = vadd.xlane.f32.xlu2 %v8804_v19 }
 0x7e2   : > { %v8258_v27 = vadd.f32 %v8218_v23, %v8064_v5  ;;  %v8810_v19 = vsel %vm3653_vm7, %v8716_v63, 0.0 }
 0x7e3   : > { %v9177_v52 = vpop.xlane.xlu0 %9176 }
 0x7e4   : > { %v8412_v8 = vpop.xlane.xlu2 %8411  ;;  %9573 = vadd.xlane.f32.xlu1 %v9572_v56  ;;  %v9225_v2 = vadd.f32 %v9177_v52, %v9030_v0  ;;  %v9297_v52 = vmul.f32 %v16242_v62, %v8682_v14 }
 0x7e5   : > { %v16405_v54 = vadd.f32 %v8412_v8, %v8258_v27  ;;  %v9458_v27 = vld [vmem:[#allocation3 + $0x19a] sm:$0xff] }
 0x7e6   : > { %v9387_v39 = vsel %vm3653_vm7, %v9297_v52, 0.0 }
 0x7e7   : > { %v8409_v48 = vpop.xlane.xlu1 %8408 }
 0x7e8   : > { %9005 = vadd.xlane.f32.xlu0 %v9004_v46  ;;  %v8451_v34 = vadd.f32 %v8409_v48, %v8257_v53 }
 0x7e9   : > { %9576 = vadd.xlane.f32.xlu2 %v9575_v41 }
 0x7eb   : > { %v9562_v45 = vpop.xlane.xlu0 %9561 }
 0x7ec   : > { %v8600_v59 = vpop.xlane.xlu2 %8599  ;;  %v9612_v21 = vadd.f32 %v9562_v45, %v9418_v57  ;;  %8614 = vadd.xlane.f32.xlu1 %v8613_v10 }
 0x7ed   : > { %v8644_v7 = vadd.f32 %v8600_v59, %v16373_v42  ;;  %v9492_v42 = vmul.f32 %v16395_v33, %v9458_v27 }
 0x7ee   : > { %9645 = vst.msk [vmem:[%s15462_s14 + $0xb0] sm:$0xff] %vm9622_vm4, %v9612_v21 }
 0x7ef   : > { %v8794_v47 = vpop.xlane.xlu1 %8793  ;;  %v9584_v28 = vsel %vm3653_vm7, %v9492_v42, 0.0 }
 0x7f0   : > { %9194 = vadd.xlane.f32.xlu0 %v9193_v15  ;;  %v8838_v35 = vadd.f32 %v8794_v47, %v8644_v7 }
 0x7f1   : > { %9191 = vadd.xlane.f32.xlu2 %v9190_v12 }
 0x7f2   : > { %v9032_v29 = vadd.f32 %v16383_v44, %v8838_v35 }
 0x7f3   : > { %v8603_v23 = vpop.xlane.xlu0 %8602 }
 0x7f4   : > { %v16418_v55 = vpop.xlane.xlu2 %8984  ;;  %v8645_v53 = vadd.f32 %v8603_v23, %v8451_v34  ;;  %9385 = vadd.xlane.f32.xlu1 %v9384_v60 }
 0x7f5   : > { %v9031_v15 = vadd.f32 %v16418_v55, %v16381_v22 }
 0x7f7   : > { %v9565_v31 = vpop.xlane.xlu1 %9564 }
 0x7f8   : > { %9579 = vadd.xlane.f32.xlu0 %v9578_v51 }
 0x7f9   : > { %8617 = vadd.xlane.f32.xlu2 %v8616_v32 }
 0x7fb   : > { %v9374_v40 = vpop.xlane.xlu0 %9373 }
 0x7fc   : > { %v9371_v1 = vpop.xlane.xlu2 %9370  ;;  %8811 = vadd.xlane.f32.xlu1 %v8810_v19 }
 0x7fd   : > { %v9419_v24 = vadd.f32 %v9371_v1, %v9225_v2 }
 0x7ff   : > { %v9613_v58 = vadd.f32 %v9565_v31, %v9419_v24  ;;  %v8221_v61 = vpop.xlane.xlu1 %8220 }
 0x800   : > { %9588 = vadd.xlane.f32.xlu0 %v9587_v25 }
 0x801   : > { %9646 = vst.msk [vmem:[%s15462_s14 + $0xb8] sm:$0xff] %vm9622_vm4, %v9613_v58  ;;  %9002 = vadd.xlane.f32.xlu2 %v9001_v3 }
 0x803   : > { %v8030_v38 = vpop.xlane.xlu0 %8029 }
 0x804   : > { %v8027_v5 = vpop.xlane.xlu2 %8026  ;;  %9582 = vadd.xlane.f32.xlu1 %v9581_v49  ;;  %v8066_v48 = vadd.f32 %v16298_v9, %v8030_v38 }
 0x805   : > { %v8065_v8 = vadd.f32 %v16298_v9, %v8027_v5 }
 0x807   : > { %v8259_v16 = vadd.f32 %v8221_v61, %v8065_v8  ;;  %v9180_v56 = vpop.xlane.xlu1 %9179 }
 0x808   : > { %v9226_v12 = vadd.f32 %v9180_v56, %v9031_v15 }
 0x809   : > { %9388 = vadd.xlane.f32.xlu2 %v9387_v39 }
 0x80a   : > { %v9420_v37 = vadd.f32 %v9374_v40, %v9226_v12  ;;  %v16775_v12 = vld [vmem:[#allocation87_spill] sm:$0xff] }
 0x80b   : > { %v8415_v46 = vpop.xlane.xlu0 %8414 }
 0x80c   : > { %v8797_v13 = vpop.xlane.xlu2 %8796  ;;  %v8453_v41 = vadd.f32 %v8415_v46, %v8259_v16 }
 0x80d   : > { %v8839_v62 = vadd.f32 %v8797_v13, %v8645_v53 }
 0x80f   : > { %v8418_v43 = vpop.xlane.xlu1 %8417 }
 0x811   : > { %9585 = vadd.xlane.f32.xlu2 %v9584_v28 }
 0x813   : > { %v8800_v57 = vpop.xlane.xlu0 %8799 }
 0x814   : > { %v8224_v34 = vpop.xlane.xlu2 %8223 }
 0x815   : > { %v8260_v45 = vadd.f32 %v8224_v34, %v8066_v48 }
 0x817   : > { %v8606_v59 = vpop.xlane.xlu1 %8605  ;;  %v16447_v36 = vadd.f32 %v8418_v43, %v8260_v45 }
 0x818   : > { %v8646_v20 = vadd.f32 %v8606_v59, %v16405_v54 }
 0x81a   : > { %v8840_v24 = vadd.f32 %v8800_v57, %v8646_v20 }
 0x81b   : > { %v9571_v26 = vpop.xlane.xlu0 %9570 }
 0x81c   : > { %v8994_v33 = vpop.xlane.xlu2 %8993 }
 0x81d   : > { %v9034_v3 = vadd.f32 %v8994_v33, %v8840_v24 }
 0x81f   : > { %v8991_v44 = vpop.xlane.xlu1 %8990 }
 0x820   : > { %v9033_v7 = vadd.f32 %v8991_v44, %v8839_v62 }
 0x823   : > { %v8227_v21 = vpop.xlane.xlu0 %8226 }
 0x824   : > { %v9183_v10 = vpop.xlane.xlu2 %9182 }
 0x825   : > { %v9227_v4 = vadd.f32 %v9183_v10, %v9032_v29 }
 0x827   : > { %v9377_v47 = vpop.xlane.xlu1 %9376 }
 0x828   : > { %v9421_v23 = vadd.f32 %v9377_v47, %v9227_v4 }
 0x82a   : > { %v9615_v53 = vadd.f32 %v9571_v26, %v9421_v23 }
 0x82b   : > { %v9186_v18 = vpop.xlane.xlu0 %9185 }
 0x82c   : > { %v9568_v11 = vpop.xlane.xlu2 %9567  ;;  %9648 = vst.msk [vmem:[%s15462_s14 + $0xc8] sm:$0xff] %vm9622_vm4, %v9615_v53  ;;  %v9228_v6 = vadd.f32 %v9186_v18, %v9033_v7  ;;  %v16776_v18 = vld [vmem:[#allocation24_spill] sm:$0xff] }
 0x82d   : > { %v9614_v17 = vadd.f32 %v9568_v11, %v9420_v37 }
 0x82f   : > { %9647 = vst.msk [vmem:[%s15462_s14 + $0xc0] sm:$0xff] %vm9622_vm4, %v9614_v17  ;;  %v8033_v60 = vpop.xlane.xlu1 %8032 }
 0x830   : > { %v8067_v30 = vadd.f32 %v16298_v9, %v8033_v60 }
 0x832   : > { %v8261_v32 = vadd.f32 %v8227_v21, %v8067_v30 }
 0x833   : > { %v8424_v51 = vpop.xlane.xlu0 %8423 }
 0x834   : > { %v8609_v14 = vpop.xlane.xlu2 %8608 }
 0x835   : > { %v8647_v54 = vadd.f32 %v8609_v14, %v8453_v41  ;;  %v16777_v14 = vld [vmem:[#allocation34_spill] sm:$0xff] }
 0x837   : > { %v8803_v22 = vpop.xlane.xlu1 %8802 }
 0x838   : > { %v8841_v39 = vadd.f32 %v8803_v22, %v8647_v54 }
 0x83b   : > { %v8612_v55 = vpop.xlane.xlu0 %8611 }
 0x83c   : > { %v9380_v0 = vpop.xlane.xlu2 %9379  ;;  %v8648_v41 = vadd.f32 %v8612_v55, %v16447_v36  ;;  %v16778_v55 = vld [vmem:[#allocation23_spill] sm:$0xff] }
 0x83d   : > { %v9422_v38 = vadd.f32 %v9380_v0, %v9228_v6 }
 0x83f   : > { %v8230_v50 = vpop.xlane.xlu1 %8229 }
 0x843   : > { %v8997_v2 = vpop.xlane.xlu0 %8996 }
 0x844   : > { %v8036_v31 = vpop.xlane.xlu2 %8035  ;;  %v9035_v29 = vadd.f32 %v8997_v2, %v8841_v39 }
 0x845   : > { %v8068_v46 = vadd.f32 %v16298_v9, %v8036_v31 }
 0x847   : > { %v9000_v63 = vpop.xlane.xlu1 %8999  ;;  %v8262_v62 = vadd.f32 %v8230_v50, %v8068_v46 }
 0x849   : > { %v8456_v45 = vadd.f32 %v8424_v51, %v8262_v62 }
 0x84b   : > { %v9383_v40 = vpop.xlane.xlu0 %9382 }
 0x84c   : > { %v8421_v1 = vpop.xlane.xlu2 %8420 }
 0x84d   : > { %v8455_v26 = vadd.f32 %v8421_v1, %v8261_v32 }
 0x84f   : > { %v9189_v25 = vpop.xlane.xlu1 %9188 }
 0x850   : > { %v9229_v61 = vadd.f32 %v9189_v25, %v9034_v3 }
 0x852   : > { %v9423_v52 = vadd.f32 %v9383_v40, %v9229_v61 }
 0x853   : > { %v8809_v19 = vpop.xlane.xlu0 %8808 }
 0x854   : > { %v8806_v58 = vpop.xlane.xlu2 %8805 }
 0x855   : > { %v8842_v10 = vadd.f32 %v8806_v58, %v8648_v41 }
 0x857   : > { %v9574_v5 = vpop.xlane.xlu1 %9573  ;;  %v9036_v47 = vadd.f32 %v9000_v63, %v8842_v10 }
 0x858   : > { %v9616_v8 = vadd.f32 %v9574_v5, %v9422_v38 }
 0x85a   : > { %9649 = vst.msk [vmem:[%s15462_s14 + $0xd0] sm:$0xff] %vm9622_vm4, %v9616_v8 }
 0x85b   : > { %v9006_v35 = vpop.xlane.xlu0 %9005 }
 0x85c   : > { %v9577_v49 = vpop.xlane.xlu2 %9576 }
 0x85d   : > { %v9617_v16 = vadd.f32 %v9577_v49, %v9423_v52 }
 0x85f   : > { %9650 = vst.msk [vmem:[%s15462_s14 + $0xd8] sm:$0xff] %vm9622_vm4, %v9617_v16  ;;  %v8615_v27 = vpop.xlane.xlu1 %8614 }
 0x860   : > { %v8649_v9 = vadd.f32 %v8615_v27, %v8455_v26 }
 0x862   : > { %v8843_v37 = vadd.f32 %v8809_v19, %v8649_v9 }
 0x863   : > { %v9195_v42 = vpop.xlane.xlu0 %9194 }
 0x864   : > { %v9192_v56 = vpop.xlane.xlu2 %9191  ;;  %v9231_v17 = vadd.f32 %v9195_v42, %v9036_v47 }
 0x865   : > { %v9230_v13 = vadd.f32 %v9192_v56, %v9035_v29 }
 0x867   : > { %v9386_v28 = vpop.xlane.xlu1 %9385 }
 0x868   : > { %v9424_v43 = vadd.f32 %v9386_v28, %v9230_v13 }
 0x86b   : > { %v9580_v48 = vpop.xlane.xlu0 %9579 }
 0x86c   : > { %v8618_v57 = vpop.xlane.xlu2 %8617  ;;  %v9618_v34 = vadd.f32 %v9580_v48, %v9424_v43 }
 0x86d   : > { %v8650_v59 = vadd.f32 %v8618_v57, %v8456_v45 }
 0x86e   : > { %9651 = vst.msk [vmem:[%s15462_s14 + $0xe0] sm:$0xff] %vm9622_vm4, %v9618_v34 }
 0x86f   : > { %v8812_v33 = vpop.xlane.xlu1 %8811 }
 0x870   : > { %v8844_v44 = vadd.f32 %v8812_v33, %v8650_v59 }
 0x872   : > { %v9038_v15 = vadd.f32 %v9006_v35, %v8844_v44 }
 0x873   : > { %v9589_v23 = vpop.xlane.xlu0 %9588 }
 0x874   : > { %v9003_v21 = vpop.xlane.xlu2 %9002  ;;  %v9233_v4 = vadd.f32 %v16775_v12, %v9038_v15 }
 0x875   : > { %v9037_v53 = vadd.f32 %v9003_v21, %v8843_v37 }
 0x876   : > { %v9427_v11 = vadd.f32 %v16776_v18, %v9233_v4 }
 0x877   : > { %v9583_v51 = vpop.xlane.xlu1 %9582  ;;  %v9232_v32 = vadd.f32 %v16777_v14, %v9037_v53 }
 0x878   : > { %v9621_v36 = vadd.f32 %v9589_v23, %v9427_v11 }
 0x879   : > { %v9426_v0 = vadd.f32 %v16778_v55, %v9232_v32 }
 0x87a   : > { %9654 = vst.msk [vmem:[%s15462_s14 + $0xf8] sm:$0xff] %vm9622_vm4, %v9621_v36 }
 0x87c   : > { %v9389_v60 = vpop.xlane.xlu2 %9388 }
 0x87d   : > { %v9425_v30 = vadd.f32 %v9389_v60, %v9231_v17 }
 0x87f   : > { %v9619_v22 = vadd.f32 %v9583_v51, %v9425_v30 }
 0x881   : > { %9652 = vst.msk [vmem:[%s15462_s14 + $0xe8] sm:$0xff] %vm9622_vm4, %v9619_v22 }
 0x884   : > { %v9586_v50 = vpop.xlane.xlu2 %9585 }
 0x885   : > { %v9620_v2 = vadd.f32 %v9586_v50, %v9426_v0 }
 0x887   : > { %9653 = vst.msk [vmem:[%s15462_s14 + $0xf0] sm:$0xff] %vm9622_vm4, %v9620_v2 }
 0x888 PF: > { %s28_s19 = sadd.s32 1, %s12501_s19  }
 0x889   : > { %p25_p7 = scmp.ge.s32.totalorder %s28_s19, 4  }
 0x88b   :  { %27 = sbr.rel (!%p25_p7) target bundleno = 8 (0x8), region = 140 }
 0x890   :  { %9676 = vsyncpa [#allocation6], 1 }
 0x891   :  { %9678 = vsyncpa [#allocation6 + $0x1], 1 }
 0x892   :  { %9679 = vsyncpa [#allocation8], 1 }
 0x893   :  { %9680 = vsyncpa [#allocation11], 1 }
 0x894   :  { %9681 = vsyncpa [#allocation14], 1 }
 0x895   :  { %9682 = vsyncpa [#allocation17], 1 }

</bundles_post_ra>
